<compile_context>
chip_gen: v6e
topology: v6e:2x2x1
jax: 0.10.0
libtpu: 0.0.40
codegen_flags: <defaults>
</compile_context>

<pallas_src>
import functools

import jax
import jax.numpy as jnp
import numpy as np
from jax.experimental import pallas as pl
from jax.experimental.pallas import tpu as pltpu

EPS = 1e-5
_VMEM = functools.partial(pl.BlockSpec, memory_space=pltpu.MemorySpace.VMEM)


# ----------------------------------------------------------------------------
# Fused Pallas kernel: full GenLayer forward
# ----------------------------------------------------------------------------
def gen_layer_kernel(x_ref, wt_ref, gt_ref, bt_ref, wc_ref, gc_ref, bc_ref,
                     out_ref, *, L, n_blocks, layers_per_block, use_roll,
                     precision):
    """Fused tconv + 5 residual blocks of 3x(Conv1d(k=3,p=1)+BN+ReLU).

    Activations live in VMEM as (NL, 2C) slabs with rows flattened over
    (batch, position j):  h[:, :C]  = output position 2j   (even)
                          h[:, C:]  = output position 2j+1 (odd)

    x_ref : (N*L, Cin)            flattened NLC input
    wt    : (3*Cin, 2*Cout)       packed tconv weight   (operand [x, x_{j-1}, x_{j+1}])
    gt/bt : (1, Cout)             tconv BN gamma / beta
    wc    : (15, 4*C, 2*C)        packed conv weights   (operand [ho_{j-1}, he, ho, he_{j+1}])
    gc/bc : (15, 1, C)            conv BN gamma / beta
    out   : (N*L, 2*Cout)         lane-dense even|odd slab
    """
    NL, _ = x_ref.shape
    C = gt_ref.shape[-1]
    dot_kw = dict(preferred_element_type=jnp.float32, precision=precision)

    # Per-sample boundary masks over flattened rows (built once, reused by all
    # 16 layers).
    j = jax.lax.broadcasted_iota(jnp.int32, (NL, 1), 0) % L
    m_first = (j != 0).astype(jnp.float32)       # zero rows with j == 0    (h[j-1] pad)
    m_last = (j != L - 1).astype(jnp.float32)    # zero rows with j == L-1  (h[j+1] pad)

    def shift_m1(v):   # v[n, j-1], zero at j == 0
        if use_roll:
            s = pltpu.roll(v, 1, axis=0)                       # XLU, no VMEM copy
        else:
            s = jnp.concatenate(
                [jnp.zeros((1, v.shape[1]), v.dtype), v[:-1, :]], axis=0)
        return s * m_first

    def shift_p1(v):   # v[n, j+1], zero at j == L-1
        if use_roll:
            s = pltpu.roll(v, v.shape[0] - 1, axis=0)          # == roll by -1
        else:
            s = jnp.concatenate(
                [v[1:, :], jnp.zeros((1, v.shape[1]), v.dtype)], axis=0)
        return s * m_last

    def bn_relu(y, gamma, beta):
        """Training-mode BN (biased var) + ReLU on an even|odd slab (NL, 2C).

        Single-pass stats (mean & E[y^2]) pooled over both halves, gamma/beta
        folded into one per-channel scale/shift, one fused elementwise pass.
        """
        inv_cnt = 1.0 / (2.0 * y.shape[0])
        rs = jnp.sum(y, axis=0, keepdims=True)          # (1, 2C)
        rq = jnp.sum(y * y, axis=0, keepdims=True)      # (1, 2C)
        mean = (rs[:, :C] + rs[:, C:]) * inv_cnt        # (1, C)
        msq = (rq[:, :C] + rq[:, C:]) * inv_cnt
        var = msq - mean * mean
        scale = gamma * jax.lax.rsqrt(var + EPS)        # (1, C)
        shift = beta - mean * scale
        scale2 = jnp.concatenate([scale, scale], axis=1)   # (1, 2C)
        shift2 = jnp.concatenate([shift, shift], axis=1)
        return jnp.maximum(y * scale2 + shift2, 0.0)

    # --- ConvTranspose1d(k=4, s=2, p=1, bias=False) + BN + ReLU --------------
    #   even out (o=2j)  : x[j] @ w1 + x[j-1] @ w3
    #   odd  out (o=2j+1): x[j] @ w2 + x[j+1] @ w0
    # One MXU push producing even|odd lane-adjacent.
    x = x_ref[...]
    a_t = jnp.concatenate([x, shift_m1(x), shift_p1(x)], axis=1)   # (NL, 3*Cin)
    y_t = jnp.dot(a_t, wt_ref[...], **dot_kw)                       # (NL, 2*Cout)
    h = bn_relu(y_t, gt_ref[...], bt_ref[...])

    # --- One Conv1d(k=3, p=1) + BN + ReLU on the even|odd slab ---------------
    #   even out: h[2j-1]k0 + h[2j]k1 + h[2j+1]k2 = ho[j-1]v0 + he[j]v1 + ho[j]v2
    #   odd  out: h[2j]k0 + h[2j+1]k1 + h[2j+2]k2 = he[j]v0 + ho[j]v1 + he[j+1]v2
    # Packed weight columns [even | odd] share one (NL, 4C) x (4C, 2C) push.
    def conv_layer(hh, w, gamma, beta):
        he = hh[:, :C]
        ho = hh[:, C:]
        a = jnp.concatenate([shift_m1(ho), hh, shift_p1(he)], axis=1)  # (NL, 4C)
        y = jnp.dot(a, w, **dot_kw)                                     # (NL, 2C)
        return bn_relu(y, gamma, beta)

    # --- 5 residual blocks of 3 conv layers, residual sums fused in-kernel ---
    s = h                         # running sum: x, x+y1, x+y1+y2, ...
    li = 0
    for _ in range(n_blocks):
        b = s
        for _ in range(layers_per_block):
            b = conv_layer(b, wc_ref[li], gc_ref[li], bc_ref[li])
            li += 1
        s = s + b

    out_ref[...] = s              # single lane-dense store


# ----------------------------------------------------------------------------
# Wrapper
# ----------------------------------------------------------------------------
def gen_layer_forward(x_ncw, packed, *, use_roll, precision):
    """Full GenLayer forward. Input/output in PyTorch NCW layout."""
    N, Cin, L = x_ncw.shape
    Cout = packed['gt'].shape[-1]
    x = jnp.transpose(x_ncw, (0, 2, 1)).reshape(N * L, Cin).astype(jnp.float32)

    slab = pl.pallas_call(
        functools.partial(gen_layer_kernel, L=L, n_blocks=5, layers_per_block=3,
                          use_roll=use_roll, precision=precision),
        out_shape=jax.ShapeDtypeStruct((N * L, 2 * Cout), jnp.float32),
        in_specs=[_VMEM()] * 7,
        out_specs=_VMEM(),
        compiler_params=pltpu.CompilerParams(vmem_limit_bytes=32 * 1024 * 1024),
    )(x, packed['wt'], packed['gt'], packed['bt'],
      packed['wc'], packed['gc'], packed['bc'])

    # De-interleave even/odd channel blocks -> NCW (N, Cout, 2L); free reshape.
    out = slab.reshape(N, L, 2, Cout).transpose(0, 3, 1, 2).reshape(N, Cout, 2 * L)
    return out


# ----------------------------------------------------------------------------
# Capability probes (run once; keep the optimized path only where it is both
# lowerable and numerically sound, otherwise fall back to the validated path).
# ----------------------------------------------------------------------------
def _probe_roll():
    """True if pltpu.roll(axis=0) lowers and matches jnp.roll semantics."""
    def k(a_ref, b_ref, oa_ref, ob_ref):
        oa_ref[...] = pltpu.roll(a_ref[...], 1, axis=0)
        ob_ref[...] = pltpu.roll(b_ref[...], b_ref.shape[0] - 1, axis=0)
    try:
        a = jnp.arange(16 * 4, dtype=jnp.float32).reshape(16, 4)
        b = jnp.arange(16 * 16, dtype=jnp.float32).reshape(16, 16)
        oa, ob = pl.pallas_call(
            k,
            out_shape=(jax.ShapeDtypeStruct((16, 4), jnp.float32),
                       jax.ShapeDtypeStruct((16, 16), jnp.float32)),
            in_specs=[_VMEM(), _VMEM()],
            out_specs=(_VMEM(), _VMEM()),
        )(a, b)
        ok = bool(jnp.array_equal(oa, jnp.roll(a, 1, axis=0)) &
                  jnp.array_equal(ob, jnp.roll(b, -1, axis=0)))
        return ok
    except Exception:
        return False


def _probe_matmul_precision():
    """Prefer Precision.HIGH (bf16_3x, fewer MXU passes); fall back to HIGHEST
    if HIGH does not lower or is silently downgraded to single-pass bf16."""
    def k(a_ref, b_ref, o_ref):
        o_ref[...] = jnp.dot(a_ref[...], b_ref[...],
                             preferred_element_type=jnp.float32,
                             precision=jax.lax.Precision.HIGH)
    try:
        kk = jax.random.PRNGKey(1)
        a = jax.random.normal(kk, (64, 128), jnp.float32)
        b = jax.random.normal(jax.random.fold_in(kk, 1), (128, 128), jnp.float32)
        got = pl.pallas_call(
            k, out_shape=jax.ShapeDtypeStruct((64, 128), jnp.float32),
            in_specs=[_VMEM(), _VMEM()], out_specs=_VMEM(),
        )(a, b)
        want = jnp.dot(a, b, precision=jax.lax.Precision.HIGHEST)
        if float(jnp.max(jnp.abs(got - want))) < 1e-3:   # multi-pass accuracy
            return jax.lax.Precision.HIGH
        return jax.lax.Precision.HIGHEST
    except Exception:
        return jax.lax.Precision.HIGHEST


# ----------------------------------------------------------------------------
# Parameters (deterministic, PyTorch-layout) + one-time packing for the kernel
# ----------------------------------------------------------------------------
def init_params(key, in_size, out_size):
    keys = iter(jax.random.split(key, 64))

    def bn(c):
        gamma = 1.0 + 0.1 * jax.random.normal(next(keys), (c,), jnp.float32)
        beta = 0.1 * jax.random.normal(next(keys), (c,), jnp.float32)
        return gamma, beta

    params = {}
    # ConvTranspose1d weight: (C_in, C_out, K=4)
    w_t = 0.05 * jax.random.normal(next(keys), (in_size, out_size, 4), jnp.float32)
    g, b = bn(out_size)
    params['tconv'] = (w_t, g, b)
    for blk in range(1, 6):
        layers = []
        for _ in range(3):
            # Conv1d weight: (C_out, C_in, K=3)
            w = 0.05 * jax.random.normal(next(keys), (out_size, out_size, 3), jnp.float32)
            g, b = bn(out_size)
            layers.append((w, g, b))
        params[f'convs{blk}'] = layers
    return params


def pack_params(params):
    """One-time repacking of PyTorch-layout weights into the kernel layout."""
    w_t, g_t, b_t = params['tconv']                     # (Cin, Cout, 4)
    Cin, Cout, _ = w_t.shape
    zt = jnp.zeros((Cin, Cout), jnp.float32)
    # Operand rows [x, x_{j-1}, x_{j+1}]; columns [even | odd].
    wt = jnp.concatenate([
        jnp.concatenate([w_t[:, :, 1], w_t[:, :, 2]], axis=1),
        jnp.concatenate([w_t[:, :, 3], zt], axis=1),
        jnp.concatenate([zt, w_t[:, :, 0]], axis=1)], axis=0)   # (3*Cin, 2*Cout)
    packed = {'wt': wt, 'gt': g_t[None, :], 'bt': b_t[None, :]}

    zc = jnp.zeros((Cout, Cout), jnp.float32)
    wcs, gcs, bcs = [], [], []
    for blk in range(1, 6):
        for (w, g, b) in params[f'convs{blk}']:         # (Cout, Cout, 3)
            v0, v1, v2 = w[:, :, 0].T, w[:, :, 1].T, w[:, :, 2].T
            # Operand rows [ho_{j-1}, he, ho, he_{j+1}]; columns [even | odd].
            wcs.append(jnp.concatenate([
                jnp.concatenate([v0, zc], axis=1),
                jnp.concatenate([v1, v0], axis=1),
                jnp.concatenate([v2, v1], axis=1),
                jnp.concatenate([zc, v2], axis=1)], axis=0))    # (4C, 2C)
            gcs.append(g[None, :])
            bcs.append(b[None, :])
    packed['wc'] = jnp.stack(wcs)                        # (15, 4C, 2C)
    packed['gc'] = jnp.stack(gcs)                        # (15, 1, C)
    packed['bc'] = jnp.stack(bcs)                        # (15, 1, C)
    return packed


# ----------------------------------------------------------------------------
# Pure-JAX reference (mirrors PyTorch semantics, NCW layout) for validation
# ----------------------------------------------------------------------------
def _ref_bn_relu(y, gamma, beta):
    mean = jnp.mean(y, axis=(0, 2), keepdims=True)
    var = jnp.mean((y - mean) ** 2, axis=(0, 2), keepdims=True)
    yhat = (y - mean) * jax.lax.rsqrt(var + EPS)
    return jnp.maximum(yhat * gamma[None, :, None] + beta[None, :, None], 0.0)


def _ref_conv(x, w, gamma, beta):
    y = jax.lax.conv_general_dilated(
        x, w, (1,), [(1, 1)], dimension_numbers=('NCH', 'OIH', 'NCH'),
        precision=jax.lax.Precision.HIGHEST)
    return _ref_bn_relu(y, gamma, beta)


def _ref_tconv(x, w, gamma, beta):
    w_flip = jnp.transpose(jnp.flip(w, axis=2), (1, 0, 2))        # (Cout, Cin, K)
    y = jax.lax.conv_general_dilated(
        x, w_flip, (1,), [(2, 2)], lhs_dilation=(2,),
        dimension_numbers=('NCH', 'OIH', 'NCH'),
        precision=jax.lax.Precision.HIGHEST)
    return _ref_bn_relu(y, gamma, beta)


def gen_layer_reference(x, params):
    w, g, b = params['tconv']
    x = _ref_tconv(x, w, g, b)

    def block(inp, layers):
        h = inp
        for (ww, gg, bb) in layers:
            h = _ref_conv(h, ww, gg, bb)
        return h

    y1 = block(x, params['convs1'])
    y2 = block(x + y1, params['convs2'])
    y3 = block(x + y1 + y2, params['convs3'])
    y4 = block(x + y1 + y2 + y3, params['convs4'])
    y5 = block(x + y1 + y2 + y3 + y4, params['convs5'])
    return x + y1 + y2 + y3 + y4 + y5


# ----------------------------------------------------------------------------
if __name__ == "__main__":
    key = jax.random.PRNGKey(0)
    k_x, k_p = jax.random.split(key)

    in_size, out_size = 4, 16
    N, L = 2, 8                                     # output length will be 2*L
    x = jax.random.normal(k_x, (N, in_size, L), jnp.float32)
    params = init_params(k_p, in_size, out_size)
    packed = pack_params(params)                    # one-time weight packing

    use_roll = _probe_roll()
    precision = _probe_matmul_precision()

    fwd = jax.jit(functools.partial(gen_layer_forward,
                                    use_roll=use_roll, precision=precision))
    out = jax.block_until_ready(fwd(x, packed))
    assert out.shape == (N, out_size, 2 * L)

    ref = gen_layer_reference(x, params)
    np.testing.assert_allclose(np.asarray(out), np.asarray(ref),
                               rtol=5e-3, atol=5e-3)
    print("KERNEL_OK")
</pallas_src>

<mosaic_0001>
module attributes {stable_mosaic.version = 11 : i64} {
  func.func @k(%arg0: memref<16x4xf32, #tpu.memory_space<vmem>>, %arg1: memref<16x16xf32, #tpu.memory_space<vmem>>, %arg2: memref<16x4xf32, #tpu.memory_space<vmem>>, %arg3: memref<16x16xf32, #tpu.memory_space<vmem>>) attributes {dimension_semantics = [], scalar_prefetch = 0 : i64, scratch_operands = 0 : i64, tpu.core_type = #tpu.core_type<tc>} {
    %c0 = arith.constant 0 : index
    %c0_0 = arith.constant 0 : index
    %0 = vector.load %arg0[%c0, %c0_0] : memref<16x4xf32, #tpu.memory_space<vmem>>, vector<16x4xf32>
    %c1_i32 = arith.constant 1 : i32
    %1 = tpu.dynamic_rotate %0 by %c1_i32 dim 0 : vector<16x4xf32>, i32 -> vector<16x4xf32>
    %c0_1 = arith.constant 0 : index
    %c0_2 = arith.constant 0 : index
    %2 = vector.load %arg2[%c0_1, %c0_2] : memref<16x4xf32, #tpu.memory_space<vmem>>, vector<16x4xf32>
    tpu.vector_store %arg2[%c0_1, %c0_2], %1 {strides = array<i32>} : memref<16x4xf32, #tpu.memory_space<vmem>>, vector<16x4xf32>,
    %c0_3 = arith.constant 0 : index
    %c0_4 = arith.constant 0 : index
    %3 = vector.load %arg1[%c0_3, %c0_4] : memref<16x16xf32, #tpu.memory_space<vmem>>, vector<16x16xf32>
    %c15_i32 = arith.constant 15 : i32
    %4 = tpu.dynamic_rotate %3 by %c15_i32 dim 0 : vector<16x16xf32>, i32 -> vector<16x16xf32>
    %c0_5 = arith.constant 0 : index
    %c0_6 = arith.constant 0 : index
    %5 = vector.load %arg3[%c0_5, %c0_6] : memref<16x16xf32, #tpu.memory_space<vmem>>, vector<16x16xf32>
    tpu.vector_store %arg3[%c0_5, %c0_6], %4 {strides = array<i32>} : memref<16x16xf32, #tpu.memory_space<vmem>>, vector<16x16xf32>,
    return
  }
}

module attributes {stable_mosaic.version = 11 : i64} {
  func.func @gen_layer_kernel(%arg0: memref<16x4xf32, #tpu.memory_space<vmem>>, %arg1: memref<12x32xf32, #tpu.memory_space<vmem>>, %arg2: memref<1x16xf32, #tpu.memory_space<vmem>>, %arg3: memref<1x16xf32, #tpu.memory_space<vmem>>, %arg4: memref<15x64x32xf32, #tpu.memory_space<vmem>>, %arg5: memref<15x1x16xf32, #tpu.memory_space<vmem>>, %arg6: memref<15x1x16xf32, #tpu.memory_space<vmem>>, %arg7: memref<16x32xf32, #tpu.memory_space<vmem>>) attributes {dimension_semantics = [], scalar_prefetch = 0 : i64, scratch_operands = 0 : i64, tpu.core_type = #tpu.core_type<tc>} {
    %0 = tpu.iota {dimensions = array<i32: 0>} : vector<16x1xi32>
    %c8_i32 = arith.constant 8 : i32
    %c0_i32 = arith.constant 0 : i32
    %1 = arith.cmpi eq, %c8_i32, %c0_i32 : i32
    %c1_i32 = arith.constant 1 : i32
    %2 = arith.select %1, %c1_i32, %c8_i32 : i32
    %3 = vector.broadcast %2 : i32 to vector<16x1xi32>
    %4 = arith.remsi %0, %3 : vector<16x1xi32>
    %c0_i32_0 = arith.constant 0 : i32
    %5 = vector.broadcast %c0_i32_0 : i32 to vector<16x1xi32>
    %6 = arith.cmpi ne, %4, %5 : vector<16x1xi32>
    %c0_i32_1 = arith.constant 0 : i32
    %7 = vector.broadcast %c0_i32_1 : i32 to vector<16x1xi32>
    %8 = arith.cmpi slt, %4, %7 : vector<16x1xi32>
    %c0_i32_2 = arith.constant 0 : i32
    %9 = arith.cmpi slt, %2, %c0_i32_2 : i32
    %10 = vector.broadcast %9 : i1 to vector<16x1xi1>
    %11 = vector.broadcast %10 : vector<16x1xi1> to vector<16x1xi1>
    %12 = arith.xori %8, %11 : vector<16x1xi1>
    %13 = arith.andi %12, %6 : vector<16x1xi1>
    %14 = vector.broadcast %2 : i32 to vector<16x1xi32>
    %15 = arith.addi %4, %14 : vector<16x1xi32>
    %16 = arith.select %13, %15, %4 : vector<16x1xi1>, vector<16x1xi32>
    %c0_i32_3 = arith.constant 0 : i32
    %17 = vector.broadcast %c0_i32_3 : i32 to vector<16x1xi32>
    %18 = arith.cmpi ne, %16, %17 : vector<16x1xi32>
    %19 = arith.extui %18 : vector<16x1xi1> to vector<16x1xi32>
    %20 = arith.sitofp %19 : vector<16x1xi32> to vector<16x1xf32>
    %c7_i32 = arith.constant 7 : i32
    %21 = vector.broadcast %c7_i32 : i32 to vector<16x1xi32>
    %22 = arith.cmpi ne, %16, %21 : vector<16x1xi32>
    %23 = arith.extui %22 : vector<16x1xi1> to vector<16x1xi32>
    %24 = arith.sitofp %23 : vector<16x1xi32> to vector<16x1xf32>
    %c0 = arith.constant 0 : index
    %c0_4 = arith.constant 0 : index
    %25 = vector.load %arg0[%c0, %c0_4] : memref<16x4xf32, #tpu.memory_space<vmem>>, vector<16x4xf32>
    %cst = arith.constant 0.000000e+00 : f32
    %26 = vector.broadcast %cst : f32 to vector<1x4xf32>
    %27 = vector.extract_strided_slice %25 {offsets = [0, 0], sizes = [15, 4], strides = [1, 1]} : vector<16x4xf32> to vector<15x4xf32>
    %28 = tpu.concatenate %26, %27 in 0 : vector<1x4xf32>, vector<15x4xf32> -> vector<16x4xf32>
    %29 = vector.broadcast %20 : vector<16x1xf32> to vector<16x4xf32>
    %30 = arith.mulf %28, %29 : vector<16x4xf32>
    %31 = vector.extract_strided_slice %25 {offsets = [1, 0], sizes = [15, 4], strides = [1, 1]} : vector<16x4xf32> to vector<15x4xf32>
    %cst_5 = arith.constant 0.000000e+00 : f32
    %32 = vector.broadcast %cst_5 : f32 to vector<1x4xf32>
    %33 = tpu.concatenate %31, %32 in 0 : vector<15x4xf32>, vector<1x4xf32> -> vector<16x4xf32>
    %34 = vector.broadcast %24 : vector<16x1xf32> to vector<16x4xf32>
    %35 = arith.mulf %33, %34 : vector<16x4xf32>
    %36 = tpu.concatenate %25, %30, %35 in 1 : vector<16x4xf32>, vector<16x4xf32>, vector<16x4xf32> -> vector<16x12xf32>
    %c0_6 = arith.constant 0 : index
    %c0_7 = arith.constant 0 : index
    %37 = vector.load %arg1[%c0_6, %c0_7] : memref<12x32xf32, #tpu.memory_space<vmem>>, vector<12x32xf32>
    %cst_8 = arith.constant dense<0.000000e+00> : vector<16x32xf32>
    %38 = tpu.matmul %36, %37, %cst_8 {dimension_numbers = #tpu.dot_dimension_numbers<[1], [0], [0], [1], [0, 0, 1, 1], [], []>, precision = #tpu.contract_precision<fp32>} : vector<16x12xf32>, vector<12x32xf32>, vector<16x32xf32> -> vector<16x32xf32>
    %c0_9 = arith.constant 0 : index
    %c0_10 = arith.constant 0 : index
    %39 = vector.load %arg2[%c0_9, %c0_10] : memref<1x16xf32, #tpu.memory_space<vmem>>, vector<1x16xf32>
    %c0_11 = arith.constant 0 : index
    %c0_12 = arith.constant 0 : index
    %40 = vector.load %arg3[%c0_11, %c0_12] : memref<1x16xf32, #tpu.memory_space<vmem>>, vector<1x16xf32>
    %cst_13 = arith.constant dense<0.000000e+00> : vector<32xf32>
    %41 = vector.multi_reduction <add>, %38, %cst_13 [0] : vector<16x32xf32> to vector<32xf32>
    %42 = vector.shape_cast %41 : vector<32xf32> to vector<1x32xf32>
    %43 = arith.mulf %38, %38 : vector<16x32xf32>
    %cst_14 = arith.constant dense<0.000000e+00> : vector<32xf32>
    %44 = vector.multi_reduction <add>, %43, %cst_14 [0] : vector<16x32xf32> to vector<32xf32>
    %45 = vector.shape_cast %44 : vector<32xf32> to vector<1x32xf32>
    %46 = vector.extract_strided_slice %42 {offsets = [0, 0], sizes = [1, 16], strides = [1, 1]} : vector<1x32xf32> to vector<1x16xf32>
    %47 = vector.extract_strided_slice %42 {offsets = [0, 16], sizes = [1, 16], strides = [1, 1]} : vector<1x32xf32> to vector<1x16xf32>
    %48 = arith.addf %46, %47 : vector<1x16xf32>
    %cst_15 = arith.constant 3.125000e-02 : f32
    %49 = vector.broadcast %cst_15 : f32 to vector<1x16xf32>
    %50 = arith.mulf %48, %49 : vector<1x16xf32>
    %51 = vector.extract_strided_slice %45 {offsets = [0, 0], sizes = [1, 16], strides = [1, 1]} : vector<1x32xf32> to vector<1x16xf32>
    %52 = vector.extract_strided_slice %45 {offsets = [0, 16], sizes = [1, 16], strides = [1, 1]} : vector<1x32xf32> to vector<1x16xf32>
    %53 = arith.addf %51, %52 : vector<1x16xf32>
    %cst_16 = arith.constant 3.125000e-02 : f32
    %54 = vector.broadcast %cst_16 : f32 to vector<1x16xf32>
    %55 = arith.mulf %53, %54 : vector<1x16xf32>
    %56 = arith.mulf %50, %50 : vector<1x16xf32>
    %57 = arith.subf %55, %56 : vector<1x16xf32>
    %cst_17 = arith.constant 9.99999974E-6 : f32
    %58 = vector.broadcast %cst_17 : f32 to vector<1x16xf32>
    %59 = arith.addf %57, %58 : vector<1x16xf32>
    %60 = math.rsqrt %59 : vector<1x16xf32>
    %61 = arith.mulf %39, %60 : vector<1x16xf32>
    %62 = arith.mulf %50, %61 : vector<1x16xf32>
    %63 = arith.subf %40, %62 : vector<1x16xf32>
    %64 = tpu.concatenate %61, %61 in 1 : vector<1x16xf32>, vector<1x16xf32> -> vector<1x32xf32>
    %65 = tpu.concatenate %63, %63 in 1 : vector<1x16xf32>, vector<1x16xf32> -> vector<1x32xf32>
    %66 = vector.broadcast %64 : vector<1x32xf32> to vector<16x32xf32>
    %67 = arith.mulf %38, %66 : vector<16x32xf32>
    %68 = vector.broadcast %65 : vector<1x32xf32> to vector<16x32xf32>
    %69 = arith.addf %67, %68 : vector<16x32xf32>
    %cst_18 = arith.constant 0.000000e+00 : f32
    %70 = vector.broadcast %cst_18 : f32 to vector<16x32xf32>
    %71 = arith.maximumf %69, %70 : vector<16x32xf32>
    %c0_19 = arith.constant 0 : index
    %c0_20 = arith.constant 0 : index
    %c0_21 = arith.constant 0 : index
    %72 = vector.load %arg4[%c0_19, %c0_20, %c0_21] : memref<15x64x32xf32, #tpu.memory_space<vmem>>, vector<1x64x32xf32>
    %73 = vector.shape_cast %72 : vector<1x64x32xf32> to vector<64x32xf32>
    %c0_22 = arith.constant 0 : index
    %c0_23 = arith.constant 0 : index
    %c0_24 = arith.constant 0 : index
    %74 = vector.load %arg5[%c0_22, %c0_23, %c0_24] : memref<15x1x16xf32, #tpu.memory_space<vmem>>, vector<1x1x16xf32>
    %75 = vector.shape_cast %74 : vector<1x1x16xf32> to vector<1x16xf32>
    %c0_25 = arith.constant 0 : index
    %c0_26 = arith.constant 0 : index
    %c0_27 = arith.constant 0 : index
    %76 = vector.load %arg6[%c0_25, %c0_26, %c0_27] : memref<15x1x16xf32, #tpu.memory_space<vmem>>, vector<1x1x16xf32>
    %77 = vector.shape_cast %76 : vector<1x1x16xf32> to vector<1x16xf32>
    %78 = vector.extract_strided_slice %71 {offsets = [0, 0], sizes = [16, 16], strides = [1, 1]} : vector<16x32xf32> to vector<16x16xf32>
    %79 = vector.extract_strided_slice %71 {offsets = [0, 16], sizes = [16, 16], strides = [1, 1]} : vector<16x32xf32> to vector<16x16xf32>
    %cst_28 = arith.constant 0.000000e+00 : f32
    %80 = vector.broadcast %cst_28 : f32 to vector<1x16xf32>
    %81 = vector.extract_strided_slice %79 {offsets = [0, 0], sizes = [15, 16], strides = [1, 1]} : vector<16x16xf32> to vector<15x16xf32>
    %82 = tpu.concatenate %80, %81 in 0 : vector<1x16xf32>, vector<15x16xf32> -> vector<16x16xf32>
    %83 = vector.broadcast %20 : vector<16x1xf32> to vector<16x16xf32>
    %84 = arith.mulf %82, %83 : vector<16x16xf32>
    %85 = vector.extract_strided_slice %78 {offsets = [1, 0], sizes = [15, 16], strides = [1, 1]} : vector<16x16xf32> to vector<15x16xf32>
    %cst_29 = arith.constant 0.000000e+00 : f32
    %86 = vector.broadcast %cst_29 : f32 to vector<1x16xf32>
    %87 = tpu.concatenate %85, %86 in 0 : vector<15x16xf32>, vector<1x16xf32> -> vector<16x16xf32>
    %88 = vector.broadcast %24 : vector<16x1xf32> to vector<16x16xf32>
    %89 = arith.mulf %87, %88 : vector<16x16xf32>
    %90 = tpu.concatenate %84, %71, %89 in 1 : vector<16x16xf32>, vector<16x32xf32>, vector<16x16xf32> -> vector<16x64xf32>
    %cst_30 = arith.constant dense<0.000000e+00> : vector<16x32xf32>
    %91 = tpu.matmul %90, %73, %cst_30 {dimension_numbers = #tpu.dot_dimension_numbers<[1], [0], [0], [1], [0, 0, 1, 1], [], []>, precision = #tpu.contract_precision<fp32>} : vector<16x64xf32>, vector<64x32xf32>, vector<16x32xf32> -> vector<16x32xf32>
    %cst_31 = arith.constant dense<0.000000e+00> : vector<32xf32>
    %92 = vector.multi_reduction <add>, %91, %cst_31 [0] : vector<16x32xf32> to vector<32xf32>
    %93 = vector.shape_cast %92 : vector<32xf32> to vector<1x32xf32>
    %94 = arith.mulf %91, %91 : vector<16x32xf32>
    %cst_32 = arith.constant dense<0.000000e+00> : vector<32xf32>
    %95 = vector.multi_reduction <add>, %94, %cst_32 [0] : vector<16x32xf32> to vector<32xf32>
    %96 = vector.shape_cast %95 : vector<32xf32> to vector<1x32xf32>
    %97 = vector.extract_strided_slice %93 {offsets = [0, 0], sizes = [1, 16], strides = [1, 1]} : vector<1x32xf32> to vector<1x16xf32>
    %98 = vector.extract_strided_slice %93 {offsets = [0, 16], sizes = [1, 16], strides = [1, 1]} : vector<1x32xf32> to vector<1x16xf32>
    %99 = arith.addf %97, %98 : vector<1x16xf32>
    %cst_33 = arith.constant 3.125000e-02 : f32
    %100 = vector.broadcast %cst_33 : f32 to vector<1x16xf32>
    %101 = arith.mulf %99, %100 : vector<1x16xf32>
    %102 = vector.extract_strided_slice %96 {offsets = [0, 0], sizes = [1, 16], strides = [1, 1]} : vector<1x32xf32> to vector<1x16xf32>
    %103 = vector.extract_strided_slice %96 {offsets = [0, 16], sizes = [1, 16], strides = [1, 1]} : vector<1x32xf32> to vector<1x16xf32>
    %104 = arith.addf %102, %103 : vector<1x16xf32>
    %cst_34 = arith.constant 3.125000e-02 : f32
    %105 = vector.broadcast %cst_34 : f32 to vector<1x16xf32>
    %106 = arith.mulf %104, %105 : vector<1x16xf32>
    %107 = arith.mulf %101, %101 : vector<1x16xf32>
    %108 = arith.subf %106, %107 : vector<1x16xf32>
    %cst_35 = arith.constant 9.99999974E-6 : f32
    %109 = vector.broadcast %cst_35 : f32 to vector<1x16xf32>
    %110 = arith.addf %108, %109 : vector<1x16xf32>
    %111 = math.rsqrt %110 : vector<1x16xf32>
    %112 = arith.mulf %75, %111 : vector<1x16xf32>
    %113 = arith.mulf %101, %112 : vector<1x16xf32>
    %114 = arith.subf %77, %113 : vector<1x16xf32>
    %115 = tpu.concatenate %112, %112 in 1 : vector<1x16xf32>, vector<1x16xf32> -> vector<1x32xf32>
    %116 = tpu.concatenate %114, %114 in 1 : vector<1x16xf32>, vector<1x16xf32> -> vector<1x32xf32>
    %117 = vector.broadcast %115 : vector<1x32xf32> to vector<16x32xf32>
    %118 = arith.mulf %91, %117 : vector<16x32xf32>
    %119 = vector.broadcast %116 : vector<1x32xf32> to vector<16x32xf32>
    %120 = arith.addf %118, %119 : vector<16x32xf32>
    %cst_36 = arith.constant 0.000000e+00 : f32
    %121 = vector.broadcast %cst_36 : f32 to vector<16x32xf32>
    %122 = arith.maximumf %120, %121 : vector<16x32xf32>
    %c1 = arith.constant 1 : index
    %c0_37 = arith.constant 0 : index
    %c0_38 = arith.constant 0 : index
    %123 = vector.load %arg4[%c1, %c0_37, %c0_38] : memref<15x64x32xf32, #tpu.memory_space<vmem>>, vector<1x64x32xf32>
    %124 = vector.shape_cast %123 : vector<1x64x32xf32> to vector<64x32xf32>
    %c1_39 = arith.constant 1 : index
    %c0_40 = arith.constant 0 : index
    %c0_41 = arith.constant 0 : index
    %125 = vector.load %arg5[%c1_39, %c0_40, %c0_41] : memref<15x1x16xf32, #tpu.memory_space<vmem>>, vector<1x1x16xf32>
    %126 = vector.shape_cast %125 : vector<1x1x16xf32> to vector<1x16xf32>
    %c1_42 = arith.constant 1 : index
    %c0_43 = arith.constant 0 : index
    %c0_44 = arith.constant 0 : index
    %127 = vector.load %arg6[%c1_42, %c0_43, %c0_44] : memref<15x1x16xf32, #tpu.memory_space<vmem>>, vector<1x1x16xf32>
    %128 = vector.shape_cast %127 : vector<1x1x16xf32> to vector<1x16xf32>
    %129 = vector.extract_strided_slice %122 {offsets = [0, 0], sizes = [16, 16], strides = [1, 1]} : vector<16x32xf32> to vector<16x16xf32>
    %130 = vector.extract_strided_slice %122 {offsets = [0, 16], sizes = [16, 16], strides = [1, 1]} : vector<16x32xf32> to vector<16x16xf32>
    %cst_45 = arith.constant 0.000000e+00 : f32
    %131 = vector.broadcast %cst_45 : f32 to vector<1x16xf32>
    %132 = vector.extract_strided_slice %130 {offsets = [0, 0], sizes = [15, 16], strides = [1, 1]} : vector<16x16xf32> to vector<15x16xf32>
    %133 = tpu.concatenate %131, %132 in 0 : vector<1x16xf32>, vector<15x16xf32> -> vector<16x16xf32>
    %134 = vector.broadcast %20 : vector<16x1xf32> to vector<16x16xf32>
    %135 = arith.mulf %133, %134 : vector<16x16xf32>
    %136 = vector.extract_strided_slice %129 {offsets = [1, 0], sizes = [15, 16], strides = [1, 1]} : vector<16x16xf32> to vector<15x16xf32>
    %cst_46 = arith.constant 0.000000e+00 : f32
    %137 = vector.broadcast %cst_46 : f32 to vector<1x16xf32>
    %138 = tpu.concatenate %136, %137 in 0 : vector<15x16xf32>, vector<1x16xf32> -> vector<16x16xf32>
    %139 = vector.broadcast %24 : vector<16x1xf32> to vector<16x16xf32>
    %140 = arith.mulf %138, %139 : vector<16x16xf32>
    %141 = tpu.concatenate %135, %122, %140 in 1 : vector<16x16xf32>, vector<16x32xf32>, vector<16x16xf32> -> vector<16x64xf32>
    %cst_47 = arith.constant dense<0.000000e+00> : vector<16x32xf32>
    %142 = tpu.matmul %141, %124, %cst_47 {dimension_numbers = #tpu.dot_dimension_numbers<[1], [0], [0], [1], [0, 0, 1, 1], [], []>, precision = #tpu.contract_precision<fp32>} : vector<16x64xf32>, vector<64x32xf32>, vector<16x32xf32> -> vector<16x32xf32>
    %cst_48 = arith.constant dense<0.000000e+00> : vector<32xf32>
    %143 = vector.multi_reduction <add>, %142, %cst_48 [0] : vector<16x32xf32> to vector<32xf32>
    %144 = vector.shape_cast %143 : vector<32xf32> to vector<1x32xf32>
    %145 = arith.mulf %142, %142 : vector<16x32xf32>
    %cst_49 = arith.constant dense<0.000000e+00> : vector<32xf32>
    %146 = vector.multi_reduction <add>, %145, %cst_49 [0] : vector<16x32xf32> to vector<32xf32>
    %147 = vector.shape_cast %146 : vector<32xf32> to vector<1x32xf32>
    %148 = vector.extract_strided_slice %144 {offsets = [0, 0], sizes = [1, 16], strides = [1, 1]} : vector<1x32xf32> to vector<1x16xf32>
    %149 = vector.extract_strided_slice %144 {offsets = [0, 16], sizes = [1, 16], strides = [1, 1]} : vector<1x32xf32> to vector<1x16xf32>
    %150 = arith.addf %148, %149 : vector<1x16xf32>
    %cst_50 = arith.constant 3.125000e-02 : f32
    %151 = vector.broadcast %cst_50 : f32 to vector<1x16xf32>
    %152 = arith.mulf %150, %151 : vector<1x16xf32>
    %153 = vector.extract_strided_slice %147 {offsets = [0, 0], sizes = [1, 16], strides = [1, 1]} : vector<1x32xf32> to vector<1x16xf32>
    %154 = vector.extract_strided_slice %147 {offsets = [0, 16], sizes = [1, 16], strides = [1, 1]} : vector<1x32xf32> to vector<1x16xf32>
    %155 = arith.addf %153, %154 : vector<1x16xf32>
    %cst_51 = arith.constant 3.125000e-02 : f32
    %156 = vector.broadcast %cst_51 : f32 to vector<1x16xf32>
    %157 = arith.mulf %155, %156 : vector<1x16xf32>
    %158 = arith.mulf %152, %152 : vector<1x16xf32>
    %159 = arith.subf %157, %158 : vector<1x16xf32>
    %cst_52 = arith.constant 9.99999974E-6 : f32
    %160 = vector.broadcast %cst_52 : f32 to vector<1x16xf32>
    %161 = arith.addf %159, %160 : vector<1x16xf32>
    %162 = math.rsqrt %161 : vector<1x16xf32>
    %163 = arith.mulf %126, %162 : vector<1x16xf32>
    %164 = arith.mulf %152, %163 : vector<1x16xf32>
    %165 = arith.subf %128, %164 : vector<1x16xf32>
    %166 = tpu.concatenate %163, %163 in 1 : vector<1x16xf32>, vector<1x16xf32> -> vector<1x32xf32>
    %167 = tpu.concatenate %165, %165 in 1 : vector<1x16xf32>, vector<1x16xf32> -> vector<1x32xf32>
    %168 = vector.broadcast %166 : vector<1x32xf32> to vector<16x32xf32>
    %169 = arith.mulf %142, %168 : vector<16x32xf32>
    %170 = vector.broadcast %167 : vector<1x32xf32> to vector<16x32xf32>
    %171 = arith.addf %169, %170 : vector<16x32xf32>
    %cst_53 = arith.constant 0.000000e+00 : f32
    %172 = vector.broadcast %cst_53 : f32 to vector<16x32xf32>
    %173 = arith.maximumf %171, %172 : vector<16x32xf32>
    %c2 = arith.constant 2 : index
    %c0_54 = arith.constant 0 : index
    %c0_55 = arith.constant 0 : index
    %174 = vector.load %arg4[%c2, %c0_54, %c0_55] : memref<15x64x32xf32, #tpu.memory_space<vmem>>, vector<1x64x32xf32>
    %175 = vector.shape_cast %174 : vector<1x64x32xf32> to vector<64x32xf32>
    %c2_56 = arith.constant 2 : index
    %c0_57 = arith.constant 0 : index
    %c0_58 = arith.constant 0 : index
    %176 = vector.load %arg5[%c2_56, %c0_57, %c0_58] : memref<15x1x16xf32, #tpu.memory_space<vmem>>, vector<1x1x16xf32>
    %177 = vector.shape_cast %176 : vector<1x1x16xf32> to vector<1x16xf32>
    %c2_59 = arith.constant 2 : index
    %c0_60 = arith.constant 0 : index
    %c0_61 = arith.constant 0 : index
    %178 = vector.load %arg6[%c2_59, %c0_60, %c0_61] : memref<15x1x16xf32, #tpu.memory_space<vmem>>, vector<1x1x16xf32>
    %179 = vector.shape_cast %178 : vector<1x1x16xf32> to vector<1x16xf32>
    %180 = vector.extract_strided_slice %173 {offsets = [0, 0], sizes = [16, 16], strides = [1, 1]} : vector<16x32xf32> to vector<16x16xf32>
    %181 = vector.extract_strided_slice %173 {offsets = [0, 16], sizes = [16, 16], strides = [1, 1]} : vector<16x32xf32> to vector<16x16xf32>
    %cst_62 = arith.constant 0.000000e+00 : f32
    %182 = vector.broadcast %cst_62 : f32 to vector<1x16xf32>
    %183 = vector.extract_strided_slice %181 {offsets = [0, 0], sizes = [15, 16], strides = [1, 1]} : vector<16x16xf32> to vector<15x16xf32>
    %184 = tpu.concatenate %182, %183 in 0 : vector<1x16xf32>, vector<15x16xf32> -> vector<16x16xf32>
    %185 = vector.broadcast %20 : vector<16x1xf32> to vector<16x16xf32>
    %186 = arith.mulf %184, %185 : vector<16x16xf32>
    %187 = vector.extract_strided_slice %180 {offsets = [1, 0], sizes = [15, 16], strides = [1, 1]} : vector<16x16xf32> to vector<15x16xf32>
    %cst_63 = arith.constant 0.000000e+00 : f32
    %188 = vector.broadcast %cst_63 : f32 to vector<1x16xf32>
    %189 = tpu.concatenate %187, %188 in 0 : vector<15x16xf32>, vector<1x16xf32> -> vector<16x16xf32>
    %190 = vector.broadcast %24 : vector<16x1xf32> to vector<16x16xf32>
    %191 = arith.mulf %189, %190 : vector<16x16xf32>
    %192 = tpu.concatenate %186, %173, %191 in 1 : vector<16x16xf32>, vector<16x32xf32>, vector<16x16xf32> -> vector<16x64xf32>
    %cst_64 = arith.constant dense<0.000000e+00> : vector<16x32xf32>
    %193 = tpu.matmul %192, %175, %cst_64 {dimension_numbers = #tpu.dot_dimension_numbers<[1], [0], [0], [1], [0, 0, 1, 1], [], []>, precision = #tpu.contract_precision<fp32>} : vector<16x64xf32>, vector<64x32xf32>, vector<16x32xf32> -> vector<16x32xf32>
    %cst_65 = arith.constant dense<0.000000e+00> : vector<32xf32>
    %194 = vector.multi_reduction <add>, %193, %cst_65 [0] : vector<16x32xf32> to vector<32xf32>
    %195 = vector.shape_cast %194 : vector<32xf32> to vector<1x32xf32>
    %196 = arith.mulf %193, %193 : vector<16x32xf32>
    %cst_66 = arith.constant dense<0.000000e+00> : vector<32xf32>
    %197 = vector.multi_reduction <add>, %196, %cst_66 [0] : vector<16x32xf32> to vector<32xf32>
    %198 = vector.shape_cast %197 : vector<32xf32> to vector<1x32xf32>
    %199 = vector.extract_strided_slice %195 {offsets = [0, 0], sizes = [1, 16], strides = [1, 1]} : vector<1x32xf32> to vector<1x16xf32>
    %200 = vector.extract_strided_slice %195 {offsets = [0, 16], sizes = [1, 16], strides = [1, 1]} : vector<1x32xf32> to vector<1x16xf32>
    %201 = arith.addf %199, %200 : vector<1x16xf32>
    %cst_67 = arith.constant 3.125000e-02 : f32
    %202 = vector.broadcast %cst_67 : f32 to vector<1x16xf32>
    %203 = arith.mulf %201, %202 : vector<1x16xf32>
    %204 = vector.extract_strided_slice %198 {offsets = [0, 0], sizes = [1, 16], strides = [1, 1]} : vector<1x32xf32> to vector<1x16xf32>
    %205 = vector.extract_strided_slice %198 {offsets = [0, 16], sizes = [1, 16], strides = [1, 1]} : vector<1x32xf32> to vector<1x16xf32>
    %206 = arith.addf %204, %205 : vector<1x16xf32>
    %cst_68 = arith.constant 3.125000e-02 : f32
    %207 = vector.broadcast %cst_68 : f32 to vector<1x16xf32>
    %208 = arith.mulf %206, %207 : vector<1x16xf32>
    %209 = arith.mulf %203, %203 : vector<1x16xf32>
    %210 = arith.subf %208, %209 : vector<1x16xf32>
    %cst_69 = arith.constant 9.99999974E-6 : f32
    %211 = vector.broadcast %cst_69 : f32 to vector<1x16xf32>
    %212 = arith.addf %210, %211 : vector<1x16xf32>
    %213 = math.rsqrt %212 : vector<1x16xf32>
    %214 = arith.mulf %177, %213 : vector<1x16xf32>
    %215 = arith.mulf %203, %214 : vector<1x16xf32>
    %216 = arith.subf %179, %215 : vector<1x16xf32>
    %217 = tpu.concatenate %214, %214 in 1 : vector<1x16xf32>, vector<1x16xf32> -> vector<1x32xf32>
    %218 = tpu.concatenate %216, %216 in 1 : vector<1x16xf32>, vector<1x16xf32> -> vector<1x32xf32>
    %219 = vector.broadcast %217 : vector<1x32xf32> to vector<16x32xf32>
    %220 = arith.mulf %193, %219 : vector<16x32xf32>
    %221 = vector.broadcast %218 : vector<1x32xf32> to vector<16x32xf32>
    %222 = arith.addf %220, %221 : vector<16x32xf32>
    %cst_70 = arith.constant 0.000000e+00 : f32
    %223 = vector.broadcast %cst_70 : f32 to vector<16x32xf32>
    %224 = arith.maximumf %222, %223 : vector<16x32xf32>
    %225 = arith.addf %71, %224 : vector<16x32xf32>
    %c3 = arith.constant 3 : index
    %c0_71 = arith.constant 0 : index
    %c0_72 = arith.constant 0 : index
    %226 = vector.load %arg4[%c3, %c0_71, %c0_72] : memref<15x64x32xf32, #tpu.memory_space<vmem>>, vector<1x64x32xf32>
    %227 = vector.shape_cast %226 : vector<1x64x32xf32> to vector<64x32xf32>
    %c3_73 = arith.constant 3 : index
    %c0_74 = arith.constant 0 : index
    %c0_75 = arith.constant 0 : index
    %228 = vector.load %arg5[%c3_73, %c0_74, %c0_75] : memref<15x1x16xf32, #tpu.memory_space<vmem>>, vector<1x1x16xf32>
    %229 = vector.shape_cast %228 : vector<1x1x16xf32> to vector<1x16xf32>
    %c3_76 = arith.constant 3 : index
    %c0_77 = arith.constant 0 : index
    %c0_78 = arith.constant 0 : index
    %230 = vector.load %arg6[%c3_76, %c0_77, %c0_78] : memref<15x1x16xf32, #tpu.memory_space<vmem>>, vector<1x1x16xf32>
    %231 = vector.shape_cast %230 : vector<1x1x16xf32> to vector<1x16xf32>
    %232 = vector.extract_strided_slice %225 {offsets = [0, 0], sizes = [16, 16], strides = [1, 1]} : vector<16x32xf32> to vector<16x16xf32>
    %233 = vector.extract_strided_slice %225 {offsets = [0, 16], sizes = [16, 16], strides = [1, 1]} : vector<16x32xf32> to vector<16x16xf32>
    %cst_79 = arith.constant 0.000000e+00 : f32
    %234 = vector.broadcast %cst_79 : f32 to vector<1x16xf32>
    %235 = vector.extract_strided_slice %233 {offsets = [0, 0], sizes = [15, 16], strides = [1, 1]} : vector<16x16xf32> to vector<15x16xf32>
    %236 = tpu.concatenate %234, %235 in 0 : vector<1x16xf32>, vector<15x16xf32> -> vector<16x16xf32>
    %237 = vector.broadcast %20 : vector<16x1xf32> to vector<16x16xf32>
    %238 = arith.mulf %236, %237 : vector<16x16xf32>
    %239 = vector.extract_strided_slice %232 {offsets = [1, 0], sizes = [15, 16], strides = [1, 1]} : vector<16x16xf32> to vector<15x16xf32>
    %cst_80 = arith.constant 0.000000e+00 : f32
    %240 = vector.broadcast %cst_80 : f32 to vector<1x16xf32>
    %241 = tpu.concatenate %239, %240 in 0 : vector<15x16xf32>, vector<1x16xf32> -> vector<16x16xf32>
    %242 = vector.broadcast %24 : vector<16x1xf32> to vector<16x16xf32>
    %243 = arith.mulf %241, %242 : vector<16x16xf32>
    %244 = tpu.concatenate %238, %225, %243 in 1 : vector<16x16xf32>, vector<16x32xf32>, vector<16x16xf32> -> vector<16x64xf32>
    %cst_81 = arith.constant dense<0.000000e+00> : vector<16x32xf32>
    %245 = tpu.matmul %244, %227, %cst_81 {dimension_numbers = #tpu.dot_dimension_numbers<[1], [0], [0], [1], [0, 0, 1, 1], [], []>, precision = #tpu.contract_precision<fp32>} : vector<16x64xf32>, vector<64x32xf32>, vector<16x32xf32> -> vector<16x32xf32>
    %cst_82 = arith.constant dense<0.000000e+00> : vector<32xf32>
    %246 = vector.multi_reduction <add>, %245, %cst_82 [0] : vector<16x32xf32> to vector<32xf32>
    %247 = vector.shape_cast %246 : vector<32xf32> to vector<1x32xf32>
    %248 = arith.mulf %245, %245 : vector<16x32xf32>
    %cst_83 = arith.constant dense<0.000000e+00> : vector<32xf32>
    %249 = vector.multi_reduction <add>, %248, %cst_83 [0] : vector<16x32xf32> to vector<32xf32>
    %250 = vector.shape_cast %249 : vector<32xf32> to vector<1x32xf32>
    %251 = vector.extract_strided_slice %247 {offsets = [0, 0], sizes = [1, 16], strides = [1, 1]} : vector<1x32xf32> to vector<1x16xf32>
    %252 = vector.extract_strided_slice %247 {offsets = [0, 16], sizes = [1, 16], strides = [1, 1]} : vector<1x32xf32> to vector<1x16xf32>
    %253 = arith.addf %251, %252 : vector<1x16xf32>
    %cst_84 = arith.constant 3.125000e-02 : f32
    %254 = vector.broadcast %cst_84 : f32 to vector<1x16xf32>
    %255 = arith.mulf %253, %254 : vector<1x16xf32>
    %256 = vector.extract_strided_slice %250 {offsets = [0, 0], sizes = [1, 16], strides = [1, 1]} : vector<1x32xf32> to vector<1x16xf32>
    %257 = vector.extract_strided_slice %250 {offsets = [0, 16], sizes = [1, 16], strides = [1, 1]} : vector<1x32xf32> to vector<1x16xf32>
    %258 = arith.addf %256, %257 : vector<1x16xf32>
    %cst_85 = arith.constant 3.125000e-02 : f32
    %259 = vector.broadcast %cst_85 : f32 to vector<1x16xf32>
    %260 = arith.mulf %258, %259 : vector<1x16xf32>
    %261 = arith.mulf %255, %255 : vector<1x16xf32>
    %262 = arith.subf %260, %261 : vector<1x16xf32>
    %cst_86 = arith.constant 9.99999974E-6 : f32
    %263 = vector.broadcast %cst_86 : f32 to vector<1x16xf32>
    %264 = arith.addf %262, %263 : vector<1x16xf32>
    %265 = math.rsqrt %264 : vector<1x16xf32>
    %266 = arith.mulf %229, %265 : vector<1x16xf32>
    %267 = arith.mulf %255, %266 : vector<1x16xf32>
    %268 = arith.subf %231, %267 : vector<1x16xf32>
    %269 = tpu.concatenate %266, %266 in 1 : vector<1x16xf32>, vector<1x16xf32> -> vector<1x32xf32>
    %270 = tpu.concatenate %268, %268 in 1 : vector<1x16xf32>, vector<1x16xf32> -> vector<1x32xf32>
    %271 = vector.broadcast %269 : vector<1x32xf32> to vector<16x32xf32>
    %272 = arith.mulf %245, %271 : vector<16x32xf32>
    %273 = vector.broadcast %270 : vector<1x32xf32> to vector<16x32xf32>
    %274 = arith.addf %272, %273 : vector<16x32xf32>
    %cst_87 = arith.constant 0.000000e+00 : f32
    %275 = vector.broadcast %cst_87 : f32 to vector<16x32xf32>
    %276 = arith.maximumf %274, %275 : vector<16x32xf32>
    %c4 = arith.constant 4 : index
    %c0_88 = arith.constant 0 : index
    %c0_89 = arith.constant 0 : index
    %277 = vector.load %arg4[%c4, %c0_88, %c0_89] : memref<15x64x32xf32, #tpu.memory_space<vmem>>, vector<1x64x32xf32>
    %278 = vector.shape_cast %277 : vector<1x64x32xf32> to vector<64x32xf32>
    %c4_90 = arith.constant 4 : index
    %c0_91 = arith.constant 0 : index
    %c0_92 = arith.constant 0 : index
    %279 = vector.load %arg5[%c4_90, %c0_91, %c0_92] : memref<15x1x16xf32, #tpu.memory_space<vmem>>, vector<1x1x16xf32>
    %280 = vector.shape_cast %279 : vector<1x1x16xf32> to vector<1x16xf32>
    %c4_93 = arith.constant 4 : index
    %c0_94 = arith.constant 0 : index
    %c0_95 = arith.constant 0 : index
    %281 = vector.load %arg6[%c4_93, %c0_94, %c0_95] : memref<15x1x16xf32, #tpu.memory_space<vmem>>, vector<1x1x16xf32>
    %282 = vector.shape_cast %281 : vector<1x1x16xf32> to vector<1x16xf32>
    %283 = vector.extract_strided_slice %276 {offsets = [0, 0], sizes = [16, 16], strides = [1, 1]} : vector<16x32xf32> to vector<16x16xf32>
    %284 = vector.extract_strided_slice %276 {offsets = [0, 16], sizes = [16, 16], strides = [1, 1]} : vector<16x32xf32> to vector<16x16xf32>
    %cst_96 = arith.constant 0.000000e+00 : f32
    %285 = vector.broadcast %cst_96 : f32 to vector<1x16xf32>
    %286 = vector.extract_strided_slice %284 {offsets = [0, 0], sizes = [15, 16], strides = [1, 1]} : vector<16x16xf32> to vector<15x16xf32>
    %287 = tpu.concatenate %285, %286 in 0 : vector<1x16xf32>, vector<15x16xf32> -> vector<16x16xf32>
    %288 = vector.broadcast %20 : vector<16x1xf32> to vector<16x16xf32>
    %289 = arith.mulf %287, %288 : vector<16x16xf32>
    %290 = vector.extract_strided_slice %283 {offsets = [1, 0], sizes = [15, 16], strides = [1, 1]} : vector<16x16xf32> to vector<15x16xf32>
    %cst_97 = arith.constant 0.000000e+00 : f32
    %291 = vector.broadcast %cst_97 : f32 to vector<1x16xf32>
    %292 = tpu.concatenate %290, %291 in 0 : vector<15x16xf32>, vector<1x16xf32> -> vector<16x16xf32>
    %293 = vector.broadcast %24 : vector<16x1xf32> to vector<16x16xf32>
    %294 = arith.mulf %292, %293 : vector<16x16xf32>
    %295 = tpu.concatenate %289, %276, %294 in 1 : vector<16x16xf32>, vector<16x32xf32>, vector<16x16xf32> -> vector<16x64xf32>
    %cst_98 = arith.constant dense<0.000000e+00> : vector<16x32xf32>
    %296 = tpu.matmul %295, %278, %cst_98 {dimension_numbers = #tpu.dot_dimension_numbers<[1], [0], [0], [1], [0, 0, 1, 1], [], []>, precision = #tpu.contract_precision<fp32>} : vector<16x64xf32>, vector<64x32xf32>, vector<16x32xf32> -> vector<16x32xf32>
    %cst_99 = arith.constant dense<0.000000e+00> : vector<32xf32>
    %297 = vector.multi_reduction <add>, %296, %cst_99 [0] : vector<16x32xf32> to vector<32xf32>
    %298 = vector.shape_cast %297 : vector<32xf32> to vector<1x32xf32>
    %299 = arith.mulf %296, %296 : vector<16x32xf32>
    %cst_100 = arith.constant dense<0.000000e+00> : vector<32xf32>
    %300 = vector.multi_reduction <add>, %299, %cst_100 [0] : vector<16x32xf32> to vector<32xf32>
    %301 = vector.shape_cast %300 : vector<32xf32> to vector<1x32xf32>
    %302 = vector.extract_strided_slice %298 {offsets = [0, 0], sizes = [1, 16], strides = [1, 1]} : vector<1x32xf32> to vector<1x16xf32>
    %303 = vector.extract_strided_slice %298 {offsets = [0, 16], sizes = [1, 16], strides = [1, 1]} : vector<1x32xf32> to vector<1x16xf32>
    %304 = arith.addf %302, %303 : vector<1x16xf32>
    %cst_101 = arith.constant 3.125000e-02 : f32
    %305 = vector.broadcast %cst_101 : f32 to vector<1x16xf32>
    %306 = arith.mulf %304, %305 : vector<1x16xf32>
    %307 = vector.extract_strided_slice %301 {offsets = [0, 0], sizes = [1, 16], strides = [1, 1]} : vector<1x32xf32> to vector<1x16xf32>
    %308 = vector.extract_strided_slice %301 {offsets = [0, 16], sizes = [1, 16], strides = [1, 1]} : vector<1x32xf32> to vector<1x16xf32>
    %309 = arith.addf %307, %308 : vector<1x16xf32>
    %cst_102 = arith.constant 3.125000e-02 : f32
    %310 = vector.broadcast %cst_102 : f32 to vector<1x16xf32>
    %311 = arith.mulf %309, %310 : vector<1x16xf32>
    %312 = arith.mulf %306, %306 : vector<1x16xf32>
    %313 = arith.subf %311, %312 : vector<1x16xf32>
    %cst_103 = arith.constant 9.99999974E-6 : f32
    %314 = vector.broadcast %cst_103 : f32 to vector<1x16xf32>
    %315 = arith.addf %313, %314 : vector<1x16xf32>
    %316 = math.rsqrt %315 : vector<1x16xf32>
    %317 = arith.mulf %280, %316 : vector<1x16xf32>
    %318 = arith.mulf %306, %317 : vector<1x16xf32>
    %319 = arith.subf %282, %318 : vector<1x16xf32>
    %320 = tpu.concatenate %317, %317 in 1 : vector<1x16xf32>, vector<1x16xf32> -> vector<1x32xf32>
    %321 = tpu.concatenate %319, %319 in 1 : vector<1x16xf32>, vector<1x16xf32> -> vector<1x32xf32>
    %322 = vector.broadcast %320 : vector<1x32xf32> to vector<16x32xf32>
    %323 = arith.mulf %296, %322 : vector<16x32xf32>
    %324 = vector.broadcast %321 : vector<1x32xf32> to vector<16x32xf32>
    %325 = arith.addf %323, %324 : vector<16x32xf32>
    %cst_104 = arith.constant 0.000000e+00 : f32
    %326 = vector.broadcast %cst_104 : f32 to vector<16x32xf32>
    %327 = arith.maximumf %325, %326 : vector<16x32xf32>
    %c5 = arith.constant 5 : index
    %c0_105 = arith.constant 0 : index
    %c0_106 = arith.constant 0 : index
    %328 = vector.load %arg4[%c5, %c0_105, %c0_106] : memref<15x64x32xf32, #tpu.memory_space<vmem>>, vector<1x64x32xf32>
    %329 = vector.shape_cast %328 : vector<1x64x32xf32> to vector<64x32xf32>
    %c5_107 = arith.constant 5 : index
    %c0_108 = arith.constant 0 : index
    %c0_109 = arith.constant 0 : index
    %330 = vector.load %arg5[%c5_107, %c0_108, %c0_109] : memref<15x1x16xf32, #tpu.memory_space<vmem>>, vector<1x1x16xf32>
    %331 = vector.shape_cast %330 : vector<1x1x16xf32> to vector<1x16xf32>
    %c5_110 = arith.constant 5 : index
    %c0_111 = arith.constant 0 : index
    %c0_112 = arith.constant 0 : index
    %332 = vector.load %arg6[%c5_110, %c0_111, %c0_112] : memref<15x1x16xf32, #tpu.memory_space<vmem>>, vector<1x1x16xf32>
    %333 = vector.shape_cast %332 : vector<1x1x16xf32> to vector<1x16xf32>
    %334 = vector.extract_strided_slice %327 {offsets = [0, 0], sizes = [16, 16], strides = [1, 1]} : vector<16x32xf32> to vector<16x16xf32>
    %335 = vector.extract_strided_slice %327 {offsets = [0, 16], sizes = [16, 16], strides = [1, 1]} : vector<16x32xf32> to vector<16x16xf32>
    %cst_113 = arith.constant 0.000000e+00 : f32
    %336 = vector.broadcast %cst_113 : f32 to vector<1x16xf32>
    %337 = vector.extract_strided_slice %335 {offsets = [0, 0], sizes = [15, 16], strides = [1, 1]} : vector<16x16xf32> to vector<15x16xf32>
    %338 = tpu.concatenate %336, %337 in 0 : vector<1x16xf32>, vector<15x16xf32> -> vector<16x16xf32>
    %339 = vector.broadcast %20 : vector<16x1xf32> to vector<16x16xf32>
    %340 = arith.mulf %338, %339 : vector<16x16xf32>
    %341 = vector.extract_strided_slice %334 {offsets = [1, 0], sizes = [15, 16], strides = [1, 1]} : vector<16x16xf32> to vector<15x16xf32>
    %cst_114 = arith.constant 0.000000e+00 : f32
    %342 = vector.broadcast %cst_114 : f32 to vector<1x16xf32>
    %343 = tpu.concatenate %341, %342 in 0 : vector<15x16xf32>, vector<1x16xf32> -> vector<16x16xf32>
    %344 = vector.broadcast %24 : vector<16x1xf32> to vector<16x16xf32>
    %345 = arith.mulf %343, %344 : vector<16x16xf32>
    %346 = tpu.concatenate %340, %327, %345 in 1 : vector<16x16xf32>, vector<16x32xf32>, vector<16x16xf32> -> vector<16x64xf32>
    %cst_115 = arith.constant dense<0.000000e+00> : vector<16x32xf32>
    %347 = tpu.matmul %346, %329, %cst_115 {dimension_numbers = #tpu.dot_dimension_numbers<[1], [0], [0], [1], [0, 0, 1, 1], [], []>, precision = #tpu.contract_precision<fp32>} : vector<16x64xf32>, vector<64x32xf32>, vector<16x32xf32> -> vector<16x32xf32>
    %cst_116 = arith.constant dense<0.000000e+00> : vector<32xf32>
    %348 = vector.multi_reduction <add>, %347, %cst_116 [0] : vector<16x32xf32> to vector<32xf32>
    %349 = vector.shape_cast %348 : vector<32xf32> to vector<1x32xf32>
    %350 = arith.mulf %347, %347 : vector<16x32xf32>
    %cst_117 = arith.constant dense<0.000000e+00> : vector<32xf32>
    %351 = vector.multi_reduction <add>, %350, %cst_117 [0] : vector<16x32xf32> to vector<32xf32>
    %352 = vector.shape_cast %351 : vector<32xf32> to vector<1x32xf32>
    %353 = vector.extract_strided_slice %349 {offsets = [0, 0], sizes = [1, 16], strides = [1, 1]} : vector<1x32xf32> to vector<1x16xf32>
    %354 = vector.extract_strided_slice %349 {offsets = [0, 16], sizes = [1, 16], strides = [1, 1]} : vector<1x32xf32> to vector<1x16xf32>
    %355 = arith.addf %353, %354 : vector<1x16xf32>
    %cst_118 = arith.constant 3.125000e-02 : f32
    %356 = vector.broadcast %cst_118 : f32 to vector<1x16xf32>
    %357 = arith.mulf %355, %356 : vector<1x16xf32>
    %358 = vector.extract_strided_slice %352 {offsets = [0, 0], sizes = [1, 16], strides = [1, 1]} : vector<1x32xf32> to vector<1x16xf32>
    %359 = vector.extract_strided_slice %352 {offsets = [0, 16], sizes = [1, 16], strides = [1, 1]} : vector<1x32xf32> to vector<1x16xf32>
    %360 = arith.addf %358, %359 : vector<1x16xf32>
    %cst_119 = arith.constant 3.125000e-02 : f32
    %361 = vector.broadcast %cst_119 : f32 to vector<1x16xf32>
    %362 = arith.mulf %360, %361 : vector<1x16xf32>
    %363 = arith.mulf %357, %357 : vector<1x16xf32>
    %364 = arith.subf %362, %363 : vector<1x16xf32>
    %cst_120 = arith.constant 9.99999974E-6 : f32
    %365 = vector.broadcast %cst_120 : f32 to vector<1x16xf32>
    %366 = arith.addf %364, %365 : vector<1x16xf32>
    %367 = math.rsqrt %366 : vector<1x16xf32>
    %368 = arith.mulf %331, %367 : vector<1x16xf32>
    %369 = arith.mulf %357, %368 : vector<1x16xf32>
    %370 = arith.subf %333, %369 : vector<1x16xf32>
    %371 = tpu.concatenate %368, %368 in 1 : vector<1x16xf32>, vector<1x16xf32> -> vector<1x32xf32>
    %372 = tpu.concatenate %370, %370 in 1 : vector<1x16xf32>, vector<1x16xf32> -> vector<1x32xf32>
    %373 = vector.broadcast %371 : vector<1x32xf32> to vector<16x32xf32>
    %374 = arith.mulf %347, %373 : vector<16x32xf32>
    %375 = vector.broadcast %372 : vector<1x32xf32> to vector<16x32xf32>
    %376 = arith.addf %374, %375 : vector<16x32xf32>
    %cst_121 = arith.constant 0.000000e+00 : f32
    %377 = vector.broadcast %cst_121 : f32 to vector<16x32xf32>
    %378 = arith.maximumf %376, %377 : vector<16x32xf32>
    %379 = arith.addf %225, %378 : vector<16x32xf32>
    %c6 = arith.constant 6 : index
    %c0_122 = arith.constant 0 : index
    %c0_123 = arith.constant 0 : index
    %380 = vector.load %arg4[%c6, %c0_122, %c0_123] : memref<15x64x32xf32, #tpu.memory_space<vmem>>, vector<1x64x32xf32>
    %381 = vector.shape_cast %380 : vector<1x64x32xf32> to vector<64x32xf32>
    %c6_124 = arith.constant 6 : index
    %c0_125 = arith.constant 0 : index
    %c0_126 = arith.constant 0 : index
    %382 = vector.load %arg5[%c6_124, %c0_125, %c0_126] : memref<15x1x16xf32, #tpu.memory_space<vmem>>, vector<1x1x16xf32>
    %383 = vector.shape_cast %382 : vector<1x1x16xf32> to vector<1x16xf32>
    %c6_127 = arith.constant 6 : index
    %c0_128 = arith.constant 0 : index
    %c0_129 = arith.constant 0 : index
    %384 = vector.load %arg6[%c6_127, %c0_128, %c0_129] : memref<15x1x16xf32, #tpu.memory_space<vmem>>, vector<1x1x16xf32>
    %385 = vector.shape_cast %384 : vector<1x1x16xf32> to vector<1x16xf32>
    %386 = vector.extract_strided_slice %379 {offsets = [0, 0], sizes = [16, 16], strides = [1, 1]} : vector<16x32xf32> to vector<16x16xf32>
    %387 = vector.extract_strided_slice %379 {offsets = [0, 16], sizes = [16, 16], strides = [1, 1]} : vector<16x32xf32> to vector<16x16xf32>
    %cst_130 = arith.constant 0.000000e+00 : f32
    %388 = vector.broadcast %cst_130 : f32 to vector<1x16xf32>
    %389 = vector.extract_strided_slice %387 {offsets = [0, 0], sizes = [15, 16], strides = [1, 1]} : vector<16x16xf32> to vector<15x16xf32>
    %390 = tpu.concatenate %388, %389 in 0 : vector<1x16xf32>, vector<15x16xf32> -> vector<16x16xf32>
    %391 = vector.broadcast %20 : vector<16x1xf32> to vector<16x16xf32>
    %392 = arith.mulf %390, %391 : vector<16x16xf32>
    %393 = vector.extract_strided_slice %386 {offsets = [1, 0], sizes = [15, 16], strides = [1, 1]} : vector<16x16xf32> to vector<15x16xf32>
    %cst_131 = arith.constant 0.000000e+00 : f32
    %394 = vector.broadcast %cst_131 : f32 to vector<1x16xf32>
    %395 = tpu.concatenate %393, %394 in 0 : vector<15x16xf32>, vector<1x16xf32> -> vector<16x16xf32>
    %396 = vector.broadcast %24 : vector<16x1xf32> to vector<16x16xf32>
    %397 = arith.mulf %395, %396 : vector<16x16xf32>
    %398 = tpu.concatenate %392, %379, %397 in 1 : vector<16x16xf32>, vector<16x32xf32>, vector<16x16xf32> -> vector<16x64xf32>
    %cst_132 = arith.constant dense<0.000000e+00> : vector<16x32xf32>
    %399 = tpu.matmul %398, %381, %cst_132 {dimension_numbers = #tpu.dot_dimension_numbers<[1], [0], [0], [1], [0, 0, 1, 1], [], []>, precision = #tpu.contract_precision<fp32>} : vector<16x64xf32>, vector<64x32xf32>, vector<16x32xf32> -> vector<16x32xf32>
    %cst_133 = arith.constant dense<0.000000e+00> : vector<32xf32>
    %400 = vector.multi_reduction <add>, %399, %cst_133 [0] : vector<16x32xf32> to vector<32xf32>
    %401 = vector.shape_cast %400 : vector<32xf32> to vector<1x32xf32>
    %402 = arith.mulf %399, %399 : vector<16x32xf32>
    %cst_134 = arith.constant dense<0.000000e+00> : vector<32xf32>
    %403 = vector.multi_reduction <add>, %402, %cst_134 [0] : vector<16x32xf32> to vector<32xf32>
    %404 = vector.shape_cast %403 : vector<32xf32> to vector<1x32xf32>
    %405 = vector.extract_strided_slice %401 {offsets = [0, 0], sizes = [1, 16], strides = [1, 1]} : vector<1x32xf32> to vector<1x16xf32>
    %406 = vector.extract_strided_slice %401 {offsets = [0, 16], sizes = [1, 16], strides = [1, 1]} : vector<1x32xf32> to vector<1x16xf32>
    %407 = arith.addf %405, %406 : vector<1x16xf32>
    %cst_135 = arith.constant 3.125000e-02 : f32
    %408 = vector.broadcast %cst_135 : f32 to vector<1x16xf32>
    %409 = arith.mulf %407, %408 : vector<1x16xf32>
    %410 = vector.extract_strided_slice %404 {offsets = [0, 0], sizes = [1, 16], strides = [1, 1]} : vector<1x32xf32> to vector<1x16xf32>
    %411 = vector.extract_strided_slice %404 {offsets = [0, 16], sizes = [1, 16], strides = [1, 1]} : vector<1x32xf32> to vector<1x16xf32>
    %412 = arith.addf %410, %411 : vector<1x16xf32>
    %cst_136 = arith.constant 3.125000e-02 : f32
    %413 = vector.broadcast %cst_136 : f32 to vector<1x16xf32>
    %414 = arith.mulf %412, %413 : vector<1x16xf32>
    %415 = arith.mulf %409, %409 : vector<1x16xf32>
    %416 = arith.subf %414, %415 : vector<1x16xf32>
    %cst_137 = arith.constant 9.99999974E-6 : f32
    %417 = vector.broadcast %cst_137 : f32 to vector<1x16xf32>
    %418 = arith.addf %416, %417 : vector<1x16xf32>
    %419 = math.rsqrt %418 : vector<1x16xf32>
    %420 = arith.mulf %383, %419 : vector<1x16xf32>
    %421 = arith.mulf %409, %420 : vector<1x16xf32>
    %422 = arith.subf %385, %421 : vector<1x16xf32>
    %423 = tpu.concatenate %420, %420 in 1 : vector<1x16xf32>, vector<1x16xf32> -> vector<1x32xf32>
    %424 = tpu.concatenate %422, %422 in 1 : vector<1x16xf32>, vector<1x16xf32> -> vector<1x32xf32>
    %425 = vector.broadcast %423 : vector<1x32xf32> to vector<16x32xf32>
    %426 = arith.mulf %399, %425 : vector<16x32xf32>
    %427 = vector.broadcast %424 : vector<1x32xf32> to vector<16x32xf32>
    %428 = arith.addf %426, %427 : vector<16x32xf32>
    %cst_138 = arith.constant 0.000000e+00 : f32
    %429 = vector.broadcast %cst_138 : f32 to vector<16x32xf32>
    %430 = arith.maximumf %428, %429 : vector<16x32xf32>
    %c7 = arith.constant 7 : index
    %c0_139 = arith.constant 0 : index
    %c0_140 = arith.constant 0 : index
    %431 = vector.load %arg4[%c7, %c0_139, %c0_140] : memref<15x64x32xf32, #tpu.memory_space<vmem>>, vector<1x64x32xf32>
    %432 = vector.shape_cast %431 : vector<1x64x32xf32> to vector<64x32xf32>
    %c7_141 = arith.constant 7 : index
    %c0_142 = arith.constant 0 : index
    %c0_143 = arith.constant 0 : index
    %433 = vector.load %arg5[%c7_141, %c0_142, %c0_143] : memref<15x1x16xf32, #tpu.memory_space<vmem>>, vector<1x1x16xf32>
    %434 = vector.shape_cast %433 : vector<1x1x16xf32> to vector<1x16xf32>
    %c7_144 = arith.constant 7 : index
    %c0_145 = arith.constant 0 : index
    %c0_146 = arith.constant 0 : index
    %435 = vector.load %arg6[%c7_144, %c0_145, %c0_146] : memref<15x1x16xf32, #tpu.memory_space<vmem>>, vector<1x1x16xf32>
    %436 = vector.shape_cast %435 : vector<1x1x16xf32> to vector<1x16xf32>
    %437 = vector.extract_strided_slice %430 {offsets = [0, 0], sizes = [16, 16], strides = [1, 1]} : vector<16x32xf32> to vector<16x16xf32>
    %438 = vector.extract_strided_slice %430 {offsets = [0, 16], sizes = [16, 16], strides = [1, 1]} : vector<16x32xf32> to vector<16x16xf32>
    %cst_147 = arith.constant 0.000000e+00 : f32
    %439 = vector.broadcast %cst_147 : f32 to vector<1x16xf32>
    %440 = vector.extract_strided_slice %438 {offsets = [0, 0], sizes = [15, 16], strides = [1, 1]} : vector<16x16xf32> to vector<15x16xf32>
    %441 = tpu.concatenate %439, %440 in 0 : vector<1x16xf32>, vector<15x16xf32> -> vector<16x16xf32>
    %442 = vector.broadcast %20 : vector<16x1xf32> to vector<16x16xf32>
    %443 = arith.mulf %441, %442 : vector<16x16xf32>
    %444 = vector.extract_strided_slice %437 {offsets = [1, 0], sizes = [15, 16], strides = [1, 1]} : vector<16x16xf32> to vector<15x16xf32>
    %cst_148 = arith.constant 0.000000e+00 : f32
    %445 = vector.broadcast %cst_148 : f32 to vector<1x16xf32>
    %446 = tpu.concatenate %444, %445 in 0 : vector<15x16xf32>, vector<1x16xf32> -> vector<16x16xf32>
    %447 = vector.broadcast %24 : vector<16x1xf32> to vector<16x16xf32>
    %448 = arith.mulf %446, %447 : vector<16x16xf32>
    %449 = tpu.concatenate %443, %430, %448 in 1 : vector<16x16xf32>, vector<16x32xf32>, vector<16x16xf32> -> vector<16x64xf32>
    %cst_149 = arith.constant dense<0.000000e+00> : vector<16x32xf32>
    %450 = tpu.matmul %449, %432, %cst_149 {dimension_numbers = #tpu.dot_dimension_numbers<[1], [0], [0], [1], [0, 0, 1, 1], [], []>, precision = #tpu.contract_precision<fp32>} : vector<16x64xf32>, vector<64x32xf32>, vector<16x32xf32> -> vector<16x32xf32>
    %cst_150 = arith.constant dense<0.000000e+00> : vector<32xf32>
    %451 = vector.multi_reduction <add>, %450, %cst_150 [0] : vector<16x32xf32> to vector<32xf32>
    %452 = vector.shape_cast %451 : vector<32xf32> to vector<1x32xf32>
    %453 = arith.mulf %450, %450 : vector<16x32xf32>
    %cst_151 = arith.constant dense<0.000000e+00> : vector<32xf32>
    %454 = vector.multi_reduction <add>, %453, %cst_151 [0] : vector<16x32xf32> to vector<32xf32>
    %455 = vector.shape_cast %454 : vector<32xf32> to vector<1x32xf32>
    %456 = vector.extract_strided_slice %452 {offsets = [0, 0], sizes = [1, 16], strides = [1, 1]} : vector<1x32xf32> to vector<1x16xf32>
    %457 = vector.extract_strided_slice %452 {offsets = [0, 16], sizes = [1, 16], strides = [1, 1]} : vector<1x32xf32> to vector<1x16xf32>
    %458 = arith.addf %456, %457 : vector<1x16xf32>
    %cst_152 = arith.constant 3.125000e-02 : f32
    %459 = vector.broadcast %cst_152 : f32 to vector<1x16xf32>
    %460 = arith.mulf %458, %459 : vector<1x16xf32>
    %461 = vector.extract_strided_slice %455 {offsets = [0, 0], sizes = [1, 16], strides = [1, 1]} : vector<1x32xf32> to vector<1x16xf32>
    %462 = vector.extract_strided_slice %455 {offsets = [0, 16], sizes = [1, 16], strides = [1, 1]} : vector<1x32xf32> to vector<1x16xf32>
    %463 = arith.addf %461, %462 : vector<1x16xf32>
    %cst_153 = arith.constant 3.125000e-02 : f32
    %464 = vector.broadcast %cst_153 : f32 to vector<1x16xf32>
    %465 = arith.mulf %463, %464 : vector<1x16xf32>
    %466 = arith.mulf %460, %460 : vector<1x16xf32>
    %467 = arith.subf %465, %466 : vector<1x16xf32>
    %cst_154 = arith.constant 9.99999974E-6 : f32
    %468 = vector.broadcast %cst_154 : f32 to vector<1x16xf32>
    %469 = arith.addf %467, %468 : vector<1x16xf32>
    %470 = math.rsqrt %469 : vector<1x16xf32>
    %471 = arith.mulf %434, %470 : vector<1x16xf32>
    %472 = arith.mulf %460, %471 : vector<1x16xf32>
    %473 = arith.subf %436, %472 : vector<1x16xf32>
    %474 = tpu.concatenate %471, %471 in 1 : vector<1x16xf32>, vector<1x16xf32> -> vector<1x32xf32>
    %475 = tpu.concatenate %473, %473 in 1 : vector<1x16xf32>, vector<1x16xf32> -> vector<1x32xf32>
    %476 = vector.broadcast %474 : vector<1x32xf32> to vector<16x32xf32>
    %477 = arith.mulf %450, %476 : vector<16x32xf32>
    %478 = vector.broadcast %475 : vector<1x32xf32> to vector<16x32xf32>
    %479 = arith.addf %477, %478 : vector<16x32xf32>
    %cst_155 = arith.constant 0.000000e+00 : f32
    %480 = vector.broadcast %cst_155 : f32 to vector<16x32xf32>
    %481 = arith.maximumf %479, %480 : vector<16x32xf32>
    %c8 = arith.constant 8 : index
    %c0_156 = arith.constant 0 : index
    %c0_157 = arith.constant 0 : index
    %482 = vector.load %arg4[%c8, %c0_156, %c0_157] : memref<15x64x32xf32, #tpu.memory_space<vmem>>, vector<1x64x32xf32>
    %483 = vector.shape_cast %482 : vector<1x64x32xf32> to vector<64x32xf32>
    %c8_158 = arith.constant 8 : index
    %c0_159 = arith.constant 0 : index
    %c0_160 = arith.constant 0 : index
    %484 = vector.load %arg5[%c8_158, %c0_159, %c0_160] : memref<15x1x16xf32, #tpu.memory_space<vmem>>, vector<1x1x16xf32>
    %485 = vector.shape_cast %484 : vector<1x1x16xf32> to vector<1x16xf32>
    %c8_161 = arith.constant 8 : index
    %c0_162 = arith.constant 0 : index
    %c0_163 = arith.constant 0 : index
    %486 = vector.load %arg6[%c8_161, %c0_162, %c0_163] : memref<15x1x16xf32, #tpu.memory_space<vmem>>, vector<1x1x16xf32>
    %487 = vector.shape_cast %486 : vector<1x1x16xf32> to vector<1x16xf32>
    %488 = vector.extract_strided_slice %481 {offsets = [0, 0], sizes = [16, 16], strides = [1, 1]} : vector<16x32xf32> to vector<16x16xf32>
    %489 = vector.extract_strided_slice %481 {offsets = [0, 16], sizes = [16, 16], strides = [1, 1]} : vector<16x32xf32> to vector<16x16xf32>
    %cst_164 = arith.constant 0.000000e+00 : f32
    %490 = vector.broadcast %cst_164 : f32 to vector<1x16xf32>
    %491 = vector.extract_strided_slice %489 {offsets = [0, 0], sizes = [15, 16], strides = [1, 1]} : vector<16x16xf32> to vector<15x16xf32>
    %492 = tpu.concatenate %490, %491 in 0 : vector<1x16xf32>, vector<15x16xf32> -> vector<16x16xf32>
    %493 = vector.broadcast %20 : vector<16x1xf32> to vector<16x16xf32>
    %494 = arith.mulf %492, %493 : vector<16x16xf32>
    %495 = vector.extract_strided_slice %488 {offsets = [1, 0], sizes = [15, 16], strides = [1, 1]} : vector<16x16xf32> to vector<15x16xf32>
    %cst_165 = arith.constant 0.000000e+00 : f32
    %496 = vector.broadcast %cst_165 : f32 to vector<1x16xf32>
    %497 = tpu.concatenate %495, %496 in 0 : vector<15x16xf32>, vector<1x16xf32> -> vector<16x16xf32>
    %498 = vector.broadcast %24 : vector<16x1xf32> to vector<16x16xf32>
    %499 = arith.mulf %497, %498 : vector<16x16xf32>
    %500 = tpu.concatenate %494, %481, %499 in 1 : vector<16x16xf32>, vector<16x32xf32>, vector<16x16xf32> -> vector<16x64xf32>
    %cst_166 = arith.constant dense<0.000000e+00> : vector<16x32xf32>
    %501 = tpu.matmul %500, %483, %cst_166 {dimension_numbers = #tpu.dot_dimension_numbers<[1], [0], [0], [1], [0, 0, 1, 1], [], []>, precision = #tpu.contract_precision<fp32>} : vector<16x64xf32>, vector<64x32xf32>, vector<16x32xf32> -> vector<16x32xf32>
    %cst_167 = arith.constant dense<0.000000e+00> : vector<32xf32>
    %502 = vector.multi_reduction <add>, %501, %cst_167 [0] : vector<16x32xf32> to vector<32xf32>
    %503 = vector.shape_cast %502 : vector<32xf32> to vector<1x32xf32>
    %504 = arith.mulf %501, %501 : vector<16x32xf32>
    %cst_168 = arith.constant dense<0.000000e+00> : vector<32xf32>
    %505 = vector.multi_reduction <add>, %504, %cst_168 [0] : vector<16x32xf32> to vector<32xf32>
    %506 = vector.shape_cast %505 : vector<32xf32> to vector<1x32xf32>
    %507 = vector.extract_strided_slice %503 {offsets = [0, 0], sizes = [1, 16], strides = [1, 1]} : vector<1x32xf32> to vector<1x16xf32>
    %508 = vector.extract_strided_slice %503 {offsets = [0, 16], sizes = [1, 16], strides = [1, 1]} : vector<1x32xf32> to vector<1x16xf32>
    %509 = arith.addf %507, %508 : vector<1x16xf32>
    %cst_169 = arith.constant 3.125000e-02 : f32
    %510 = vector.broadcast %cst_169 : f32 to vector<1x16xf32>
    %511 = arith.mulf %509, %510 : vector<1x16xf32>
    %512 = vector.extract_strided_slice %506 {offsets = [0, 0], sizes = [1, 16], strides = [1, 1]} : vector<1x32xf32> to vector<1x16xf32>
    %513 = vector.extract_strided_slice %506 {offsets = [0, 16], sizes = [1, 16], strides = [1, 1]} : vector<1x32xf32> to vector<1x16xf32>
    %514 = arith.addf %512, %513 : vector<1x16xf32>
    %cst_170 = arith.constant 3.125000e-02 : f32
    %515 = vector.broadcast %cst_170 : f32 to vector<1x16xf32>
    %516 = arith.mulf %514, %515 : vector<1x16xf32>
    %517 = arith.mulf %511, %511 : vector<1x16xf32>
    %518 = arith.subf %516, %517 : vector<1x16xf32>
    %cst_171 = arith.constant 9.99999974E-6 : f32
    %519 = vector.broadcast %cst_171 : f32 to vector<1x16xf32>
    %520 = arith.addf %518, %519 : vector<1x16xf32>
    %521 = math.rsqrt %520 : vector<1x16xf32>
    %522 = arith.mulf %485, %521 : vector<1x16xf32>
    %523 = arith.mulf %511, %522 : vector<1x16xf32>
    %524 = arith.subf %487, %523 : vector<1x16xf32>
    %525 = tpu.concatenate %522, %522 in 1 : vector<1x16xf32>, vector<1x16xf32> -> vector<1x32xf32>
    %526 = tpu.concatenate %524, %524 in 1 : vector<1x16xf32>, vector<1x16xf32> -> vector<1x32xf32>
    %527 = vector.broadcast %525 : vector<1x32xf32> to vector<16x32xf32>
    %528 = arith.mulf %501, %527 : vector<16x32xf32>
    %529 = vector.broadcast %526 : vector<1x32xf32> to vector<16x32xf32>
    %530 = arith.addf %528, %529 : vector<16x32xf32>
    %cst_172 = arith.constant 0.000000e+00 : f32
    %531 = vector.broadcast %cst_172 : f32 to vector<16x32xf32>
    %532 = arith.maximumf %530, %531 : vector<16x32xf32>
    %533 = arith.addf %379, %532 : vector<16x32xf32>
    %c9 = arith.constant 9 : index
    %c0_173 = arith.constant 0 : index
    %c0_174 = arith.constant 0 : index
    %534 = vector.load %arg4[%c9, %c0_173, %c0_174] : memref<15x64x32xf32, #tpu.memory_space<vmem>>, vector<1x64x32xf32>
    %535 = vector.shape_cast %534 : vector<1x64x32xf32> to vector<64x32xf32>
    %c9_175 = arith.constant 9 : index
    %c0_176 = arith.constant 0 : index
    %c0_177 = arith.constant 0 : index
    %536 = vector.load %arg5[%c9_175, %c0_176, %c0_177] : memref<15x1x16xf32, #tpu.memory_space<vmem>>, vector<1x1x16xf32>
    %537 = vector.shape_cast %536 : vector<1x1x16xf32> to vector<1x16xf32>
    %c9_178 = arith.constant 9 : index
    %c0_179 = arith.constant 0 : index
    %c0_180 = arith.constant 0 : index
    %538 = vector.load %arg6[%c9_178, %c0_179, %c0_180] : memref<15x1x16xf32, #tpu.memory_space<vmem>>, vector<1x1x16xf32>
    %539 = vector.shape_cast %538 : vector<1x1x16xf32> to vector<1x16xf32>
    %540 = vector.extract_strided_slice %533 {offsets = [0, 0], sizes = [16, 16], strides = [1, 1]} : vector<16x32xf32> to vector<16x16xf32>
    %541 = vector.extract_strided_slice %533 {offsets = [0, 16], sizes = [16, 16], strides = [1, 1]} : vector<16x32xf32> to vector<16x16xf32>
    %cst_181 = arith.constant 0.000000e+00 : f32
    %542 = vector.broadcast %cst_181 : f32 to vector<1x16xf32>
    %543 = vector.extract_strided_slice %541 {offsets = [0, 0], sizes = [15, 16], strides = [1, 1]} : vector<16x16xf32> to vector<15x16xf32>
    %544 = tpu.concatenate %542, %543 in 0 : vector<1x16xf32>, vector<15x16xf32> -> vector<16x16xf32>
    %545 = vector.broadcast %20 : vector<16x1xf32> to vector<16x16xf32>
    %546 = arith.mulf %544, %545 : vector<16x16xf32>
    %547 = vector.extract_strided_slice %540 {offsets = [1, 0], sizes = [15, 16], strides = [1, 1]} : vector<16x16xf32> to vector<15x16xf32>
    %cst_182 = arith.constant 0.000000e+00 : f32
    %548 = vector.broadcast %cst_182 : f32 to vector<1x16xf32>
    %549 = tpu.concatenate %547, %548 in 0 : vector<15x16xf32>, vector<1x16xf32> -> vector<16x16xf32>
    %550 = vector.broadcast %24 : vector<16x1xf32> to vector<16x16xf32>
    %551 = arith.mulf %549, %550 : vector<16x16xf32>
    %552 = tpu.concatenate %546, %533, %551 in 1 : vector<16x16xf32>, vector<16x32xf32>, vector<16x16xf32> -> vector<16x64xf32>
    %cst_183 = arith.constant dense<0.000000e+00> : vector<16x32xf32>
    %553 = tpu.matmul %552, %535, %cst_183 {dimension_numbers = #tpu.dot_dimension_numbers<[1], [0], [0], [1], [0, 0, 1, 1], [], []>, precision = #tpu.contract_precision<fp32>} : vector<16x64xf32>, vector<64x32xf32>, vector<16x32xf32> -> vector<16x32xf32>
    %cst_184 = arith.constant dense<0.000000e+00> : vector<32xf32>
    %554 = vector.multi_reduction <add>, %553, %cst_184 [0] : vector<16x32xf32> to vector<32xf32>
    %555 = vector.shape_cast %554 : vector<32xf32> to vector<1x32xf32>
    %556 = arith.mulf %553, %553 : vector<16x32xf32>
    %cst_185 = arith.constant dense<0.000000e+00> : vector<32xf32>
    %557 = vector.multi_reduction <add>, %556, %cst_185 [0] : vector<16x32xf32> to vector<32xf32>
    %558 = vector.shape_cast %557 : vector<32xf32> to vector<1x32xf32>
    %559 = vector.extract_strided_slice %555 {offsets = [0, 0], sizes = [1, 16], strides = [1, 1]} : vector<1x32xf32> to vector<1x16xf32>
    %560 = vector.extract_strided_slice %555 {offsets = [0, 16], sizes = [1, 16], strides = [1, 1]} : vector<1x32xf32> to vector<1x16xf32>
    %561 = arith.addf %559, %560 : vector<1x16xf32>
    %cst_186 = arith.constant 3.125000e-02 : f32
    %562 = vector.broadcast %cst_186 : f32 to vector<1x16xf32>
    %563 = arith.mulf %561, %562 : vector<1x16xf32>
    %564 = vector.extract_strided_slice %558 {offsets = [0, 0], sizes = [1, 16], strides = [1, 1]} : vector<1x32xf32> to vector<1x16xf32>
    %565 = vector.extract_strided_slice %558 {offsets = [0, 16], sizes = [1, 16], strides = [1, 1]} : vector<1x32xf32> to vector<1x16xf32>
    %566 = arith.addf %564, %565 : vector<1x16xf32>
    %cst_187 = arith.constant 3.125000e-02 : f32
    %567 = vector.broadcast %cst_187 : f32 to vector<1x16xf32>
    %568 = arith.mulf %566, %567 : vector<1x16xf32>
    %569 = arith.mulf %563, %563 : vector<1x16xf32>
    %570 = arith.subf %568, %569 : vector<1x16xf32>
    %cst_188 = arith.constant 9.99999974E-6 : f32
    %571 = vector.broadcast %cst_188 : f32 to vector<1x16xf32>
    %572 = arith.addf %570, %571 : vector<1x16xf32>
    %573 = math.rsqrt %572 : vector<1x16xf32>
    %574 = arith.mulf %537, %573 : vector<1x16xf32>
    %575 = arith.mulf %563, %574 : vector<1x16xf32>
    %576 = arith.subf %539, %575 : vector<1x16xf32>
    %577 = tpu.concatenate %574, %574 in 1 : vector<1x16xf32>, vector<1x16xf32> -> vector<1x32xf32>
    %578 = tpu.concatenate %576, %576 in 1 : vector<1x16xf32>, vector<1x16xf32> -> vector<1x32xf32>
    %579 = vector.broadcast %577 : vector<1x32xf32> to vector<16x32xf32>
    %580 = arith.mulf %553, %579 : vector<16x32xf32>
    %581 = vector.broadcast %578 : vector<1x32xf32> to vector<16x32xf32>
    %582 = arith.addf %580, %581 : vector<16x32xf32>
    %cst_189 = arith.constant 0.000000e+00 : f32
    %583 = vector.broadcast %cst_189 : f32 to vector<16x32xf32>
    %584 = arith.maximumf %582, %583 : vector<16x32xf32>
    %c10 = arith.constant 10 : index
    %c0_190 = arith.constant 0 : index
    %c0_191 = arith.constant 0 : index
    %585 = vector.load %arg4[%c10, %c0_190, %c0_191] : memref<15x64x32xf32, #tpu.memory_space<vmem>>, vector<1x64x32xf32>
    %586 = vector.shape_cast %585 : vector<1x64x32xf32> to vector<64x32xf32>
    %c10_192 = arith.constant 10 : index
    %c0_193 = arith.constant 0 : index
    %c0_194 = arith.constant 0 : index
    %587 = vector.load %arg5[%c10_192, %c0_193, %c0_194] : memref<15x1x16xf32, #tpu.memory_space<vmem>>, vector<1x1x16xf32>
    %588 = vector.shape_cast %587 : vector<1x1x16xf32> to vector<1x16xf32>
    %c10_195 = arith.constant 10 : index
    %c0_196 = arith.constant 0 : index
    %c0_197 = arith.constant 0 : index
    %589 = vector.load %arg6[%c10_195, %c0_196, %c0_197] : memref<15x1x16xf32, #tpu.memory_space<vmem>>, vector<1x1x16xf32>
    %590 = vector.shape_cast %589 : vector<1x1x16xf32> to vector<1x16xf32>
    %591 = vector.extract_strided_slice %584 {offsets = [0, 0], sizes = [16, 16], strides = [1, 1]} : vector<16x32xf32> to vector<16x16xf32>
    %592 = vector.extract_strided_slice %584 {offsets = [0, 16], sizes = [16, 16], strides = [1, 1]} : vector<16x32xf32> to vector<16x16xf32>
    %cst_198 = arith.constant 0.000000e+00 : f32
    %593 = vector.broadcast %cst_198 : f32 to vector<1x16xf32>
    %594 = vector.extract_strided_slice %592 {offsets = [0, 0], sizes = [15, 16], strides = [1, 1]} : vector<16x16xf32> to vector<15x16xf32>
    %595 = tpu.concatenate %593, %594 in 0 : vector<1x16xf32>, vector<15x16xf32> -> vector<16x16xf32>
    %596 = vector.broadcast %20 : vector<16x1xf32> to vector<16x16xf32>
    %597 = arith.mulf %595, %596 : vector<16x16xf32>
    %598 = vector.extract_strided_slice %591 {offsets = [1, 0], sizes = [15, 16], strides = [1, 1]} : vector<16x16xf32> to vector<15x16xf32>
    %cst_199 = arith.constant 0.000000e+00 : f32
    %599 = vector.broadcast %cst_199 : f32 to vector<1x16xf32>
    %600 = tpu.concatenate %598, %599 in 0 : vector<15x16xf32>, vector<1x16xf32> -> vector<16x16xf32>
    %601 = vector.broadcast %24 : vector<16x1xf32> to vector<16x16xf32>
    %602 = arith.mulf %600, %601 : vector<16x16xf32>
    %603 = tpu.concatenate %597, %584, %602 in 1 : vector<16x16xf32>, vector<16x32xf32>, vector<16x16xf32> -> vector<16x64xf32>
    %cst_200 = arith.constant dense<0.000000e+00> : vector<16x32xf32>
    %604 = tpu.matmul %603, %586, %cst_200 {dimension_numbers = #tpu.dot_dimension_numbers<[1], [0], [0], [1], [0, 0, 1, 1], [], []>, precision = #tpu.contract_precision<fp32>} : vector<16x64xf32>, vector<64x32xf32>, vector<16x32xf32> -> vector<16x32xf32>
    %cst_201 = arith.constant dense<0.000000e+00> : vector<32xf32>
    %605 = vector.multi_reduction <add>, %604, %cst_201 [0] : vector<16x32xf32> to vector<32xf32>
    %606 = vector.shape_cast %605 : vector<32xf32> to vector<1x32xf32>
    %607 = arith.mulf %604, %604 : vector<16x32xf32>
    %cst_202 = arith.constant dense<0.000000e+00> : vector<32xf32>
    %608 = vector.multi_reduction <add>, %607, %cst_202 [0] : vector<16x32xf32> to vector<32xf32>
    %609 = vector.shape_cast %608 : vector<32xf32> to vector<1x32xf32>
    %610 = vector.extract_strided_slice %606 {offsets = [0, 0], sizes = [1, 16], strides = [1, 1]} : vector<1x32xf32> to vector<1x16xf32>
    %611 = vector.extract_strided_slice %606 {offsets = [0, 16], sizes = [1, 16], strides = [1, 1]} : vector<1x32xf32> to vector<1x16xf32>
    %612 = arith.addf %610, %611 : vector<1x16xf32>
    %cst_203 = arith.constant 3.125000e-02 : f32
    %613 = vector.broadcast %cst_203 : f32 to vector<1x16xf32>
    %614 = arith.mulf %612, %613 : vector<1x16xf32>
    %615 = vector.extract_strided_slice %609 {offsets = [0, 0], sizes = [1, 16], strides = [1, 1]} : vector<1x32xf32> to vector<1x16xf32>
    %616 = vector.extract_strided_slice %609 {offsets = [0, 16], sizes = [1, 16], strides = [1, 1]} : vector<1x32xf32> to vector<1x16xf32>
    %617 = arith.addf %615, %616 : vector<1x16xf32>
    %cst_204 = arith.constant 3.125000e-02 : f32
    %618 = vector.broadcast %cst_204 : f32 to vector<1x16xf32>
    %619 = arith.mulf %617, %618 : vector<1x16xf32>
    %620 = arith.mulf %614, %614 : vector<1x16xf32>
    %621 = arith.subf %619, %620 : vector<1x16xf32>
    %cst_205 = arith.constant 9.99999974E-6 : f32
    %622 = vector.broadcast %cst_205 : f32 to vector<1x16xf32>
    %623 = arith.addf %621, %622 : vector<1x16xf32>
    %624 = math.rsqrt %623 : vector<1x16xf32>
    %625 = arith.mulf %588, %624 : vector<1x16xf32>
    %626 = arith.mulf %614, %625 : vector<1x16xf32>
    %627 = arith.subf %590, %626 : vector<1x16xf32>
    %628 = tpu.concatenate %625, %625 in 1 : vector<1x16xf32>, vector<1x16xf32> -> vector<1x32xf32>
    %629 = tpu.concatenate %627, %627 in 1 : vector<1x16xf32>, vector<1x16xf32> -> vector<1x32xf32>
    %630 = vector.broadcast %628 : vector<1x32xf32> to vector<16x32xf32>
    %631 = arith.mulf %604, %630 : vector<16x32xf32>
    %632 = vector.broadcast %629 : vector<1x32xf32> to vector<16x32xf32>
    %633 = arith.addf %631, %632 : vector<16x32xf32>
    %cst_206 = arith.constant 0.000000e+00 : f32
    %634 = vector.broadcast %cst_206 : f32 to vector<16x32xf32>
    %635 = arith.maximumf %633, %634 : vector<16x32xf32>
    %c11 = arith.constant 11 : index
    %c0_207 = arith.constant 0 : index
    %c0_208 = arith.constant 0 : index
    %636 = vector.load %arg4[%c11, %c0_207, %c0_208] : memref<15x64x32xf32, #tpu.memory_space<vmem>>, vector<1x64x32xf32>
    %637 = vector.shape_cast %636 : vector<1x64x32xf32> to vector<64x32xf32>
    %c11_209 = arith.constant 11 : index
    %c0_210 = arith.constant 0 : index
    %c0_211 = arith.constant 0 : index
    %638 = vector.load %arg5[%c11_209, %c0_210, %c0_211] : memref<15x1x16xf32, #tpu.memory_space<vmem>>, vector<1x1x16xf32>
    %639 = vector.shape_cast %638 : vector<1x1x16xf32> to vector<1x16xf32>
    %c11_212 = arith.constant 11 : index
    %c0_213 = arith.constant 0 : index
    %c0_214 = arith.constant 0 : index
    %640 = vector.load %arg6[%c11_212, %c0_213, %c0_214] : memref<15x1x16xf32, #tpu.memory_space<vmem>>, vector<1x1x16xf32>
    %641 = vector.shape_cast %640 : vector<1x1x16xf32> to vector<1x16xf32>
    %642 = vector.extract_strided_slice %635 {offsets = [0, 0], sizes = [16, 16], strides = [1, 1]} : vector<16x32xf32> to vector<16x16xf32>
    %643 = vector.extract_strided_slice %635 {offsets = [0, 16], sizes = [16, 16], strides = [1, 1]} : vector<16x32xf32> to vector<16x16xf32>
    %cst_215 = arith.constant 0.000000e+00 : f32
    %644 = vector.broadcast %cst_215 : f32 to vector<1x16xf32>
    %645 = vector.extract_strided_slice %643 {offsets = [0, 0], sizes = [15, 16], strides = [1, 1]} : vector<16x16xf32> to vector<15x16xf32>
    %646 = tpu.concatenate %644, %645 in 0 : vector<1x16xf32>, vector<15x16xf32> -> vector<16x16xf32>
    %647 = vector.broadcast %20 : vector<16x1xf32> to vector<16x16xf32>
    %648 = arith.mulf %646, %647 : vector<16x16xf32>
    %649 = vector.extract_strided_slice %642 {offsets = [1, 0], sizes = [15, 16], strides = [1, 1]} : vector<16x16xf32> to vector<15x16xf32>
    %cst_216 = arith.constant 0.000000e+00 : f32
    %650 = vector.broadcast %cst_216 : f32 to vector<1x16xf32>
    %651 = tpu.concatenate %649, %650 in 0 : vector<15x16xf32>, vector<1x16xf32> -> vector<16x16xf32>
    %652 = vector.broadcast %24 : vector<16x1xf32> to vector<16x16xf32>
    %653 = arith.mulf %651, %652 : vector<16x16xf32>
    %654 = tpu.concatenate %648, %635, %653 in 1 : vector<16x16xf32>, vector<16x32xf32>, vector<16x16xf32> -> vector<16x64xf32>
    %cst_217 = arith.constant dense<0.000000e+00> : vector<16x32xf32>
    %655 = tpu.matmul %654, %637, %cst_217 {dimension_numbers = #tpu.dot_dimension_numbers<[1], [0], [0], [1], [0, 0, 1, 1], [], []>, precision = #tpu.contract_precision<fp32>} : vector<16x64xf32>, vector<64x32xf32>, vector<16x32xf32> -> vector<16x32xf32>
    %cst_218 = arith.constant dense<0.000000e+00> : vector<32xf32>
    %656 = vector.multi_reduction <add>, %655, %cst_218 [0] : vector<16x32xf32> to vector<32xf32>
    %657 = vector.shape_cast %656 : vector<32xf32> to vector<1x32xf32>
    %658 = arith.mulf %655, %655 : vector<16x32xf32>
    %cst_219 = arith.constant dense<0.000000e+00> : vector<32xf32>
    %659 = vector.multi_reduction <add>, %658, %cst_219 [0] : vector<16x32xf32> to vector<32xf32>
    %660 = vector.shape_cast %659 : vector<32xf32> to vector<1x32xf32>
    %661 = vector.extract_strided_slice %657 {offsets = [0, 0], sizes = [1, 16], strides = [1, 1]} : vector<1x32xf32> to vector<1x16xf32>
    %662 = vector.extract_strided_slice %657 {offsets = [0, 16], sizes = [1, 16], strides = [1, 1]} : vector<1x32xf32> to vector<1x16xf32>
    %663 = arith.addf %661, %662 : vector<1x16xf32>
    %cst_220 = arith.constant 3.125000e-02 : f32
    %664 = vector.broadcast %cst_220 : f32 to vector<1x16xf32>
    %665 = arith.mulf %663, %664 : vector<1x16xf32>
    %666 = vector.extract_strided_slice %660 {offsets = [0, 0], sizes = [1, 16], strides = [1, 1]} : vector<1x32xf32> to vector<1x16xf32>
    %667 = vector.extract_strided_slice %660 {offsets = [0, 16], sizes = [1, 16], strides = [1, 1]} : vector<1x32xf32> to vector<1x16xf32>
    %668 = arith.addf %666, %667 : vector<1x16xf32>
    %cst_221 = arith.constant 3.125000e-02 : f32
    %669 = vector.broadcast %cst_221 : f32 to vector<1x16xf32>
    %670 = arith.mulf %668, %669 : vector<1x16xf32>
    %671 = arith.mulf %665, %665 : vector<1x16xf32>
    %672 = arith.subf %670, %671 : vector<1x16xf32>
    %cst_222 = arith.constant 9.99999974E-6 : f32
    %673 = vector.broadcast %cst_222 : f32 to vector<1x16xf32>
    %674 = arith.addf %672, %673 : vector<1x16xf32>
    %675 = math.rsqrt %674 : vector<1x16xf32>
    %676 = arith.mulf %639, %675 : vector<1x16xf32>
    %677 = arith.mulf %665, %676 : vector<1x16xf32>
    %678 = arith.subf %641, %677 : vector<1x16xf32>
    %679 = tpu.concatenate %676, %676 in 1 : vector<1x16xf32>, vector<1x16xf32> -> vector<1x32xf32>
    %680 = tpu.concatenate %678, %678 in 1 : vector<1x16xf32>, vector<1x16xf32> -> vector<1x32xf32>
    %681 = vector.broadcast %679 : vector<1x32xf32> to vector<16x32xf32>
    %682 = arith.mulf %655, %681 : vector<16x32xf32>
    %683 = vector.broadcast %680 : vector<1x32xf32> to vector<16x32xf32>
    %684 = arith.addf %682, %683 : vector<16x32xf32>
    %cst_223 = arith.constant 0.000000e+00 : f32
    %685 = vector.broadcast %cst_223 : f32 to vector<16x32xf32>
    %686 = arith.maximumf %684, %685 : vector<16x32xf32>
    %687 = arith.addf %533, %686 : vector<16x32xf32>
    %c12 = arith.constant 12 : index
    %c0_224 = arith.constant 0 : index
    %c0_225 = arith.constant 0 : index
    %688 = vector.load %arg4[%c12, %c0_224, %c0_225] : memref<15x64x32xf32, #tpu.memory_space<vmem>>, vector<1x64x32xf32>
    %689 = vector.shape_cast %688 : vector<1x64x32xf32> to vector<64x32xf32>
    %c12_226 = arith.constant 12 : index
    %c0_227 = arith.constant 0 : index
    %c0_228 = arith.constant 0 : index
    %690 = vector.load %arg5[%c12_226, %c0_227, %c0_228] : memref<15x1x16xf32, #tpu.memory_space<vmem>>, vector<1x1x16xf32>
    %691 = vector.shape_cast %690 : vector<1x1x16xf32> to vector<1x16xf32>
    %c12_229 = arith.constant 12 : index
    %c0_230 = arith.constant 0 : index
    %c0_231 = arith.constant 0 : index
    %692 = vector.load %arg6[%c12_229, %c0_230, %c0_231] : memref<15x1x16xf32, #tpu.memory_space<vmem>>, vector<1x1x16xf32>
    %693 = vector.shape_cast %692 : vector<1x1x16xf32> to vector<1x16xf32>
    %694 = vector.extract_strided_slice %687 {offsets = [0, 0], sizes = [16, 16], strides = [1, 1]} : vector<16x32xf32> to vector<16x16xf32>
    %695 = vector.extract_strided_slice %687 {offsets = [0, 16], sizes = [16, 16], strides = [1, 1]} : vector<16x32xf32> to vector<16x16xf32>
    %cst_232 = arith.constant 0.000000e+00 : f32
    %696 = vector.broadcast %cst_232 : f32 to vector<1x16xf32>
    %697 = vector.extract_strided_slice %695 {offsets = [0, 0], sizes = [15, 16], strides = [1, 1]} : vector<16x16xf32> to vector<15x16xf32>
    %698 = tpu.concatenate %696, %697 in 0 : vector<1x16xf32>, vector<15x16xf32> -> vector<16x16xf32>
    %699 = vector.broadcast %20 : vector<16x1xf32> to vector<16x16xf32>
    %700 = arith.mulf %698, %699 : vector<16x16xf32>
    %701 = vector.extract_strided_slice %694 {offsets = [1, 0], sizes = [15, 16], strides = [1, 1]} : vector<16x16xf32> to vector<15x16xf32>
    %cst_233 = arith.constant 0.000000e+00 : f32
    %702 = vector.broadcast %cst_233 : f32 to vector<1x16xf32>
    %703 = tpu.concatenate %701, %702 in 0 : vector<15x16xf32>, vector<1x16xf32> -> vector<16x16xf32>
    %704 = vector.broadcast %24 : vector<16x1xf32> to vector<16x16xf32>
    %705 = arith.mulf %703, %704 : vector<16x16xf32>
    %706 = tpu.concatenate %700, %687, %705 in 1 : vector<16x16xf32>, vector<16x32xf32>, vector<16x16xf32> -> vector<16x64xf32>
    %cst_234 = arith.constant dense<0.000000e+00> : vector<16x32xf32>
    %707 = tpu.matmul %706, %689, %cst_234 {dimension_numbers = #tpu.dot_dimension_numbers<[1], [0], [0], [1], [0, 0, 1, 1], [], []>, precision = #tpu.contract_precision<fp32>} : vector<16x64xf32>, vector<64x32xf32>, vector<16x32xf32> -> vector<16x32xf32>
    %cst_235 = arith.constant dense<0.000000e+00> : vector<32xf32>
    %708 = vector.multi_reduction <add>, %707, %cst_235 [0] : vector<16x32xf32> to vector<32xf32>
    %709 = vector.shape_cast %708 : vector<32xf32> to vector<1x32xf32>
    %710 = arith.mulf %707, %707 : vector<16x32xf32>
    %cst_236 = arith.constant dense<0.000000e+00> : vector<32xf32>
    %711 = vector.multi_reduction <add>, %710, %cst_236 [0] : vector<16x32xf32> to vector<32xf32>
    %712 = vector.shape_cast %711 : vector<32xf32> to vector<1x32xf32>
    %713 = vector.extract_strided_slice %709 {offsets = [0, 0], sizes = [1, 16], strides = [1, 1]} : vector<1x32xf32> to vector<1x16xf32>
    %714 = vector.extract_strided_slice %709 {offsets = [0, 16], sizes = [1, 16], strides = [1, 1]} : vector<1x32xf32> to vector<1x16xf32>
    %715 = arith.addf %713, %714 : vector<1x16xf32>
    %cst_237 = arith.constant 3.125000e-02 : f32
    %716 = vector.broadcast %cst_237 : f32 to vector<1x16xf32>
    %717 = arith.mulf %715, %716 : vector<1x16xf32>
    %718 = vector.extract_strided_slice %712 {offsets = [0, 0], sizes = [1, 16], strides = [1, 1]} : vector<1x32xf32> to vector<1x16xf32>
    %719 = vector.extract_strided_slice %712 {offsets = [0, 16], sizes = [1, 16], strides = [1, 1]} : vector<1x32xf32> to vector<1x16xf32>
    %720 = arith.addf %718, %719 : vector<1x16xf32>
    %cst_238 = arith.constant 3.125000e-02 : f32
    %721 = vector.broadcast %cst_238 : f32 to vector<1x16xf32>
    %722 = arith.mulf %720, %721 : vector<1x16xf32>
    %723 = arith.mulf %717, %717 : vector<1x16xf32>
    %724 = arith.subf %722, %723 : vector<1x16xf32>
    %cst_239 = arith.constant 9.99999974E-6 : f32
    %725 = vector.broadcast %cst_239 : f32 to vector<1x16xf32>
    %726 = arith.addf %724, %725 : vector<1x16xf32>
    %727 = math.rsqrt %726 : vector<1x16xf32>
    %728 = arith.mulf %691, %727 : vector<1x16xf32>
    %729 = arith.mulf %717, %728 : vector<1x16xf32>
    %730 = arith.subf %693, %729 : vector<1x16xf32>
    %731 = tpu.concatenate %728, %728 in 1 : vector<1x16xf32>, vector<1x16xf32> -> vector<1x32xf32>
    %732 = tpu.concatenate %730, %730 in 1 : vector<1x16xf32>, vector<1x16xf32> -> vector<1x32xf32>
    %733 = vector.broadcast %731 : vector<1x32xf32> to vector<16x32xf32>
    %734 = arith.mulf %707, %733 : vector<16x32xf32>
    %735 = vector.broadcast %732 : vector<1x32xf32> to vector<16x32xf32>
    %736 = arith.addf %734, %735 : vector<16x32xf32>
    %cst_240 = arith.constant 0.000000e+00 : f32
    %737 = vector.broadcast %cst_240 : f32 to vector<16x32xf32>
    %738 = arith.maximumf %736, %737 : vector<16x32xf32>
    %c13 = arith.constant 13 : index
    %c0_241 = arith.constant 0 : index
    %c0_242 = arith.constant 0 : index
    %739 = vector.load %arg4[%c13, %c0_241, %c0_242] : memref<15x64x32xf32, #tpu.memory_space<vmem>>, vector<1x64x32xf32>
    %740 = vector.shape_cast %739 : vector<1x64x32xf32> to vector<64x32xf32>
    %c13_243 = arith.constant 13 : index
    %c0_244 = arith.constant 0 : index
    %c0_245 = arith.constant 0 : index
    %741 = vector.load %arg5[%c13_243, %c0_244, %c0_245] : memref<15x1x16xf32, #tpu.memory_space<vmem>>, vector<1x1x16xf32>
    %742 = vector.shape_cast %741 : vector<1x1x16xf32> to vector<1x16xf32>
    %c13_246 = arith.constant 13 : index
    %c0_247 = arith.constant 0 : index
    %c0_248 = arith.constant 0 : index
    %743 = vector.load %arg6[%c13_246, %c0_247, %c0_248] : memref<15x1x16xf32, #tpu.memory_space<vmem>>, vector<1x1x16xf32>
    %744 = vector.shape_cast %743 : vector<1x1x16xf32> to vector<1x16xf32>
    %745 = vector.extract_strided_slice %738 {offsets = [0, 0], sizes = [16, 16], strides = [1, 1]} : vector<16x32xf32> to vector<16x16xf32>
    %746 = vector.extract_strided_slice %738 {offsets = [0, 16], sizes = [16, 16], strides = [1, 1]} : vector<16x32xf32> to vector<16x16xf32>
    %cst_249 = arith.constant 0.000000e+00 : f32
    %747 = vector.broadcast %cst_249 : f32 to vector<1x16xf32>
    %748 = vector.extract_strided_slice %746 {offsets = [0, 0], sizes = [15, 16], strides = [1, 1]} : vector<16x16xf32> to vector<15x16xf32>
    %749 = tpu.concatenate %747, %748 in 0 : vector<1x16xf32>, vector<15x16xf32> -> vector<16x16xf32>
    %750 = vector.broadcast %20 : vector<16x1xf32> to vector<16x16xf32>
    %751 = arith.mulf %749, %750 : vector<16x16xf32>
    %752 = vector.extract_strided_slice %745 {offsets = [1, 0], sizes = [15, 16], strides = [1, 1]} : vector<16x16xf32> to vector<15x16xf32>
    %cst_250 = arith.constant 0.000000e+00 : f32
    %753 = vector.broadcast %cst_250 : f32 to vector<1x16xf32>
    %754 = tpu.concatenate %752, %753 in 0 : vector<15x16xf32>, vector<1x16xf32> -> vector<16x16xf32>
    %755 = vector.broadcast %24 : vector<16x1xf32> to vector<16x16xf32>
    %756 = arith.mulf %754, %755 : vector<16x16xf32>
    %757 = tpu.concatenate %751, %738, %756 in 1 : vector<16x16xf32>, vector<16x32xf32>, vector<16x16xf32> -> vector<16x64xf32>
    %cst_251 = arith.constant dense<0.000000e+00> : vector<16x32xf32>
    %758 = tpu.matmul %757, %740, %cst_251 {dimension_numbers = #tpu.dot_dimension_numbers<[1], [0], [0], [1], [0, 0, 1, 1], [], []>, precision = #tpu.contract_precision<fp32>} : vector<16x64xf32>, vector<64x32xf32>, vector<16x32xf32> -> vector<16x32xf32>
    %cst_252 = arith.constant dense<0.000000e+00> : vector<32xf32>
    %759 = vector.multi_reduction <add>, %758, %cst_252 [0] : vector<16x32xf32> to vector<32xf32>
    %760 = vector.shape_cast %759 : vector<32xf32> to vector<1x32xf32>
    %761 = arith.mulf %758, %758 : vector<16x32xf32>
    %cst_253 = arith.constant dense<0.000000e+00> : vector<32xf32>
    %762 = vector.multi_reduction <add>, %761, %cst_253 [0] : vector<16x32xf32> to vector<32xf32>
    %763 = vector.shape_cast %762 : vector<32xf32> to vector<1x32xf32>
    %764 = vector.extract_strided_slice %760 {offsets = [0, 0], sizes = [1, 16], strides = [1, 1]} : vector<1x32xf32> to vector<1x16xf32>
    %765 = vector.extract_strided_slice %760 {offsets = [0, 16], sizes = [1, 16], strides = [1, 1]} : vector<1x32xf32> to vector<1x16xf32>
    %766 = arith.addf %764, %765 : vector<1x16xf32>
    %cst_254 = arith.constant 3.125000e-02 : f32
    %767 = vector.broadcast %cst_254 : f32 to vector<1x16xf32>
    %768 = arith.mulf %766, %767 : vector<1x16xf32>
    %769 = vector.extract_strided_slice %763 {offsets = [0, 0], sizes = [1, 16], strides = [1, 1]} : vector<1x32xf32> to vector<1x16xf32>
    %770 = vector.extract_strided_slice %763 {offsets = [0, 16], sizes = [1, 16], strides = [1, 1]} : vector<1x32xf32> to vector<1x16xf32>
    %771 = arith.addf %769, %770 : vector<1x16xf32>
    %cst_255 = arith.constant 3.125000e-02 : f32
    %772 = vector.broadcast %cst_255 : f32 to vector<1x16xf32>
    %773 = arith.mulf %771, %772 : vector<1x16xf32>
    %774 = arith.mulf %768, %768 : vector<1x16xf32>
    %775 = arith.subf %773, %774 : vector<1x16xf32>
    %cst_256 = arith.constant 9.99999974E-6 : f32
    %776 = vector.broadcast %cst_256 : f32 to vector<1x16xf32>
    %777 = arith.addf %775, %776 : vector<1x16xf32>
    %778 = math.rsqrt %777 : vector<1x16xf32>
    %779 = arith.mulf %742, %778 : vector<1x16xf32>
    %780 = arith.mulf %768, %779 : vector<1x16xf32>
    %781 = arith.subf %744, %780 : vector<1x16xf32>
    %782 = tpu.concatenate %779, %779 in 1 : vector<1x16xf32>, vector<1x16xf32> -> vector<1x32xf32>
    %783 = tpu.concatenate %781, %781 in 1 : vector<1x16xf32>, vector<1x16xf32> -> vector<1x32xf32>
    %784 = vector.broadcast %782 : vector<1x32xf32> to vector<16x32xf32>
    %785 = arith.mulf %758, %784 : vector<16x32xf32>
    %786 = vector.broadcast %783 : vector<1x32xf32> to vector<16x32xf32>
    %787 = arith.addf %785, %786 : vector<16x32xf32>
    %cst_257 = arith.constant 0.000000e+00 : f32
    %788 = vector.broadcast %cst_257 : f32 to vector<16x32xf32>
    %789 = arith.maximumf %787, %788 : vector<16x32xf32>
    %c14 = arith.constant 14 : index
    %c0_258 = arith.constant 0 : index
    %c0_259 = arith.constant 0 : index
    %790 = vector.load %arg4[%c14, %c0_258, %c0_259] : memref<15x64x32xf32, #tpu.memory_space<vmem>>, vector<1x64x32xf32>
    %791 = vector.shape_cast %790 : vector<1x64x32xf32> to vector<64x32xf32>
    %c14_260 = arith.constant 14 : index
    %c0_261 = arith.constant 0 : index
    %c0_262 = arith.constant 0 : index
    %792 = vector.load %arg5[%c14_260, %c0_261, %c0_262] : memref<15x1x16xf32, #tpu.memory_space<vmem>>, vector<1x1x16xf32>
    %793 = vector.shape_cast %792 : vector<1x1x16xf32> to vector<1x16xf32>
    %c14_263 = arith.constant 14 : index
    %c0_264 = arith.constant 0 : index
    %c0_265 = arith.constant 0 : index
    %794 = vector.load %arg6[%c14_263, %c0_264, %c0_265] : memref<15x1x16xf32, #tpu.memory_space<vmem>>, vector<1x1x16xf32>
    %795 = vector.shape_cast %794 : vector<1x1x16xf32> to vector<1x16xf32>
    %796 = vector.extract_strided_slice %789 {offsets = [0, 0], sizes = [16, 16], strides = [1, 1]} : vector<16x32xf32> to vector<16x16xf32>
    %797 = vector.extract_strided_slice %789 {offsets = [0, 16], sizes = [16, 16], strides = [1, 1]} : vector<16x32xf32> to vector<16x16xf32>
    %cst_266 = arith.constant 0.000000e+00 : f32
    %798 = vector.broadcast %cst_266 : f32 to vector<1x16xf32>
    %799 = vector.extract_strided_slice %797 {offsets = [0, 0], sizes = [15, 16], strides = [1, 1]} : vector<16x16xf32> to vector<15x16xf32>
    %800 = tpu.concatenate %798, %799 in 0 : vector<1x16xf32>, vector<15x16xf32> -> vector<16x16xf32>
    %801 = vector.broadcast %20 : vector<16x1xf32> to vector<16x16xf32>
    %802 = arith.mulf %800, %801 : vector<16x16xf32>
    %803 = vector.extract_strided_slice %796 {offsets = [1, 0], sizes = [15, 16], strides = [1, 1]} : vector<16x16xf32> to vector<15x16xf32>
    %cst_267 = arith.constant 0.000000e+00 : f32
    %804 = vector.broadcast %cst_267 : f32 to vector<1x16xf32>
    %805 = tpu.concatenate %803, %804 in 0 : vector<15x16xf32>, vector<1x16xf32> -> vector<16x16xf32>
    %806 = vector.broadcast %24 : vector<16x1xf32> to vector<16x16xf32>
    %807 = arith.mulf %805, %806 : vector<16x16xf32>
    %808 = tpu.concatenate %802, %789, %807 in 1 : vector<16x16xf32>, vector<16x32xf32>, vector<16x16xf32> -> vector<16x64xf32>
    %cst_268 = arith.constant dense<0.000000e+00> : vector<16x32xf32>
    %809 = tpu.matmul %808, %791, %cst_268 {dimension_numbers = #tpu.dot_dimension_numbers<[1], [0], [0], [1], [0, 0, 1, 1], [], []>, precision = #tpu.contract_precision<fp32>} : vector<16x64xf32>, vector<64x32xf32>, vector<16x32xf32> -> vector<16x32xf32>
    %cst_269 = arith.constant dense<0.000000e+00> : vector<32xf32>
    %810 = vector.multi_reduction <add>, %809, %cst_269 [0] : vector<16x32xf32> to vector<32xf32>
    %811 = vector.shape_cast %810 : vector<32xf32> to vector<1x32xf32>
    %812 = arith.mulf %809, %809 : vector<16x32xf32>
    %cst_270 = arith.constant dense<0.000000e+00> : vector<32xf32>
    %813 = vector.multi_reduction <add>, %812, %cst_270 [0] : vector<16x32xf32> to vector<32xf32>
    %814 = vector.shape_cast %813 : vector<32xf32> to vector<1x32xf32>
    %815 = vector.extract_strided_slice %811 {offsets = [0, 0], sizes = [1, 16], strides = [1, 1]} : vector<1x32xf32> to vector<1x16xf32>
    %816 = vector.extract_strided_slice %811 {offsets = [0, 16], sizes = [1, 16], strides = [1, 1]} : vector<1x32xf32> to vector<1x16xf32>
    %817 = arith.addf %815, %816 : vector<1x16xf32>
    %cst_271 = arith.constant 3.125000e-02 : f32
    %818 = vector.broadcast %cst_271 : f32 to vector<1x16xf32>
    %819 = arith.mulf %817, %818 : vector<1x16xf32>
    %820 = vector.extract_strided_slice %814 {offsets = [0, 0], sizes = [1, 16], strides = [1, 1]} : vector<1x32xf32> to vector<1x16xf32>
    %821 = vector.extract_strided_slice %814 {offsets = [0, 16], sizes = [1, 16], strides = [1, 1]} : vector<1x32xf32> to vector<1x16xf32>
    %822 = arith.addf %820, %821 : vector<1x16xf32>
    %cst_272 = arith.constant 3.125000e-02 : f32
    %823 = vector.broadcast %cst_272 : f32 to vector<1x16xf32>
    %824 = arith.mulf %822, %823 : vector<1x16xf32>
    %825 = arith.mulf %819, %819 : vector<1x16xf32>
    %826 = arith.subf %824, %825 : vector<1x16xf32>
    %cst_273 = arith.constant 9.99999974E-6 : f32
    %827 = vector.broadcast %cst_273 : f32 to vector<1x16xf32>
    %828 = arith.addf %826, %827 : vector<1x16xf32>
    %829 = math.rsqrt %828 : vector<1x16xf32>
    %830 = arith.mulf %793, %829 : vector<1x16xf32>
    %831 = arith.mulf %819, %830 : vector<1x16xf32>
    %832 = arith.subf %795, %831 : vector<1x16xf32>
    %833 = tpu.concatenate %830, %830 in 1 : vector<1x16xf32>, vector<1x16xf32> -> vector<1x32xf32>
    %834 = tpu.concatenate %832, %832 in 1 : vector<1x16xf32>, vector<1x16xf32> -> vector<1x32xf32>
    %835 = vector.broadcast %833 : vector<1x32xf32> to vector<16x32xf32>
    %836 = arith.mulf %809, %835 : vector<16x32xf32>
    %837 = vector.broadcast %834 : vector<1x32xf32> to vector<16x32xf32>
    %838 = arith.addf %836, %837 : vector<16x32xf32>
    %cst_274 = arith.constant 0.000000e+00 : f32
    %839 = vector.broadcast %cst_274 : f32 to vector<16x32xf32>
    %840 = arith.maximumf %838, %839 : vector<16x32xf32>
    %841 = arith.addf %687, %840 : vector<16x32xf32>
    %c0_275 = arith.constant 0 : index
    %c0_276 = arith.constant 0 : index
    %842 = vector.load %arg7[%c0_275, %c0_276] : memref<16x32xf32, #tpu.memory_space<vmem>>, vector<16x32xf32>
    tpu.vector_store %arg7[%c0_275, %c0_276], %841 {strides = array<i32>} : memref<16x32xf32, #tpu.memory_space<vmem>>, vector<16x32xf32>,
    return
  }
}

</mosaic_0001>

<bundles_post_ra>
// kernel: tpu_custom_call.1
= control target key start
LH: loop header
LB: loop body
LE: loop exit
PB: predicated region body
PF: predicated region fallthrough
CT: control target
= control target key end

     0   :  { %v18_v0 = vlaneseq  ;;  %s125_s0 = inlined_call_operand.vmem [shape: f32[16,4], index: 0, kind: input, shape index: {}]   ;;  %s126_s1 = inlined_call_operand.vmem [shape: f32[16,16], index: 1, kind: input, shape index: {}]   ;;  %s127_s2 = inlined_call_operand.vmem [shape: f32[16,4], index: 2, kind: output, shape index: {0}]   ;;  %s128_s3 = inlined_call_operand.hbm [shape: f32[16,16], index: 3, kind: output, shape index: {1}]  }
   0x1   :  { %v26_v1 = vld [vmem:[%s126_s1] sm:$0xff]  ;;  %v27_v2 = vld [vmem:[%s126_s1 + $0x8] sm:$0xff] }
   0x2   :  { %v14_v3 = vld [vmem:[%s125_s0] sm:$0xff]  ;;  %v28_v4 = vrot.slane %v26_v1, 1  ;;  %v29_v5 = vrot.slane %v27_v2, 1  ;;  %v15_v6 = vld [vmem:[%s125_s0 + $0x8] sm:$0xff] }
   0x3   :  { %v16_v7 = vrot.slane %v14_v3, 7 }
   0x4   :  { %9 = vsyncpa [#allocation3], 0  ;;  %v19_v8 = vshrl.u32 %v18_v0, 7  ;;  %v17_v9 = vrot.slane %v15_v6, 7  ;;  %s81_s20 = smov [#allocation2]   ;;  %vm33_vm0 = vcmask 130048  }
   0x5   :  { %s43_s21 = sshll.u32 %s81_s20, 4  ;;  %vm23_vm1 = vcmask 31744   ;;  %s44_s21 = int_to_ptr.vmem [resolvable:$true] %s43_s21 }
   0x6   :  { %vm30_vm2 = vcmp.lt.s32.totalorder %v19_v8, 7  ;;  %vm20_vm3 = vcmp.lt.s32.totalorder %v19_v8, 1  ;;  %s59_s24 = scalar_lea.vmem %s44_s21, 256  ;;  %p64_p1 = scmp.lt.s32.totalorder %s44_s21, %s44_s21 }
   0x7   :  { %v31_v10 = vsel %vm30_vm2, %v28_v4, %v29_v5  ;;  %v32_v11 = vsel %vm30_vm2, %v29_v5, %v28_v4  ;;  %v22_v12 = vsel %vm20_vm3, %v17_v9, %v16_v7  ;;  %v21_v13 = vsel %vm20_vm3, %v16_v7, %v17_v9  ;;  %p60_p0 = scmp.ne.s32.totalorder %s44_s21, %s59_s24  ;;  %p65_p2 = scmp.lt.s32.totalorder %s59_s24, %s59_s24 }
   0x8   :  { %34 = vst.msk [vmem:[#allocation2] sm:$0xff] %vm33_vm0, %v31_v10  ;;  %35 = vst.msk [vmem:[#allocation2 + $0x8] sm:$0xff] %vm33_vm0, %v32_v11 }
   0x9   :  { %24 = vst.msk [vmem:[%s127_s2] sm:$0xff] %vm23_vm1, %v22_v12  ;;  %25 = vst.msk [vmem:[%s127_s2 + $0x8] sm:$0xff] %vm23_vm1, %v21_v13  ;;  %p66_p3 = por %p65_p2, %p64_p1 }
   0xb   :  { %p67_p4 = pnand %p66_p3, %p60_p0 }
   0xd   :  { %70 = shalt.err (!%p67_p4)
}
   0xe   :  { %s82_s25 = smov 128   ;;  %s83_s26 = smov 8  }
   0xf   :  { %49 = dma.vmem_to_hbm [thread:$0]  %s44_s21, 256, %s128_s3, [#allocation3], %s82_s25, %s82_s25, %s83_s26  }
  0x10   :  { %79 = dma.done.wait [#allocation3], 256  }
  0x11   :  { %80 = vsyncadd [#allocation3], 4294967040 }
  0x12   :  { %55 = vsyncpa [#allocation3], 1 }

// kernel: gen_layer_forward.1
= control target key start
LH: loop header
LB: loop body
LE: loop exit
PB: predicated region body
PF: predicated region fallthrough
CT: control target
= control target key end

     0   :  { %v26_v0 = vlaneseq  ;;  %vm69_vm0 = vcmask 1040384   ;;  %vm78_vm1 = vcmask 1046528   ;;  %vm118_vm2 = vcmask 1043456   ;;  %s14224_s8 = smov 8   ;;  %s14225_s9 = smov 112   ;;  %s18181_s0 = inlined_call_operand.vmem [shape: f32[16,4], index: 0, kind: input, shape index: {}]   ;;  %s18182_s1 = inlined_call_operand.vmem [shape: f32[12,32], index: 1, kind: input, shape index: {}]   ;;  %s18183_s2 = inlined_call_operand.vmem [shape: f32[1,16], index: 2, kind: input, shape index: {}]   ;;  %s18184_s3 = inlined_call_operand.vmem [shape: f32[1,16], index: 3, kind: input, shape index: {}]   ;;  %s18185_s4 = inlined_call_operand.vmem [shape: f32[15,64,32], index: 4, kind: input, shape index: {}]   ;;  %s18186_s5 = inlined_call_operand.vmem [shape: f32[15,1,16], index: 5, kind: input, shape index: {}]   ;;  %s18187_s6 = inlined_call_operand.vmem [shape: f32[15,1,16], index: 6, kind: input, shape index: {}]   ;;  %s18188_s7 = inlined_call_operand.vmem [shape: f32[16,32], index: 7, kind: output, shape index: {}]  }
   0x1   :  { %v14271_v1 = vld [vmem:[%s18181_s0] sm:$0xff]  ;;  %v14276_v2 = vld [vmem:[%s18181_s0 + $0x8] sm:$0xff]  ;;  %v14222_v18 = vmov 0.0   ;;  %vm103_vm7 = vcmask 31744   ;;  %vm106_vm8 = vcmask 64512   ;;  %vm111_vm9 = vcmask 97280  }
   0x2   :  { %v14278_v3 = vshrl.u32 %v26_v0, 7  ;;  %v70_v4 = vrot.slane %v14271_v1, 7  ;;  %v79_v5 = vrot.slane %v14271_v1, 1  ;;  %v80_v6 = vrot.slane %v14276_v2, 1  ;;  %v110_v7 = vld [vmem:[%s18182_s1 + $0x8] sm:$0xf] }
   0x3   :  { %v71_v8 = vrot.slane %v14276_v2, 7  ;;  %v120_v9 = vsel %vm118_vm2, %v110_v7, 0  ;;  %v109_v10 = vld [vmem:[%s18182_s1] sm:$0xff]  ;;  %s14223_s1 = smov 4   ;;  %vm626_vm10 = vcmask 261120   ;;  %s14226_s14 = smov 16  }
   0x4   :  { %v33_v11 = vand.u32 7, %v14278_v3  ;;  %v75_v12 = vsel %vm69_vm0, 0.0, %v70_v4  ;;  %v81_v13 = vsel %vm78_vm1, %v79_v5, %v80_v6  ;;  %v28_v14 = vadd.s32 8, %v14278_v3  ;;  %s14227_s29 = smov 48  }
   0x5   :  { %v14294_v15 = vand.u32 4294901760, %v120_v9  ;;  %v72_v16 = vsel %vm69_vm0, %v70_v4, %v71_v8  ;;  %v14297_v17 = vand.u32 4294901760, %v109_v10  ;;  %v84_v25 = vsel %vm78_vm1, %v80_v6, 0.0 }
   0x6   :  { %vm53_vm3 = vcmp.ne.s32.totalorder %v33_v11, 0  ;;  %vm59_vm4 = vcmp.ne.s32.totalorder %v33_v11, 7  ;;  %v40_v21 = vand.u32 7, %v28_v14  ;;  %vm674_vm11 = vcmask 130048  }
   0x7   :  { %v14299_v19 = vsel %vm53_vm3, 1.0, %v14222_v18  ;;  %v14301_v20 = vsel %vm59_vm4, 1.0, %v14222_v18  ;;  %v14304_v22 = vsub.f32 %v120_v9, %v14294_v15  ;;  %12432 = vmatprep.subr.mxu0 %v14294_v15  ;;  %v14311_v26 = vsub.f32 %v109_v10, %v14297_v17 }
   0x8   :  { %v76_v23 = vmul.f32 %v14299_v19, %v75_v12  ;;  %v85_v24 = vmul.f32 %v14301_v20, %v81_v13  ;;  %12433 = vmatpush3.msra.mxu0 %v14294_v15  ;;  %vm54_vm5 = vcmp.ne.s32.totalorder %v40_v21, 0  ;;  %vm60_vm6 = vcmp.ne.s32.totalorder %v40_v21, 7 }
   0x9   :  { %v14315_v27 = vand.u32 4294901760, %v14304_v22  ;;  %12434 = vmatprep.subr.mxu0 %v14297_v17  ;;  %v14318_v28 = vsel %vm54_vm5, 1.0, %v14222_v18  ;;  %v14320_v29 = vsel %vm60_vm6, 1.0, %v14222_v18  ;;  %v247_v30 = vand.u32 4294901760, %v14311_v26 }
   0xa   :  { %89 = vrot.lane.b32.xlu0 %v76_v23, %s14223_s1  ;;  %97 = vrot.lane.b32.xlu1 %v85_v24, %s14224_s8  ;;  %v77_v31 = vmul.f32 %v14318_v28, %v72_v16  ;;  %v86_v32 = vmul.f32 %v14320_v29, %v84_v25  ;;  %vm747_vm12 = vcmask 392192   ;;  %vm750_vm13 = vcmask 523264  }
   0xb   :  { %v241_v33 = vsub.f32 %v14304_v22, %v14315_v27  ;;  %12435 = vmatpush3.msra.mxu0 %v14297_v17  ;;  %v248_v34 = vsub.f32 %v14311_v26, %v247_v30 }
   0xc   :  { %12446 = vmatprep.subr.mxu0 %v14304_v22 }
   0xd   :  { %v242_v35 = vand.u32 4294901760, %v241_v33  ;;  %v249_v36 = vand.u32 4294901760, %v248_v34 }
   0xe   :  { %91 = vrot.lane.b32.xlu0 %v77_v31, %s14223_s1  ;;  %99 = vrot.lane.b32.xlu1 %v86_v32, %s14224_s8 }
   0xf   :  { %12439 = vmatprep.subr.mxu1 %v242_v35 }
  0x10   :  { %12440 = vmatpush3.msra.mxu1 %v242_v35 }
  0x11   :  { %12441 = vmatprep.subr.mxu1 %v249_v36 }
  0x12   :  { %12442 = vmatpush3.msra.mxu1 %v249_v36 }
  0x13   :  { %12453 = vmatprep.subr.mxu1 %v14294_v15 }
  0x7c   :  { %v90_v37 = vpop.permute.xlu0 %89  ;;  %v98_v38 = vpop.permute.xlu1 %97 }
  0x7d   :  { %v104_v39 = vsel %vm103_vm7, %v14271_v1, %v90_v37 }
  0x7e   :  { %v107_v40 = vsel %vm106_vm8, %v104_v39, %v98_v38 }
  0x7f   :  { %v113_v41 = vsel %vm111_vm9, %v107_v40, 0 }
  0x80   :  { %v189_v42 = vand.u32 4294901760, %v113_v41  ;;  %v92_v43 = vpop.permute.xlu0 %91  ;;  %v100_v44 = vpop.permute.xlu1 %99 }
  0x81   :  { %v105_v45 = vsel %vm103_vm7, %v14276_v2, %v92_v43 }
  0x82   :  { %v190_v46 = vsub.f32 %v113_v41, %v189_v42  ;;  %v108_v47 = vsel %vm106_vm8, %v105_v45, %v100_v44  ;;  %12443 = vmatprep.mubr.f32.mxu1 %v189_v42 }
  0x83   :  { %v116_v48 = vsel %vm111_vm9, %v108_v47, 0 }
  0x84   :  { %v199_v49 = vand.u32 4294901760, %v116_v48  ;;  %v191_v50 = vand.u32 4294901760, %v190_v46 }
  0x86   :  { %v200_v51 = vsub.f32 %v116_v48, %v199_v49  ;;  %12444 = vmatmul.mubr.f32.vlgmr.msra.gmra.mxu1 %v199_v49  ;;  %v192_v52 = vsub.f32 %v190_v46, %v191_v50 }
  0x87   :  { %12454 = vmatpush3.msra.mxu1 %v14294_v15  ;;  %12457 = vmatprep.mubr.f32.mxu1 %v191_v50  ;;  %v14365_v50 = vsub.s32 0, %v14278_v3 }
  0x88   :  { %12455 = vmatprep.subr.mxu1 %v14297_v17  ;;  %v193_v53 = vand.u32 4294901760, %v192_v52  ;;  %v201_v54 = vand.u32 4294901760, %v200_v51 }
  0x89   :  { %12456 = vmatpush3.msra.mxu1 %v14297_v17 }
  0x8a   :  { %12436 = vmatprep.mubr.f32.mxu0 %v193_v53  ;;  %12458 = vmatmul.mubr.f32.vlgmr.msra.gmra.mxu1 %v201_v54  ;;  %v202_v55 = vsub.f32 %v200_v51, %v201_v54  ;;  %v625_v53 = vld [vmem:[%s18184_s3] sm:$0x1] }
  0x8b   :  { %12467 = vmatprep.subr.mxu1 %v14294_v15  ;;  %12471 = vmatprep.mubr.f32.mxu1 %v189_v42 }
  0x8c   :  { %12468 = vmatpush3.msra.mxu1 %v14294_v15  ;;  %v203_v56 = vand.u32 4294901760, %v202_v55 }
  0x8d   :  { %12469 = vmatprep.subr.mxu1 %v14297_v17 }
  0x8e   :  { %12470 = vmatpush3.msra.mxu1 %v14297_v17  ;;  %12437 = vmatmul.mubr.f32.vlgmr.msra.gmra.mxu0 %v203_v56 }
  0x8f   :  { %12447 = vmatpush3.msra.mxu0 %v14304_v22  ;;  %12472 = vmatmul.mubr.f32.vlgmr.msra.gmra.mxu1 %v199_v49 }
  0x90   :  { %12448 = vmatprep.subr.mxu0 %v14311_v26  ;;  %12450 = vmatprep.mubr.f32.mxu0 %v190_v46 }
  0x91   :  { %12449 = vmatpush3.msra.mxu0 %v14311_v26 }
  0x92   :  { %12460 = vmatprep.subr.mxu0 %v14315_v27  ;;  %12451 = vmatmul.mubr.f32.vlgmr.msra.gmra.mxu0 %v200_v51 }
  0x93   :  { %12461 = vmatpush3.msra.mxu0 %v14315_v27  ;;  %12464 = vmatprep.mubr.f32.mxu0 %v189_v42 }
  0x94   :  { %12462 = vmatprep.subr.mxu0 %v247_v30 }
  0x95   :  { %12463 = vmatpush3.msra.mxu0 %v247_v30 }
  0x96   :  { %12465 = vmatmul.mubr.f32.vlgmr.msra.gmra.mxu0 %v199_v49  ;;  %v624_v49 = vld [vmem:[%s18183_s2] sm:$0x1] }
 0x146   :  { %v12445_v57 = vpop.f32.mrf.mxu1 }
 0x148   :  { %v286_v58 = vpop.f32.mrf.mxu1 }
 0x14a   :  { %v12459_v59 = vpop.f32.mrf.mxu1 }
 0x14c   :  { %v450_v63 = vpop.f32.mrf.mxu1 }
 0x14e   :  { %v12438_v60 = vpop.f32.mrf.mxu0 }
 0x14f   :  { %v293_v62 = vadd.f32 %v12445_v57, %v12438_v60  ;;  %v12473_v7 = vpop.f32.mrf.mxu1  ;;  %v706_v57 = vld [vmem:[%s18185_s4 + $0x38] sm:$0xff] }
 0x150   :  { %v195_v61 = vpop.f32.mrf.mxu0 }
 0x151   :  { %v287_v1 = vadd.f32 %v286_v58, %v195_v61  ;;  %v614_v14 = vpop.f32.mrf.mxu1  ;;  %v705_v58 = vld [vmem:[%s18185_s4 + $0x30] sm:$0xff] }
 0x152   :  { %v12452_v0 = vpop.f32.mrf.mxu0  ;;  %v14389_v60 = vand.u32 4294901760, %v705_v58 }
 0x153   :  { %v376_v2 = vadd.f32 %v12452_v0, %v293_v62 }
 0x154   :  { %v368_v4 = vpop.f32.mrf.mxu0  ;;  %v14395_v62 = vsub.f32 %v705_v58, %v14389_v60 }
 0x155   :  { %v369_v5 = vadd.f32 %v368_v4, %v287_v1  ;;  %v459_v6 = vadd.f32 %v12459_v59, %v376_v2  ;;  %v14387_v59 = vand.u32 4294901760, %v706_v57 }
 0x156   :  { %v12466_v8 = vpop.f32.mrf.mxu0  ;;  %v14403_v0 = vand.u32 4294901760, %v14395_v62 }
 0x157   :  { %v542_v9 = vadd.f32 %v12466_v8, %v459_v6  ;;  %v451_v10 = vadd.f32 %v450_v63, %v369_v5  ;;  %v14392_v61 = vsub.f32 %v706_v57, %v14387_v59  ;;  %12474 = vmatprep.subr.mxu0 %v14387_v59  ;;  %v704_v6 = vld [vmem:[%s18185_s4 + $0x28] sm:$0xff]  ;;  %v703_v8 = vld [vmem:[%s18185_s4 + $0x20] sm:$0xff] }
 0x158   :  { %v535_v11 = vpop.f32.mrf.mxu0  ;;  %12475 = vmatpush3.msra.mxu0 %v14387_v59  ;;  %v877_v2 = vsub.f32 %v14395_v62, %v14403_v0 }
 0x159   :  { %v14345_v12 = vadd.f32 %v12473_v7, %v542_v9  ;;  %v536_v13 = vadd.f32 %v535_v11, %v451_v10  ;;  %v14400_v63 = vand.u32 4294901760, %v14392_v61  ;;  %12476 = vmatprep.subr.mxu0 %v14389_v60  ;;  %v14414_v7 = vand.u32 4294901760, %v704_v6  ;;  %v702_v11 = vld [vmem:[%s18185_s4 + $0x18] sm:$0xff] }
 0x15a   :  { %12477 = vmatpush3.msra.mxu0 %v14389_v60  ;;  %v878_v5 = vand.u32 4294901760, %v877_v2  ;;  %v14422_v10 = vand.u32 4294901760, %v703_v8 }
 0x15b   :  { %v637_v15 = vmul.f32 %v14345_v12, %v14345_v12  ;;  %v14349_v16 = vadd.f32 %v614_v14, %v536_v13  ;;  %v628_v17 = vsel %vm626_vm10, %v14345_v12, 0.0  ;;  %v870_v1 = vsub.f32 %v14392_v61, %v14400_v63  ;;  %12478 = vmatprep.subr.mxu0 %v14414_v7 }
 0x15c   :  { %v14420_v9 = vsub.f32 %v704_v6, %v14414_v7  ;;  %12479 = vmatpush3.msra.mxu0 %v14414_v7  ;;  %v14433_v14 = vsub.f32 %v703_v8, %v14422_v10 }
 0x15d   :  { %v627_v18 = vsel %vm626_vm10, %v14349_v16, 0.0  ;;  %v636_v21 = vmul.f32 %v14349_v16, %v14349_v16  ;;  %v639_v23 = vsel %vm626_vm10, %v637_v15, 0.0  ;;  %v871_v4 = vand.u32 4294901760, %v870_v1  ;;  %12480 = vmatprep.subr.mxu0 %v14422_v10 }
 0x15e   :  { %v629_v22 = vadd.f32 %v628_v17, %v627_v18  ;;  %v14430_v13 = vand.u32 4294901760, %v14420_v9  ;;  %v14435_v15 = vand.u32 4294901760, %v702_v11  ;;  %v701_v17 = vld [vmem:[%s18185_s4 + $0x10] sm:$0xff]  ;;  %12481 = vmatpush3.msra.mxu0 %v14422_v10 }
 0x15f   :  { %v638_v24 = vsel %vm626_vm10, %v636_v21, 0.0  ;;  %12493 = vmatprep.subr.mxu1 %v871_v4  ;;  %v14445_v21 = vand.u32 4294901760, %v14433_v14 }
 0x160   :  { %v630_v25 = vrot.slane %v629_v22, 4  ;;  %v640_v26 = vadd.f32 %v639_v23, %v638_v24  ;;  %12494 = vmatpush3.msra.mxu1 %v871_v4  ;;  %v884_v18 = vsub.f32 %v14420_v9, %v14430_v13  ;;  %v14450_v23 = vand.u32 4294901760, %v701_v17  ;;  %12482 = vmatprep.subr.mxu0 %v14435_v15  ;;  %v700_v24 = vld [vmem:[%s18185_s4 + $0x8] sm:$0xff] }
 0x161   :  { %12495 = vmatprep.subr.mxu1 %v878_v5  ;;  %12483 = vmatpush3.msra.mxu0 %v14435_v15 }
 0x162   :  { %v631_v27 = vadd.f32 %v630_v25, %v629_v22  ;;  %v641_v30 = vrot.slane %v640_v26, 4  ;;  %12496 = vmatpush3.msra.mxu1 %v878_v5  ;;  %v14448_v22 = vsub.f32 %v702_v11, %v14435_v15  ;;  %v885_v25 = vand.u32 4294901760, %v884_v18  ;;  %12484 = vmatprep.subr.mxu0 %v14450_v23 }
 0x163   :  { %12485 = vmatpush3.msra.mxu0 %v14450_v23 }
 0x164   :  { %v632_v31 = vrot.slane %v631_v27, 2  ;;  %v642_v32 = vadd.f32 %v641_v30, %v640_v26  ;;  %v891_v26 = vsub.f32 %v14433_v14, %v14445_v21  ;;  %v14463_v30 = vsub.f32 %v701_v17, %v14450_v23  ;;  %12497 = vmatprep.subr.mxu1 %v885_v25 }
 0x165   :  { %12498 = vmatpush3.msra.mxu1 %v885_v25 }
 0x166   :  { %v633_v33 = vadd.f32 %v632_v31, %v631_v27  ;;  %v643_v34 = vrot.slane %v642_v32, 2  ;;  %v14460_v27 = vand.u32 4294901760, %v14448_v22  ;;  %v14466_v31 = vand.u32 4294901760, %v700_v24 }
 0x168   :  { %v634_v35 = vrot.slane %v633_v33, 1  ;;  %v644_v36 = vadd.f32 %v643_v34, %v642_v32  ;;  %v699_v32 = vld [vmem:[%s18185_s4] sm:$0xff]  ;;  %v892_v34 = vand.u32 4294901760, %v891_v26  ;;  %12486 = vmatprep.subr.mxu0 %v14466_v31 }
 0x169   :  { %12487 = vmatpush3.msra.mxu0 %v14466_v31 }
 0x16a   :  { %v635_v37 = vadd.f32 %v634_v35, %v633_v33  ;;  %v645_v38 = vrot.slane %v644_v36, 1  ;;  %v898_v35 = vsub.f32 %v14448_v22, %v14460_v27  ;;  %12499 = vmatprep.subr.mxu1 %v892_v34 }
 0x16b   :  { %12500 = vmatpush3.msra.mxu1 %v892_v34 }
 0x16c   :  { %648 = vrot.lane.b32.xlu0 %v635_v37, %s14225_s9  ;;  %v646_v39 = vadd.f32 %v645_v38, %v644_v36  ;;  %v14475_v36 = vand.u32 4294901760, %v14463_v30 }
 0x16e   :  { %654 = vrot.lane.b32.xlu1 %v646_v39, %s14225_s9 }
 0x1de   :  { %v649_v40 = vpop.permute.xlu0 %648 }
 0x1df   :  { %v651_v41 = vadd.f32 %v649_v40, %v635_v37  ;;  %v14477_v37 = vand.u32 4294901760, %v699_v32 }
 0x1e0   :  { %v655_v42 = vpop.permute.xlu1 %654 }
 0x1e1   :  { %v652_v43 = vmul.f32 0.03125, %v651_v41  ;;  %v657_v44 = vadd.f32 %v655_v42, %v646_v39  ;;  %v14482_v39 = vsub.f32 %v700_v24, %v14466_v31  ;;  %v899_v41 = vand.u32 4294901760, %v898_v35  ;;  %12488 = vmatprep.subr.mxu0 %v14477_v37 }
 0x1e2   :  { %v905_v42 = vsub.f32 %v14463_v30, %v14475_v36  ;;  %12489 = vmatpush3.msra.mxu0 %v14477_v37 }
 0x1e3   :  { %v659_v45 = vmul.f32 %v652_v43, %v652_v43  ;;  %v658_v46 = vmul.f32 0.03125, %v657_v44  ;;  %v14493_v44 = vand.u32 4294901760, %v14482_v39  ;;  %12501 = vmatprep.subr.mxu1 %v899_v41  ;;  %12512 = vmatprep.subr.mxu0 %v14392_v61 }
 0x1e4   :  { %12502 = vmatpush3.msra.mxu1 %v899_v41 }
 0x1e5   :  { %v660_v47 = vsub.f32 %v658_v46, %v659_v45  ;;  %v906_v46 = vand.u32 4294901760, %v905_v42 }
 0x1e7   :  { %v661_v48 = vadd.f32 1e-05, %v660_v47  ;;  %12503 = vmatprep.subr.mxu1 %v906_v46 }
 0x1e8   :  { %12504 = vmatpush3.msra.mxu1 %v906_v46 }
 0x1e9   :  { %14190 = vrsqrt.f32 %v661_v48 }
 0x1f6   :  { %v14191_v51 = vpop.eup %14190 }
 0x1f7   :  { %v14367_v52 = vmul.f32 %v14191_v51, %v624_v49  ;;  %v912_v49 = vsub.f32 %v14482_v39, %v14493_v44 }
 0x1f9   :  { %v670_v54 = vrot.slane %v14367_v52, %v14365_v50  ;;  %v664_v55 = vmul.f32 %v14367_v52, %v652_v43  ;;  %v14489_v43 = vsub.f32 %v699_v32, %v14477_v37 }
 0x1fb   :  { %671 = vrot.lane.b32.xlu0 %v670_v54, %s14226_s14  ;;  %v14376_v56 = vsub.f32 %v625_v53, %v664_v55  ;;  %v14497_v47 = vand.u32 4294901760, %v14489_v43  ;;  %v913_v55 = vand.u32 4294901760, %v912_v49 }
 0x1fd   :  { %v680_v3 = vrot.slane %v14376_v56, %v14365_v50  ;;  %v919_v54 = vsub.f32 %v14489_v43, %v14497_v47  ;;  %12505 = vmatprep.subr.mxu1 %v913_v55 }
 0x1fe   :  { %12506 = vmatpush3.msra.mxu1 %v913_v55 }
 0x1ff   :  { %681 = vrot.lane.b32.xlu1 %v680_v3, %s14226_s14  ;;  %v920_v57 = vand.u32 4294901760, %v919_v54 }
 0x201   :  { %12507 = vmatprep.subr.mxu1 %v920_v57 }
 0x202   :  { %12508 = vmatpush3.msra.mxu1 %v920_v57 }
 0x203   :  { %12531 = vmatprep.subr.mxu1 %v14387_v59 }
 0x26d   :  { %v672_v33 = vpop.permute.xlu0 %671 }
 0x26e   :  { %v675_v38 = vsel %vm674_vm11, %v14367_v52, %v672_v33 }
 0x26f   :  { %v688_v40 = vrot.slane %v675_v38, %v14365_v50 }
 0x271   :  { %v682_v45 = vpop.permute.xlu1 %681  ;;  %v689_v51 = vmul.f32 %v688_v40, %v14349_v16  ;;  %v690_v52 = vmul.f32 %v688_v40, %v14345_v12 }
 0x272   :  { %v684_v48 = vsel %vm674_vm11, %v14376_v56, %v682_v45 }
 0x273   :  { %v694_v53 = vrot.slane %v684_v48, %v14365_v50 }
 0x275   :  { %v695_v3 = vadd.f32 %v694_v53, %v689_v51  ;;  %v696_v56 = vadd.f32 %v694_v53, %v690_v52 }
 0x277   :  { %v14510_v58 = vmax.f32 %v695_v3, 0.0  ;;  %v14512_v1 = vmax.f32 %v696_v56, 0.0 }
 0x279   :  { %733 = vrot.lane.b32.xlu1 %v14512_v1, %s14226_s14  ;;  %731 = vrot.lane.b32.xlu0 %v14510_v58, %s14226_s14  ;;  %v711_v12 = vrot.slane %v14510_v58, 7  ;;  %v712_v16 = vrot.slane %v14512_v1, 7  ;;  %v723_v2 = vrot.slane %v14510_v58, 1  ;;  %v724_v4 = vrot.slane %v14512_v1, 1 }
 0x27b   :  { %v713_v5 = vsel %vm69_vm0, %v711_v12, %v712_v16  ;;  %v725_v6 = vsel %vm78_vm1, %v723_v2, %v724_v4  ;;  %v728_v8 = vsel %vm78_vm1, %v724_v4, 0.0 }
 0x27c   :  { %v729_v11 = vmul.f32 %v14301_v20, %v725_v6  ;;  %v730_v17 = vmul.f32 %v14320_v29, %v728_v8 }
 0x27d   :  { %714 = vrot.lane.b32.xlu0 %v711_v12, %s14225_s9  ;;  %716 = vrot.lane.b32.xlu1 %v713_v5, %s14225_s9 }
 0x281   :  { %739 = vrot.lane.b32.xlu0 %v729_v11, %s14227_s29  ;;  %741 = vrot.lane.b32.xlu1 %v730_v17, %s14227_s29 }
 0x2eb   :  { %v734_v18 = vpop.permute.xlu1 %733  ;;  %v732_v24 = vpop.permute.xlu0 %731 }
 0x2ef   :  { %v715_v25 = vpop.permute.xlu0 %714  ;;  %v717_v26 = vpop.permute.xlu1 %716 }
 0x2f0   :  { %v720_v32 = vsel %vm69_vm0, 0.0, %v715_v25  ;;  %v722_v33 = vmul.f32 %v14318_v28, %v717_v26 }
 0x2f1   :  { %v721_v34 = vmul.f32 %v14299_v19, %v720_v32 }
 0x2f2   :  { %v746_v35 = vsel %vm674_vm11, %v722_v33, %v734_v18 }
 0x2f3   :  { %v745_v38 = vsel %vm674_vm11, %v721_v34, %v732_v24  ;;  %v740_v40 = vpop.permute.xlu0 %739  ;;  %v742_v41 = vpop.permute.xlu1 %741 }
 0x2f4   :  { %v748_v42 = vsel %vm747_vm12, %v745_v38, %v740_v40  ;;  %v749_v45 = vsel %vm747_vm12, %v746_v35, %v742_v41 }
 0x2f5   :  { %v752_v46 = vsel %vm750_vm13, %v748_v42, 0  ;;  %v755_v48 = vsel %vm750_vm13, %v749_v45, 0 }
 0x2f6   :  { %v830_v49 = vand.u32 4294901760, %v752_v46  ;;  %v14541_v51 = vand.u32 4294901760, %v755_v48 }
 0x2f8   :  { %v831_v52 = vsub.f32 %v752_v46, %v830_v49  ;;  %v841_v53 = vsub.f32 %v755_v48, %v14541_v51  ;;  %12509 = vmatprep.mubr.f32.mxu1 %v830_v49 }
 0x2f9   :  { %12510 = vmatmul.mubr.f32.vlgmr.msra.gmra.mxu1 %v14541_v51 }
 0x2fa   :  { %v842_v54 = vand.u32 4294901760, %v841_v53  ;;  %12532 = vmatpush3.msra.mxu1 %v14387_v59  ;;  %v832_v55 = vand.u32 4294901760, %v831_v52 }
 0x2fb   :  { %12533 = vmatprep.subr.mxu1 %v14389_v60 }
 0x2fc   :  { %12534 = vmatpush3.msra.mxu1 %v14389_v60  ;;  %12547 = vmatprep.mubr.f32.mxu1 %v832_v55  ;;  %v833_v3 = vsub.f32 %v831_v52, %v832_v55  ;;  %v843_v56 = vsub.f32 %v841_v53, %v842_v54 }
 0x2fd   :  { %12535 = vmatprep.subr.mxu1 %v14414_v7 }
 0x2fe   :  { %12536 = vmatpush3.msra.mxu1 %v14414_v7  ;;  %v834_v57 = vand.u32 4294901760, %v833_v3  ;;  %v844_v12 = vand.u32 4294901760, %v843_v56  ;;  %v708_v56 = vld [vmem:[%s18187_s6] sm:$0x1] }
 0x2ff   :  { %12537 = vmatprep.subr.mxu1 %v14422_v10 }
 0x300   :  { %12538 = vmatpush3.msra.mxu1 %v14422_v10  ;;  %12490 = vmatprep.mubr.f32.mxu0 %v834_v57 }
 0x301   :  { %12539 = vmatprep.subr.mxu1 %v14435_v15  ;;  %12491 = vmatmul.mubr.f32.vlgmr.msra.gmra.mxu0 %v844_v12 }
 0x302   :  { %12513 = vmatpush3.msra.mxu0 %v14392_v61  ;;  %12540 = vmatpush3.msra.mxu1 %v14435_v15 }
 0x303   :  { %12514 = vmatprep.subr.mxu0 %v14395_v62  ;;  %12528 = vmatprep.mubr.f32.mxu0 %v831_v52 }
 0x304   :  { %12541 = vmatprep.subr.mxu1 %v14450_v23  ;;  %12515 = vmatpush3.msra.mxu0 %v14395_v62 }
 0x305   :  { %12542 = vmatpush3.msra.mxu1 %v14450_v23  ;;  %12516 = vmatprep.subr.mxu0 %v14420_v9 }
 0x306   :  { %12543 = vmatprep.subr.mxu1 %v14466_v31  ;;  %12517 = vmatpush3.msra.mxu0 %v14420_v9 }
 0x307   :  { %12544 = vmatpush3.msra.mxu1 %v14466_v31  ;;  %12518 = vmatprep.subr.mxu0 %v14433_v14 }
 0x308   :  { %12545 = vmatprep.subr.mxu1 %v14477_v37  ;;  %12519 = vmatpush3.msra.mxu0 %v14433_v14 }
 0x309   :  { %12546 = vmatpush3.msra.mxu1 %v14477_v37  ;;  %12520 = vmatprep.subr.mxu0 %v14448_v22 }
 0x30a   :  { %12548 = vmatmul.mubr.f32.vlgmr.msra.gmra.mxu1 %v842_v54  ;;  %12569 = vmatprep.subr.mxu1 %v14387_v59  ;;  %v707_v54 = vld [vmem:[%s18186_s5] sm:$0x1] }
 0x30b   :  { %12521 = vmatpush3.msra.mxu0 %v14448_v22  ;;  %12570 = vmatpush3.msra.mxu1 %v14387_v59 }
 0x30c   :  { %12585 = vmatprep.mubr.f32.mxu1 %v830_v49  ;;  %12522 = vmatprep.subr.mxu0 %v14463_v30 }
 0x30d   :  { %12571 = vmatprep.subr.mxu1 %v14389_v60  ;;  %12523 = vmatpush3.msra.mxu0 %v14463_v30 }
 0x30e   :  { %12572 = vmatpush3.msra.mxu1 %v14389_v60  ;;  %12524 = vmatprep.subr.mxu0 %v14482_v39 }
 0x30f   :  { %12573 = vmatprep.subr.mxu1 %v14414_v7  ;;  %12525 = vmatpush3.msra.mxu0 %v14482_v39 }
 0x310   :  { %12574 = vmatpush3.msra.mxu1 %v14414_v7  ;;  %12526 = vmatprep.subr.mxu0 %v14489_v43 }
 0x311   :  { %12575 = vmatprep.subr.mxu1 %v14422_v10  ;;  %12527 = vmatpush3.msra.mxu0 %v14489_v43 }
 0x312   :  { %12576 = vmatpush3.msra.mxu1 %v14422_v10  ;;  %12529 = vmatmul.mubr.f32.vlgmr.msra.gmra.mxu0 %v841_v53 }
 0x313   :  { %12550 = vmatprep.subr.mxu0 %v14400_v63  ;;  %12577 = vmatprep.subr.mxu1 %v14435_v15 }
 0x314   :  { %12551 = vmatpush3.msra.mxu0 %v14400_v63  ;;  %12566 = vmatprep.mubr.f32.mxu0 %v830_v49 }
 0x315   :  { %12578 = vmatpush3.msra.mxu1 %v14435_v15  ;;  %12552 = vmatprep.subr.mxu0 %v14403_v0 }
 0x316   :  { %12579 = vmatprep.subr.mxu1 %v14450_v23  ;;  %12553 = vmatpush3.msra.mxu0 %v14403_v0 }
 0x317   :  { %12580 = vmatpush3.msra.mxu1 %v14450_v23  ;;  %12554 = vmatprep.subr.mxu0 %v14430_v13 }
 0x318   :  { %12581 = vmatprep.subr.mxu1 %v14466_v31  ;;  %12555 = vmatpush3.msra.mxu0 %v14430_v13 }
 0x319   :  { %12582 = vmatpush3.msra.mxu1 %v14466_v31  ;;  %12556 = vmatprep.subr.mxu0 %v14445_v21 }
 0x31a   :  { %12583 = vmatprep.subr.mxu1 %v14477_v37  ;;  %12557 = vmatpush3.msra.mxu0 %v14445_v21 }
 0x31b   :  { %12584 = vmatpush3.msra.mxu1 %v14477_v37  ;;  %12558 = vmatprep.subr.mxu0 %v14460_v27 }
 0x31c   :  { %12586 = vmatmul.mubr.f32.vlgmr.msra.gmra.mxu1 %v14541_v51  ;;  %12559 = vmatpush3.msra.mxu0 %v14460_v27 }
 0x31d   :  { %12560 = vmatprep.subr.mxu0 %v14475_v36 }
 0x31e   :  { %12561 = vmatpush3.msra.mxu0 %v14475_v36 }
 0x31f   :  { %12562 = vmatprep.subr.mxu0 %v14493_v44 }
 0x320   :  { %12563 = vmatpush3.msra.mxu0 %v14493_v44 }
 0x321   :  { %12564 = vmatprep.subr.mxu0 %v14497_v47 }
 0x322   :  { %12565 = vmatpush3.msra.mxu0 %v14497_v47 }
 0x323   :  { %12567 = vmatmul.mubr.f32.vlgmr.msra.gmra.mxu0 %v14541_v51 }
 0x3b9   :  { %v12511_v60 = vpop.f32.mrf.mxu1 }
 0x3bb   :  { %v957_v63 = vpop.f32.mrf.mxu1 }
 0x3c1   :  { %v12492_v59 = vpop.f32.mrf.mxu0 }
 0x3c2   :  { %v964_v0 = vadd.f32 %v12511_v60, %v12492_v59 }
 0x3c3   :  { %v836_v61 = vpop.f32.mrf.mxu0 }
 0x3c4   :  { %v958_v10 = vadd.f32 %v957_v63, %v836_v61  ;;  %v11375_v61 = vld [vmem:[%s18185_s4 + $0x78] sm:$0xff] }
 0x3c5   :  { %v14648_v63 = vand.u32 4294901760, %v11375_v61 }
 0x3c7   :  { %12588 = vmatprep.subr.mxu0 %v14648_v63 }
 0x3c8   :  { %12589 = vmatpush3.msra.mxu0 %v14648_v63 }
 0x3ca   :  { %v12549_v7 = vpop.f32.mrf.mxu1 }
 0x3cc   :  { %v1139_v15 = vpop.f32.mrf.mxu1 }
 0x3d2   :  { %v12530_v62 = vpop.f32.mrf.mxu0 }
 0x3d3   :  { %v1059_v13 = vadd.f32 %v12530_v62, %v964_v0  ;;  %v11374_v62 = vld [vmem:[%s18185_s4 + $0x70] sm:$0xff] }
 0x3d4   :  { %v1051_v9 = vpop.f32.mrf.mxu0  ;;  %v14650_v0 = vand.u32 4294901760, %v11374_v62 }
 0x3d5   :  { %v1052_v14 = vadd.f32 %v1051_v9, %v958_v10  ;;  %v1148_v21 = vadd.f32 %v12549_v7, %v1059_v13  ;;  %v14653_v7 = vsub.f32 %v11375_v61, %v14648_v63 }
 0x3d6   :  { %v14656_v9 = vsub.f32 %v11374_v62, %v14650_v0  ;;  %12590 = vmatprep.subr.mxu0 %v14650_v0 }
 0x3d7   :  { %v1140_v30 = vadd.f32 %v1139_v15, %v1052_v14  ;;  %v14661_v10 = vand.u32 4294901760, %v14653_v7  ;;  %12591 = vmatpush3.msra.mxu0 %v14650_v0 }
 0x3d8   :  { %v14664_v13 = vand.u32 4294901760, %v14656_v9 }
 0x3d9   :  { %v1580_v14 = vsub.f32 %v14653_v7, %v14661_v10 }
 0x3da   :  { %v1587_v15 = vsub.f32 %v14656_v9, %v14664_v13 }
 0x3dc   :  { %v12587_v22 = vpop.f32.mrf.mxu1 }
 0x3de   :  { %v1327_v39 = vpop.f32.mrf.mxu1 }
 0x3e3   :  { %v12568_v23 = vpop.f32.mrf.mxu0 }
 0x3e4   :  { %v1249_v27 = vadd.f32 %v12568_v23, %v1148_v21  ;;  %v1581_v21 = vand.u32 4294901760, %v1580_v14  ;;  %v11373_v23 = vld [vmem:[%s18185_s4 + $0x68] sm:$0xff] }
 0x3e5   :  { %v1242_v31 = vpop.f32.mrf.mxu0 }
 0x3e6   :  { %v14609_v36 = vadd.f32 %v12587_v22, %v1249_v27  ;;  %v1243_v37 = vadd.f32 %v1242_v31, %v1140_v30  ;;  %v1588_v22 = vand.u32 4294901760, %v1587_v15  ;;  %12607 = vmatprep.subr.mxu1 %v1581_v21  ;;  %v14675_v27 = vand.u32 4294901760, %v11373_v23  ;;  %v11372_v30 = vld [vmem:[%s18185_s4 + $0x60] sm:$0xff] }
 0x3e7   :  { %12608 = vmatpush3.msra.mxu1 %v1581_v21 }
 0x3e8   :  { %v1347_v43 = vmul.f32 %v14609_v36, %v14609_v36  ;;  %v14613_v44 = vadd.f32 %v1327_v39, %v1243_v37  ;;  %v1338_v47 = vsel %vm626_vm10, %v14609_v36, 0.0  ;;  %12609 = vmatprep.subr.mxu1 %v1588_v22  ;;  %v14681_v31 = vsub.f32 %v11373_v23, %v14675_v27  ;;  %12592 = vmatprep.subr.mxu0 %v14675_v27  ;;  %v11371_v39 = vld [vmem:[%s18185_s4 + $0x58] sm:$0xff] }
 0x3e9   :  { %12610 = vmatpush3.msra.mxu1 %v1588_v22  ;;  %v14683_v37 = vand.u32 4294901760, %v11372_v30  ;;  %12593 = vmatpush3.msra.mxu0 %v14675_v27 }
 0x3ea   :  { %v1337_v16 = vsel %vm626_vm10, %v14613_v44, 0.0  ;;  %v1346_v2 = vmul.f32 %v14613_v44, %v14613_v44  ;;  %v1349_v5 = vsel %vm626_vm10, %v1347_v43, 0.0  ;;  %v14691_v43 = vand.u32 4294901760, %v14681_v31 }
 0x3eb   :  { %v1339_v4 = vadd.f32 %v1338_v47, %v1337_v16  ;;  %v14694_v47 = vsub.f32 %v11372_v30, %v14683_v37  ;;  %v14696_v16 = vand.u32 4294901760, %v11371_v39  ;;  %12594 = vmatprep.subr.mxu0 %v14683_v37 }
 0x3ec   :  { %v1348_v6 = vsel %vm626_vm10, %v1346_v2, 0.0  ;;  %v11370_v2 = vld [vmem:[%s18185_s4 + $0x50] sm:$0xff]  ;;  %12595 = vmatpush3.msra.mxu0 %v14683_v37 }
 0x3ed   :  { %v1340_v8 = vrot.slane %v1339_v4, 4  ;;  %v1350_v11 = vadd.f32 %v1349_v5, %v1348_v6  ;;  %v14706_v5 = vand.u32 4294901760, %v14694_v47  ;;  %v14709_v6 = vsub.f32 %v11371_v39, %v14696_v16  ;;  %12596 = vmatprep.subr.mxu0 %v14696_v16 }
 0x3ee   :  { %12597 = vmatpush3.msra.mxu0 %v14696_v16 }
 0x3ef   :  { %v1341_v17 = vadd.f32 %v1340_v8, %v1339_v4  ;;  %v1351_v18 = vrot.slane %v1350_v11, 4  ;;  %v1594_v4 = vsub.f32 %v14681_v31, %v14691_v43  ;;  %v14711_v8 = vand.u32 4294901760, %v11370_v2 }
 0x3f1   :  { %v1342_v24 = vrot.slane %v1341_v17, 2  ;;  %v1352_v25 = vadd.f32 %v1351_v18, %v1350_v11  ;;  %v11369_v11 = vld [vmem:[%s18185_s4 + $0x48] sm:$0xff]  ;;  %v1601_v18 = vsub.f32 %v14694_v47, %v14706_v5  ;;  %12598 = vmatprep.subr.mxu0 %v14711_v8 }
 0x3f2   :  { %12599 = vmatpush3.msra.mxu0 %v14711_v8 }
 0x3f3   :  { %v1343_v26 = vadd.f32 %v1342_v24, %v1341_v17  ;;  %v1353_v32 = vrot.slane %v1352_v25, 2  ;;  %v1595_v17 = vand.u32 4294901760, %v1594_v4  ;;  %v14721_v24 = vand.u32 4294901760, %v14709_v6 }
 0x3f5   :  { %v1344_v33 = vrot.slane %v1343_v26, 1  ;;  %v1354_v34 = vadd.f32 %v1353_v32, %v1352_v25  ;;  %v14724_v25 = vsub.f32 %v11370_v2, %v14711_v8  ;;  %v11368_v32 = vld [vmem:[%s18185_s4 + $0x40] sm:$0xff]  ;;  %12611 = vmatprep.subr.mxu1 %v1595_v17 }
 0x3f6   :  { %12612 = vmatpush3.msra.mxu1 %v1595_v17 }
 0x3f7   :  { %v1345_v35 = vadd.f32 %v1344_v33, %v1343_v26  ;;  %v1355_v38 = vrot.slane %v1354_v34, 1  ;;  %v14727_v26 = vand.u32 4294901760, %v11369_v11 }
 0x3f9   :  { %1358 = vrot.lane.b32.xlu0 %v1345_v35, %s14225_s9  ;;  %v1356_v40 = vadd.f32 %v1355_v38, %v1354_v34  ;;  %v1602_v34 = vand.u32 4294901760, %v1601_v18  ;;  %v14736_v38 = vand.u32 4294901760, %v14724_v25  ;;  %12600 = vmatprep.subr.mxu0 %v14727_v26 }
 0x3fa   :  { %12601 = vmatpush3.msra.mxu0 %v14727_v26 }
 0x3fb   :  { %1364 = vrot.lane.b32.xlu1 %v1356_v40, %s14225_s9  ;;  %12613 = vmatprep.subr.mxu1 %v1602_v34 }
 0x3fc   :  { %12614 = vmatpush3.msra.mxu1 %v1602_v34 }
 0x46b   :  { %v1359_v41 = vpop.permute.xlu0 %1358 }
 0x46c   :  { %v1361_v42 = vadd.f32 %v1359_v41, %v1345_v35  ;;  %v1608_v35 = vsub.f32 %v14709_v6, %v14721_v24 }
 0x46d   :  { %v1365_v45 = vpop.permute.xlu1 %1364 }
 0x46e   :  { %v1362_v46 = vmul.f32 0.03125, %v1361_v42  ;;  %v1367_v48 = vadd.f32 %v1365_v45, %v1356_v40  ;;  %v14738_v40 = vand.u32 4294901760, %v11368_v32  ;;  %v14743_v42 = vsub.f32 %v11369_v11, %v14727_v26 }
 0x470   :  { %v1369_v49 = vmul.f32 %v1362_v46, %v1362_v46  ;;  %v1368_v51 = vmul.f32 0.03125, %v1367_v48  ;;  %v1615_v48 = vsub.f32 %v14724_v25, %v14736_v38  ;;  %12602 = vmatprep.subr.mxu0 %v14738_v40 }
 0x471   :  { %12603 = vmatpush3.msra.mxu0 %v14738_v40 }
 0x472   :  { %v1370_v52 = vsub.f32 %v1368_v51, %v1369_v49  ;;  %v14750_v49 = vsub.f32 %v11368_v32, %v14738_v40  ;;  %v14754_v51 = vand.u32 4294901760, %v14743_v42  ;;  %12626 = vmatprep.subr.mxu0 %v14653_v7 }
 0x474   :  { %v1371_v53 = vadd.f32 1e-05, %v1370_v52 }
 0x476   :  { %14192 = vrsqrt.f32 %v1371_v53  ;;  %v1616_v53 = vand.u32 4294901760, %v1615_v48 }
 0x483   :  { %v14193_v55 = vpop.eup %14192 }
 0x484   :  { %v14628_v3 = vmul.f32 %v14193_v55, %v707_v54  ;;  %v14758_v54 = vand.u32 4294901760, %v14750_v49 }
 0x486   :  { %v1380_v57 = vrot.slane %v14628_v3, %v14365_v50  ;;  %v1374_v12 = vmul.f32 %v14628_v3, %v1362_v46  ;;  %v1609_v46 = vand.u32 4294901760, %v1608_v35 }
 0x488   :  { %1381 = vrot.lane.b32.xlu0 %v1380_v57, %s14226_s14  ;;  %v14637_v59 = vsub.f32 %v708_v56, %v1374_v12  ;;  %12615 = vmatprep.subr.mxu1 %v1609_v46 }
 0x489   :  { %12616 = vmatpush3.msra.mxu1 %v1609_v46 }
 0x48a   :  { %v1389_v60 = vrot.slane %v14637_v59, %v14365_v50  ;;  %12617 = vmatprep.subr.mxu1 %v1616_v53 }
 0x48b   :  { %12618 = vmatpush3.msra.mxu1 %v1616_v53 }
 0x48c   :  { %1390 = vrot.lane.b32.xlu1 %v1389_v60, %s14226_s14  ;;  %v1629_v60 = vsub.f32 %v14750_v49, %v14758_v54 }
 0x48e   :  { %v1630_v14 = vand.u32 4294901760, %v1629_v60 }
 0x4fa   :  { %v1382_v33 = vpop.permute.xlu0 %1381 }
 0x4fb   :  { %v1384_v41 = vsel %vm674_vm11, %v14628_v3, %v1382_v33  ;;  %v1622_v3 = vsub.f32 %v14743_v42, %v14754_v51 }
 0x4fc   :  { %v1397_v45 = vrot.slane %v1384_v41, %v14365_v50 }
 0x4fd   :  { %v1623_v61 = vand.u32 4294901760, %v1622_v3 }
 0x4fe   :  { %v1391_v52 = vpop.permute.xlu1 %1390  ;;  %v1398_v56 = vmul.f32 %v1397_v45, %v14613_v44  ;;  %v1399_v57 = vmul.f32 %v1397_v45, %v14609_v36 }
 0x4ff   :  { %v1393_v55 = vsel %vm674_vm11, %v14637_v59, %v1391_v52  ;;  %12619 = vmatprep.subr.mxu1 %v1623_v61 }
 0x500   :  { %v1403_v12 = vrot.slane %v1393_v55, %v14365_v50  ;;  %12620 = vmatpush3.msra.mxu1 %v1623_v61 }
 0x501   :  { %12621 = vmatprep.subr.mxu1 %v1630_v14 }
 0x502   :  { %v1405_v62 = vadd.f32 %v1403_v12, %v1399_v57  ;;  %v1404_v59 = vadd.f32 %v1403_v12, %v1398_v56  ;;  %12622 = vmatpush3.msra.mxu1 %v1630_v14 }
 0x503   :  { %12645 = vmatprep.subr.mxu1 %v14648_v63 }
 0x504   :  { %v1407_v15 = vmax.f32 %v1405_v62, 0.0  ;;  %v1406_v21 = vmax.f32 %v1404_v59, 0.0 }
 0x506   :  { %1445 = vrot.lane.b32.xlu1 %v1407_v15, %s14226_s14  ;;  %v1436_v44 = vrot.slane %v1407_v15, 1  ;;  %1443 = vrot.lane.b32.xlu0 %v1406_v21, %s14226_s14  ;;  %v1435_v36 = vrot.slane %v1406_v21, 1  ;;  %v1423_v22 = vrot.slane %v1406_v21, 7  ;;  %v1424_v23 = vrot.slane %v1407_v15, 7 }
 0x508   :  { %v1425_v30 = vsel %vm69_vm0, %v1423_v22, %v1424_v23  ;;  %v1437_v39 = vsel %vm78_vm1, %v1435_v36, %v1436_v44  ;;  %v1440_v2 = vsel %vm78_vm1, %v1436_v44, 0.0 }
 0x509   :  { %v1441_v4 = vmul.f32 %v14301_v20, %v1437_v39  ;;  %v1442_v11 = vmul.f32 %v14320_v29, %v1440_v2 }
 0x50a   :  { %1426 = vrot.lane.b32.xlu0 %v1423_v22, %s14225_s9  ;;  %1428 = vrot.lane.b32.xlu1 %v1425_v30, %s14225_s9 }
 0x50e   :  { %1451 = vrot.lane.b32.xlu0 %v1441_v4, %s14227_s29  ;;  %1453 = vrot.lane.b32.xlu1 %v1442_v11, %s14227_s29 }
 0x578   :  { %v1446_v17 = vpop.permute.xlu1 %1445  ;;  %v1444_v18 = vpop.permute.xlu0 %1443 }
 0x57c   :  { %v1427_v32 = vpop.permute.xlu0 %1426  ;;  %v1429_v33 = vpop.permute.xlu1 %1428 }
 0x57d   :  { %v1432_v34 = vsel %vm69_vm0, 0.0, %v1427_v32  ;;  %v1434_v35 = vmul.f32 %v14318_v28, %v1429_v33 }
 0x57e   :  { %v1433_v41 = vmul.f32 %v14299_v19, %v1432_v34 }
 0x57f   :  { %v1458_v45 = vsel %vm674_vm11, %v1434_v35, %v1446_v17 }
 0x580   :  { %v1457_v46 = vsel %vm674_vm11, %v1433_v41, %v1444_v18  ;;  %v1452_v48 = vpop.permute.xlu0 %1451  ;;  %v1454_v52 = vpop.permute.xlu1 %1453 }
 0x581   :  { %v1459_v53 = vsel %vm747_vm12, %v1457_v46, %v1452_v48  ;;  %v1460_v55 = vsel %vm747_vm12, %v1458_v45, %v1454_v52 }
 0x582   :  { %v1462_v3 = vsel %vm750_vm13, %v1459_v53, 0  ;;  %v1465_v56 = vsel %vm750_vm13, %v1460_v55, 0 }
 0x583   :  { %v1540_v57 = vand.u32 4294901760, %v1462_v3  ;;  %v14792_v12 = vand.u32 4294901760, %v1465_v56 }
 0x585   :  { %v1541_v60 = vsub.f32 %v1462_v3, %v1540_v57  ;;  %v1551_v61 = vsub.f32 %v1465_v56, %v14792_v12  ;;  %12623 = vmatprep.mubr.f32.mxu1 %v1540_v57 }
 0x586   :  { %12624 = vmatmul.mubr.f32.vlgmr.msra.gmra.mxu1 %v14792_v12 }
 0x587   :  { %v1552_v62 = vand.u32 4294901760, %v1551_v61  ;;  %12646 = vmatpush3.msra.mxu1 %v14648_v63  ;;  %v1542_v59 = vand.u32 4294901760, %v1541_v60 }
 0x588   :  { %12647 = vmatprep.subr.mxu1 %v14650_v0 }
 0x589   :  { %12648 = vmatpush3.msra.mxu1 %v14650_v0  ;;  %12661 = vmatprep.mubr.f32.mxu1 %v1542_v59  ;;  %v1543_v14 = vsub.f32 %v1541_v60, %v1542_v59  ;;  %v1553_v15 = vsub.f32 %v1551_v61, %v1552_v62 }
 0x58a   :  { %12649 = vmatprep.subr.mxu1 %v14675_v27 }
 0x58b   :  { %12650 = vmatpush3.msra.mxu1 %v14675_v27  ;;  %v1544_v21 = vand.u32 4294901760, %v1543_v14  ;;  %v1554_v44 = vand.u32 4294901760, %v1553_v15  ;;  %v11377_v15 = vld [vmem:[%s18187_s6 + $0x1] sm:$0x1] }
 0x58c   :  { %12651 = vmatprep.subr.mxu1 %v14683_v37 }
 0x58d   :  { %12652 = vmatpush3.msra.mxu1 %v14683_v37  ;;  %12604 = vmatprep.mubr.f32.mxu0 %v1544_v21 }
 0x58e   :  { %12653 = vmatprep.subr.mxu1 %v14696_v16  ;;  %12605 = vmatmul.mubr.f32.vlgmr.msra.gmra.mxu0 %v1554_v44 }
 0x58f   :  { %12627 = vmatpush3.msra.mxu0 %v14653_v7  ;;  %12654 = vmatpush3.msra.mxu1 %v14696_v16 }
 0x590   :  { %12628 = vmatprep.subr.mxu0 %v14656_v9  ;;  %12642 = vmatprep.mubr.f32.mxu0 %v1541_v60 }
 0x591   :  { %12655 = vmatprep.subr.mxu1 %v14711_v8  ;;  %12629 = vmatpush3.msra.mxu0 %v14656_v9 }
 0x592   :  { %12656 = vmatpush3.msra.mxu1 %v14711_v8  ;;  %12630 = vmatprep.subr.mxu0 %v14681_v31 }
 0x593   :  { %12657 = vmatprep.subr.mxu1 %v14727_v26  ;;  %12631 = vmatpush3.msra.mxu0 %v14681_v31 }
 0x594   :  { %12658 = vmatpush3.msra.mxu1 %v14727_v26  ;;  %12632 = vmatprep.subr.mxu0 %v14694_v47 }
 0x595   :  { %12659 = vmatprep.subr.mxu1 %v14738_v40  ;;  %12633 = vmatpush3.msra.mxu0 %v14694_v47 }
 0x596   :  { %12660 = vmatpush3.msra.mxu1 %v14738_v40  ;;  %12634 = vmatprep.subr.mxu0 %v14709_v6 }
 0x597   :  { %12662 = vmatmul.mubr.f32.vlgmr.msra.gmra.mxu1 %v1552_v62  ;;  %12683 = vmatprep.subr.mxu1 %v14648_v63  ;;  %v11376_v62 = vld [vmem:[%s18186_s5 + $0x1] sm:$0x1] }
 0x598   :  { %12635 = vmatpush3.msra.mxu0 %v14709_v6  ;;  %12684 = vmatpush3.msra.mxu1 %v14648_v63 }
 0x599   :  { %12699 = vmatprep.mubr.f32.mxu1 %v1540_v57  ;;  %12636 = vmatprep.subr.mxu0 %v14724_v25 }
 0x59a   :  { %12685 = vmatprep.subr.mxu1 %v14650_v0  ;;  %12637 = vmatpush3.msra.mxu0 %v14724_v25 }
 0x59b   :  { %12686 = vmatpush3.msra.mxu1 %v14650_v0  ;;  %12638 = vmatprep.subr.mxu0 %v14743_v42 }
 0x59c   :  { %12687 = vmatprep.subr.mxu1 %v14675_v27  ;;  %12639 = vmatpush3.msra.mxu0 %v14743_v42 }
 0x59d   :  { %12688 = vmatpush3.msra.mxu1 %v14675_v27  ;;  %12640 = vmatprep.subr.mxu0 %v14750_v49 }
 0x59e   :  { %12689 = vmatprep.subr.mxu1 %v14683_v37  ;;  %12641 = vmatpush3.msra.mxu0 %v14750_v49 }
 0x59f   :  { %12690 = vmatpush3.msra.mxu1 %v14683_v37  ;;  %12643 = vmatmul.mubr.f32.vlgmr.msra.gmra.mxu0 %v1551_v61 }
 0x5a0   :  { %12664 = vmatprep.subr.mxu0 %v14661_v10  ;;  %12691 = vmatprep.subr.mxu1 %v14696_v16 }
 0x5a1   :  { %12665 = vmatpush3.msra.mxu0 %v14661_v10  ;;  %12680 = vmatprep.mubr.f32.mxu0 %v1540_v57 }
 0x5a2   :  { %12692 = vmatpush3.msra.mxu1 %v14696_v16  ;;  %12666 = vmatprep.subr.mxu0 %v14664_v13 }
 0x5a3   :  { %12693 = vmatprep.subr.mxu1 %v14711_v8  ;;  %12667 = vmatpush3.msra.mxu0 %v14664_v13 }
 0x5a4   :  { %12694 = vmatpush3.msra.mxu1 %v14711_v8  ;;  %12668 = vmatprep.subr.mxu0 %v14691_v43 }
 0x5a5   :  { %12695 = vmatprep.subr.mxu1 %v14727_v26  ;;  %12669 = vmatpush3.msra.mxu0 %v14691_v43 }
 0x5a6   :  { %12696 = vmatpush3.msra.mxu1 %v14727_v26  ;;  %12670 = vmatprep.subr.mxu0 %v14706_v5 }
 0x5a7   :  { %12697 = vmatprep.subr.mxu1 %v14738_v40  ;;  %12671 = vmatpush3.msra.mxu0 %v14706_v5 }
 0x5a8   :  { %12698 = vmatpush3.msra.mxu1 %v14738_v40  ;;  %12672 = vmatprep.subr.mxu0 %v14721_v24 }
 0x5a9   :  { %12700 = vmatmul.mubr.f32.vlgmr.msra.gmra.mxu1 %v14792_v12  ;;  %12673 = vmatpush3.msra.mxu0 %v14721_v24 }
 0x5aa   :  { %12674 = vmatprep.subr.mxu0 %v14736_v38 }
 0x5ab   :  { %12675 = vmatpush3.msra.mxu0 %v14736_v38 }
 0x5ac   :  { %12676 = vmatprep.subr.mxu0 %v14754_v51 }
 0x5ad   :  { %12677 = vmatpush3.msra.mxu0 %v14754_v51 }
 0x5ae   :  { %12678 = vmatprep.subr.mxu0 %v14758_v54 }
 0x5af   :  { %12679 = vmatpush3.msra.mxu0 %v14758_v54 }
 0x5b0   :  { %12681 = vmatmul.mubr.f32.vlgmr.msra.gmra.mxu0 %v14792_v12 }
 0x646   :  { %v12625_v0 = vpop.f32.mrf.mxu1 }
 0x648   :  { %v1667_v10 = vpop.f32.mrf.mxu1 }
 0x64e   :  { %v12606_v63 = vpop.f32.mrf.mxu0 }
 0x64f   :  { %v1674_v13 = vadd.f32 %v12625_v0, %v12606_v63 }
 0x650   :  { %v1546_v7 = vpop.f32.mrf.mxu0 }
 0x651   :  { %v1668_v37 = vadd.f32 %v1667_v10, %v1546_v7  ;;  %v11385_v7 = vld [vmem:[%s18185_s4 + $0xb8] sm:$0xff] }
 0x652   :  { %v14899_v10 = vand.u32 4294901760, %v11385_v7 }
 0x654   :  { %12702 = vmatprep.subr.mxu0 %v14899_v10 }
 0x655   :  { %12703 = vmatpush3.msra.mxu0 %v14899_v10 }
 0x657   :  { %v12663_v27 = vpop.f32.mrf.mxu1 }
 0x659   :  { %v1849_v16 = vpop.f32.mrf.mxu1 }
 0x65f   :  { %v12644_v9 = vpop.f32.mrf.mxu0 }
 0x660   :  { %v1769_v43 = vadd.f32 %v12644_v9, %v1674_v13  ;;  %v11384_v9 = vld [vmem:[%s18185_s4 + $0xb0] sm:$0xff] }
 0x661   :  { %v1761_v31 = vpop.f32.mrf.mxu0  ;;  %v14901_v13 = vand.u32 4294901760, %v11384_v9 }
 0x662   :  { %v1762_v47 = vadd.f32 %v1761_v31, %v1668_v37  ;;  %v1858_v5 = vadd.f32 %v12663_v27, %v1769_v43  ;;  %v14904_v27 = vsub.f32 %v11385_v7, %v14899_v10 }
 0x663   :  { %v14907_v31 = vsub.f32 %v11384_v9, %v14901_v13  ;;  %12704 = vmatprep.subr.mxu0 %v14901_v13 }
 0x664   :  { %v1850_v25 = vadd.f32 %v1849_v16, %v1762_v47  ;;  %v14912_v37 = vand.u32 4294901760, %v14904_v27  ;;  %12705 = vmatpush3.msra.mxu0 %v14901_v13 }
 0x665   :  { %v14915_v43 = vand.u32 4294901760, %v14907_v31 }
 0x666   :  { %v2290_v47 = vsub.f32 %v14904_v27, %v14912_v37 }
 0x667   :  { %v2297_v16 = vsub.f32 %v14907_v31, %v14915_v43 }
 0x669   :  { %v12701_v6 = vpop.f32.mrf.mxu1 }
 0x66b   :  { %v2037_v42 = vpop.f32.mrf.mxu1 }
 0x670   :  { %v12682_v8 = vpop.f32.mrf.mxu0 }
 0x671   :  { %v1959_v24 = vadd.f32 %v12682_v8, %v1858_v5  ;;  %v2291_v5 = vand.u32 4294901760, %v2290_v47  ;;  %v11383_v8 = vld [vmem:[%s18185_s4 + $0xa8] sm:$0xff] }
 0x672   :  { %v1952_v26 = vpop.f32.mrf.mxu0 }
 0x673   :  { %v14860_v38 = vadd.f32 %v12701_v6, %v1959_v24  ;;  %v1953_v40 = vadd.f32 %v1952_v26, %v1850_v25  ;;  %v2298_v6 = vand.u32 4294901760, %v2297_v16  ;;  %12721 = vmatprep.subr.mxu1 %v2291_v5  ;;  %v14926_v24 = vand.u32 4294901760, %v11383_v8  ;;  %v11382_v25 = vld [vmem:[%s18185_s4 + $0xa0] sm:$0xff] }
 0x674   :  { %12722 = vmatpush3.msra.mxu1 %v2291_v5 }
 0x675   :  { %v2057_v49 = vmul.f32 %v14860_v38, %v14860_v38  ;;  %v14864_v51 = vadd.f32 %v2037_v42, %v1953_v40  ;;  %v2048_v54 = vsel %vm626_vm10, %v14860_v38, 0.0  ;;  %12723 = vmatprep.subr.mxu1 %v2298_v6  ;;  %v14932_v26 = vsub.f32 %v11383_v8, %v14926_v24  ;;  %12706 = vmatprep.subr.mxu0 %v14926_v24  ;;  %v11381_v42 = vld [vmem:[%s18185_s4 + $0x98] sm:$0xff] }
 0x676   :  { %12724 = vmatpush3.msra.mxu1 %v2298_v6  ;;  %v14934_v40 = vand.u32 4294901760, %v11382_v25  ;;  %12707 = vmatpush3.msra.mxu0 %v14926_v24 }
 0x677   :  { %v2047_v36 = vsel %vm626_vm10, %v14864_v51, 0.0  ;;  %v2056_v22 = vmul.f32 %v14864_v51, %v14864_v51  ;;  %v2059_v30 = vsel %vm626_vm10, %v2057_v49, 0.0  ;;  %v14942_v49 = vand.u32 4294901760, %v14932_v26 }
 0x678   :  { %v2049_v23 = vadd.f32 %v2048_v54, %v2047_v36  ;;  %v14945_v54 = vsub.f32 %v11382_v25, %v14934_v40  ;;  %v14947_v36 = vand.u32 4294901760, %v11381_v42  ;;  %12708 = vmatprep.subr.mxu0 %v14934_v40 }
 0x679   :  { %v2058_v39 = vsel %vm626_vm10, %v2056_v22, 0.0  ;;  %v11380_v22 = vld [vmem:[%s18185_s4 + $0x90] sm:$0xff]  ;;  %12709 = vmatpush3.msra.mxu0 %v14934_v40 }
 0x67a   :  { %v2050_v2 = vrot.slane %v2049_v23, 4  ;;  %v2060_v4 = vadd.f32 %v2059_v30, %v2058_v39  ;;  %v14957_v30 = vand.u32 4294901760, %v14945_v54  ;;  %v14960_v39 = vsub.f32 %v11381_v42, %v14947_v36  ;;  %12710 = vmatprep.subr.mxu0 %v14947_v36 }
 0x67b   :  { %12711 = vmatpush3.msra.mxu0 %v14947_v36 }
 0x67c   :  { %v2051_v11 = vadd.f32 %v2050_v2, %v2049_v23  ;;  %v2061_v17 = vrot.slane %v2060_v4, 4  ;;  %v2304_v23 = vsub.f32 %v14932_v26, %v14942_v49  ;;  %v14962_v2 = vand.u32 4294901760, %v11380_v22 }
 0x67e   :  { %v2052_v18 = vrot.slane %v2051_v11, 2  ;;  %v2062_v32 = vadd.f32 %v2061_v17, %v2060_v4  ;;  %v11379_v4 = vld [vmem:[%s18185_s4 + $0x88] sm:$0xff]  ;;  %v2311_v17 = vsub.f32 %v14945_v54, %v14957_v30  ;;  %12712 = vmatprep.subr.mxu0 %v14962_v2 }
 0x67f   :  { %12713 = vmatpush3.msra.mxu0 %v14962_v2 }
 0x680   :  { %v2053_v33 = vadd.f32 %v2052_v18, %v2051_v11  ;;  %v2063_v34 = vrot.slane %v2062_v32, 2  ;;  %v2305_v11 = vand.u32 4294901760, %v2304_v23  ;;  %v14972_v18 = vand.u32 4294901760, %v14960_v39 }
 0x682   :  { %v2054_v35 = vrot.slane %v2053_v33, 1  ;;  %v2064_v41 = vadd.f32 %v2063_v34, %v2062_v32  ;;  %v14975_v32 = vsub.f32 %v11380_v22, %v14962_v2  ;;  %v11378_v34 = vld [vmem:[%s18185_s4 + $0x80] sm:$0xff]  ;;  %12725 = vmatprep.subr.mxu1 %v2305_v11 }
 0x683   :  { %12726 = vmatpush3.msra.mxu1 %v2305_v11 }
 0x684   :  { %v2055_v45 = vadd.f32 %v2054_v35, %v2053_v33  ;;  %v2065_v46 = vrot.slane %v2064_v41, 1  ;;  %v14978_v33 = vand.u32 4294901760, %v11379_v4 }
 0x686   :  { %2068 = vrot.lane.b32.xlu0 %v2055_v45, %s14225_s9  ;;  %v2066_v48 = vadd.f32 %v2065_v46, %v2064_v41  ;;  %v2312_v41 = vand.u32 4294901760, %v2311_v17  ;;  %v14987_v46 = vand.u32 4294901760, %v14975_v32  ;;  %12714 = vmatprep.subr.mxu0 %v14978_v33 }
 0x687   :  { %12715 = vmatpush3.msra.mxu0 %v14978_v33 }
 0x688   :  { %2074 = vrot.lane.b32.xlu1 %v2066_v48, %s14225_s9  ;;  %12727 = vmatprep.subr.mxu1 %v2312_v41 }
 0x689   :  { %12728 = vmatpush3.msra.mxu1 %v2312_v41 }
 0x6f8   :  { %v2069_v52 = vpop.permute.xlu0 %2068 }
 0x6f9   :  { %v2071_v53 = vadd.f32 %v2069_v52, %v2055_v45  ;;  %v2318_v45 = vsub.f32 %v14960_v39, %v14972_v18 }
 0x6fa   :  { %v2075_v55 = vpop.permute.xlu1 %2074 }
 0x6fb   :  { %v2072_v3 = vmul.f32 0.03125, %v2071_v53  ;;  %v2077_v56 = vadd.f32 %v2075_v55, %v2066_v48  ;;  %v14989_v48 = vand.u32 4294901760, %v11378_v34  ;;  %v14994_v53 = vsub.f32 %v11379_v4, %v14978_v33 }
 0x6fd   :  { %v2079_v57 = vmul.f32 %v2072_v3, %v2072_v3  ;;  %v2078_v12 = vmul.f32 0.03125, %v2077_v56  ;;  %v2325_v56 = vsub.f32 %v14975_v32, %v14987_v46  ;;  %12716 = vmatprep.subr.mxu0 %v14989_v48 }
 0x6fe   :  { %12717 = vmatpush3.msra.mxu0 %v14989_v48 }
 0x6ff   :  { %v2080_v60 = vsub.f32 %v2078_v12, %v2079_v57  ;;  %v15001_v57 = vsub.f32 %v11378_v34, %v14989_v48  ;;  %v15005_v12 = vand.u32 4294901760, %v14994_v53  ;;  %12740 = vmatprep.subr.mxu0 %v14904_v27 }
 0x701   :  { %v2081_v61 = vadd.f32 1e-05, %v2080_v60 }
 0x703   :  { %14194 = vrsqrt.f32 %v2081_v61  ;;  %v2326_v61 = vand.u32 4294901760, %v2325_v56 }
 0x710   :  { %v14195_v59 = vpop.eup %14194 }
 0x711   :  { %v14879_v14 = vmul.f32 %v14195_v59, %v11376_v62  ;;  %v15009_v62 = vand.u32 4294901760, %v15001_v57 }
 0x713   :  { %v2090_v21 = vrot.slane %v14879_v14, %v14365_v50  ;;  %v2084_v44 = vmul.f32 %v14879_v14, %v2072_v3  ;;  %v2319_v3 = vand.u32 4294901760, %v2318_v45 }
 0x715   :  { %2091 = vrot.lane.b32.xlu0 %v2090_v21, %s14226_s14  ;;  %v14888_v63 = vsub.f32 %v11377_v15, %v2084_v44  ;;  %12729 = vmatprep.subr.mxu1 %v2319_v3 }
 0x716   :  { %12730 = vmatpush3.msra.mxu1 %v2319_v3 }
 0x717   :  { %v2099_v0 = vrot.slane %v14888_v63, %v14365_v50  ;;  %12731 = vmatprep.subr.mxu1 %v2326_v61 }
 0x718   :  { %12732 = vmatpush3.msra.mxu1 %v2326_v61 }
 0x719   :  { %2100 = vrot.lane.b32.xlu1 %v2099_v0, %s14226_s14  ;;  %v2339_v0 = vsub.f32 %v15001_v57, %v15009_v62 }
 0x71b   :  { %v2340_v47 = vand.u32 4294901760, %v2339_v0 }
 0x787   :  { %v2092_v35 = vpop.permute.xlu0 %2091 }
 0x788   :  { %v2094_v52 = vsel %vm674_vm11, %v14879_v14, %v2092_v35  ;;  %v2332_v14 = vsub.f32 %v14994_v53, %v15005_v12 }
 0x789   :  { %v2107_v55 = vrot.slane %v2094_v52, %v14365_v50 }
 0x78a   :  { %v2333_v7 = vand.u32 4294901760, %v2332_v14 }
 0x78b   :  { %v2101_v60 = vpop.permute.xlu1 %2100  ;;  %v2108_v15 = vmul.f32 %v2107_v55, %v14864_v51  ;;  %v2109_v21 = vmul.f32 %v2107_v55, %v14860_v38 }
 0x78c   :  { %v2103_v59 = vsel %vm674_vm11, %v14888_v63, %v2101_v60  ;;  %12733 = vmatprep.subr.mxu1 %v2333_v7 }
 0x78d   :  { %v2113_v44 = vrot.slane %v2103_v59, %v14365_v50  ;;  %12734 = vmatpush3.msra.mxu1 %v2333_v7 }
 0x78e   :  { %12735 = vmatprep.subr.mxu1 %v2340_v47 }
 0x78f   :  { %v2115_v9 = vadd.f32 %v2113_v44, %v2109_v21  ;;  %v2114_v63 = vadd.f32 %v2113_v44, %v2108_v15  ;;  %12736 = vmatpush3.msra.mxu1 %v2340_v47 }
 0x790   :  { %12759 = vmatprep.subr.mxu1 %v14899_v10 }
 0x791   :  { %v2117_v16 = vmax.f32 %v2115_v9, 0.0  ;;  %v2116_v5 = vmax.f32 %v2114_v63, 0.0 }
 0x793   :  { %2155 = vrot.lane.b32.xlu1 %v2117_v16, %s14226_s14  ;;  %v2146_v51 = vrot.slane %v2117_v16, 1  ;;  %2153 = vrot.lane.b32.xlu0 %v2116_v5, %s14226_s14  ;;  %v2145_v38 = vrot.slane %v2116_v5, 1  ;;  %v2133_v6 = vrot.slane %v2116_v5, 7  ;;  %v2134_v8 = vrot.slane %v2117_v16, 7 }
 0x795   :  { %v2135_v25 = vsel %vm69_vm0, %v2133_v6, %v2134_v8  ;;  %v2147_v42 = vsel %vm78_vm1, %v2145_v38, %v2146_v51  ;;  %v2150_v22 = vsel %vm78_vm1, %v2146_v51, 0.0 }
 0x796   :  { %v2151_v23 = vmul.f32 %v14301_v20, %v2147_v42  ;;  %v2152_v4 = vmul.f32 %v14320_v29, %v2150_v22 }
 0x797   :  { %2136 = vrot.lane.b32.xlu0 %v2133_v6, %s14225_s9  ;;  %2138 = vrot.lane.b32.xlu1 %v2135_v25, %s14225_s9 }
 0x79b   :  { %2161 = vrot.lane.b32.xlu0 %v2151_v23, %s14227_s29  ;;  %2163 = vrot.lane.b32.xlu1 %v2152_v4, %s14227_s29 }
 0x805   :  { %v2156_v11 = vpop.permute.xlu1 %2155  ;;  %v2154_v17 = vpop.permute.xlu0 %2153 }
 0x809   :  { %v2137_v34 = vpop.permute.xlu0 %2136  ;;  %v2139_v35 = vpop.permute.xlu1 %2138 }
 0x80a   :  { %v2142_v41 = vsel %vm69_vm0, 0.0, %v2137_v34  ;;  %v2144_v45 = vmul.f32 %v14318_v28, %v2139_v35 }
 0x80b   :  { %v2143_v52 = vmul.f32 %v14299_v19, %v2142_v41 }
 0x80c   :  { %v2168_v55 = vsel %vm674_vm11, %v2144_v45, %v2156_v11 }
 0x80d   :  { %v2167_v3 = vsel %vm674_vm11, %v2143_v52, %v2154_v17  ;;  %v2162_v56 = vpop.permute.xlu0 %2161  ;;  %v2164_v60 = vpop.permute.xlu1 %2163 }
 0x80e   :  { %v2169_v61 = vsel %vm747_vm12, %v2167_v3, %v2162_v56  ;;  %v2170_v59 = vsel %vm747_vm12, %v2168_v55, %v2164_v60 }
 0x80f   :  { %v2172_v14 = vsel %vm750_vm13, %v2169_v61, 0  ;;  %v2175_v15 = vsel %vm750_vm13, %v2170_v59, 0 }
 0x810   :  { %v2250_v21 = vand.u32 4294901760, %v2172_v14  ;;  %v15043_v44 = vand.u32 4294901760, %v2175_v15 }
 0x812   :  { %v2251_v0 = vsub.f32 %v2172_v14, %v2250_v21  ;;  %v2261_v7 = vsub.f32 %v2175_v15, %v15043_v44  ;;  %12737 = vmatprep.mubr.f32.mxu1 %v2250_v21 }
 0x813   :  { %12738 = vmatmul.mubr.f32.vlgmr.msra.gmra.mxu1 %v15043_v44 }
 0x814   :  { %v2262_v9 = vand.u32 4294901760, %v2261_v7  ;;  %12760 = vmatpush3.msra.mxu1 %v14899_v10  ;;  %v2252_v63 = vand.u32 4294901760, %v2251_v0 }
 0x815   :  { %12761 = vmatprep.subr.mxu1 %v14901_v13 }
 0x816   :  { %12762 = vmatpush3.msra.mxu1 %v14901_v13  ;;  %12775 = vmatprep.mubr.f32.mxu1 %v2252_v63  ;;  %v2253_v47 = vsub.f32 %v2251_v0, %v2252_v63  ;;  %v2263_v16 = vsub.f32 %v2261_v7, %v2262_v9 }
 0x817   :  { %12763 = vmatprep.subr.mxu1 %v14926_v24 }
 0x818   :  { %12764 = vmatpush3.msra.mxu1 %v14926_v24  ;;  %v2254_v5 = vand.u32 4294901760, %v2253_v47  ;;  %v2264_v51 = vand.u32 4294901760, %v2263_v16  ;;  %v11387_v16 = vld [vmem:[%s18187_s6 + $0x2] sm:$0x1] }
 0x819   :  { %12765 = vmatprep.subr.mxu1 %v14934_v40 }
 0x81a   :  { %12766 = vmatpush3.msra.mxu1 %v14934_v40  ;;  %12718 = vmatprep.mubr.f32.mxu0 %v2254_v5 }
 0x81b   :  { %12767 = vmatprep.subr.mxu1 %v14947_v36  ;;  %12719 = vmatmul.mubr.f32.vlgmr.msra.gmra.mxu0 %v2264_v51 }
 0x81c   :  { %12741 = vmatpush3.msra.mxu0 %v14904_v27  ;;  %12768 = vmatpush3.msra.mxu1 %v14947_v36 }
 0x81d   :  { %12742 = vmatprep.subr.mxu0 %v14907_v31  ;;  %12756 = vmatprep.mubr.f32.mxu0 %v2251_v0 }
 0x81e   :  { %12769 = vmatprep.subr.mxu1 %v14962_v2  ;;  %12743 = vmatpush3.msra.mxu0 %v14907_v31 }
 0x81f   :  { %12770 = vmatpush3.msra.mxu1 %v14962_v2  ;;  %12744 = vmatprep.subr.mxu0 %v14932_v26 }
 0x820   :  { %12771 = vmatprep.subr.mxu1 %v14978_v33  ;;  %12745 = vmatpush3.msra.mxu0 %v14932_v26 }
 0x821   :  { %12772 = vmatpush3.msra.mxu1 %v14978_v33  ;;  %12746 = vmatprep.subr.mxu0 %v14945_v54 }
 0x822   :  { %12773 = vmatprep.subr.mxu1 %v14989_v48  ;;  %12747 = vmatpush3.msra.mxu0 %v14945_v54 }
 0x823   :  { %12774 = vmatpush3.msra.mxu1 %v14989_v48  ;;  %12748 = vmatprep.subr.mxu0 %v14960_v39 }
 0x824   :  { %12776 = vmatmul.mubr.f32.vlgmr.msra.gmra.mxu1 %v2262_v9  ;;  %12797 = vmatprep.subr.mxu1 %v14899_v10  ;;  %v11386_v9 = vld [vmem:[%s18186_s5 + $0x2] sm:$0x1] }
 0x825   :  { %12749 = vmatpush3.msra.mxu0 %v14960_v39  ;;  %12798 = vmatpush3.msra.mxu1 %v14899_v10 }
 0x826   :  { %12813 = vmatprep.mubr.f32.mxu1 %v2250_v21  ;;  %12750 = vmatprep.subr.mxu0 %v14975_v32 }
 0x827   :  { %12799 = vmatprep.subr.mxu1 %v14901_v13  ;;  %12751 = vmatpush3.msra.mxu0 %v14975_v32 }
 0x828   :  { %12800 = vmatpush3.msra.mxu1 %v14901_v13  ;;  %12752 = vmatprep.subr.mxu0 %v14994_v53 }
 0x829   :  { %12801 = vmatprep.subr.mxu1 %v14926_v24  ;;  %12753 = vmatpush3.msra.mxu0 %v14994_v53 }
 0x82a   :  { %12802 = vmatpush3.msra.mxu1 %v14926_v24  ;;  %12754 = vmatprep.subr.mxu0 %v15001_v57 }
 0x82b   :  { %12803 = vmatprep.subr.mxu1 %v14934_v40  ;;  %12755 = vmatpush3.msra.mxu0 %v15001_v57 }
 0x82c   :  { %12804 = vmatpush3.msra.mxu1 %v14934_v40  ;;  %12757 = vmatmul.mubr.f32.vlgmr.msra.gmra.mxu0 %v2261_v7 }
 0x82d   :  { %12778 = vmatprep.subr.mxu0 %v14912_v37  ;;  %12805 = vmatprep.subr.mxu1 %v14947_v36 }
 0x82e   :  { %12779 = vmatpush3.msra.mxu0 %v14912_v37  ;;  %12794 = vmatprep.mubr.f32.mxu0 %v2250_v21 }
 0x82f   :  { %12806 = vmatpush3.msra.mxu1 %v14947_v36  ;;  %12780 = vmatprep.subr.mxu0 %v14915_v43 }
 0x830   :  { %12807 = vmatprep.subr.mxu1 %v14962_v2  ;;  %12781 = vmatpush3.msra.mxu0 %v14915_v43 }
 0x831   :  { %12808 = vmatpush3.msra.mxu1 %v14962_v2  ;;  %12782 = vmatprep.subr.mxu0 %v14942_v49 }
 0x832   :  { %12809 = vmatprep.subr.mxu1 %v14978_v33  ;;  %12783 = vmatpush3.msra.mxu0 %v14942_v49 }
 0x833   :  { %12810 = vmatpush3.msra.mxu1 %v14978_v33  ;;  %12784 = vmatprep.subr.mxu0 %v14957_v30 }
 0x834   :  { %12811 = vmatprep.subr.mxu1 %v14989_v48  ;;  %12785 = vmatpush3.msra.mxu0 %v14957_v30 }
 0x835   :  { %12812 = vmatpush3.msra.mxu1 %v14989_v48  ;;  %12786 = vmatprep.subr.mxu0 %v14972_v18 }
 0x836   :  { %12814 = vmatmul.mubr.f32.vlgmr.msra.gmra.mxu1 %v15043_v44  ;;  %12787 = vmatpush3.msra.mxu0 %v14972_v18 }
 0x837   :  { %12788 = vmatprep.subr.mxu0 %v14987_v46 }
 0x838   :  { %12789 = vmatpush3.msra.mxu0 %v14987_v46 }
 0x839   :  { %12790 = vmatprep.subr.mxu0 %v15005_v12 }
 0x83a   :  { %12791 = vmatpush3.msra.mxu0 %v15005_v12 }
 0x83b   :  { %12792 = vmatprep.subr.mxu0 %v15009_v62 }
 0x83c   :  { %12793 = vmatpush3.msra.mxu0 %v15009_v62 }
 0x83d   :  { %12795 = vmatmul.mubr.f32.vlgmr.msra.gmra.mxu0 %v15043_v44 }
 0x8d3   :  { %v12739_v13 = vpop.f32.mrf.mxu1 }
 0x8d5   :  { %v2377_v37 = vpop.f32.mrf.mxu1 }
 0x8db   :  { %v12720_v10 = vpop.f32.mrf.mxu0 }
 0x8dc   :  { %v2384_v43 = vadd.f32 %v12739_v13, %v12720_v10 }
 0x8dd   :  { %v2256_v27 = vpop.f32.mrf.mxu0 }
 0x8de   :  { %v2378_v40 = vadd.f32 %v2377_v37, %v2256_v27  ;;  %v11395_v27 = vld [vmem:[%s18185_s4 + $0xf8] sm:$0xff] }
 0x8df   :  { %v15146_v37 = vand.u32 4294901760, %v11395_v27 }
 0x8e1   :  { %12816 = vmatprep.subr.mxu0 %v15146_v37 }
 0x8e2   :  { %12817 = vmatpush3.msra.mxu0 %v15146_v37 }
 0x8e4   :  { %v12777_v24 = vpop.f32.mrf.mxu1 }
 0x8e6   :  { %v2559_v36 = vpop.f32.mrf.mxu1 }
 0x8ec   :  { %v12758_v31 = vpop.f32.mrf.mxu0 }
 0x8ed   :  { %v2479_v49 = vadd.f32 %v12758_v31, %v2384_v43  ;;  %v11394_v31 = vld [vmem:[%s18185_s4 + $0xf0] sm:$0xff] }
 0x8ee   :  { %v2471_v26 = vpop.f32.mrf.mxu0  ;;  %v15148_v43 = vand.u32 4294901760, %v11394_v31 }
 0x8ef   :  { %v2472_v54 = vadd.f32 %v2471_v26, %v2378_v40  ;;  %v2568_v30 = vadd.f32 %v12777_v24, %v2479_v49  ;;  %v15151_v24 = vsub.f32 %v11395_v27, %v15146_v37 }
 0x8f0   :  { %v15154_v26 = vsub.f32 %v11394_v31, %v15148_v43  ;;  %12818 = vmatprep.subr.mxu0 %v15148_v43 }
 0x8f1   :  { %v2560_v32 = vadd.f32 %v2559_v36, %v2472_v54  ;;  %v15159_v40 = vand.u32 4294901760, %v15151_v24  ;;  %12819 = vmatpush3.msra.mxu0 %v15148_v43 }
 0x8f2   :  { %v15162_v49 = vand.u32 4294901760, %v15154_v26 }
 0x8f3   :  { %v3002_v54 = vsub.f32 %v15151_v24, %v15159_v40 }
 0x8f4   :  { %v3009_v36 = vsub.f32 %v15154_v26, %v15162_v49 }
 0x8f6   :  { %v12815_v39 = vpop.f32.mrf.mxu1 }
 0x8f8   :  { %v2747_v53 = vpop.f32.mrf.mxu1 }
 0x8fd   :  { %v12796_v2 = vpop.f32.mrf.mxu0 }
 0x8fe   :  { %v2669_v18 = vadd.f32 %v12796_v2, %v2568_v30  ;;  %v3003_v30 = vand.u32 4294901760, %v3002_v54  ;;  %v11393_v2 = vld [vmem:[%s18185_s4 + $0xe8] sm:$0xff] }
 0x8ff   :  { %v2662_v33 = vpop.f32.mrf.mxu0 }
 0x900   :  { %v15111_v46 = vadd.f32 %v12815_v39, %v2669_v18  ;;  %v2663_v48 = vadd.f32 %v2662_v33, %v2560_v32  ;;  %v3010_v39 = vand.u32 4294901760, %v3009_v36  ;;  %12835 = vmatprep.subr.mxu1 %v3003_v30  ;;  %v15173_v18 = vand.u32 4294901760, %v11393_v2  ;;  %v11392_v32 = vld [vmem:[%s18185_s4 + $0xe0] sm:$0xff] }
 0x901   :  { %12836 = vmatpush3.msra.mxu1 %v3003_v30 }
 0x902   :  { %v2767_v57 = vmul.f32 %v15111_v46, %v15111_v46  ;;  %v15115_v12 = vadd.f32 %v2747_v53, %v2663_v48  ;;  %v2758_v62 = vsel %vm626_vm10, %v15111_v46, 0.0  ;;  %12837 = vmatprep.subr.mxu1 %v3010_v39  ;;  %v15179_v33 = vsub.f32 %v11393_v2, %v15173_v18  ;;  %12820 = vmatprep.subr.mxu0 %v15173_v18  ;;  %v11391_v53 = vld [vmem:[%s18185_s4 + $0xd8] sm:$0xff] }
 0x903   :  { %12838 = vmatpush3.msra.mxu1 %v3010_v39  ;;  %v15181_v48 = vand.u32 4294901760, %v11392_v32  ;;  %12821 = vmatpush3.msra.mxu0 %v15173_v18 }
 0x904   :  { %v2757_v38 = vsel %vm626_vm10, %v15115_v12, 0.0  ;;  %v2766_v6 = vmul.f32 %v15115_v12, %v15115_v12  ;;  %v2769_v25 = vsel %vm626_vm10, %v2767_v57, 0.0  ;;  %v15189_v57 = vand.u32 4294901760, %v15179_v33 }
 0x905   :  { %v2759_v8 = vadd.f32 %v2758_v62, %v2757_v38  ;;  %v15192_v62 = vsub.f32 %v11392_v32, %v15181_v48  ;;  %v15194_v38 = vand.u32 4294901760, %v11391_v53  ;;  %12822 = vmatprep.subr.mxu0 %v15181_v48 }
 0x906   :  { %v2768_v42 = vsel %vm626_vm10, %v2766_v6, 0.0  ;;  %v11390_v6 = vld [vmem:[%s18185_s4 + $0xd0] sm:$0xff]  ;;  %12823 = vmatpush3.msra.mxu0 %v15181_v48 }
 0x907   :  { %v2760_v22 = vrot.slane %v2759_v8, 4  ;;  %v2770_v23 = vadd.f32 %v2769_v25, %v2768_v42  ;;  %v15204_v25 = vand.u32 4294901760, %v15192_v62  ;;  %v15207_v42 = vsub.f32 %v11391_v53, %v15194_v38  ;;  %12824 = vmatprep.subr.mxu0 %v15194_v38 }
 0x908   :  { %12825 = vmatpush3.msra.mxu0 %v15194_v38 }
 0x909   :  { %v2761_v4 = vadd.f32 %v2760_v22, %v2759_v8  ;;  %v2771_v11 = vrot.slane %v2770_v23, 4  ;;  %v3016_v8 = vsub.f32 %v15179_v33, %v15189_v57  ;;  %v15209_v22 = vand.u32 4294901760, %v11390_v6 }
 0x90b   :  { %v2762_v17 = vrot.slane %v2761_v4, 2  ;;  %v2772_v34 = vadd.f32 %v2771_v11, %v2770_v23  ;;  %v11389_v23 = vld [vmem:[%s18185_s4 + $0xc8] sm:$0xff]  ;;  %v3017_v11 = vand.u32 4294901760, %v3016_v8  ;;  %12826 = vmatprep.subr.mxu0 %v15209_v22 }
 0x90c   :  { %12827 = vmatpush3.msra.mxu0 %v15209_v22 }
 0x90d   :  { %v2763_v35 = vadd.f32 %v2762_v17, %v2761_v4  ;;  %v2773_v41 = vrot.slane %v2772_v34, 2  ;;  %v3023_v17 = vsub.f32 %v15192_v62, %v15204_v25  ;;  %12839 = vmatprep.subr.mxu1 %v3017_v11 }
 0x90e   :  { %12840 = vmatpush3.msra.mxu1 %v3017_v11 }
 0x90f   :  { %v2764_v45 = vrot.slane %v2763_v35, 1  ;;  %v2774_v52 = vadd.f32 %v2773_v41, %v2772_v34  ;;  %v15219_v34 = vand.u32 4294901760, %v15207_v42 }
 0x911   :  { %v2765_v55 = vadd.f32 %v2764_v45, %v2763_v35  ;;  %v2775_v3 = vrot.slane %v2774_v52, 1  ;;  %v15222_v35 = vsub.f32 %v11390_v6, %v15209_v22  ;;  %v15226_v45 = vand.u32 4294901760, %v11389_v23 }
 0x913   :  { %2778 = vrot.lane.b32.xlu0 %v2765_v55, %s14225_s9  ;;  %v2776_v56 = vadd.f32 %v2775_v3, %v2774_v52  ;;  %v11388_v52 = vld [vmem:[%s18185_s4 + $0xc0] sm:$0xff]  ;;  %v3024_v3 = vand.u32 4294901760, %v3023_v17  ;;  %12828 = vmatprep.subr.mxu0 %v15226_v45 }
 0x914   :  { %12829 = vmatpush3.msra.mxu0 %v15226_v45 }
 0x915   :  { %2784 = vrot.lane.b32.xlu1 %v2776_v56, %s14225_s9  ;;  %12841 = vmatprep.subr.mxu1 %v3024_v3 }
 0x916   :  { %12842 = vmatpush3.msra.mxu1 %v3024_v3 }
 0x985   :  { %v2779_v60 = vpop.permute.xlu0 %2778 }
 0x986   :  { %v2781_v61 = vadd.f32 %v2779_v60, %v2765_v55  ;;  %v15236_v60 = vand.u32 4294901760, %v15222_v35 }
 0x987   :  { %v2785_v59 = vpop.permute.xlu1 %2784 }
 0x988   :  { %v2782_v14 = vmul.f32 0.03125, %v2781_v61  ;;  %v2787_v15 = vadd.f32 %v2785_v59, %v2776_v56  ;;  %v3030_v56 = vsub.f32 %v15207_v42, %v15219_v34  ;;  %v15239_v61 = vsub.f32 %v11389_v23, %v15226_v45 }
 0x989   :  { %v15241_v59 = vand.u32 4294901760, %v11388_v52 }
 0x98a   :  { %v2789_v21 = vmul.f32 %v2782_v14, %v2782_v14  ;;  %v2788_v44 = vmul.f32 0.03125, %v2787_v15  ;;  %v3031_v15 = vand.u32 4294901760, %v3030_v56 }
 0x98b   :  { %12830 = vmatprep.subr.mxu0 %v15241_v59 }
 0x98c   :  { %v2790_v0 = vsub.f32 %v2788_v44, %v2789_v21  ;;  %v3037_v21 = vsub.f32 %v15222_v35, %v15236_v60  ;;  %12843 = vmatprep.subr.mxu1 %v3031_v15  ;;  %12831 = vmatpush3.msra.mxu0 %v15241_v59 }
 0x98d   :  { %12844 = vmatpush3.msra.mxu1 %v3031_v15  ;;  %12854 = vmatprep.subr.mxu0 %v15151_v24 }
 0x98e   :  { %v2791_v7 = vadd.f32 1e-05, %v2790_v0  ;;  %v15250_v0 = vand.u32 4294901760, %v15239_v61 }
 0x990   :  { %14196 = vrsqrt.f32 %v2791_v7  ;;  %v15253_v7 = vsub.f32 %v11388_v52, %v15241_v59 }
 0x99d   :  { %v14197_v63 = vpop.eup %14196 }
 0x99e   :  { %v2793_v47 = vmul.f32 %v14197_v63, %v11386_v9 }
 0x9a0   :  { %v2800_v5 = vrot.slane %v2793_v47, %v14365_v50  ;;  %v2794_v51 = vmul.f32 %v2793_v47, %v2782_v14 }
 0x9a2   :  { %2801 = vrot.lane.b32.xlu0 %v2800_v5, %s14226_s14  ;;  %v15135_v10 = vsub.f32 %v11387_v16, %v2794_v51  ;;  %v3038_v16 = vand.u32 4294901760, %v3037_v21  ;;  %v3044_v5 = vsub.f32 %v15239_v61, %v15250_v0  ;;  %v15263_v51 = vand.u32 4294901760, %v15253_v7 }
 0x9a4   :  { %v2809_v13 = vrot.slane %v15135_v10, %v14365_v50  ;;  %12845 = vmatprep.subr.mxu1 %v3038_v16 }
 0x9a5   :  { %12846 = vmatpush3.msra.mxu1 %v3038_v16 }
 0x9a6   :  { %2810 = vrot.lane.b32.xlu1 %v2809_v13, %s14226_s14 }
 0xa14   :  { %v2802_v4 = vpop.permute.xlu0 %2801 }
 0xa15   :  { %v2804_v41 = vsel %vm674_vm11, %v2793_v47, %v2802_v4 }
 0xa16   :  { %v2817_v55 = vrot.slane %v2804_v41, %v14365_v50 }
 0xa18   :  { %v2811_v14 = vpop.permute.xlu1 %2810  ;;  %v2818_v9 = vmul.f32 %v2817_v55, %v15115_v12  ;;  %v2819_v63 = vmul.f32 %v2817_v55, %v15111_v46  ;;  %v3045_v46 = vand.u32 4294901760, %v3044_v5  ;;  %v3051_v12 = vsub.f32 %v15253_v7, %v15263_v51 }
 0xa19   :  { %v2813_v44 = vsel %vm674_vm11, %v15135_v10, %v2811_v14 }
 0xa1a   :  { %v2823_v47 = vrot.slane %v2813_v44, %v14365_v50  ;;  %12847 = vmatprep.subr.mxu1 %v3045_v46  ;;  %v3052_v54 = vand.u32 4294901760, %v3051_v12 }
 0xa1b   :  { %12848 = vmatpush3.msra.mxu1 %v3045_v46 }
 0xa1c   :  { %v2824_v10 = vadd.f32 %v2823_v47, %v2818_v9  ;;  %v2825_v13 = vadd.f32 %v2823_v47, %v2819_v63  ;;  %12849 = vmatprep.subr.mxu1 %v3052_v54 }
 0xa1d   :  { %12850 = vmatpush3.msra.mxu1 %v3052_v54 }
 0xa1e   :  { %v2826_v27 = vmax.f32 %v2824_v10, 0.0  ;;  %v2827_v31 = vmax.f32 %v2825_v13, 0.0  ;;  %12873 = vmatprep.subr.mxu1 %v15146_v37 }
 0xa20   :  { %v15269_v36 = vadd.f32 %v2826_v27, %v14510_v58  ;;  %v15272_v30 = vadd.f32 %v2827_v31, %v14512_v1 }
 0xa22   :  { %2867 = vrot.lane.b32.xlu1 %v15272_v30, %s14226_s14  ;;  %2865 = vrot.lane.b32.xlu0 %v15269_v36, %s14226_s14  ;;  %v2845_v39 = vrot.slane %v15269_v36, 7  ;;  %v2846_v2 = vrot.slane %v15272_v30, 7  ;;  %v2857_v32 = vrot.slane %v15269_v36, 1  ;;  %v2858_v58 = vrot.slane %v15272_v30, 1 }
 0xa24   :  { %v2847_v1 = vsel %vm69_vm0, %v2845_v39, %v2846_v2  ;;  %v2859_v53 = vsel %vm78_vm1, %v2857_v32, %v2858_v58  ;;  %v2862_v6 = vsel %vm78_vm1, %v2858_v58, 0.0 }
 0xa25   :  { %v2863_v8 = vmul.f32 %v14301_v20, %v2859_v53  ;;  %v2864_v23 = vmul.f32 %v14320_v29, %v2862_v6 }
 0xa26   :  { %2848 = vrot.lane.b32.xlu0 %v2845_v39, %s14225_s9  ;;  %2850 = vrot.lane.b32.xlu1 %v2847_v1, %s14225_s9 }
 0xa2a   :  { %2873 = vrot.lane.b32.xlu0 %v2863_v8, %s14227_s29  ;;  %2875 = vrot.lane.b32.xlu1 %v2864_v23, %s14227_s29 }
 0xa94   :  { %v2868_v4 = vpop.permute.xlu1 %2867  ;;  %v2866_v11 = vpop.permute.xlu0 %2865 }
 0xa98   :  { %v2849_v17 = vpop.permute.xlu0 %2848  ;;  %v2851_v41 = vpop.permute.xlu1 %2850 }
 0xa99   :  { %v2854_v52 = vsel %vm69_vm0, 0.0, %v2849_v17  ;;  %v2856_v55 = vmul.f32 %v14318_v28, %v2851_v41 }
 0xa9a   :  { %v2855_v3 = vmul.f32 %v14299_v19, %v2854_v52 }
 0xa9b   :  { %v2880_v56 = vsel %vm674_vm11, %v2856_v55, %v2868_v4 }
 0xa9c   :  { %v2879_v14 = vsel %vm674_vm11, %v2855_v3, %v2866_v11  ;;  %v2874_v15 = vpop.permute.xlu0 %2873  ;;  %v2876_v21 = vpop.permute.xlu1 %2875 }
 0xa9d   :  { %v2881_v44 = vsel %vm747_vm12, %v2879_v14, %v2874_v15  ;;  %v2882_v9 = vsel %vm747_vm12, %v2880_v56, %v2876_v21 }
 0xa9e   :  { %v2884_v63 = vsel %vm750_vm13, %v2881_v44, 0  ;;  %v2887_v47 = vsel %vm750_vm13, %v2882_v9, 0 }
 0xa9f   :  { %v2962_v16 = vand.u32 4294901760, %v2884_v63  ;;  %v15301_v5 = vand.u32 4294901760, %v2887_v47 }
 0xaa1   :  { %v2963_v10 = vsub.f32 %v2884_v63, %v2962_v16  ;;  %v2973_v13 = vsub.f32 %v2887_v47, %v15301_v5  ;;  %12851 = vmatprep.mubr.f32.mxu1 %v2962_v16 }
 0xaa2   :  { %12852 = vmatmul.mubr.f32.vlgmr.msra.gmra.mxu1 %v15301_v5 }
 0xaa3   :  { %v2974_v46 = vand.u32 4294901760, %v2973_v13  ;;  %12874 = vmatpush3.msra.mxu1 %v15146_v37  ;;  %v2964_v12 = vand.u32 4294901760, %v2963_v10 }
 0xaa4   :  { %12875 = vmatprep.subr.mxu1 %v15148_v43 }
 0xaa5   :  { %12876 = vmatpush3.msra.mxu1 %v15148_v43  ;;  %12889 = vmatprep.mubr.f32.mxu1 %v2964_v12  ;;  %v2965_v27 = vsub.f32 %v2963_v10, %v2964_v12  ;;  %v2975_v31 = vsub.f32 %v2973_v13, %v2974_v46 }
 0xaa6   :  { %12877 = vmatprep.subr.mxu1 %v15173_v18 }
 0xaa7   :  { %12878 = vmatpush3.msra.mxu1 %v15173_v18  ;;  %v2966_v54 = vand.u32 4294901760, %v2965_v27  ;;  %v2976_v39 = vand.u32 4294901760, %v2975_v31  ;;  %v11397_v31 = vld [vmem:[%s18187_s6 + $0x3] sm:$0x1] }
 0xaa8   :  { %12879 = vmatprep.subr.mxu1 %v15181_v48 }
 0xaa9   :  { %12880 = vmatpush3.msra.mxu1 %v15181_v48  ;;  %12832 = vmatprep.mubr.f32.mxu0 %v2966_v54 }
 0xaaa   :  { %12881 = vmatprep.subr.mxu1 %v15194_v38  ;;  %12833 = vmatmul.mubr.f32.vlgmr.msra.gmra.mxu0 %v2976_v39 }
 0xaab   :  { %12855 = vmatpush3.msra.mxu0 %v15151_v24  ;;  %12882 = vmatpush3.msra.mxu1 %v15194_v38 }
 0xaac   :  { %12856 = vmatprep.subr.mxu0 %v15154_v26  ;;  %12870 = vmatprep.mubr.f32.mxu0 %v2963_v10 }
 0xaad   :  { %12883 = vmatprep.subr.mxu1 %v15209_v22  ;;  %12857 = vmatpush3.msra.mxu0 %v15154_v26 }
 0xaae   :  { %12884 = vmatpush3.msra.mxu1 %v15209_v22  ;;  %12858 = vmatprep.subr.mxu0 %v15179_v33 }
 0xaaf   :  { %12885 = vmatprep.subr.mxu1 %v15226_v45  ;;  %12859 = vmatpush3.msra.mxu0 %v15179_v33 }
 0xab0   :  { %12886 = vmatpush3.msra.mxu1 %v15226_v45  ;;  %12860 = vmatprep.subr.mxu0 %v15192_v62 }
 0xab1   :  { %12887 = vmatprep.subr.mxu1 %v15241_v59  ;;  %12861 = vmatpush3.msra.mxu0 %v15192_v62 }
 0xab2   :  { %12888 = vmatpush3.msra.mxu1 %v15241_v59  ;;  %12862 = vmatprep.subr.mxu0 %v15207_v42 }
 0xab3   :  { %12890 = vmatmul.mubr.f32.vlgmr.msra.gmra.mxu1 %v2974_v46  ;;  %12911 = vmatprep.subr.mxu1 %v15146_v37  ;;  %v11396_v46 = vld [vmem:[%s18186_s5 + $0x3] sm:$0x1] }
 0xab4   :  { %12863 = vmatpush3.msra.mxu0 %v15207_v42  ;;  %12912 = vmatpush3.msra.mxu1 %v15146_v37 }
 0xab5   :  { %12927 = vmatprep.mubr.f32.mxu1 %v2962_v16  ;;  %12864 = vmatprep.subr.mxu0 %v15222_v35 }
 0xab6   :  { %12913 = vmatprep.subr.mxu1 %v15148_v43  ;;  %12865 = vmatpush3.msra.mxu0 %v15222_v35 }
 0xab7   :  { %12914 = vmatpush3.msra.mxu1 %v15148_v43  ;;  %12866 = vmatprep.subr.mxu0 %v15239_v61 }
 0xab8   :  { %12915 = vmatprep.subr.mxu1 %v15173_v18  ;;  %12867 = vmatpush3.msra.mxu0 %v15239_v61 }
 0xab9   :  { %12916 = vmatpush3.msra.mxu1 %v15173_v18  ;;  %12868 = vmatprep.subr.mxu0 %v15253_v7 }
 0xaba   :  { %12917 = vmatprep.subr.mxu1 %v15181_v48  ;;  %12869 = vmatpush3.msra.mxu0 %v15253_v7 }
 0xabb   :  { %12918 = vmatpush3.msra.mxu1 %v15181_v48  ;;  %12871 = vmatmul.mubr.f32.vlgmr.msra.gmra.mxu0 %v2973_v13 }
 0xabc   :  { %12892 = vmatprep.subr.mxu0 %v15159_v40  ;;  %12919 = vmatprep.subr.mxu1 %v15194_v38 }
 0xabd   :  { %12893 = vmatpush3.msra.mxu0 %v15159_v40  ;;  %12908 = vmatprep.mubr.f32.mxu0 %v2962_v16 }
 0xabe   :  { %12920 = vmatpush3.msra.mxu1 %v15194_v38  ;;  %12894 = vmatprep.subr.mxu0 %v15162_v49 }
 0xabf   :  { %12921 = vmatprep.subr.mxu1 %v15209_v22  ;;  %12895 = vmatpush3.msra.mxu0 %v15162_v49 }
 0xac0   :  { %12922 = vmatpush3.msra.mxu1 %v15209_v22  ;;  %12896 = vmatprep.subr.mxu0 %v15189_v57 }
 0xac1   :  { %12923 = vmatprep.subr.mxu1 %v15226_v45  ;;  %12897 = vmatpush3.msra.mxu0 %v15189_v57 }
 0xac2   :  { %12924 = vmatpush3.msra.mxu1 %v15226_v45  ;;  %12898 = vmatprep.subr.mxu0 %v15204_v25 }
 0xac3   :  { %12925 = vmatprep.subr.mxu1 %v15241_v59  ;;  %12899 = vmatpush3.msra.mxu0 %v15204_v25 }
 0xac4   :  { %12926 = vmatpush3.msra.mxu1 %v15241_v59  ;;  %12900 = vmatprep.subr.mxu0 %v15219_v34 }
 0xac5   :  { %12928 = vmatmul.mubr.f32.vlgmr.msra.gmra.mxu1 %v15301_v5  ;;  %12901 = vmatpush3.msra.mxu0 %v15219_v34 }
 0xac6   :  { %12902 = vmatprep.subr.mxu0 %v15236_v60 }
 0xac7   :  { %12903 = vmatpush3.msra.mxu0 %v15236_v60 }
 0xac8   :  { %12904 = vmatprep.subr.mxu0 %v15250_v0 }
 0xac9   :  { %12905 = vmatpush3.msra.mxu0 %v15250_v0 }
 0xaca   :  { %12906 = vmatprep.subr.mxu0 %v15263_v51 }
 0xacb   :  { %12907 = vmatpush3.msra.mxu0 %v15263_v51 }
 0xacc   :  { %12909 = vmatmul.mubr.f32.vlgmr.msra.gmra.mxu0 %v15301_v5 }
 0xb62   :  { %v12853_v43 = vpop.f32.mrf.mxu1 }
 0xb64   :  { %v3089_v40 = vpop.f32.mrf.mxu1 }
 0xb6a   :  { %v12834_v37 = vpop.f32.mrf.mxu0 }
 0xb6b   :  { %v3096_v49 = vadd.f32 %v12853_v43, %v12834_v37 }
 0xb6c   :  { %v2968_v24 = vpop.f32.mrf.mxu0 }
 0xb6d   :  { %v3090_v48 = vadd.f32 %v3089_v40, %v2968_v24  ;;  %v11405_v24 = vld [vmem:[%s18185_s4 + $0x138] sm:$0xff] }
 0xb6e   :  { %v15408_v40 = vand.u32 4294901760, %v11405_v24 }
 0xb70   :  { %12930 = vmatprep.subr.mxu0 %v15408_v40 }
 0xb71   :  { %12931 = vmatpush3.msra.mxu0 %v15408_v40 }
 0xb73   :  { %v12891_v18 = vpop.f32.mrf.mxu1 }
 0xb75   :  { %v3271_v38 = vpop.f32.mrf.mxu1 }
 0xb7b   :  { %v12872_v26 = vpop.f32.mrf.mxu0 }
 0xb7c   :  { %v3191_v57 = vadd.f32 %v12872_v26, %v3096_v49  ;;  %v11404_v26 = vld [vmem:[%s18185_s4 + $0x130] sm:$0xff] }
 0xb7d   :  { %v3183_v33 = vpop.f32.mrf.mxu0  ;;  %v15410_v49 = vand.u32 4294901760, %v11404_v26 }
 0xb7e   :  { %v3184_v62 = vadd.f32 %v3183_v33, %v3090_v48  ;;  %v3280_v25 = vadd.f32 %v12891_v18, %v3191_v57  ;;  %v15413_v18 = vsub.f32 %v11405_v24, %v15408_v40 }
 0xb7f   :  { %v15416_v33 = vsub.f32 %v11404_v26, %v15410_v49  ;;  %12932 = vmatprep.subr.mxu0 %v15410_v49 }
 0xb80   :  { %v3272_v35 = vadd.f32 %v3271_v38, %v3184_v62  ;;  %v15421_v48 = vand.u32 4294901760, %v15413_v18  ;;  %12933 = vmatpush3.msra.mxu0 %v15410_v49 }
 0xb81   :  { %v15424_v57 = vand.u32 4294901760, %v15416_v33 }
 0xb82   :  { %v3712_v62 = vsub.f32 %v15413_v18, %v15421_v48 }
 0xb83   :  { %v3719_v38 = vsub.f32 %v15416_v33, %v15424_v57 }
 0xb85   :  { %v12929_v42 = vpop.f32.mrf.mxu1 }
 0xb87   :  { %v3459_v59 = vpop.f32.mrf.mxu1 }
 0xb8c   :  { %v12910_v22 = vpop.f32.mrf.mxu0 }
 0xb8d   :  { %v3381_v34 = vadd.f32 %v12910_v22, %v3280_v25  ;;  %v3713_v25 = vand.u32 4294901760, %v3712_v62  ;;  %v11403_v22 = vld [vmem:[%s18185_s4 + $0x128] sm:$0xff] }
 0xb8e   :  { %v3374_v45 = vpop.f32.mrf.mxu0 }
 0xb8f   :  { %v15369_v60 = vadd.f32 %v12929_v42, %v3381_v34  ;;  %v3375_v61 = vadd.f32 %v3374_v45, %v3272_v35  ;;  %v3720_v42 = vand.u32 4294901760, %v3719_v38  ;;  %12949 = vmatprep.subr.mxu1 %v3713_v25  ;;  %v15435_v34 = vand.u32 4294901760, %v11403_v22  ;;  %v11402_v35 = vld [vmem:[%s18185_s4 + $0x120] sm:$0xff] }
 0xb90   :  { %12950 = vmatpush3.msra.mxu1 %v3713_v25 }
 0xb91   :  { %v3479_v0 = vmul.f32 %v15369_v60, %v15369_v60  ;;  %v15373_v7 = vadd.f32 %v3459_v59, %v3375_v61  ;;  %v3470_v51 = vsel %vm626_vm10, %v15369_v60, 0.0  ;;  %12951 = vmatprep.subr.mxu1 %v3720_v42  ;;  %v15441_v45 = vsub.f32 %v11403_v22, %v15435_v34  ;;  %12934 = vmatprep.subr.mxu0 %v15435_v34  ;;  %v11401_v59 = vld [vmem:[%s18185_s4 + $0x118] sm:$0xff] }
 0xb92   :  { %12952 = vmatpush3.msra.mxu1 %v3720_v42  ;;  %v15443_v61 = vand.u32 4294901760, %v11402_v35  ;;  %12935 = vmatpush3.msra.mxu0 %v15435_v34 }
 0xb93   :  { %v3469_v2 = vsel %vm626_vm10, %v15373_v7, 0.0  ;;  %v3478_v32 = vmul.f32 %v15373_v7, %v15373_v7  ;;  %v3481_v1 = vsel %vm626_vm10, %v3479_v0, 0.0  ;;  %v15451_v0 = vand.u32 4294901760, %v15441_v45 }
 0xb94   :  { %v3471_v58 = vadd.f32 %v3470_v51, %v3469_v2  ;;  %v15454_v51 = vsub.f32 %v11402_v35, %v15443_v61  ;;  %v15456_v2 = vand.u32 4294901760, %v11401_v59  ;;  %12936 = vmatprep.subr.mxu0 %v15443_v61 }
 0xb95   :  { %v3480_v53 = vsel %vm626_vm10, %v3478_v32, 0.0  ;;  %v11400_v32 = vld [vmem:[%s18185_s4 + $0x110] sm:$0xff]  ;;  %12937 = vmatpush3.msra.mxu0 %v15443_v61 }
 0xb96   :  { %v3472_v6 = vrot.slane %v3471_v58, 4  ;;  %v3482_v8 = vadd.f32 %v3481_v1, %v3480_v53  ;;  %v15466_v1 = vand.u32 4294901760, %v15454_v51  ;;  %v15469_v53 = vsub.f32 %v11401_v59, %v15456_v2  ;;  %12938 = vmatprep.subr.mxu0 %v15456_v2 }
 0xb97   :  { %12939 = vmatpush3.msra.mxu0 %v15456_v2 }
 0xb98   :  { %v3473_v23 = vadd.f32 %v3472_v6, %v3471_v58  ;;  %v3483_v4 = vrot.slane %v3482_v8, 4  ;;  %v3726_v58 = vsub.f32 %v15441_v45, %v15451_v0  ;;  %v15471_v6 = vand.u32 4294901760, %v11400_v32 }
 0xb9a   :  { %v3474_v11 = vrot.slane %v3473_v23, 2  ;;  %v3484_v17 = vadd.f32 %v3483_v4, %v3482_v8  ;;  %v11399_v8 = vld [vmem:[%s18185_s4 + $0x108] sm:$0xff]  ;;  %v3733_v4 = vsub.f32 %v15454_v51, %v15466_v1  ;;  %12940 = vmatprep.subr.mxu0 %v15471_v6 }
 0xb9b   :  { %12941 = vmatpush3.msra.mxu0 %v15471_v6 }
 0xb9c   :  { %v3475_v41 = vadd.f32 %v3474_v11, %v3473_v23  ;;  %v3485_v52 = vrot.slane %v3484_v17, 2  ;;  %v3727_v23 = vand.u32 4294901760, %v3726_v58  ;;  %v15481_v11 = vand.u32 4294901760, %v15469_v53 }
 0xb9e   :  { %v3476_v55 = vrot.slane %v3475_v41, 1  ;;  %v3486_v3 = vadd.f32 %v3485_v52, %v3484_v17  ;;  %v15484_v17 = vsub.f32 %v11400_v32, %v15471_v6  ;;  %v11398_v52 = vld [vmem:[%s18185_s4 + $0x100] sm:$0xff]  ;;  %12953 = vmatprep.subr.mxu1 %v3727_v23 }
 0xb9f   :  { %12954 = vmatpush3.msra.mxu1 %v3727_v23 }
 0xba0   :  { %v3477_v56 = vadd.f32 %v3476_v55, %v3475_v41  ;;  %v3487_v14 = vrot.slane %v3486_v3, 1  ;;  %v15487_v41 = vand.u32 4294901760, %v11399_v8 }
 0xba2   :  { %3490 = vrot.lane.b32.xlu0 %v3477_v56, %s14225_s9  ;;  %v3488_v15 = vadd.f32 %v3487_v14, %v3486_v3  ;;  %v3734_v3 = vand.u32 4294901760, %v3733_v4  ;;  %v15496_v14 = vand.u32 4294901760, %v15484_v17  ;;  %12942 = vmatprep.subr.mxu0 %v15487_v41 }
 0xba3   :  { %12943 = vmatpush3.msra.mxu0 %v15487_v41 }
 0xba4   :  { %3496 = vrot.lane.b32.xlu1 %v3488_v15, %s14225_s9  ;;  %12955 = vmatprep.subr.mxu1 %v3734_v3 }
 0xba5   :  { %12956 = vmatpush3.msra.mxu1 %v3734_v3 }
 0xc14   :  { %v3491_v21 = vpop.permute.xlu0 %3490 }
 0xc15   :  { %v3493_v44 = vadd.f32 %v3491_v21, %v3477_v56  ;;  %v3740_v56 = vsub.f32 %v15469_v53, %v15481_v11 }
 0xc16   :  { %v3497_v9 = vpop.permute.xlu1 %3496 }
 0xc17   :  { %v3494_v63 = vmul.f32 0.03125, %v3493_v44  ;;  %v3499_v47 = vadd.f32 %v3497_v9, %v3488_v15  ;;  %v15498_v15 = vand.u32 4294901760, %v11398_v52  ;;  %v15503_v44 = vsub.f32 %v11399_v8, %v15487_v41 }
 0xc19   :  { %v3501_v16 = vmul.f32 %v3494_v63, %v3494_v63  ;;  %v3500_v5 = vmul.f32 0.03125, %v3499_v47  ;;  %v3747_v47 = vsub.f32 %v15484_v17, %v15496_v14  ;;  %12944 = vmatprep.subr.mxu0 %v15498_v15 }
 0xc1a   :  { %12945 = vmatpush3.msra.mxu0 %v15498_v15 }
 0xc1b   :  { %v3502_v10 = vsub.f32 %v3500_v5, %v3501_v16  ;;  %v15510_v16 = vsub.f32 %v11398_v52, %v15498_v15  ;;  %v15514_v5 = vand.u32 4294901760, %v15503_v44  ;;  %12968 = vmatprep.subr.mxu0 %v15413_v18 }
 0xc1d   :  { %v3503_v13 = vadd.f32 1e-05, %v3502_v10 }
 0xc1f   :  { %14198 = vrsqrt.f32 %v3503_v13  ;;  %v3748_v13 = vand.u32 4294901760, %v3747_v47 }
 0xc2c   :  { %v14199_v12 = vpop.eup %14198 }
 0xc2d   :  { %v15388_v27 = vmul.f32 %v14199_v12, %v11396_v46  ;;  %v15518_v46 = vand.u32 4294901760, %v15510_v16 }
 0xc2f   :  { %v3512_v54 = vrot.slane %v15388_v27, %v14365_v50  ;;  %v3506_v39 = vmul.f32 %v15388_v27, %v3494_v63  ;;  %v3741_v63 = vand.u32 4294901760, %v3740_v56 }
 0xc31   :  { %3513 = vrot.lane.b32.xlu0 %v3512_v54, %s14226_s14  ;;  %v15397_v37 = vsub.f32 %v11397_v31, %v3506_v39  ;;  %12957 = vmatprep.subr.mxu1 %v3741_v63 }
 0xc32   :  { %12958 = vmatpush3.msra.mxu1 %v3741_v63 }
 0xc33   :  { %v3521_v43 = vrot.slane %v15397_v37, %v14365_v50  ;;  %12959 = vmatprep.subr.mxu1 %v3748_v13 }
 0xc34   :  { %12960 = vmatpush3.msra.mxu1 %v3748_v13 }
 0xc35   :  { %3522 = vrot.lane.b32.xlu1 %v3521_v43, %s14226_s14  ;;  %v3761_v43 = vsub.f32 %v15510_v16, %v15518_v46 }
 0xc37   :  { %v3762_v62 = vand.u32 4294901760, %v3761_v43 }
 0xca3   :  { %v3514_v55 = vpop.permute.xlu0 %3513 }
 0xca4   :  { %v3516_v21 = vsel %vm674_vm11, %v15388_v27, %v3514_v55  ;;  %v3754_v27 = vsub.f32 %v15503_v44, %v15514_v5 }
 0xca5   :  { %v3529_v9 = vrot.slane %v3516_v21, %v14365_v50 }
 0xca6   :  { %v3755_v24 = vand.u32 4294901760, %v3754_v27 }
 0xca7   :  { %v3523_v10 = vpop.permute.xlu1 %3522  ;;  %v3530_v31 = vmul.f32 %v3529_v9, %v15373_v7  ;;  %v3531_v54 = vmul.f32 %v3529_v9, %v15369_v60 }
 0xca8   :  { %v3525_v12 = vsel %vm674_vm11, %v15397_v37, %v3523_v10  ;;  %12961 = vmatprep.subr.mxu1 %v3755_v24 }
 0xca9   :  { %v3535_v39 = vrot.slane %v3525_v12, %v14365_v50  ;;  %12962 = vmatpush3.msra.mxu1 %v3755_v24 }
 0xcaa   :  { %12963 = vmatprep.subr.mxu1 %v3762_v62 }
 0xcab   :  { %v3537_v26 = vadd.f32 %v3535_v39, %v3531_v54  ;;  %v3536_v37 = vadd.f32 %v3535_v39, %v3530_v31  ;;  %12964 = vmatpush3.msra.mxu1 %v3762_v62 }
 0xcac   :  { %12987 = vmatprep.subr.mxu1 %v15408_v40 }
 0xcad   :  { %v3539_v38 = vmax.f32 %v3537_v26, 0.0  ;;  %v3538_v25 = vmax.f32 %v3536_v37, 0.0 }
 0xcaf   :  { %3577 = vrot.lane.b32.xlu1 %v3539_v38, %s14226_s14  ;;  %v3568_v7 = vrot.slane %v3539_v38, 1  ;;  %3575 = vrot.lane.b32.xlu0 %v3538_v25, %s14226_s14  ;;  %v3567_v60 = vrot.slane %v3538_v25, 1  ;;  %v3555_v42 = vrot.slane %v3538_v25, 7  ;;  %v3556_v22 = vrot.slane %v3539_v38, 7 }
 0xcb1   :  { %v3557_v35 = vsel %vm69_vm0, %v3555_v42, %v3556_v22  ;;  %v3569_v59 = vsel %vm78_vm1, %v3567_v60, %v3568_v7  ;;  %v3572_v32 = vsel %vm78_vm1, %v3568_v7, 0.0 }
 0xcb2   :  { %v3573_v58 = vmul.f32 %v14301_v20, %v3569_v59  ;;  %v3574_v8 = vmul.f32 %v14320_v29, %v3572_v32 }
 0xcb3   :  { %3558 = vrot.lane.b32.xlu0 %v3555_v42, %s14225_s9  ;;  %3560 = vrot.lane.b32.xlu1 %v3557_v35, %s14225_s9 }
 0xcb7   :  { %3583 = vrot.lane.b32.xlu0 %v3573_v58, %s14227_s29  ;;  %3585 = vrot.lane.b32.xlu1 %v3574_v8, %s14227_s29 }
 0xd21   :  { %v3578_v23 = vpop.permute.xlu1 %3577  ;;  %v3576_v4 = vpop.permute.xlu0 %3575 }
 0xd25   :  { %v3559_v52 = vpop.permute.xlu0 %3558  ;;  %v3561_v55 = vpop.permute.xlu1 %3560 }
 0xd26   :  { %v3564_v3 = vsel %vm69_vm0, 0.0, %v3559_v52  ;;  %v3566_v56 = vmul.f32 %v14318_v28, %v3561_v55 }
 0xd27   :  { %v3565_v21 = vmul.f32 %v14299_v19, %v3564_v3 }
 0xd28   :  { %v3590_v9 = vsel %vm674_vm11, %v3566_v56, %v3578_v23 }
 0xd29   :  { %v3589_v63 = vsel %vm674_vm11, %v3565_v21, %v3576_v4  ;;  %v3584_v47 = vpop.permute.xlu0 %3583  ;;  %v3586_v10 = vpop.permute.xlu1 %3585 }
 0xd2a   :  { %v3591_v13 = vsel %vm747_vm12, %v3589_v63, %v3584_v47  ;;  %v3592_v12 = vsel %vm747_vm12, %v3590_v9, %v3586_v10 }
 0xd2b   :  { %v3594_v27 = vsel %vm750_vm13, %v3591_v13, 0  ;;  %v3597_v31 = vsel %vm750_vm13, %v3592_v12, 0 }
 0xd2c   :  { %v3672_v54 = vand.u32 4294901760, %v3594_v27  ;;  %v15552_v39 = vand.u32 4294901760, %v3597_v31 }
 0xd2e   :  { %v3673_v43 = vsub.f32 %v3594_v27, %v3672_v54  ;;  %v3683_v24 = vsub.f32 %v3597_v31, %v15552_v39  ;;  %12965 = vmatprep.mubr.f32.mxu1 %v3672_v54 }
 0xd2f   :  { %12966 = vmatmul.mubr.f32.vlgmr.msra.gmra.mxu1 %v15552_v39 }
 0xd30   :  { %v3684_v26 = vand.u32 4294901760, %v3683_v24  ;;  %12988 = vmatpush3.msra.mxu1 %v15408_v40  ;;  %v3674_v37 = vand.u32 4294901760, %v3673_v43 }
 0xd31   :  { %12989 = vmatprep.subr.mxu1 %v15410_v49 }
 0xd32   :  { %12990 = vmatpush3.msra.mxu1 %v15410_v49  ;;  %13003 = vmatprep.mubr.f32.mxu1 %v3674_v37  ;;  %v3675_v62 = vsub.f32 %v3673_v43, %v3674_v37  ;;  %v3685_v38 = vsub.f32 %v3683_v24, %v3684_v26 }
 0xd33   :  { %12991 = vmatprep.subr.mxu1 %v15435_v34 }
 0xd34   :  { %12992 = vmatpush3.msra.mxu1 %v15435_v34  ;;  %v3676_v25 = vand.u32 4294901760, %v3675_v62  ;;  %v3686_v7 = vand.u32 4294901760, %v3685_v38  ;;  %v11407_v38 = vld [vmem:[%s18187_s6 + $0x4] sm:$0x1] }
 0xd35   :  { %12993 = vmatprep.subr.mxu1 %v15443_v61 }
 0xd36   :  { %12994 = vmatpush3.msra.mxu1 %v15443_v61  ;;  %12946 = vmatprep.mubr.f32.mxu0 %v3676_v25 }
 0xd37   :  { %12995 = vmatprep.subr.mxu1 %v15456_v2  ;;  %12947 = vmatmul.mubr.f32.vlgmr.msra.gmra.mxu0 %v3686_v7 }
 0xd38   :  { %12969 = vmatpush3.msra.mxu0 %v15413_v18  ;;  %12996 = vmatpush3.msra.mxu1 %v15456_v2 }
 0xd39   :  { %12970 = vmatprep.subr.mxu0 %v15416_v33  ;;  %12984 = vmatprep.mubr.f32.mxu0 %v3673_v43 }
 0xd3a   :  { %12997 = vmatprep.subr.mxu1 %v15471_v6  ;;  %12971 = vmatpush3.msra.mxu0 %v15416_v33 }
 0xd3b   :  { %12998 = vmatpush3.msra.mxu1 %v15471_v6  ;;  %12972 = vmatprep.subr.mxu0 %v15441_v45 }
 0xd3c   :  { %12999 = vmatprep.subr.mxu1 %v15487_v41  ;;  %12973 = vmatpush3.msra.mxu0 %v15441_v45 }
 0xd3d   :  { %13000 = vmatpush3.msra.mxu1 %v15487_v41  ;;  %12974 = vmatprep.subr.mxu0 %v15454_v51 }
 0xd3e   :  { %13001 = vmatprep.subr.mxu1 %v15498_v15  ;;  %12975 = vmatpush3.msra.mxu0 %v15454_v51 }
 0xd3f   :  { %13002 = vmatpush3.msra.mxu1 %v15498_v15  ;;  %12976 = vmatprep.subr.mxu0 %v15469_v53 }
 0xd40   :  { %13004 = vmatmul.mubr.f32.vlgmr.msra.gmra.mxu1 %v3684_v26  ;;  %13025 = vmatprep.subr.mxu1 %v15408_v40  ;;  %v11406_v26 = vld [vmem:[%s18186_s5 + $0x4] sm:$0x1] }
 0xd41   :  { %12977 = vmatpush3.msra.mxu0 %v15469_v53  ;;  %13026 = vmatpush3.msra.mxu1 %v15408_v40 }
 0xd42   :  { %13041 = vmatprep.mubr.f32.mxu1 %v3672_v54  ;;  %12978 = vmatprep.subr.mxu0 %v15484_v17 }
 0xd43   :  { %13027 = vmatprep.subr.mxu1 %v15410_v49  ;;  %12979 = vmatpush3.msra.mxu0 %v15484_v17 }
 0xd44   :  { %13028 = vmatpush3.msra.mxu1 %v15410_v49  ;;  %12980 = vmatprep.subr.mxu0 %v15503_v44 }
 0xd45   :  { %13029 = vmatprep.subr.mxu1 %v15435_v34  ;;  %12981 = vmatpush3.msra.mxu0 %v15503_v44 }
 0xd46   :  { %13030 = vmatpush3.msra.mxu1 %v15435_v34  ;;  %12982 = vmatprep.subr.mxu0 %v15510_v16 }
 0xd47   :  { %13031 = vmatprep.subr.mxu1 %v15443_v61  ;;  %12983 = vmatpush3.msra.mxu0 %v15510_v16 }
 0xd48   :  { %13032 = vmatpush3.msra.mxu1 %v15443_v61  ;;  %12985 = vmatmul.mubr.f32.vlgmr.msra.gmra.mxu0 %v3683_v24 }
 0xd49   :  { %13006 = vmatprep.subr.mxu0 %v15421_v48  ;;  %13033 = vmatprep.subr.mxu1 %v15456_v2 }
 0xd4a   :  { %13007 = vmatpush3.msra.mxu0 %v15421_v48  ;;  %13022 = vmatprep.mubr.f32.mxu0 %v3672_v54 }
 0xd4b   :  { %13034 = vmatpush3.msra.mxu1 %v15456_v2  ;;  %13008 = vmatprep.subr.mxu0 %v15424_v57 }
 0xd4c   :  { %13035 = vmatprep.subr.mxu1 %v15471_v6  ;;  %13009 = vmatpush3.msra.mxu0 %v15424_v57 }
 0xd4d   :  { %13036 = vmatpush3.msra.mxu1 %v15471_v6  ;;  %13010 = vmatprep.subr.mxu0 %v15451_v0 }
 0xd4e   :  { %13037 = vmatprep.subr.mxu1 %v15487_v41  ;;  %13011 = vmatpush3.msra.mxu0 %v15451_v0 }
 0xd4f   :  { %13038 = vmatpush3.msra.mxu1 %v15487_v41  ;;  %13012 = vmatprep.subr.mxu0 %v15466_v1 }
 0xd50   :  { %13039 = vmatprep.subr.mxu1 %v15498_v15  ;;  %13013 = vmatpush3.msra.mxu0 %v15466_v1 }
 0xd51   :  { %13040 = vmatpush3.msra.mxu1 %v15498_v15  ;;  %13014 = vmatprep.subr.mxu0 %v15481_v11 }
 0xd52   :  { %13042 = vmatmul.mubr.f32.vlgmr.msra.gmra.mxu1 %v15552_v39  ;;  %13015 = vmatpush3.msra.mxu0 %v15481_v11 }
 0xd53   :  { %13016 = vmatprep.subr.mxu0 %v15496_v14 }
 0xd54   :  { %13017 = vmatpush3.msra.mxu0 %v15496_v14 }
 0xd55   :  { %13018 = vmatprep.subr.mxu0 %v15514_v5 }
 0xd56   :  { %13019 = vmatpush3.msra.mxu0 %v15514_v5 }
 0xd57   :  { %13020 = vmatprep.subr.mxu0 %v15518_v46 }
 0xd58   :  { %13021 = vmatpush3.msra.mxu0 %v15518_v46 }
 0xd59   :  { %13023 = vmatmul.mubr.f32.vlgmr.msra.gmra.mxu0 %v15552_v39 }
 0xdef   :  { %v12967_v49 = vpop.f32.mrf.mxu1 }
 0xdf1   :  { %v3799_v48 = vpop.f32.mrf.mxu1 }
 0xdf7   :  { %v12948_v40 = vpop.f32.mrf.mxu0 }
 0xdf8   :  { %v3806_v57 = vadd.f32 %v12967_v49, %v12948_v40 }
 0xdf9   :  { %v3678_v18 = vpop.f32.mrf.mxu0 }
 0xdfa   :  { %v3800_v61 = vadd.f32 %v3799_v48, %v3678_v18  ;;  %v11415_v18 = vld [vmem:[%s18185_s4 + $0x178] sm:$0xff] }
 0xdfb   :  { %v15659_v48 = vand.u32 4294901760, %v11415_v18 }
 0xdfd   :  { %13044 = vmatprep.subr.mxu0 %v15659_v48 }
 0xdfe   :  { %13045 = vmatpush3.msra.mxu0 %v15659_v48 }
 0xe00   :  { %v13005_v34 = vpop.f32.mrf.mxu1 }
 0xe02   :  { %v3981_v2 = vpop.f32.mrf.mxu1 }
 0xe08   :  { %v12986_v33 = vpop.f32.mrf.mxu0 }
 0xe09   :  { %v3901_v0 = vadd.f32 %v12986_v33, %v3806_v57  ;;  %v11414_v33 = vld [vmem:[%s18185_s4 + $0x170] sm:$0xff] }
 0xe0a   :  { %v3893_v45 = vpop.f32.mrf.mxu0  ;;  %v15661_v57 = vand.u32 4294901760, %v11414_v33 }
 0xe0b   :  { %v3894_v51 = vadd.f32 %v3893_v45, %v3800_v61  ;;  %v3990_v1 = vadd.f32 %v13005_v34, %v3901_v0  ;;  %v15664_v34 = vsub.f32 %v11415_v18, %v15659_v48 }
 0xe0c   :  { %v15667_v45 = vsub.f32 %v11414_v33, %v15661_v57  ;;  %13046 = vmatprep.subr.mxu0 %v15661_v57 }
 0xe0d   :  { %v3982_v17 = vadd.f32 %v3981_v2, %v3894_v51  ;;  %v15672_v61 = vand.u32 4294901760, %v15664_v34  ;;  %13047 = vmatpush3.msra.mxu0 %v15661_v57 }
 0xe0e   :  { %v15675_v0 = vand.u32 4294901760, %v15667_v45 }
 0xe0f   :  { %v4422_v51 = vsub.f32 %v15664_v34, %v15672_v61 }
 0xe10   :  { %v4429_v2 = vsub.f32 %v15667_v45, %v15675_v0 }
 0xe12   :  { %v13043_v53 = vpop.f32.mrf.mxu1 }
 0xe14   :  { %v4169_v44 = vpop.f32.mrf.mxu1 }
 0xe19   :  { %v13024_v6 = vpop.f32.mrf.mxu0 }
 0xe1a   :  { %v4091_v11 = vadd.f32 %v13024_v6, %v3990_v1  ;;  %v4423_v1 = vand.u32 4294901760, %v4422_v51  ;;  %v11413_v6 = vld [vmem:[%s18185_s4 + $0x168] sm:$0xff] }
 0xe1b   :  { %v4084_v41 = vpop.f32.mrf.mxu0 }
 0xe1c   :  { %v15620_v14 = vadd.f32 %v13043_v53, %v4091_v11  ;;  %v4085_v15 = vadd.f32 %v4084_v41, %v3982_v17  ;;  %v4430_v53 = vand.u32 4294901760, %v4429_v2  ;;  %13063 = vmatprep.subr.mxu1 %v4423_v1  ;;  %v15686_v11 = vand.u32 4294901760, %v11413_v6  ;;  %v11412_v17 = vld [vmem:[%s18185_s4 + $0x160] sm:$0xff] }
 0xe1d   :  { %13064 = vmatpush3.msra.mxu1 %v4423_v1 }
 0xe1e   :  { %v4189_v16 = vmul.f32 %v15620_v14, %v15620_v14  ;;  %v15624_v5 = vadd.f32 %v4169_v44, %v4085_v15  ;;  %v4180_v46 = vsel %vm626_vm10, %v15620_v14, 0.0  ;;  %13065 = vmatprep.subr.mxu1 %v4430_v53  ;;  %v15692_v41 = vsub.f32 %v11413_v6, %v15686_v11  ;;  %13048 = vmatprep.subr.mxu0 %v15686_v11  ;;  %v11411_v44 = vld [vmem:[%s18185_s4 + $0x158] sm:$0xff] }
 0xe1f   :  { %13066 = vmatpush3.msra.mxu1 %v4430_v53  ;;  %v15694_v15 = vand.u32 4294901760, %v11412_v17  ;;  %13049 = vmatpush3.msra.mxu0 %v15686_v11 }
 0xe20   :  { %v4179_v60 = vsel %vm626_vm10, %v15624_v5, 0.0  ;;  %v4188_v42 = vmul.f32 %v15624_v5, %v15624_v5  ;;  %v4191_v35 = vsel %vm626_vm10, %v4189_v16, 0.0  ;;  %v15702_v16 = vand.u32 4294901760, %v15692_v41 }
 0xe21   :  { %v4181_v22 = vadd.f32 %v4180_v46, %v4179_v60  ;;  %v15705_v46 = vsub.f32 %v11412_v17, %v15694_v15  ;;  %v15707_v60 = vand.u32 4294901760, %v11411_v44  ;;  %13050 = vmatprep.subr.mxu0 %v15694_v15 }
 0xe22   :  { %v4190_v59 = vsel %vm626_vm10, %v4188_v42, 0.0  ;;  %v11410_v42 = vld [vmem:[%s18185_s4 + $0x150] sm:$0xff]  ;;  %13051 = vmatpush3.msra.mxu0 %v15694_v15 }
 0xe23   :  { %v4182_v32 = vrot.slane %v4181_v22, 4  ;;  %v4192_v58 = vadd.f32 %v4191_v35, %v4190_v59  ;;  %v15717_v35 = vand.u32 4294901760, %v15705_v46  ;;  %v15720_v59 = vsub.f32 %v11411_v44, %v15707_v60  ;;  %13052 = vmatprep.subr.mxu0 %v15707_v60 }
 0xe24   :  { %13053 = vmatpush3.msra.mxu0 %v15707_v60 }
 0xe25   :  { %v4183_v8 = vadd.f32 %v4182_v32, %v4181_v22  ;;  %v4193_v23 = vrot.slane %v4192_v58, 4  ;;  %v4436_v22 = vsub.f32 %v15692_v41, %v15702_v16  ;;  %v15722_v32 = vand.u32 4294901760, %v11410_v42 }
 0xe27   :  { %v4184_v4 = vrot.slane %v4183_v8, 2  ;;  %v4194_v52 = vadd.f32 %v4193_v23, %v4192_v58  ;;  %v11409_v58 = vld [vmem:[%s18185_s4 + $0x148] sm:$0xff]  ;;  %v4443_v23 = vsub.f32 %v15705_v46, %v15717_v35  ;;  %13054 = vmatprep.subr.mxu0 %v15722_v32 }
 0xe28   :  { %13055 = vmatpush3.msra.mxu0 %v15722_v32 }
 0xe29   :  { %v4185_v55 = vadd.f32 %v4184_v4, %v4183_v8  ;;  %v4195_v3 = vrot.slane %v4194_v52, 2  ;;  %v4437_v8 = vand.u32 4294901760, %v4436_v22  ;;  %v15732_v4 = vand.u32 4294901760, %v15720_v59 }
 0xe2b   :  { %v4186_v56 = vrot.slane %v4185_v55, 1  ;;  %v4196_v21 = vadd.f32 %v4195_v3, %v4194_v52  ;;  %v15735_v52 = vsub.f32 %v11410_v42, %v15722_v32  ;;  %v11408_v3 = vld [vmem:[%s18185_s4 + $0x140] sm:$0xff]  ;;  %13067 = vmatprep.subr.mxu1 %v4437_v8 }
 0xe2c   :  { %13068 = vmatpush3.msra.mxu1 %v4437_v8 }
 0xe2d   :  { %v4187_v9 = vadd.f32 %v4186_v56, %v4185_v55  ;;  %v4197_v63 = vrot.slane %v4196_v21, 1  ;;  %v15738_v55 = vand.u32 4294901760, %v11409_v58 }
 0xe2f   :  { %4200 = vrot.lane.b32.xlu0 %v4187_v9, %s14225_s9  ;;  %v4198_v47 = vadd.f32 %v4197_v63, %v4196_v21  ;;  %v4444_v21 = vand.u32 4294901760, %v4443_v23  ;;  %v15747_v63 = vand.u32 4294901760, %v15735_v52  ;;  %13056 = vmatprep.subr.mxu0 %v15738_v55 }
 0xe30   :  { %13057 = vmatpush3.msra.mxu0 %v15738_v55 }
 0xe31   :  { %4206 = vrot.lane.b32.xlu1 %v4198_v47, %s14225_s9  ;;  %13069 = vmatprep.subr.mxu1 %v4444_v21 }
 0xe32   :  { %13070 = vmatpush3.msra.mxu1 %v4444_v21 }
 0xea1   :  { %v4201_v10 = vpop.permute.xlu0 %4200 }
 0xea2   :  { %v4203_v13 = vadd.f32 %v4201_v10, %v4187_v9  ;;  %v4450_v9 = vsub.f32 %v15720_v59, %v15732_v4 }
 0xea3   :  { %v4207_v12 = vpop.permute.xlu1 %4206 }
 0xea4   :  { %v4204_v27 = vmul.f32 0.03125, %v4203_v13  ;;  %v4209_v31 = vadd.f32 %v4207_v12, %v4198_v47  ;;  %v15749_v47 = vand.u32 4294901760, %v11408_v3  ;;  %v15754_v13 = vsub.f32 %v11409_v58, %v15738_v55 }
 0xea6   :  { %v4211_v54 = vmul.f32 %v4204_v27, %v4204_v27  ;;  %v4210_v39 = vmul.f32 0.03125, %v4209_v31  ;;  %v4457_v31 = vsub.f32 %v15735_v52, %v15747_v63  ;;  %13058 = vmatprep.subr.mxu0 %v15749_v47 }
 0xea7   :  { %13059 = vmatpush3.msra.mxu0 %v15749_v47 }
 0xea8   :  { %v4212_v43 = vsub.f32 %v4210_v39, %v4211_v54  ;;  %v15761_v54 = vsub.f32 %v11408_v3, %v15749_v47  ;;  %v15765_v39 = vand.u32 4294901760, %v15754_v13  ;;  %13082 = vmatprep.subr.mxu0 %v15664_v34 }
 0xeaa   :  { %v4213_v24 = vadd.f32 1e-05, %v4212_v43 }
 0xeac   :  { %14200 = vrsqrt.f32 %v4213_v24  ;;  %v4458_v24 = vand.u32 4294901760, %v4457_v31 }
 0xeb9   :  { %v14201_v37 = vpop.eup %14200 }
 0xeba   :  { %v15639_v62 = vmul.f32 %v14201_v37, %v11406_v26  ;;  %v15769_v26 = vand.u32 4294901760, %v15761_v54 }
 0xebc   :  { %v4222_v25 = vrot.slane %v15639_v62, %v14365_v50  ;;  %v4216_v7 = vmul.f32 %v15639_v62, %v4204_v27  ;;  %v4451_v27 = vand.u32 4294901760, %v4450_v9 }
 0xebe   :  { %4223 = vrot.lane.b32.xlu0 %v4222_v25, %s14226_s14  ;;  %v15648_v40 = vsub.f32 %v11407_v38, %v4216_v7  ;;  %13071 = vmatprep.subr.mxu1 %v4451_v27 }
 0xebf   :  { %13072 = vmatpush3.msra.mxu1 %v4451_v27 }
 0xec0   :  { %v4231_v49 = vrot.slane %v15648_v40, %v14365_v50  ;;  %13073 = vmatprep.subr.mxu1 %v4458_v24 }
 0xec1   :  { %13074 = vmatpush3.msra.mxu1 %v4458_v24 }
 0xec2   :  { %4232 = vrot.lane.b32.xlu1 %v4231_v49, %s14226_s14  ;;  %v4471_v49 = vsub.f32 %v15761_v54, %v15769_v26 }
 0xec4   :  { %v4472_v51 = vand.u32 4294901760, %v4471_v49 }
 0xf30   :  { %v4224_v56 = vpop.permute.xlu0 %4223 }
 0xf31   :  { %v4226_v10 = vsel %vm674_vm11, %v15639_v62, %v4224_v56  ;;  %v4464_v62 = vsub.f32 %v15754_v13, %v15765_v39 }
 0xf32   :  { %v4239_v12 = vrot.slane %v4226_v10, %v14365_v50 }
 0xf33   :  { %v4465_v18 = vand.u32 4294901760, %v4464_v62 }
 0xf34   :  { %v4233_v43 = vpop.permute.xlu1 %4232  ;;  %v4240_v38 = vmul.f32 %v4239_v12, %v15624_v5  ;;  %v4241_v25 = vmul.f32 %v4239_v12, %v15620_v14 }
 0xf35   :  { %v4235_v37 = vsel %vm674_vm11, %v15648_v40, %v4233_v43  ;;  %13075 = vmatprep.subr.mxu1 %v4465_v18 }
 0xf36   :  { %v4245_v7 = vrot.slane %v4235_v37, %v14365_v50  ;;  %13076 = vmatpush3.msra.mxu1 %v4465_v18 }
 0xf37   :  { %13077 = vmatprep.subr.mxu1 %v4472_v51 }
 0xf38   :  { %v4247_v33 = vadd.f32 %v4245_v7, %v4241_v25  ;;  %v4246_v40 = vadd.f32 %v4245_v7, %v4240_v38  ;;  %13078 = vmatpush3.msra.mxu1 %v4472_v51 }
 0xf39   :  { %13101 = vmatprep.subr.mxu1 %v15659_v48 }
 0xf3a   :  { %v4249_v2 = vmax.f32 %v4247_v33, 0.0  ;;  %v4248_v1 = vmax.f32 %v4246_v40, 0.0 }
 0xf3c   :  { %4287 = vrot.lane.b32.xlu1 %v4249_v2, %s14226_s14  ;;  %v4278_v5 = vrot.slane %v4249_v2, 1  ;;  %4285 = vrot.lane.b32.xlu0 %v4248_v1, %s14226_s14  ;;  %v4277_v14 = vrot.slane %v4248_v1, 1  ;;  %v4265_v53 = vrot.slane %v4248_v1, 7  ;;  %v4266_v6 = vrot.slane %v4249_v2, 7 }
 0xf3e   :  { %v4267_v17 = vsel %vm69_vm0, %v4265_v53, %v4266_v6  ;;  %v4279_v44 = vsel %vm78_vm1, %v4277_v14, %v4278_v5  ;;  %v4282_v42 = vsel %vm78_vm1, %v4278_v5, 0.0 }
 0xf3f   :  { %v4283_v22 = vmul.f32 %v14301_v20, %v4279_v44  ;;  %v4284_v58 = vmul.f32 %v14320_v29, %v4282_v42 }
 0xf40   :  { %4268 = vrot.lane.b32.xlu0 %v4265_v53, %s14225_s9  ;;  %4270 = vrot.lane.b32.xlu1 %v4267_v17, %s14225_s9 }
 0xf44   :  { %4293 = vrot.lane.b32.xlu0 %v4283_v22, %s14227_s29  ;;  %4295 = vrot.lane.b32.xlu1 %v4284_v58, %s14227_s29 }
 0xfae   :  { %v4288_v8 = vpop.permute.xlu1 %4287  ;;  %v4286_v23 = vpop.permute.xlu0 %4285 }
 0xfb2   :  { %v4269_v3 = vpop.permute.xlu0 %4268  ;;  %v4271_v56 = vpop.permute.xlu1 %4270 }
 0xfb3   :  { %v4274_v21 = vsel %vm69_vm0, 0.0, %v4269_v3  ;;  %v4276_v9 = vmul.f32 %v14318_v28, %v4271_v56 }
 0xfb4   :  { %v4275_v10 = vmul.f32 %v14299_v19, %v4274_v21 }
 0xfb5   :  { %v4300_v12 = vsel %vm674_vm11, %v4276_v9, %v4288_v8 }
 0xfb6   :  { %v4299_v27 = vsel %vm674_vm11, %v4275_v10, %v4286_v23  ;;  %v4294_v31 = vpop.permute.xlu0 %4293  ;;  %v4296_v43 = vpop.permute.xlu1 %4295 }
 0xfb7   :  { %v4301_v24 = vsel %vm747_vm12, %v4299_v27, %v4294_v31  ;;  %v4302_v37 = vsel %vm747_vm12, %v4300_v12, %v4296_v43 }
 0xfb8   :  { %v4304_v62 = vsel %vm750_vm13, %v4301_v24, 0  ;;  %v4307_v38 = vsel %vm750_vm13, %v4302_v37, 0 }
 0xfb9   :  { %v4382_v25 = vand.u32 4294901760, %v4304_v62  ;;  %v15803_v7 = vand.u32 4294901760, %v4307_v38 }
 0xfbb   :  { %v4383_v49 = vsub.f32 %v4304_v62, %v4382_v25  ;;  %v4393_v18 = vsub.f32 %v4307_v38, %v15803_v7  ;;  %13079 = vmatprep.mubr.f32.mxu1 %v4382_v25 }
 0xfbc   :  { %13080 = vmatmul.mubr.f32.vlgmr.msra.gmra.mxu1 %v15803_v7 }
 0xfbd   :  { %v4394_v33 = vand.u32 4294901760, %v4393_v18  ;;  %13102 = vmatpush3.msra.mxu1 %v15659_v48  ;;  %v4384_v40 = vand.u32 4294901760, %v4383_v49 }
 0xfbe   :  { %13103 = vmatprep.subr.mxu1 %v15661_v57 }
 0xfbf   :  { %13104 = vmatpush3.msra.mxu1 %v15661_v57  ;;  %13117 = vmatprep.mubr.f32.mxu1 %v4384_v40  ;;  %v4385_v51 = vsub.f32 %v4383_v49, %v4384_v40  ;;  %v4395_v2 = vsub.f32 %v4393_v18, %v4394_v33 }
 0xfc0   :  { %13105 = vmatprep.subr.mxu1 %v15686_v11 }
 0xfc1   :  { %13106 = vmatpush3.msra.mxu1 %v15686_v11  ;;  %v4386_v1 = vand.u32 4294901760, %v4385_v51  ;;  %v4396_v5 = vand.u32 4294901760, %v4395_v2  ;;  %v11417_v2 = vld [vmem:[%s18187_s6 + $0x5] sm:$0x1] }
 0xfc2   :  { %13107 = vmatprep.subr.mxu1 %v15694_v15 }
 0xfc3   :  { %13108 = vmatpush3.msra.mxu1 %v15694_v15  ;;  %13060 = vmatprep.mubr.f32.mxu0 %v4386_v1 }
 0xfc4   :  { %13109 = vmatprep.subr.mxu1 %v15707_v60  ;;  %13061 = vmatmul.mubr.f32.vlgmr.msra.gmra.mxu0 %v4396_v5 }
 0xfc5   :  { %13083 = vmatpush3.msra.mxu0 %v15664_v34  ;;  %13110 = vmatpush3.msra.mxu1 %v15707_v60 }
 0xfc6   :  { %13084 = vmatprep.subr.mxu0 %v15667_v45  ;;  %13098 = vmatprep.mubr.f32.mxu0 %v4383_v49 }
 0xfc7   :  { %13111 = vmatprep.subr.mxu1 %v15722_v32  ;;  %13085 = vmatpush3.msra.mxu0 %v15667_v45 }
 0xfc8   :  { %13112 = vmatpush3.msra.mxu1 %v15722_v32  ;;  %13086 = vmatprep.subr.mxu0 %v15692_v41 }
 0xfc9   :  { %13113 = vmatprep.subr.mxu1 %v15738_v55  ;;  %13087 = vmatpush3.msra.mxu0 %v15692_v41 }
 0xfca   :  { %13114 = vmatpush3.msra.mxu1 %v15738_v55  ;;  %13088 = vmatprep.subr.mxu0 %v15705_v46 }
 0xfcb   :  { %13115 = vmatprep.subr.mxu1 %v15749_v47  ;;  %13089 = vmatpush3.msra.mxu0 %v15705_v46 }
 0xfcc   :  { %13116 = vmatpush3.msra.mxu1 %v15749_v47  ;;  %13090 = vmatprep.subr.mxu0 %v15720_v59 }
 0xfcd   :  { %13118 = vmatmul.mubr.f32.vlgmr.msra.gmra.mxu1 %v4394_v33  ;;  %13139 = vmatprep.subr.mxu1 %v15659_v48  ;;  %v11416_v33 = vld [vmem:[%s18186_s5 + $0x5] sm:$0x1] }
 0xfce   :  { %13091 = vmatpush3.msra.mxu0 %v15720_v59  ;;  %13140 = vmatpush3.msra.mxu1 %v15659_v48 }
 0xfcf   :  { %13155 = vmatprep.mubr.f32.mxu1 %v4382_v25  ;;  %13092 = vmatprep.subr.mxu0 %v15735_v52 }
 0xfd0   :  { %13141 = vmatprep.subr.mxu1 %v15661_v57  ;;  %13093 = vmatpush3.msra.mxu0 %v15735_v52 }
 0xfd1   :  { %13142 = vmatpush3.msra.mxu1 %v15661_v57  ;;  %13094 = vmatprep.subr.mxu0 %v15754_v13 }
 0xfd2   :  { %13143 = vmatprep.subr.mxu1 %v15686_v11  ;;  %13095 = vmatpush3.msra.mxu0 %v15754_v13 }
 0xfd3   :  { %13144 = vmatpush3.msra.mxu1 %v15686_v11  ;;  %13096 = vmatprep.subr.mxu0 %v15761_v54 }
 0xfd4   :  { %13145 = vmatprep.subr.mxu1 %v15694_v15  ;;  %13097 = vmatpush3.msra.mxu0 %v15761_v54 }
 0xfd5   :  { %13146 = vmatpush3.msra.mxu1 %v15694_v15  ;;  %13099 = vmatmul.mubr.f32.vlgmr.msra.gmra.mxu0 %v4393_v18 }
 0xfd6   :  { %13120 = vmatprep.subr.mxu0 %v15672_v61  ;;  %13147 = vmatprep.subr.mxu1 %v15707_v60 }
 0xfd7   :  { %13121 = vmatpush3.msra.mxu0 %v15672_v61  ;;  %13136 = vmatprep.mubr.f32.mxu0 %v4382_v25 }
 0xfd8   :  { %13148 = vmatpush3.msra.mxu1 %v15707_v60  ;;  %13122 = vmatprep.subr.mxu0 %v15675_v0 }
 0xfd9   :  { %13149 = vmatprep.subr.mxu1 %v15722_v32  ;;  %13123 = vmatpush3.msra.mxu0 %v15675_v0 }
 0xfda   :  { %13150 = vmatpush3.msra.mxu1 %v15722_v32  ;;  %13124 = vmatprep.subr.mxu0 %v15702_v16 }
 0xfdb   :  { %13151 = vmatprep.subr.mxu1 %v15738_v55  ;;  %13125 = vmatpush3.msra.mxu0 %v15702_v16 }
 0xfdc   :  { %13152 = vmatpush3.msra.mxu1 %v15738_v55  ;;  %13126 = vmatprep.subr.mxu0 %v15717_v35 }
 0xfdd   :  { %13153 = vmatprep.subr.mxu1 %v15749_v47  ;;  %13127 = vmatpush3.msra.mxu0 %v15717_v35 }
 0xfde   :  { %13154 = vmatpush3.msra.mxu1 %v15749_v47  ;;  %13128 = vmatprep.subr.mxu0 %v15732_v4 }
 0xfdf   :  { %13156 = vmatmul.mubr.f32.vlgmr.msra.gmra.mxu1 %v15803_v7  ;;  %13129 = vmatpush3.msra.mxu0 %v15732_v4 }
 0xfe0   :  { %13130 = vmatprep.subr.mxu0 %v15747_v63 }
 0xfe1   :  { %13131 = vmatpush3.msra.mxu0 %v15747_v63 }
 0xfe2   :  { %13132 = vmatprep.subr.mxu0 %v15765_v39 }
 0xfe3   :  { %13133 = vmatpush3.msra.mxu0 %v15765_v39 }
 0xfe4   :  { %13134 = vmatprep.subr.mxu0 %v15769_v26 }
 0xfe5   :  { %13135 = vmatpush3.msra.mxu0 %v15769_v26 }
 0xfe6   :  { %13137 = vmatmul.mubr.f32.vlgmr.msra.gmra.mxu0 %v15803_v7 }
0x107c   :  { %v13081_v57 = vpop.f32.mrf.mxu1 }
0x107e   :  { %v4509_v61 = vpop.f32.mrf.mxu1 }
0x1084   :  { %v13062_v48 = vpop.f32.mrf.mxu0 }
0x1085   :  { %v4516_v0 = vadd.f32 %v13081_v57, %v13062_v48 }
0x1086   :  { %v4388_v34 = vpop.f32.mrf.mxu0 }
0x1087   :  { %v4510_v15 = vadd.f32 %v4509_v61, %v4388_v34  ;;  %v11425_v34 = vld [vmem:[%s18185_s4 + $0x1b8] sm:$0xff] }
0x1088   :  { %v15906_v61 = vand.u32 4294901760, %v11425_v34 }
0x108a   :  { %13158 = vmatprep.subr.mxu0 %v15906_v61 }
0x108b   :  { %13159 = vmatpush3.msra.mxu0 %v15906_v61 }
0x108d   :  { %v13119_v11 = vpop.f32.mrf.mxu1 }
0x108f   :  { %v4691_v60 = vpop.f32.mrf.mxu1 }
0x1095   :  { %v13100_v45 = vpop.f32.mrf.mxu0 }
0x1096   :  { %v4611_v16 = vadd.f32 %v13100_v45, %v4516_v0  ;;  %v11424_v45 = vld [vmem:[%s18185_s4 + $0x1b0] sm:$0xff] }
0x1097   :  { %v4603_v41 = vpop.f32.mrf.mxu0  ;;  %v15908_v0 = vand.u32 4294901760, %v11424_v45 }
0x1098   :  { %v4604_v46 = vadd.f32 %v4603_v41, %v4510_v15  ;;  %v4700_v35 = vadd.f32 %v13119_v11, %v4611_v16  ;;  %v15911_v11 = vsub.f32 %v11425_v34, %v15906_v61 }
0x1099   :  { %v15914_v41 = vsub.f32 %v11424_v45, %v15908_v0  ;;  %13160 = vmatprep.subr.mxu0 %v15908_v0 }
0x109a   :  { %v4692_v52 = vadd.f32 %v4691_v60, %v4604_v46  ;;  %v15919_v15 = vand.u32 4294901760, %v15911_v11  ;;  %13161 = vmatpush3.msra.mxu0 %v15908_v0 }
0x109b   :  { %v15922_v16 = vand.u32 4294901760, %v15914_v41 }
0x109c   :  { %v5134_v46 = vsub.f32 %v15911_v11, %v15919_v15 }
0x109d   :  { %v5141_v60 = vsub.f32 %v15914_v41, %v15922_v16 }
0x109f   :  { %v13157_v59 = vpop.f32.mrf.mxu1 }
0x10a1   :  { %v4879_v13 = vpop.f32.mrf.mxu1 }
0x10a6   :  { %v13138_v32 = vpop.f32.mrf.mxu0 }
0x10a7   :  { %v4801_v4 = vadd.f32 %v13138_v32, %v4700_v35  ;;  %v5135_v35 = vand.u32 4294901760, %v5134_v46  ;;  %v11423_v32 = vld [vmem:[%s18185_s4 + $0x1a8] sm:$0xff] }
0x10a8   :  { %v4794_v55 = vpop.f32.mrf.mxu0 }
0x10a9   :  { %v15871_v63 = vadd.f32 %v13157_v59, %v4801_v4  ;;  %v4795_v47 = vadd.f32 %v4794_v55, %v4692_v52  ;;  %v5142_v59 = vand.u32 4294901760, %v5141_v60  ;;  %13177 = vmatprep.subr.mxu1 %v5135_v35  ;;  %v15933_v4 = vand.u32 4294901760, %v11423_v32  ;;  %v11422_v52 = vld [vmem:[%s18185_s4 + $0x1a0] sm:$0xff] }
0x10aa   :  { %13178 = vmatpush3.msra.mxu1 %v5135_v35 }
0x10ab   :  { %v4899_v54 = vmul.f32 %v15871_v63, %v15871_v63  ;;  %v15875_v39 = vadd.f32 %v4879_v13, %v4795_v47  ;;  %v4890_v26 = vsel %vm626_vm10, %v15871_v63, 0.0  ;;  %13179 = vmatprep.subr.mxu1 %v5142_v59  ;;  %v15939_v55 = vsub.f32 %v11423_v32, %v15933_v4  ;;  %13162 = vmatprep.subr.mxu0 %v15933_v4  ;;  %v11421_v13 = vld [vmem:[%s18185_s4 + $0x198] sm:$0xff] }
0x10ac   :  { %13180 = vmatpush3.msra.mxu1 %v5142_v59  ;;  %v15941_v47 = vand.u32 4294901760, %v11422_v52  ;;  %13163 = vmatpush3.msra.mxu0 %v15933_v4 }
0x10ad   :  { %v4889_v14 = vsel %vm626_vm10, %v15875_v39, 0.0  ;;  %v4898_v53 = vmul.f32 %v15875_v39, %v15875_v39  ;;  %v4901_v17 = vsel %vm626_vm10, %v4899_v54, 0.0  ;;  %v15949_v54 = vand.u32 4294901760, %v15939_v55 }
0x10ae   :  { %v4891_v6 = vadd.f32 %v4890_v26, %v4889_v14  ;;  %v15952_v26 = vsub.f32 %v11422_v52, %v15941_v47  ;;  %v15954_v14 = vand.u32 4294901760, %v11421_v13  ;;  %13164 = vmatprep.subr.mxu0 %v15941_v47 }
0x10af   :  { %v4900_v44 = vsel %vm626_vm10, %v4898_v53, 0.0  ;;  %v11420_v53 = vld [vmem:[%s18185_s4 + $0x190] sm:$0xff]  ;;  %13165 = vmatpush3.msra.mxu0 %v15941_v47 }
0x10b0   :  { %v4892_v42 = vrot.slane %v4891_v6, 4  ;;  %v4902_v22 = vadd.f32 %v4901_v17, %v4900_v44  ;;  %v15964_v17 = vand.u32 4294901760, %v15952_v26  ;;  %v15967_v44 = vsub.f32 %v11421_v13, %v15954_v14  ;;  %13166 = vmatprep.subr.mxu0 %v15954_v14 }
0x10b1   :  { %13167 = vmatpush3.msra.mxu0 %v15954_v14 }
0x10b2   :  { %v4893_v58 = vadd.f32 %v4892_v42, %v4891_v6  ;;  %v4903_v8 = vrot.slane %v4902_v22, 4  ;;  %v5148_v6 = vsub.f32 %v15939_v55, %v15949_v54  ;;  %v15969_v42 = vand.u32 4294901760, %v11420_v53 }
0x10b4   :  { %v4894_v23 = vrot.slane %v4893_v58, 2  ;;  %v4904_v3 = vadd.f32 %v4903_v8, %v4902_v22  ;;  %v11419_v22 = vld [vmem:[%s18185_s4 + $0x188] sm:$0xff]  ;;  %v5149_v8 = vand.u32 4294901760, %v5148_v6  ;;  %13168 = vmatprep.subr.mxu0 %v15969_v42 }
0x10b5   :  { %13169 = vmatpush3.msra.mxu0 %v15969_v42 }
0x10b6   :  { %v4895_v56 = vadd.f32 %v4894_v23, %v4893_v58  ;;  %v4905_v21 = vrot.slane %v4904_v3, 2  ;;  %v5155_v23 = vsub.f32 %v15952_v26, %v15964_v17  ;;  %13181 = vmatprep.subr.mxu1 %v5149_v8 }
0x10b7   :  { %13182 = vmatpush3.msra.mxu1 %v5149_v8 }
0x10b8   :  { %v4896_v9 = vrot.slane %v4895_v56, 1  ;;  %v4906_v10 = vadd.f32 %v4905_v21, %v4904_v3  ;;  %v15979_v3 = vand.u32 4294901760, %v15967_v44 }
0x10ba   :  { %v4897_v12 = vadd.f32 %v4896_v9, %v4895_v56  ;;  %v4907_v27 = vrot.slane %v4906_v10, 1  ;;  %v15982_v56 = vsub.f32 %v11420_v53, %v15969_v42  ;;  %v15986_v9 = vand.u32 4294901760, %v11419_v22 }
0x10bc   :  { %4910 = vrot.lane.b32.xlu0 %v4897_v12, %s14225_s9  ;;  %v4908_v31 = vadd.f32 %v4907_v27, %v4906_v10  ;;  %v11418_v10 = vld [vmem:[%s18185_s4 + $0x180] sm:$0xff]  ;;  %v5156_v27 = vand.u32 4294901760, %v5155_v23  ;;  %13170 = vmatprep.subr.mxu0 %v15986_v9 }
0x10bd   :  { %13171 = vmatpush3.msra.mxu0 %v15986_v9 }
0x10be   :  { %4916 = vrot.lane.b32.xlu1 %v4908_v31, %s14225_s9  ;;  %13183 = vmatprep.subr.mxu1 %v5156_v27 }
0x10bf   :  { %13184 = vmatpush3.msra.mxu1 %v5156_v27 }
0x112e   :  { %v4911_v43 = vpop.permute.xlu0 %4910 }
0x112f   :  { %v4913_v24 = vadd.f32 %v4911_v43, %v4897_v12  ;;  %v15996_v43 = vand.u32 4294901760, %v15982_v56 }
0x1130   :  { %v4917_v37 = vpop.permute.xlu1 %4916 }
0x1131   :  { %v4914_v62 = vmul.f32 0.03125, %v4913_v24  ;;  %v4919_v38 = vadd.f32 %v4917_v37, %v4908_v31  ;;  %v5162_v31 = vsub.f32 %v15967_v44, %v15979_v3  ;;  %v15999_v24 = vsub.f32 %v11419_v22, %v15986_v9 }
0x1132   :  { %v16001_v37 = vand.u32 4294901760, %v11418_v10 }
0x1133   :  { %v4921_v25 = vmul.f32 %v4914_v62, %v4914_v62  ;;  %v4920_v7 = vmul.f32 0.03125, %v4919_v38  ;;  %v5163_v38 = vand.u32 4294901760, %v5162_v31 }
0x1134   :  { %13172 = vmatprep.subr.mxu0 %v16001_v37 }
0x1135   :  { %v4922_v49 = vsub.f32 %v4920_v7, %v4921_v25  ;;  %v5169_v25 = vsub.f32 %v15982_v56, %v15996_v43  ;;  %13185 = vmatprep.subr.mxu1 %v5163_v38  ;;  %13173 = vmatpush3.msra.mxu0 %v16001_v37 }
0x1136   :  { %13186 = vmatpush3.msra.mxu1 %v5163_v38  ;;  %13196 = vmatprep.subr.mxu0 %v15911_v11 }
0x1137   :  { %v4923_v18 = vadd.f32 1e-05, %v4922_v49  ;;  %v16010_v49 = vand.u32 4294901760, %v15999_v24 }
0x1139   :  { %14202 = vrsqrt.f32 %v4923_v18  ;;  %v16013_v18 = vsub.f32 %v11418_v10, %v16001_v37 }
0x1146   :  { %v14203_v40 = vpop.eup %14202 }
0x1147   :  { %v4925_v51 = vmul.f32 %v14203_v40, %v11416_v33 }
0x1149   :  { %v4932_v1 = vrot.slane %v4925_v51, %v14365_v50  ;;  %v4926_v5 = vmul.f32 %v4925_v51, %v4914_v62 }
0x114b   :  { %4933 = vrot.lane.b32.xlu0 %v4932_v1, %s14226_s14  ;;  %v15895_v48 = vsub.f32 %v11417_v2, %v4926_v5  ;;  %v5170_v2 = vand.u32 4294901760, %v5169_v25  ;;  %v5176_v1 = vsub.f32 %v15999_v24, %v16010_v49  ;;  %v16023_v5 = vand.u32 4294901760, %v16013_v18 }
0x114d   :  { %v4941_v57 = vrot.slane %v15895_v48, %v14365_v50  ;;  %13187 = vmatprep.subr.mxu1 %v5170_v2 }
0x114e   :  { %13188 = vmatpush3.msra.mxu1 %v5170_v2 }
0x114f   :  { %4942 = vrot.lane.b32.xlu1 %v4941_v57, %s14226_s14 }
0x11bd   :  { %v4934_v58 = vpop.permute.xlu0 %4933 }
0x11be   :  { %v4936_v21 = vsel %vm674_vm11, %v4925_v51, %v4934_v58 }
0x11bf   :  { %v4949_v12 = vrot.slane %v4936_v21, %v14365_v50 }
0x11c1   :  { %v4943_v62 = vpop.permute.xlu1 %4942  ;;  %v4950_v33 = vmul.f32 %v4949_v12, %v15875_v39  ;;  %v4951_v40 = vmul.f32 %v4949_v12, %v15871_v63  ;;  %v5177_v63 = vand.u32 4294901760, %v5176_v1  ;;  %v5183_v39 = vsub.f32 %v16013_v18, %v16023_v5 }
0x11c2   :  { %v4945_v7 = vsel %vm674_vm11, %v15895_v48, %v4943_v62 }
0x11c3   :  { %v4955_v51 = vrot.slane %v4945_v7, %v14365_v50  ;;  %13189 = vmatprep.subr.mxu1 %v5177_v63  ;;  %v5184_v46 = vand.u32 4294901760, %v5183_v39 }
0x11c4   :  { %13190 = vmatpush3.msra.mxu1 %v5177_v63 }
0x11c5   :  { %v4956_v48 = vadd.f32 %v4955_v51, %v4950_v33  ;;  %v4957_v57 = vadd.f32 %v4955_v51, %v4951_v40  ;;  %13191 = vmatprep.subr.mxu1 %v5184_v46 }
0x11c6   :  { %13192 = vmatpush3.msra.mxu1 %v5184_v46 }
0x11c7   :  { %v4958_v34 = vmax.f32 %v4956_v48, 0.0  ;;  %v4959_v45 = vmax.f32 %v4957_v57, 0.0  ;;  %13215 = vmatprep.subr.mxu1 %v15906_v61 }
0x11c9   :  { %v16029_v60 = vadd.f32 %v4958_v34, %v15269_v36  ;;  %v16032_v35 = vadd.f32 %v4959_v45, %v15272_v30 }
0x11cb   :  { %4999 = vrot.lane.b32.xlu1 %v16032_v35, %s14226_s14  ;;  %4997 = vrot.lane.b32.xlu0 %v16029_v60, %s14226_s14  ;;  %v4977_v59 = vrot.slane %v16029_v60, 7  ;;  %v4978_v32 = vrot.slane %v16032_v35, 7  ;;  %v4989_v52 = vrot.slane %v16029_v60, 1  ;;  %v4990_v36 = vrot.slane %v16032_v35, 1 }
0x11cd   :  { %v4979_v30 = vsel %vm69_vm0, %v4977_v59, %v4978_v32  ;;  %v4991_v13 = vsel %vm78_vm1, %v4989_v52, %v4990_v36  ;;  %v4994_v53 = vsel %vm78_vm1, %v4990_v36, 0.0 }
0x11ce   :  { %v4995_v6 = vmul.f32 %v14301_v20, %v4991_v13  ;;  %v4996_v22 = vmul.f32 %v14320_v29, %v4994_v53 }
0x11cf   :  { %4980 = vrot.lane.b32.xlu0 %v4977_v59, %s14225_s9  ;;  %4982 = vrot.lane.b32.xlu1 %v4979_v30, %s14225_s9 }
0x11d3   :  { %5005 = vrot.lane.b32.xlu0 %v4995_v6, %s14227_s29  ;;  %5007 = vrot.lane.b32.xlu1 %v4996_v22, %s14227_s29 }
0x123d   :  { %v5000_v58 = vpop.permute.xlu1 %4999  ;;  %v4998_v8 = vpop.permute.xlu0 %4997 }
0x1241   :  { %v4981_v23 = vpop.permute.xlu0 %4980  ;;  %v4983_v21 = vpop.permute.xlu1 %4982 }
0x1242   :  { %v4986_v10 = vsel %vm69_vm0, 0.0, %v4981_v23  ;;  %v4988_v12 = vmul.f32 %v14318_v28, %v4983_v21 }
0x1243   :  { %v4987_v27 = vmul.f32 %v14299_v19, %v4986_v10 }
0x1244   :  { %v5012_v31 = vsel %vm674_vm11, %v4988_v12, %v5000_v58 }
0x1245   :  { %v5011_v62 = vsel %vm674_vm11, %v4987_v27, %v4998_v8  ;;  %v5006_v38 = vpop.permute.xlu0 %5005  ;;  %v5008_v25 = vpop.permute.xlu1 %5007 }
0x1246   :  { %v5013_v7 = vsel %vm747_vm12, %v5011_v62, %v5006_v38  ;;  %v5014_v33 = vsel %vm747_vm12, %v5012_v31, %v5008_v25 }
0x1247   :  { %v5016_v40 = vsel %vm750_vm13, %v5013_v7, 0  ;;  %v5019_v51 = vsel %vm750_vm13, %v5014_v33, 0 }
0x1248   :  { %v5094_v2 = vand.u32 4294901760, %v5016_v40  ;;  %v16061_v1 = vand.u32 4294901760, %v5019_v51 }
0x124a   :  { %v5095_v48 = vsub.f32 %v5016_v40, %v5094_v2  ;;  %v5105_v57 = vsub.f32 %v5019_v51, %v16061_v1  ;;  %13193 = vmatprep.mubr.f32.mxu1 %v5094_v2 }
0x124b   :  { %13194 = vmatmul.mubr.f32.vlgmr.msra.gmra.mxu1 %v16061_v1 }
0x124c   :  { %v5106_v63 = vand.u32 4294901760, %v5105_v57  ;;  %13216 = vmatpush3.msra.mxu1 %v15906_v61  ;;  %v5096_v39 = vand.u32 4294901760, %v5095_v48 }
0x124d   :  { %13217 = vmatprep.subr.mxu1 %v15908_v0 }
0x124e   :  { %13218 = vmatpush3.msra.mxu1 %v15908_v0  ;;  %13231 = vmatprep.mubr.f32.mxu1 %v5096_v39  ;;  %v5097_v34 = vsub.f32 %v5095_v48, %v5096_v39  ;;  %v5107_v45 = vsub.f32 %v5105_v57, %v5106_v63 }
0x124f   :  { %13219 = vmatprep.subr.mxu1 %v15933_v4 }
0x1250   :  { %13220 = vmatpush3.msra.mxu1 %v15933_v4  ;;  %v5098_v46 = vand.u32 4294901760, %v5097_v34  ;;  %v5108_v59 = vand.u32 4294901760, %v5107_v45  ;;  %v11427_v45 = vld [vmem:[%s18187_s6 + $0x6] sm:$0x1] }
0x1251   :  { %13221 = vmatprep.subr.mxu1 %v15941_v47 }
0x1252   :  { %13222 = vmatpush3.msra.mxu1 %v15941_v47  ;;  %13174 = vmatprep.mubr.f32.mxu0 %v5098_v46 }
0x1253   :  { %13223 = vmatprep.subr.mxu1 %v15954_v14  ;;  %13175 = vmatmul.mubr.f32.vlgmr.msra.gmra.mxu0 %v5108_v59 }
0x1254   :  { %13197 = vmatpush3.msra.mxu0 %v15911_v11  ;;  %13224 = vmatpush3.msra.mxu1 %v15954_v14 }
0x1255   :  { %13198 = vmatprep.subr.mxu0 %v15914_v41  ;;  %13212 = vmatprep.mubr.f32.mxu0 %v5095_v48 }
0x1256   :  { %13225 = vmatprep.subr.mxu1 %v15969_v42  ;;  %13199 = vmatpush3.msra.mxu0 %v15914_v41 }
0x1257   :  { %13226 = vmatpush3.msra.mxu1 %v15969_v42  ;;  %13200 = vmatprep.subr.mxu0 %v15939_v55 }
0x1258   :  { %13227 = vmatprep.subr.mxu1 %v15986_v9  ;;  %13201 = vmatpush3.msra.mxu0 %v15939_v55 }
0x1259   :  { %13228 = vmatpush3.msra.mxu1 %v15986_v9  ;;  %13202 = vmatprep.subr.mxu0 %v15952_v26 }
0x125a   :  { %13229 = vmatprep.subr.mxu1 %v16001_v37  ;;  %13203 = vmatpush3.msra.mxu0 %v15952_v26 }
0x125b   :  { %13230 = vmatpush3.msra.mxu1 %v16001_v37  ;;  %13204 = vmatprep.subr.mxu0 %v15967_v44 }
0x125c   :  { %13232 = vmatmul.mubr.f32.vlgmr.msra.gmra.mxu1 %v5106_v63  ;;  %13253 = vmatprep.subr.mxu1 %v15906_v61  ;;  %v11426_v63 = vld [vmem:[%s18186_s5 + $0x6] sm:$0x1] }
0x125d   :  { %13205 = vmatpush3.msra.mxu0 %v15967_v44  ;;  %13254 = vmatpush3.msra.mxu1 %v15906_v61 }
0x125e   :  { %13269 = vmatprep.mubr.f32.mxu1 %v5094_v2  ;;  %13206 = vmatprep.subr.mxu0 %v15982_v56 }
0x125f   :  { %13255 = vmatprep.subr.mxu1 %v15908_v0  ;;  %13207 = vmatpush3.msra.mxu0 %v15982_v56 }
0x1260   :  { %13256 = vmatpush3.msra.mxu1 %v15908_v0  ;;  %13208 = vmatprep.subr.mxu0 %v15999_v24 }
0x1261   :  { %13257 = vmatprep.subr.mxu1 %v15933_v4  ;;  %13209 = vmatpush3.msra.mxu0 %v15999_v24 }
0x1262   :  { %13258 = vmatpush3.msra.mxu1 %v15933_v4  ;;  %13210 = vmatprep.subr.mxu0 %v16013_v18 }
0x1263   :  { %13259 = vmatprep.subr.mxu1 %v15941_v47  ;;  %13211 = vmatpush3.msra.mxu0 %v16013_v18 }
0x1264   :  { %13260 = vmatpush3.msra.mxu1 %v15941_v47  ;;  %13213 = vmatmul.mubr.f32.vlgmr.msra.gmra.mxu0 %v5105_v57 }
0x1265   :  { %13234 = vmatprep.subr.mxu0 %v15919_v15  ;;  %13261 = vmatprep.subr.mxu1 %v15954_v14 }
0x1266   :  { %13235 = vmatpush3.msra.mxu0 %v15919_v15  ;;  %13250 = vmatprep.mubr.f32.mxu0 %v5094_v2 }
0x1267   :  { %13262 = vmatpush3.msra.mxu1 %v15954_v14  ;;  %13236 = vmatprep.subr.mxu0 %v15922_v16 }
0x1268   :  { %13263 = vmatprep.subr.mxu1 %v15969_v42  ;;  %13237 = vmatpush3.msra.mxu0 %v15922_v16 }
0x1269   :  { %13264 = vmatpush3.msra.mxu1 %v15969_v42  ;;  %13238 = vmatprep.subr.mxu0 %v15949_v54 }
0x126a   :  { %13265 = vmatprep.subr.mxu1 %v15986_v9  ;;  %13239 = vmatpush3.msra.mxu0 %v15949_v54 }
0x126b   :  { %13266 = vmatpush3.msra.mxu1 %v15986_v9  ;;  %13240 = vmatprep.subr.mxu0 %v15964_v17 }
0x126c   :  { %13267 = vmatprep.subr.mxu1 %v16001_v37  ;;  %13241 = vmatpush3.msra.mxu0 %v15964_v17 }
0x126d   :  { %13268 = vmatpush3.msra.mxu1 %v16001_v37  ;;  %13242 = vmatprep.subr.mxu0 %v15979_v3 }
0x126e   :  { %13270 = vmatmul.mubr.f32.vlgmr.msra.gmra.mxu1 %v16061_v1  ;;  %13243 = vmatpush3.msra.mxu0 %v15979_v3 }
0x126f   :  { %13244 = vmatprep.subr.mxu0 %v15996_v43 }
0x1270   :  { %13245 = vmatpush3.msra.mxu0 %v15996_v43 }
0x1271   :  { %13246 = vmatprep.subr.mxu0 %v16010_v49 }
0x1272   :  { %13247 = vmatpush3.msra.mxu0 %v16010_v49 }
0x1273   :  { %13248 = vmatprep.subr.mxu0 %v16023_v5 }
0x1274   :  { %13249 = vmatpush3.msra.mxu0 %v16023_v5 }
0x1275   :  { %13251 = vmatmul.mubr.f32.vlgmr.msra.gmra.mxu0 %v16061_v1 }
0x130b   :  { %v13195_v0 = vpop.f32.mrf.mxu1 }
0x130d   :  { %v5221_v15 = vpop.f32.mrf.mxu1 }
0x1313   :  { %v13176_v61 = vpop.f32.mrf.mxu0 }
0x1314   :  { %v5228_v16 = vadd.f32 %v13195_v0, %v13176_v61 }
0x1315   :  { %v5100_v11 = vpop.f32.mrf.mxu0 }
0x1316   :  { %v5222_v47 = vadd.f32 %v5221_v15, %v5100_v11  ;;  %v11435_v11 = vld [vmem:[%s18185_s4 + $0x1f8] sm:$0xff] }
0x1317   :  { %v16168_v15 = vand.u32 4294901760, %v11435_v11 }
0x1319   :  { %13272 = vmatprep.subr.mxu0 %v16168_v15 }
0x131a   :  { %13273 = vmatpush3.msra.mxu0 %v16168_v15 }
0x131c   :  { %v13233_v4 = vpop.f32.mrf.mxu1 }
0x131e   :  { %v5403_v14 = vpop.f32.mrf.mxu1 }
0x1324   :  { %v13214_v41 = vpop.f32.mrf.mxu0 }
0x1325   :  { %v5323_v54 = vadd.f32 %v13214_v41, %v5228_v16  ;;  %v11434_v41 = vld [vmem:[%s18185_s4 + $0x1f0] sm:$0xff] }
0x1326   :  { %v5315_v55 = vpop.f32.mrf.mxu0  ;;  %v16170_v16 = vand.u32 4294901760, %v11434_v41 }
0x1327   :  { %v5316_v26 = vadd.f32 %v5315_v55, %v5222_v47  ;;  %v5412_v17 = vadd.f32 %v13233_v4, %v5323_v54  ;;  %v16173_v4 = vsub.f32 %v11435_v11, %v16168_v15 }
0x1328   :  { %v16176_v55 = vsub.f32 %v11434_v41, %v16170_v16  ;;  %13274 = vmatprep.subr.mxu0 %v16170_v16 }
0x1329   :  { %v5404_v56 = vadd.f32 %v5403_v14, %v5316_v26  ;;  %v16181_v47 = vand.u32 4294901760, %v16173_v4  ;;  %13275 = vmatpush3.msra.mxu0 %v16170_v16 }
0x132a   :  { %v16184_v54 = vand.u32 4294901760, %v16176_v55 }
0x132b   :  { %v5844_v26 = vsub.f32 %v16173_v4, %v16181_v47 }
0x132c   :  { %v5851_v14 = vsub.f32 %v16176_v55, %v16184_v54 }
0x132e   :  { %v13271_v44 = vpop.f32.mrf.mxu1 }
0x1330   :  { %v5591_v37 = vpop.f32.mrf.mxu1 }
0x1335   :  { %v13252_v42 = vpop.f32.mrf.mxu0 }
0x1336   :  { %v5513_v3 = vadd.f32 %v13252_v42, %v5412_v17  ;;  %v5845_v17 = vand.u32 4294901760, %v5844_v26  ;;  %v11433_v42 = vld [vmem:[%s18185_s4 + $0x1e8] sm:$0xff] }
0x1337   :  { %v5506_v9 = vpop.f32.mrf.mxu0 }
0x1338   :  { %v16129_v43 = vadd.f32 %v13271_v44, %v5513_v3  ;;  %v5507_v24 = vadd.f32 %v5506_v9, %v5404_v56  ;;  %v5852_v44 = vand.u32 4294901760, %v5851_v14  ;;  %13291 = vmatprep.subr.mxu1 %v5845_v17  ;;  %v16195_v3 = vand.u32 4294901760, %v11433_v42  ;;  %v11432_v56 = vld [vmem:[%s18185_s4 + $0x1e0] sm:$0xff] }
0x1339   :  { %13292 = vmatpush3.msra.mxu1 %v5845_v17 }
0x133a   :  { %v5611_v49 = vmul.f32 %v16129_v43, %v16129_v43  ;;  %v16133_v18 = vadd.f32 %v5591_v37, %v5507_v24  ;;  %v5602_v5 = vsel %vm626_vm10, %v16129_v43, 0.0  ;;  %13293 = vmatprep.subr.mxu1 %v5852_v44  ;;  %v16201_v9 = vsub.f32 %v11433_v42, %v16195_v3  ;;  %13276 = vmatprep.subr.mxu0 %v16195_v3  ;;  %v11431_v37 = vld [vmem:[%s18185_s4 + $0x1d8] sm:$0xff] }
0x133b   :  { %13294 = vmatpush3.msra.mxu1 %v5852_v44  ;;  %v16203_v24 = vand.u32 4294901760, %v11432_v56  ;;  %13277 = vmatpush3.msra.mxu0 %v16195_v3 }
0x133c   :  { %v5601_v32 = vsel %vm626_vm10, %v16133_v18, 0.0  ;;  %v5610_v52 = vmul.f32 %v16133_v18, %v16133_v18  ;;  %v5613_v30 = vsel %vm626_vm10, %v5611_v49, 0.0  ;;  %v16211_v49 = vand.u32 4294901760, %v16201_v9 }
0x133d   :  { %v5603_v36 = vadd.f32 %v5602_v5, %v5601_v32  ;;  %v16214_v5 = vsub.f32 %v11432_v56, %v16203_v24  ;;  %v16216_v32 = vand.u32 4294901760, %v11431_v37  ;;  %13278 = vmatprep.subr.mxu0 %v16203_v24 }
0x133e   :  { %v5612_v13 = vsel %vm626_vm10, %v5610_v52, 0.0  ;;  %v11430_v52 = vld [vmem:[%s18185_s4 + $0x1d0] sm:$0xff]  ;;  %13279 = vmatpush3.msra.mxu0 %v16203_v24 }
0x133f   :  { %v5604_v53 = vrot.slane %v5603_v36, 4  ;;  %v5614_v6 = vadd.f32 %v5613_v30, %v5612_v13  ;;  %v16226_v30 = vand.u32 4294901760, %v16214_v5  ;;  %v16229_v13 = vsub.f32 %v11431_v37, %v16216_v32  ;;  %13280 = vmatprep.subr.mxu0 %v16216_v32 }
0x1340   :  { %13281 = vmatpush3.msra.mxu0 %v16216_v32 }
0x1341   :  { %v5605_v22 = vadd.f32 %v5604_v53, %v5603_v36  ;;  %v5615_v58 = vrot.slane %v5614_v6, 4  ;;  %v5858_v36 = vsub.f32 %v16201_v9, %v16211_v49  ;;  %v16231_v53 = vand.u32 4294901760, %v11430_v52 }
0x1343   :  { %v5606_v8 = vrot.slane %v5605_v22, 2  ;;  %v5616_v23 = vadd.f32 %v5615_v58, %v5614_v6  ;;  %v11429_v6 = vld [vmem:[%s18185_s4 + $0x1c8] sm:$0xff]  ;;  %v5865_v58 = vsub.f32 %v16214_v5, %v16226_v30  ;;  %13282 = vmatprep.subr.mxu0 %v16231_v53 }
0x1344   :  { %13283 = vmatpush3.msra.mxu0 %v16231_v53 }
0x1345   :  { %v5607_v21 = vadd.f32 %v5606_v8, %v5605_v22  ;;  %v5617_v10 = vrot.slane %v5616_v23, 2  ;;  %v5859_v22 = vand.u32 4294901760, %v5858_v36  ;;  %v16241_v8 = vand.u32 4294901760, %v16229_v13 }
0x1347   :  { %v5608_v12 = vrot.slane %v5607_v21, 1  ;;  %v5618_v27 = vadd.f32 %v5617_v10, %v5616_v23  ;;  %v16244_v23 = vsub.f32 %v11430_v52, %v16231_v53  ;;  %v11428_v10 = vld [vmem:[%s18185_s4 + $0x1c0] sm:$0xff]  ;;  %13295 = vmatprep.subr.mxu1 %v5859_v22 }
0x1348   :  { %13296 = vmatpush3.msra.mxu1 %v5859_v22 }
0x1349   :  { %v5609_v31 = vadd.f32 %v5608_v12, %v5607_v21  ;;  %v5619_v62 = vrot.slane %v5618_v27, 1  ;;  %v16247_v21 = vand.u32 4294901760, %v11429_v6 }
0x134b   :  { %5622 = vrot.lane.b32.xlu0 %v5609_v31, %s14225_s9  ;;  %v5620_v38 = vadd.f32 %v5619_v62, %v5618_v27  ;;  %v5866_v27 = vand.u32 4294901760, %v5865_v58  ;;  %v16256_v62 = vand.u32 4294901760, %v16244_v23  ;;  %13284 = vmatprep.subr.mxu0 %v16247_v21 }
0x134c   :  { %13285 = vmatpush3.msra.mxu0 %v16247_v21 }
0x134d   :  { %5628 = vrot.lane.b32.xlu1 %v5620_v38, %s14225_s9  ;;  %13297 = vmatprep.subr.mxu1 %v5866_v27 }
0x134e   :  { %13298 = vmatpush3.msra.mxu1 %v5866_v27 }
0x13bd   :  { %v5623_v25 = vpop.permute.xlu0 %5622 }
0x13be   :  { %v5625_v7 = vadd.f32 %v5623_v25, %v5609_v31  ;;  %v5872_v31 = vsub.f32 %v16229_v13, %v16241_v8 }
0x13bf   :  { %v5629_v33 = vpop.permute.xlu1 %5628 }
0x13c0   :  { %v5626_v40 = vmul.f32 0.03125, %v5625_v7  ;;  %v5631_v51 = vadd.f32 %v5629_v33, %v5620_v38  ;;  %v16258_v38 = vand.u32 4294901760, %v11428_v10  ;;  %v16263_v7 = vsub.f32 %v11429_v6, %v16247_v21 }
0x13c2   :  { %v5633_v2 = vmul.f32 %v5626_v40, %v5626_v40  ;;  %v5632_v1 = vmul.f32 0.03125, %v5631_v51  ;;  %v5879_v51 = vsub.f32 %v16244_v23, %v16256_v62  ;;  %13286 = vmatprep.subr.mxu0 %v16258_v38 }
0x13c3   :  { %13287 = vmatpush3.msra.mxu0 %v16258_v38 }
0x13c4   :  { %v5634_v48 = vsub.f32 %v5632_v1, %v5633_v2  ;;  %v16270_v2 = vsub.f32 %v11428_v10, %v16258_v38  ;;  %v16274_v1 = vand.u32 4294901760, %v16263_v7  ;;  %13310 = vmatprep.subr.mxu0 %v16173_v4 }
0x13c6   :  { %v5635_v57 = vadd.f32 1e-05, %v5634_v48 }
0x13c8   :  { %14204 = vrsqrt.f32 %v5635_v57  ;;  %v5880_v57 = vand.u32 4294901760, %v5879_v51 }
0x13d5   :  { %v14205_v39 = vpop.eup %14204 }
0x13d6   :  { %v16148_v34 = vmul.f32 %v14205_v39, %v11426_v63  ;;  %v16278_v63 = vand.u32 4294901760, %v16270_v2 }
0x13d8   :  { %v5644_v46 = vrot.slane %v16148_v34, %v14365_v50  ;;  %v5638_v59 = vmul.f32 %v16148_v34, %v5626_v40  ;;  %v5873_v40 = vand.u32 4294901760, %v5872_v31 }
0x13da   :  { %5645 = vrot.lane.b32.xlu0 %v5644_v46, %s14226_s14  ;;  %v16157_v61 = vsub.f32 %v11427_v45, %v5638_v59  ;;  %13299 = vmatprep.subr.mxu1 %v5873_v40 }
0x13db   :  { %13300 = vmatpush3.msra.mxu1 %v5873_v40 }
0x13dc   :  { %v5653_v0 = vrot.slane %v16157_v61, %v14365_v50  ;;  %13301 = vmatprep.subr.mxu1 %v5880_v57 }
0x13dd   :  { %13302 = vmatpush3.msra.mxu1 %v5880_v57 }
0x13de   :  { %5654 = vrot.lane.b32.xlu1 %v5653_v0, %s14226_s14  ;;  %v5893_v0 = vsub.f32 %v16270_v2, %v16278_v63 }
0x13e0   :  { %v5894_v26 = vand.u32 4294901760, %v5893_v0 }
0x144c   :  { %v5646_v12 = vpop.permute.xlu0 %5645 }
0x144d   :  { %v5648_v25 = vsel %vm674_vm11, %v16148_v34, %v5646_v12  ;;  %v5886_v34 = vsub.f32 %v16263_v7, %v16274_v1 }
0x144e   :  { %v5661_v33 = vrot.slane %v5648_v25, %v14365_v50 }
0x144f   :  { %v5887_v11 = vand.u32 4294901760, %v5886_v34 }
0x1450   :  { %v5655_v48 = vpop.permute.xlu1 %5654  ;;  %v5662_v45 = vmul.f32 %v5661_v33, %v16133_v18  ;;  %v5663_v46 = vmul.f32 %v5661_v33, %v16129_v43 }
0x1451   :  { %v5657_v39 = vsel %vm674_vm11, %v16157_v61, %v5655_v48  ;;  %13303 = vmatprep.subr.mxu1 %v5887_v11 }
0x1452   :  { %v5667_v59 = vrot.slane %v5657_v39, %v14365_v50  ;;  %13304 = vmatpush3.msra.mxu1 %v5887_v11 }
0x1453   :  { %13305 = vmatprep.subr.mxu1 %v5894_v26 }
0x1454   :  { %v5669_v41 = vadd.f32 %v5667_v59, %v5663_v46  ;;  %v5668_v61 = vadd.f32 %v5667_v59, %v5662_v45  ;;  %13306 = vmatpush3.msra.mxu1 %v5894_v26 }
0x1455   :  { %13329 = vmatprep.subr.mxu1 %v16168_v15 }
0x1456   :  { %v5671_v14 = vmax.f32 %v5669_v41, 0.0  ;;  %v5670_v17 = vmax.f32 %v5668_v61, 0.0 }
0x1458   :  { %5709 = vrot.lane.b32.xlu1 %v5671_v14, %s14226_s14  ;;  %v5700_v18 = vrot.slane %v5671_v14, 1  ;;  %5707 = vrot.lane.b32.xlu0 %v5670_v17, %s14226_s14  ;;  %v5699_v43 = vrot.slane %v5670_v17, 1  ;;  %v5687_v44 = vrot.slane %v5670_v17, 7  ;;  %v5688_v42 = vrot.slane %v5671_v14, 7 }
0x145a   :  { %v5689_v56 = vsel %vm69_vm0, %v5687_v44, %v5688_v42  ;;  %v5701_v37 = vsel %vm78_vm1, %v5699_v43, %v5700_v18  ;;  %v5704_v52 = vsel %vm78_vm1, %v5700_v18, 0.0 }
0x145b   :  { %v5705_v36 = vmul.f32 %v14301_v20, %v5701_v37  ;;  %v5706_v6 = vmul.f32 %v14320_v29, %v5704_v52 }
0x145c   :  { %5690 = vrot.lane.b32.xlu0 %v5687_v44, %s14225_s9  ;;  %5692 = vrot.lane.b32.xlu1 %v5689_v56, %s14225_s9 }
0x1460   :  { %5715 = vrot.lane.b32.xlu0 %v5705_v36, %s14227_s29  ;;  %5717 = vrot.lane.b32.xlu1 %v5706_v6, %s14227_s29 }
0x14ca   :  { %v5710_v22 = vpop.permute.xlu1 %5709  ;;  %v5708_v58 = vpop.permute.xlu0 %5707 }
0x14ce   :  { %v5691_v10 = vpop.permute.xlu0 %5690  ;;  %v5693_v12 = vpop.permute.xlu1 %5692 }
0x14cf   :  { %v5696_v27 = vsel %vm69_vm0, 0.0, %v5691_v10  ;;  %v5698_v31 = vmul.f32 %v14318_v28, %v5693_v12 }
0x14d0   :  { %v5697_v25 = vmul.f32 %v14299_v19, %v5696_v27 }
0x14d1   :  { %v5722_v33 = vsel %vm674_vm11, %v5698_v31, %v5710_v22 }
0x14d2   :  { %v5721_v40 = vsel %vm674_vm11, %v5697_v25, %v5708_v58  ;;  %v5716_v51 = vpop.permute.xlu0 %5715  ;;  %v5718_v48 = vpop.permute.xlu1 %5717 }
0x14d3   :  { %v5723_v57 = vsel %vm747_vm12, %v5721_v40, %v5716_v51  ;;  %v5724_v39 = vsel %vm747_vm12, %v5722_v33, %v5718_v48 }
0x14d4   :  { %v5726_v34 = vsel %vm750_vm13, %v5723_v57, 0  ;;  %v5729_v45 = vsel %vm750_vm13, %v5724_v39, 0 }
0x14d5   :  { %v5804_v46 = vand.u32 4294901760, %v5726_v34  ;;  %v16312_v59 = vand.u32 4294901760, %v5729_v45 }
0x14d7   :  { %v5805_v0 = vsub.f32 %v5726_v34, %v5804_v46  ;;  %v5815_v11 = vsub.f32 %v5729_v45, %v16312_v59  ;;  %13307 = vmatprep.mubr.f32.mxu1 %v5804_v46 }
0x14d8   :  { %13308 = vmatmul.mubr.f32.vlgmr.msra.gmra.mxu1 %v16312_v59 }
0x14d9   :  { %v5816_v41 = vand.u32 4294901760, %v5815_v11  ;;  %13330 = vmatpush3.msra.mxu1 %v16168_v15  ;;  %v5806_v61 = vand.u32 4294901760, %v5805_v0 }
0x14da   :  { %13331 = vmatprep.subr.mxu1 %v16170_v16 }
0x14db   :  { %13332 = vmatpush3.msra.mxu1 %v16170_v16  ;;  %13345 = vmatprep.mubr.f32.mxu1 %v5806_v61  ;;  %v5807_v26 = vsub.f32 %v5805_v0, %v5806_v61  ;;  %v5817_v14 = vsub.f32 %v5815_v11, %v5816_v41 }
0x14dc   :  { %13333 = vmatprep.subr.mxu1 %v16195_v3 }
0x14dd   :  { %13334 = vmatpush3.msra.mxu1 %v16195_v3  ;;  %v5808_v17 = vand.u32 4294901760, %v5807_v26  ;;  %v5818_v18 = vand.u32 4294901760, %v5817_v14  ;;  %v11437_v14 = vld [vmem:[%s18187_s6 + $0x7] sm:$0x1] }
0x14de   :  { %13335 = vmatprep.subr.mxu1 %v16203_v24 }
0x14df   :  { %13336 = vmatpush3.msra.mxu1 %v16203_v24  ;;  %13288 = vmatprep.mubr.f32.mxu0 %v5808_v17 }
0x14e0   :  { %13337 = vmatprep.subr.mxu1 %v16216_v32  ;;  %13289 = vmatmul.mubr.f32.vlgmr.msra.gmra.mxu0 %v5818_v18 }
0x14e1   :  { %13311 = vmatpush3.msra.mxu0 %v16173_v4  ;;  %13338 = vmatpush3.msra.mxu1 %v16216_v32 }
0x14e2   :  { %13312 = vmatprep.subr.mxu0 %v16176_v55  ;;  %13326 = vmatprep.mubr.f32.mxu0 %v5805_v0 }
0x14e3   :  { %13339 = vmatprep.subr.mxu1 %v16231_v53  ;;  %13313 = vmatpush3.msra.mxu0 %v16176_v55 }
0x14e4   :  { %13340 = vmatpush3.msra.mxu1 %v16231_v53  ;;  %13314 = vmatprep.subr.mxu0 %v16201_v9 }
0x14e5   :  { %13341 = vmatprep.subr.mxu1 %v16247_v21  ;;  %13315 = vmatpush3.msra.mxu0 %v16201_v9 }
0x14e6   :  { %13342 = vmatpush3.msra.mxu1 %v16247_v21  ;;  %13316 = vmatprep.subr.mxu0 %v16214_v5 }
0x14e7   :  { %13343 = vmatprep.subr.mxu1 %v16258_v38  ;;  %13317 = vmatpush3.msra.mxu0 %v16214_v5 }
0x14e8   :  { %13344 = vmatpush3.msra.mxu1 %v16258_v38  ;;  %13318 = vmatprep.subr.mxu0 %v16229_v13 }
0x14e9   :  { %13346 = vmatmul.mubr.f32.vlgmr.msra.gmra.mxu1 %v5816_v41  ;;  %13367 = vmatprep.subr.mxu1 %v16168_v15  ;;  %v11436_v41 = vld [vmem:[%s18186_s5 + $0x7] sm:$0x1] }
0x14ea   :  { %13319 = vmatpush3.msra.mxu0 %v16229_v13  ;;  %13368 = vmatpush3.msra.mxu1 %v16168_v15 }
0x14eb   :  { %13383 = vmatprep.mubr.f32.mxu1 %v5804_v46  ;;  %13320 = vmatprep.subr.mxu0 %v16244_v23 }
0x14ec   :  { %13369 = vmatprep.subr.mxu1 %v16170_v16  ;;  %13321 = vmatpush3.msra.mxu0 %v16244_v23 }
0x14ed   :  { %13370 = vmatpush3.msra.mxu1 %v16170_v16  ;;  %13322 = vmatprep.subr.mxu0 %v16263_v7 }
0x14ee   :  { %13371 = vmatprep.subr.mxu1 %v16195_v3  ;;  %13323 = vmatpush3.msra.mxu0 %v16263_v7 }
0x14ef   :  { %13372 = vmatpush3.msra.mxu1 %v16195_v3  ;;  %13324 = vmatprep.subr.mxu0 %v16270_v2 }
0x14f0   :  { %13373 = vmatprep.subr.mxu1 %v16203_v24  ;;  %13325 = vmatpush3.msra.mxu0 %v16270_v2 }
0x14f1   :  { %13374 = vmatpush3.msra.mxu1 %v16203_v24  ;;  %13327 = vmatmul.mubr.f32.vlgmr.msra.gmra.mxu0 %v5815_v11 }
0x14f2   :  { %13348 = vmatprep.subr.mxu0 %v16181_v47  ;;  %13375 = vmatprep.subr.mxu1 %v16216_v32 }
0x14f3   :  { %13349 = vmatpush3.msra.mxu0 %v16181_v47  ;;  %13364 = vmatprep.mubr.f32.mxu0 %v5804_v46 }
0x14f4   :  { %13376 = vmatpush3.msra.mxu1 %v16216_v32  ;;  %13350 = vmatprep.subr.mxu0 %v16184_v54 }
0x14f5   :  { %13377 = vmatprep.subr.mxu1 %v16231_v53  ;;  %13351 = vmatpush3.msra.mxu0 %v16184_v54 }
0x14f6   :  { %13378 = vmatpush3.msra.mxu1 %v16231_v53  ;;  %13352 = vmatprep.subr.mxu0 %v16211_v49 }
0x14f7   :  { %13379 = vmatprep.subr.mxu1 %v16247_v21  ;;  %13353 = vmatpush3.msra.mxu0 %v16211_v49 }
0x14f8   :  { %13380 = vmatpush3.msra.mxu1 %v16247_v21  ;;  %13354 = vmatprep.subr.mxu0 %v16226_v30 }
0x14f9   :  { %13381 = vmatprep.subr.mxu1 %v16258_v38  ;;  %13355 = vmatpush3.msra.mxu0 %v16226_v30 }
0x14fa   :  { %13382 = vmatpush3.msra.mxu1 %v16258_v38  ;;  %13356 = vmatprep.subr.mxu0 %v16241_v8 }
0x14fb   :  { %13384 = vmatmul.mubr.f32.vlgmr.msra.gmra.mxu1 %v16312_v59  ;;  %13357 = vmatpush3.msra.mxu0 %v16241_v8 }
0x14fc   :  { %13358 = vmatprep.subr.mxu0 %v16256_v62 }
0x14fd   :  { %13359 = vmatpush3.msra.mxu0 %v16256_v62 }
0x14fe   :  { %13360 = vmatprep.subr.mxu0 %v16274_v1 }
0x14ff   :  { %13361 = vmatpush3.msra.mxu0 %v16274_v1 }
0x1500   :  { %13362 = vmatprep.subr.mxu0 %v16278_v63 }
0x1501   :  { %13363 = vmatpush3.msra.mxu0 %v16278_v63 }
0x1502   :  { %13365 = vmatmul.mubr.f32.vlgmr.msra.gmra.mxu0 %v16312_v59 }
0x1598   :  { %v13309_v16 = vpop.f32.mrf.mxu1 }
0x159a   :  { %v5931_v47 = vpop.f32.mrf.mxu1 }
0x15a0   :  { %v13290_v15 = vpop.f32.mrf.mxu0 }
0x15a1   :  { %v5938_v54 = vadd.f32 %v13309_v16, %v13290_v15 }
0x15a2   :  { %v5810_v4 = vpop.f32.mrf.mxu0 }
0x15a3   :  { %v5932_v24 = vadd.f32 %v5931_v47, %v5810_v4  ;;  %v11445_v4 = vld [vmem:[%s18185_s4 + $0x238] sm:$0xff] }
0x15a4   :  { %v16419_v47 = vand.u32 4294901760, %v11445_v4 }
0x15a6   :  { %13386 = vmatprep.subr.mxu0 %v16419_v47 }
0x15a7   :  { %13387 = vmatpush3.msra.mxu0 %v16419_v47 }
0x15a9   :  { %v13347_v3 = vpop.f32.mrf.mxu1 }
0x15ab   :  { %v6113_v32 = vpop.f32.mrf.mxu1 }
0x15b1   :  { %v13328_v55 = vpop.f32.mrf.mxu0 }
0x15b2   :  { %v6033_v49 = vadd.f32 %v13328_v55, %v5938_v54  ;;  %v11444_v55 = vld [vmem:[%s18185_s4 + $0x230] sm:$0xff] }
0x15b3   :  { %v6025_v9 = vpop.f32.mrf.mxu0  ;;  %v16421_v54 = vand.u32 4294901760, %v11444_v55 }
0x15b4   :  { %v6026_v5 = vadd.f32 %v6025_v9, %v5932_v24  ;;  %v6122_v30 = vadd.f32 %v13347_v3, %v6033_v49  ;;  %v16424_v3 = vsub.f32 %v11445_v4, %v16419_v47 }
0x15b5   :  { %v16427_v9 = vsub.f32 %v11444_v55, %v16421_v54  ;;  %13388 = vmatprep.subr.mxu0 %v16421_v54 }
0x15b6   :  { %v6114_v23 = vadd.f32 %v6113_v32, %v6026_v5  ;;  %v16432_v24 = vand.u32 4294901760, %v16424_v3  ;;  %13389 = vmatpush3.msra.mxu0 %v16421_v54 }
0x15b7   :  { %v16435_v49 = vand.u32 4294901760, %v16427_v9 }
0x15b8   :  { %v6554_v5 = vsub.f32 %v16424_v3, %v16432_v24 }
0x15b9   :  { %v6561_v32 = vsub.f32 %v16427_v9, %v16435_v49 }
0x15bb   :  { %v13385_v13 = vpop.f32.mrf.mxu1 }
0x15bd   :  { %v6301_v7 = vpop.f32.mrf.mxu1 }
0x15c2   :  { %v13366_v53 = vpop.f32.mrf.mxu0 }
0x15c3   :  { %v6223_v8 = vadd.f32 %v13366_v53, %v6122_v30  ;;  %v6555_v30 = vand.u32 4294901760, %v6554_v5  ;;  %v11443_v53 = vld [vmem:[%s18185_s4 + $0x228] sm:$0xff] }
0x15c4   :  { %v6216_v21 = vpop.f32.mrf.mxu0 }
0x15c5   :  { %v16380_v62 = vadd.f32 %v13385_v13, %v6223_v8  ;;  %v6217_v38 = vadd.f32 %v6216_v21, %v6114_v23  ;;  %v6562_v13 = vand.u32 4294901760, %v6561_v32  ;;  %13405 = vmatprep.subr.mxu1 %v6555_v30  ;;  %v16446_v8 = vand.u32 4294901760, %v11443_v53  ;;  %v11442_v23 = vld [vmem:[%s18185_s4 + $0x220] sm:$0xff] }
0x15c6   :  { %13406 = vmatpush3.msra.mxu1 %v6555_v30 }
0x15c7   :  { %v6321_v2 = vmul.f32 %v16380_v62, %v16380_v62  ;;  %v16384_v1 = vadd.f32 %v6301_v7, %v6217_v38  ;;  %v6312_v63 = vsel %vm626_vm10, %v16380_v62, 0.0  ;;  %13407 = vmatprep.subr.mxu1 %v6562_v13  ;;  %v16452_v21 = vsub.f32 %v11443_v53, %v16446_v8  ;;  %13390 = vmatprep.subr.mxu0 %v16446_v8  ;;  %v11441_v7 = vld [vmem:[%s18185_s4 + $0x218] sm:$0xff] }
0x15c8   :  { %13408 = vmatpush3.msra.mxu1 %v6562_v13  ;;  %v16454_v38 = vand.u32 4294901760, %v11442_v23  ;;  %13391 = vmatpush3.msra.mxu0 %v16446_v8 }
0x15c9   :  { %v6311_v43 = vsel %vm626_vm10, %v16384_v1, 0.0  ;;  %v6320_v44 = vmul.f32 %v16384_v1, %v16384_v1  ;;  %v6323_v56 = vsel %vm626_vm10, %v6321_v2, 0.0  ;;  %v16462_v2 = vand.u32 4294901760, %v16452_v21 }
0x15ca   :  { %v6313_v42 = vadd.f32 %v6312_v63, %v6311_v43  ;;  %v16465_v63 = vsub.f32 %v11442_v23, %v16454_v38  ;;  %v16467_v43 = vand.u32 4294901760, %v11441_v7  ;;  %13392 = vmatprep.subr.mxu0 %v16454_v38 }
0x15cb   :  { %v6322_v37 = vsel %vm626_vm10, %v6320_v44, 0.0  ;;  %v11440_v44 = vld [vmem:[%s18185_s4 + $0x210] sm:$0xff]  ;;  %13393 = vmatpush3.msra.mxu0 %v16454_v38 }
0x15cc   :  { %v6314_v52 = vrot.slane %v6313_v42, 4  ;;  %v6324_v36 = vadd.f32 %v6323_v56, %v6322_v37  ;;  %v16477_v56 = vand.u32 4294901760, %v16465_v63  ;;  %v16480_v37 = vsub.f32 %v11441_v7, %v16467_v43  ;;  %13394 = vmatprep.subr.mxu0 %v16467_v43 }
0x15cd   :  { %13395 = vmatpush3.msra.mxu0 %v16467_v43 }
0x15ce   :  { %v6315_v6 = vadd.f32 %v6314_v52, %v6313_v42  ;;  %v6325_v22 = vrot.slane %v6324_v36, 4  ;;  %v6568_v42 = vsub.f32 %v16452_v21, %v16462_v2  ;;  %v16482_v52 = vand.u32 4294901760, %v11440_v44 }
0x15d0   :  { %v6316_v58 = vrot.slane %v6315_v6, 2  ;;  %v6326_v10 = vadd.f32 %v6325_v22, %v6324_v36  ;;  %v11439_v36 = vld [vmem:[%s18185_s4 + $0x208] sm:$0xff]  ;;  %v6575_v22 = vsub.f32 %v16465_v63, %v16477_v56  ;;  %13396 = vmatprep.subr.mxu0 %v16482_v52 }
0x15d1   :  { %13397 = vmatpush3.msra.mxu0 %v16482_v52 }
0x15d2   :  { %v6317_v12 = vadd.f32 %v6316_v58, %v6315_v6  ;;  %v6327_v27 = vrot.slane %v6326_v10, 2  ;;  %v6569_v6 = vand.u32 4294901760, %v6568_v42  ;;  %v16492_v58 = vand.u32 4294901760, %v16480_v37 }
0x15d4   :  { %v6318_v31 = vrot.slane %v6317_v12, 1  ;;  %v6328_v25 = vadd.f32 %v6327_v27, %v6326_v10  ;;  %v16495_v10 = vsub.f32 %v11440_v44, %v16482_v52  ;;  %v11438_v27 = vld [vmem:[%s18185_s4 + $0x200] sm:$0xff]  ;;  %13409 = vmatprep.subr.mxu1 %v6569_v6 }
0x15d5   :  { %13410 = vmatpush3.msra.mxu1 %v6569_v6 }
0x15d6   :  { %v6319_v33 = vadd.f32 %v6318_v31, %v6317_v12  ;;  %v6329_v40 = vrot.slane %v6328_v25, 1  ;;  %v16498_v12 = vand.u32 4294901760, %v11439_v36 }
0x15d8   :  { %6332 = vrot.lane.b32.xlu0 %v6319_v33, %s14225_s9  ;;  %v6330_v51 = vadd.f32 %v6329_v40, %v6328_v25  ;;  %v6576_v25 = vand.u32 4294901760, %v6575_v22  ;;  %v16507_v40 = vand.u32 4294901760, %v16495_v10  ;;  %13398 = vmatprep.subr.mxu0 %v16498_v12 }
0x15d9   :  { %13399 = vmatpush3.msra.mxu0 %v16498_v12 }
0x15da   :  { %6338 = vrot.lane.b32.xlu1 %v6330_v51, %s14225_s9  ;;  %13411 = vmatprep.subr.mxu1 %v6576_v25 }
0x15db   :  { %13412 = vmatpush3.msra.mxu1 %v6576_v25 }
0x164a   :  { %v6333_v48 = vpop.permute.xlu0 %6332 }
0x164b   :  { %v6335_v57 = vadd.f32 %v6333_v48, %v6319_v33  ;;  %v6582_v33 = vsub.f32 %v16480_v37, %v16492_v58 }
0x164c   :  { %v6339_v39 = vpop.permute.xlu1 %6338 }
0x164d   :  { %v6336_v34 = vmul.f32 0.03125, %v6335_v57  ;;  %v6341_v45 = vadd.f32 %v6339_v39, %v6330_v51  ;;  %v16509_v51 = vand.u32 4294901760, %v11438_v27  ;;  %v16514_v57 = vsub.f32 %v11439_v36, %v16498_v12 }
0x164f   :  { %v6343_v46 = vmul.f32 %v6336_v34, %v6336_v34  ;;  %v6342_v59 = vmul.f32 0.03125, %v6341_v45  ;;  %v6589_v45 = vsub.f32 %v16495_v10, %v16507_v40  ;;  %13400 = vmatprep.subr.mxu0 %v16509_v51 }
0x1650   :  { %13401 = vmatpush3.msra.mxu0 %v16509_v51 }
0x1651   :  { %v6344_v0 = vsub.f32 %v6342_v59, %v6343_v46  ;;  %v16521_v46 = vsub.f32 %v11438_v27, %v16509_v51  ;;  %v16525_v59 = vand.u32 4294901760, %v16514_v57  ;;  %13424 = vmatprep.subr.mxu0 %v16424_v3 }
0x1653   :  { %v6345_v11 = vadd.f32 1e-05, %v6344_v0 }
0x1655   :  { %14206 = vrsqrt.f32 %v6345_v11  ;;  %v6590_v11 = vand.u32 4294901760, %v6589_v45 }
0x1662   :  { %v14207_v61 = vpop.eup %14206 }
0x1663   :  { %v16399_v26 = vmul.f32 %v14207_v61, %v11436_v41  ;;  %v16529_v41 = vand.u32 4294901760, %v16521_v46 }
0x1665   :  { %v6354_v17 = vrot.slane %v16399_v26, %v14365_v50  ;;  %v6348_v18 = vmul.f32 %v16399_v26, %v6336_v34  ;;  %v6583_v34 = vand.u32 4294901760, %v6582_v33 }
0x1667   :  { %6355 = vrot.lane.b32.xlu0 %v6354_v17, %s14226_s14  ;;  %v16408_v15 = vsub.f32 %v11437_v14, %v6348_v18  ;;  %13413 = vmatprep.subr.mxu1 %v6583_v34 }
0x1668   :  { %13414 = vmatpush3.msra.mxu1 %v6583_v34 }
0x1669   :  { %v6363_v16 = vrot.slane %v16408_v15, %v14365_v50  ;;  %13415 = vmatprep.subr.mxu1 %v6590_v11 }
0x166a   :  { %13416 = vmatpush3.msra.mxu1 %v6590_v11 }
0x166b   :  { %6364 = vrot.lane.b32.xlu1 %v6363_v16, %s14226_s14  ;;  %v6603_v16 = vsub.f32 %v16521_v46, %v16529_v41 }
0x166d   :  { %v6604_v5 = vand.u32 4294901760, %v6603_v16 }
0x16d9   :  { %v6356_v31 = vpop.permute.xlu0 %6355 }
0x16da   :  { %v6358_v48 = vsel %vm674_vm11, %v16399_v26, %v6356_v31  ;;  %v6596_v26 = vsub.f32 %v16514_v57, %v16525_v59 }
0x16db   :  { %v6371_v39 = vrot.slane %v6358_v48, %v14365_v50 }
0x16dc   :  { %v6597_v4 = vand.u32 4294901760, %v6596_v26 }
0x16dd   :  { %v6365_v0 = vpop.permute.xlu1 %6364  ;;  %v6372_v14 = vmul.f32 %v6371_v39, %v16384_v1  ;;  %v6373_v17 = vmul.f32 %v6371_v39, %v16380_v62 }
0x16de   :  { %v6367_v61 = vsel %vm674_vm11, %v16408_v15, %v6365_v0  ;;  %13417 = vmatprep.subr.mxu1 %v6597_v4 }
0x16df   :  { %v6377_v18 = vrot.slane %v6367_v61, %v14365_v50  ;;  %13418 = vmatpush3.msra.mxu1 %v6597_v4 }
0x16e0   :  { %13419 = vmatprep.subr.mxu1 %v6604_v5 }
0x16e1   :  { %v6379_v55 = vadd.f32 %v6377_v18, %v6373_v17  ;;  %v6378_v15 = vadd.f32 %v6377_v18, %v6372_v14  ;;  %13420 = vmatpush3.msra.mxu1 %v6604_v5 }
0x16e2   :  { %13443 = vmatprep.subr.mxu1 %v16419_v47 }
0x16e3   :  { %v6381_v32 = vmax.f32 %v6379_v55, 0.0  ;;  %v6380_v30 = vmax.f32 %v6378_v15, 0.0 }
0x16e5   :  { %6419 = vrot.lane.b32.xlu1 %v6381_v32, %s14226_s14  ;;  %v6410_v1 = vrot.slane %v6381_v32, 1  ;;  %6417 = vrot.lane.b32.xlu0 %v6380_v30, %s14226_s14  ;;  %v6409_v62 = vrot.slane %v6380_v30, 1  ;;  %v6397_v13 = vrot.slane %v6380_v30, 7  ;;  %v6398_v53 = vrot.slane %v6381_v32, 7 }
0x16e7   :  { %v6399_v23 = vsel %vm69_vm0, %v6397_v13, %v6398_v53  ;;  %v6411_v7 = vsel %vm78_vm1, %v6409_v62, %v6410_v1  ;;  %v6414_v44 = vsel %vm78_vm1, %v6410_v1, 0.0 }
0x16e8   :  { %v6415_v42 = vmul.f32 %v14301_v20, %v6411_v7  ;;  %v6416_v36 = vmul.f32 %v14320_v29, %v6414_v44 }
0x16e9   :  { %6400 = vrot.lane.b32.xlu0 %v6397_v13, %s14225_s9  ;;  %6402 = vrot.lane.b32.xlu1 %v6399_v23, %s14225_s9 }
0x16ed   :  { %6425 = vrot.lane.b32.xlu0 %v6415_v42, %s14227_s29  ;;  %6427 = vrot.lane.b32.xlu1 %v6416_v36, %s14227_s29 }
0x1757   :  { %v6420_v6 = vpop.permute.xlu1 %6419  ;;  %v6418_v22 = vpop.permute.xlu0 %6417 }
0x175b   :  { %v6401_v27 = vpop.permute.xlu0 %6400  ;;  %v6403_v31 = vpop.permute.xlu1 %6402 }
0x175c   :  { %v6406_v25 = vsel %vm69_vm0, 0.0, %v6401_v27  ;;  %v6408_v33 = vmul.f32 %v14318_v28, %v6403_v31 }
0x175d   :  { %v6407_v48 = vmul.f32 %v14299_v19, %v6406_v25 }
0x175e   :  { %v6432_v39 = vsel %vm674_vm11, %v6408_v33, %v6420_v6 }
0x175f   :  { %v6431_v34 = vsel %vm674_vm11, %v6407_v48, %v6418_v22  ;;  %v6426_v45 = vpop.permute.xlu0 %6425  ;;  %v6428_v0 = vpop.permute.xlu1 %6427 }
0x1760   :  { %v6433_v11 = vsel %vm747_vm12, %v6431_v34, %v6426_v45  ;;  %v6434_v61 = vsel %vm747_vm12, %v6432_v39, %v6428_v0 }
0x1761   :  { %v6436_v26 = vsel %vm750_vm13, %v6433_v11, 0  ;;  %v6439_v14 = vsel %vm750_vm13, %v6434_v61, 0 }
0x1762   :  { %v6514_v17 = vand.u32 4294901760, %v6436_v26  ;;  %v16563_v18 = vand.u32 4294901760, %v6439_v14 }
0x1764   :  { %v6515_v16 = vsub.f32 %v6436_v26, %v6514_v17  ;;  %v6525_v4 = vsub.f32 %v6439_v14, %v16563_v18  ;;  %13421 = vmatprep.mubr.f32.mxu1 %v6514_v17 }
0x1765   :  { %13422 = vmatmul.mubr.f32.vlgmr.msra.gmra.mxu1 %v16563_v18 }
0x1766   :  { %v6526_v55 = vand.u32 4294901760, %v6525_v4  ;;  %13444 = vmatpush3.msra.mxu1 %v16419_v47  ;;  %v6516_v15 = vand.u32 4294901760, %v6515_v16 }
0x1767   :  { %13445 = vmatprep.subr.mxu1 %v16421_v54 }
0x1768   :  { %13446 = vmatpush3.msra.mxu1 %v16421_v54  ;;  %13459 = vmatprep.mubr.f32.mxu1 %v6516_v15  ;;  %v6517_v5 = vsub.f32 %v6515_v16, %v6516_v15  ;;  %v6527_v32 = vsub.f32 %v6525_v4, %v6526_v55 }
0x1769   :  { %13447 = vmatprep.subr.mxu1 %v16446_v8 }
0x176a   :  { %13448 = vmatpush3.msra.mxu1 %v16446_v8  ;;  %v6518_v30 = vand.u32 4294901760, %v6517_v5  ;;  %v6528_v1 = vand.u32 4294901760, %v6527_v32  ;;  %v11447_v32 = vld [vmem:[%s18187_s6 + $0x8] sm:$0x1] }
0x176b   :  { %13449 = vmatprep.subr.mxu1 %v16454_v38 }
0x176c   :  { %13450 = vmatpush3.msra.mxu1 %v16454_v38  ;;  %13402 = vmatprep.mubr.f32.mxu0 %v6518_v30 }
0x176d   :  { %13451 = vmatprep.subr.mxu1 %v16467_v43  ;;  %13403 = vmatmul.mubr.f32.vlgmr.msra.gmra.mxu0 %v6528_v1 }
0x176e   :  { %13425 = vmatpush3.msra.mxu0 %v16424_v3  ;;  %13452 = vmatpush3.msra.mxu1 %v16467_v43 }
0x176f   :  { %13426 = vmatprep.subr.mxu0 %v16427_v9  ;;  %13440 = vmatprep.mubr.f32.mxu0 %v6515_v16 }
0x1770   :  { %13453 = vmatprep.subr.mxu1 %v16482_v52  ;;  %13427 = vmatpush3.msra.mxu0 %v16427_v9 }
0x1771   :  { %13454 = vmatpush3.msra.mxu1 %v16482_v52  ;;  %13428 = vmatprep.subr.mxu0 %v16452_v21 }
0x1772   :  { %13455 = vmatprep.subr.mxu1 %v16498_v12  ;;  %13429 = vmatpush3.msra.mxu0 %v16452_v21 }
0x1773   :  { %13456 = vmatpush3.msra.mxu1 %v16498_v12  ;;  %13430 = vmatprep.subr.mxu0 %v16465_v63 }
0x1774   :  { %13457 = vmatprep.subr.mxu1 %v16509_v51  ;;  %13431 = vmatpush3.msra.mxu0 %v16465_v63 }
0x1775   :  { %13458 = vmatpush3.msra.mxu1 %v16509_v51  ;;  %13432 = vmatprep.subr.mxu0 %v16480_v37 }
0x1776   :  { %13460 = vmatmul.mubr.f32.vlgmr.msra.gmra.mxu1 %v6526_v55  ;;  %13481 = vmatprep.subr.mxu1 %v16419_v47  ;;  %v11446_v55 = vld [vmem:[%s18186_s5 + $0x8] sm:$0x1] }
0x1777   :  { %13433 = vmatpush3.msra.mxu0 %v16480_v37  ;;  %13482 = vmatpush3.msra.mxu1 %v16419_v47 }
0x1778   :  { %13497 = vmatprep.mubr.f32.mxu1 %v6514_v17  ;;  %13434 = vmatprep.subr.mxu0 %v16495_v10 }
0x1779   :  { %13483 = vmatprep.subr.mxu1 %v16421_v54  ;;  %13435 = vmatpush3.msra.mxu0 %v16495_v10 }
0x177a   :  { %13484 = vmatpush3.msra.mxu1 %v16421_v54  ;;  %13436 = vmatprep.subr.mxu0 %v16514_v57 }
0x177b   :  { %13485 = vmatprep.subr.mxu1 %v16446_v8  ;;  %13437 = vmatpush3.msra.mxu0 %v16514_v57 }
0x177c   :  { %13486 = vmatpush3.msra.mxu1 %v16446_v8  ;;  %13438 = vmatprep.subr.mxu0 %v16521_v46 }
0x177d   :  { %13487 = vmatprep.subr.mxu1 %v16454_v38  ;;  %13439 = vmatpush3.msra.mxu0 %v16521_v46 }
0x177e   :  { %13488 = vmatpush3.msra.mxu1 %v16454_v38  ;;  %13441 = vmatmul.mubr.f32.vlgmr.msra.gmra.mxu0 %v6525_v4 }
0x177f   :  { %13462 = vmatprep.subr.mxu0 %v16432_v24  ;;  %13489 = vmatprep.subr.mxu1 %v16467_v43 }
0x1780   :  { %13463 = vmatpush3.msra.mxu0 %v16432_v24  ;;  %13478 = vmatprep.mubr.f32.mxu0 %v6514_v17 }
0x1781   :  { %13490 = vmatpush3.msra.mxu1 %v16467_v43  ;;  %13464 = vmatprep.subr.mxu0 %v16435_v49 }
0x1782   :  { %13491 = vmatprep.subr.mxu1 %v16482_v52  ;;  %13465 = vmatpush3.msra.mxu0 %v16435_v49 }
0x1783   :  { %13492 = vmatpush3.msra.mxu1 %v16482_v52  ;;  %13466 = vmatprep.subr.mxu0 %v16462_v2 }
0x1784   :  { %13493 = vmatprep.subr.mxu1 %v16498_v12  ;;  %13467 = vmatpush3.msra.mxu0 %v16462_v2 }
0x1785   :  { %13494 = vmatpush3.msra.mxu1 %v16498_v12  ;;  %13468 = vmatprep.subr.mxu0 %v16477_v56 }
0x1786   :  { %13495 = vmatprep.subr.mxu1 %v16509_v51  ;;  %13469 = vmatpush3.msra.mxu0 %v16477_v56 }
0x1787   :  { %13496 = vmatpush3.msra.mxu1 %v16509_v51  ;;  %13470 = vmatprep.subr.mxu0 %v16492_v58 }
0x1788   :  { %13498 = vmatmul.mubr.f32.vlgmr.msra.gmra.mxu1 %v16563_v18  ;;  %13471 = vmatpush3.msra.mxu0 %v16492_v58 }
0x1789   :  { %13472 = vmatprep.subr.mxu0 %v16507_v40 }
0x178a   :  { %13473 = vmatpush3.msra.mxu0 %v16507_v40 }
0x178b   :  { %13474 = vmatprep.subr.mxu0 %v16525_v59 }
0x178c   :  { %13475 = vmatpush3.msra.mxu0 %v16525_v59 }
0x178d   :  { %13476 = vmatprep.subr.mxu0 %v16529_v41 }
0x178e   :  { %13477 = vmatpush3.msra.mxu0 %v16529_v41 }
0x178f   :  { %13479 = vmatmul.mubr.f32.vlgmr.msra.gmra.mxu0 %v16563_v18 }
0x1825   :  { %v13423_v54 = vpop.f32.mrf.mxu1 }
0x1827   :  { %v6641_v24 = vpop.f32.mrf.mxu1 }
0x182d   :  { %v13404_v47 = vpop.f32.mrf.mxu0 }
0x182e   :  { %v6648_v49 = vadd.f32 %v13423_v54, %v13404_v47 }
0x182f   :  { %v6520_v3 = vpop.f32.mrf.mxu0 }
0x1830   :  { %v6642_v38 = vadd.f32 %v6641_v24, %v6520_v3  ;;  %v11455_v3 = vld [vmem:[%s18185_s4 + $0x278] sm:$0xff] }
0x1831   :  { %v16666_v24 = vand.u32 4294901760, %v11455_v3 }
0x1833   :  { %13500 = vmatprep.subr.mxu0 %v16666_v24 }
0x1834   :  { %13501 = vmatpush3.msra.mxu0 %v16666_v24 }
0x1836   :  { %v13461_v8 = vpop.f32.mrf.mxu1 }
0x1838   :  { %v6823_v43 = vpop.f32.mrf.mxu1 }
0x183e   :  { %v13442_v9 = vpop.f32.mrf.mxu0 }
0x183f   :  { %v6743_v2 = vadd.f32 %v13442_v9, %v6648_v49  ;;  %v11454_v9 = vld [vmem:[%s18185_s4 + $0x270] sm:$0xff] }
0x1840   :  { %v6735_v21 = vpop.f32.mrf.mxu0  ;;  %v16668_v49 = vand.u32 4294901760, %v11454_v9 }
0x1841   :  { %v6736_v63 = vadd.f32 %v6735_v21, %v6642_v38  ;;  %v6832_v56 = vadd.f32 %v13461_v8, %v6743_v2  ;;  %v16671_v8 = vsub.f32 %v11455_v3, %v16666_v24 }
0x1842   :  { %v16674_v21 = vsub.f32 %v11454_v9, %v16668_v49  ;;  %13502 = vmatprep.subr.mxu0 %v16668_v49 }
0x1843   :  { %v6824_v10 = vadd.f32 %v6823_v43, %v6736_v63  ;;  %v16679_v38 = vand.u32 4294901760, %v16671_v8  ;;  %13503 = vmatpush3.msra.mxu0 %v16668_v49 }
0x1844   :  { %v16682_v2 = vand.u32 4294901760, %v16674_v21 }
0x1845   :  { %v7266_v63 = vsub.f32 %v16671_v8, %v16679_v38 }
0x1846   :  { %v7273_v43 = vsub.f32 %v16674_v21, %v16682_v2 }
0x1848   :  { %v13499_v37 = vpop.f32.mrf.mxu1 }
0x184a   :  { %v7011_v57 = vpop.f32.mrf.mxu1 }
0x184f   :  { %v13480_v52 = vpop.f32.mrf.mxu0 }
0x1850   :  { %v6933_v58 = vadd.f32 %v13480_v52, %v6832_v56  ;;  %v7267_v56 = vand.u32 4294901760, %v7266_v63  ;;  %v11453_v52 = vld [vmem:[%s18185_s4 + $0x268] sm:$0xff] }
0x1851   :  { %v6926_v12 = vpop.f32.mrf.mxu0 }
0x1852   :  { %v16631_v40 = vadd.f32 %v13499_v37, %v6933_v58  ;;  %v6927_v51 = vadd.f32 %v6926_v12, %v6824_v10  ;;  %v7274_v37 = vand.u32 4294901760, %v7273_v43  ;;  %13519 = vmatprep.subr.mxu1 %v7267_v56  ;;  %v16693_v58 = vand.u32 4294901760, %v11453_v52  ;;  %v11452_v10 = vld [vmem:[%s18185_s4 + $0x260] sm:$0xff] }
0x1853   :  { %13520 = vmatpush3.msra.mxu1 %v7267_v56 }
0x1854   :  { %v7031_v46 = vmul.f32 %v16631_v40, %v16631_v40  ;;  %v16635_v59 = vadd.f32 %v7011_v57, %v6927_v51  ;;  %v7022_v41 = vsel %vm626_vm10, %v16631_v40, 0.0  ;;  %13521 = vmatprep.subr.mxu1 %v7274_v37  ;;  %v16699_v12 = vsub.f32 %v11453_v52, %v16693_v58  ;;  %13504 = vmatprep.subr.mxu0 %v16693_v58  ;;  %v11451_v57 = vld [vmem:[%s18185_s4 + $0x258] sm:$0xff] }
0x1855   :  { %13522 = vmatpush3.msra.mxu1 %v7274_v37  ;;  %v16701_v51 = vand.u32 4294901760, %v11452_v10  ;;  %13505 = vmatpush3.msra.mxu0 %v16693_v58 }
0x1856   :  { %v7021_v62 = vsel %vm626_vm10, %v16635_v59, 0.0  ;;  %v7030_v13 = vmul.f32 %v16635_v59, %v16635_v59  ;;  %v7033_v23 = vsel %vm626_vm10, %v7031_v46, 0.0  ;;  %v16709_v46 = vand.u32 4294901760, %v16699_v12 }
0x1857   :  { %v7023_v53 = vadd.f32 %v7022_v41, %v7021_v62  ;;  %v16712_v41 = vsub.f32 %v11452_v10, %v16701_v51  ;;  %v16714_v62 = vand.u32 4294901760, %v11451_v57  ;;  %13506 = vmatprep.subr.mxu0 %v16701_v51 }
0x1858   :  { %v7032_v7 = vsel %vm626_vm10, %v7030_v13, 0.0  ;;  %v11450_v13 = vld [vmem:[%s18185_s4 + $0x250] sm:$0xff]  ;;  %13507 = vmatpush3.msra.mxu0 %v16701_v51 }
0x1859   :  { %v7024_v44 = vrot.slane %v7023_v53, 4  ;;  %v7034_v42 = vadd.f32 %v7033_v23, %v7032_v7  ;;  %v16724_v23 = vand.u32 4294901760, %v16712_v41  ;;  %v16727_v7 = vsub.f32 %v11451_v57, %v16714_v62  ;;  %13508 = vmatprep.subr.mxu0 %v16714_v62 }
0x185a   :  { %13509 = vmatpush3.msra.mxu0 %v16714_v62 }
0x185b   :  { %v7025_v36 = vadd.f32 %v7024_v44, %v7023_v53  ;;  %v7035_v6 = vrot.slane %v7034_v42, 4  ;;  %v7280_v53 = vsub.f32 %v16699_v12, %v16709_v46  ;;  %v16729_v44 = vand.u32 4294901760, %v11450_v13 }
0x185d   :  { %v7026_v22 = vrot.slane %v7025_v36, 2  ;;  %v7036_v27 = vadd.f32 %v7035_v6, %v7034_v42  ;;  %v11449_v42 = vld [vmem:[%s18185_s4 + $0x248] sm:$0xff]  ;;  %v7281_v6 = vand.u32 4294901760, %v7280_v53  ;;  %13510 = vmatprep.subr.mxu0 %v16729_v44 }
0x185e   :  { %13511 = vmatpush3.msra.mxu0 %v16729_v44 }
0x185f   :  { %v7027_v31 = vadd.f32 %v7026_v22, %v7025_v36  ;;  %v7037_v25 = vrot.slane %v7036_v27, 2  ;;  %v7287_v22 = vsub.f32 %v16712_v41, %v16724_v23  ;;  %13523 = vmatprep.subr.mxu1 %v7281_v6 }
0x1860   :  { %13524 = vmatpush3.msra.mxu1 %v7281_v6 }
0x1861   :  { %v7028_v33 = vrot.slane %v7027_v31, 1  ;;  %v7038_v48 = vadd.f32 %v7037_v25, %v7036_v27  ;;  %v16739_v27 = vand.u32 4294901760, %v16727_v7 }
0x1863   :  { %v7029_v39 = vadd.f32 %v7028_v33, %v7027_v31  ;;  %v7039_v34 = vrot.slane %v7038_v48, 1  ;;  %v16742_v31 = vsub.f32 %v11450_v13, %v16729_v44  ;;  %v16746_v33 = vand.u32 4294901760, %v11449_v42 }
0x1865   :  { %7042 = vrot.lane.b32.xlu0 %v7029_v39, %s14225_s9  ;;  %v7040_v45 = vadd.f32 %v7039_v34, %v7038_v48  ;;  %v11448_v48 = vld [vmem:[%s18185_s4 + $0x240] sm:$0xff]  ;;  %v7288_v34 = vand.u32 4294901760, %v7287_v22  ;;  %13512 = vmatprep.subr.mxu0 %v16746_v33 }
0x1866   :  { %13513 = vmatpush3.msra.mxu0 %v16746_v33 }
0x1867   :  { %7048 = vrot.lane.b32.xlu1 %v7040_v45, %s14225_s9  ;;  %13525 = vmatprep.subr.mxu1 %v7288_v34 }
0x1868   :  { %13526 = vmatpush3.msra.mxu1 %v7288_v34 }
0x18d7   :  { %v7043_v0 = vpop.permute.xlu0 %7042 }
0x18d8   :  { %v7045_v11 = vadd.f32 %v7043_v0, %v7029_v39  ;;  %v16756_v0 = vand.u32 4294901760, %v16742_v31 }
0x18d9   :  { %v7049_v61 = vpop.permute.xlu1 %7048 }
0x18da   :  { %v7046_v26 = vmul.f32 0.03125, %v7045_v11  ;;  %v7051_v14 = vadd.f32 %v7049_v61, %v7040_v45  ;;  %v7294_v45 = vsub.f32 %v16727_v7, %v16739_v27  ;;  %v16759_v11 = vsub.f32 %v11449_v42, %v16746_v33 }
0x18db   :  { %v16761_v61 = vand.u32 4294901760, %v11448_v48 }
0x18dc   :  { %v7053_v17 = vmul.f32 %v7046_v26, %v7046_v26  ;;  %v7052_v18 = vmul.f32 0.03125, %v7051_v14  ;;  %v7295_v14 = vand.u32 4294901760, %v7294_v45 }
0x18dd   :  { %13514 = vmatprep.subr.mxu0 %v16761_v61 }
0x18de   :  { %v7054_v16 = vsub.f32 %v7052_v18, %v7053_v17  ;;  %v7301_v17 = vsub.f32 %v16742_v31, %v16756_v0  ;;  %13527 = vmatprep.subr.mxu1 %v7295_v14  ;;  %13515 = vmatpush3.msra.mxu0 %v16761_v61 }
0x18df   :  { %13528 = vmatpush3.msra.mxu1 %v7295_v14  ;;  %13538 = vmatprep.subr.mxu0 %v16671_v8 }
0x18e0   :  { %v7055_v4 = vadd.f32 1e-05, %v7054_v16  ;;  %v16770_v16 = vand.u32 4294901760, %v16759_v11 }
0x18e2   :  { %14208 = vrsqrt.f32 %v7055_v4  ;;  %v16773_v4 = vsub.f32 %v11448_v48, %v16761_v61 }
0x18ef   :  { %v14209_v15 = vpop.eup %14208 }
0x18f0   :  { %v7057_v5 = vmul.f32 %v14209_v15, %v11446_v55 }
0x18f2   :  { %v7064_v30 = vrot.slane %v7057_v5, %v14365_v50  ;;  %v7058_v1 = vmul.f32 %v7057_v5, %v7046_v26 }
0x18f4   :  { %7065 = vrot.lane.b32.xlu0 %v7064_v30, %s14226_s14  ;;  %v16655_v47 = vsub.f32 %v11447_v32, %v7058_v1  ;;  %v7302_v32 = vand.u32 4294901760, %v7301_v17  ;;  %v7308_v30 = vsub.f32 %v16759_v11, %v16770_v16  ;;  %v16783_v1 = vand.u32 4294901760, %v16773_v4 }
0x18f6   :  { %v7073_v54 = vrot.slane %v16655_v47, %v14365_v50  ;;  %13529 = vmatprep.subr.mxu1 %v7302_v32 }
0x18f7   :  { %13530 = vmatpush3.msra.mxu1 %v7302_v32 }
0x18f8   :  { %7074 = vrot.lane.b32.xlu1 %v7073_v54, %s14226_s14 }
0x1966   :  { %v7066_v36 = vpop.permute.xlu0 %7065 }
0x1967   :  { %v7068_v25 = vsel %vm674_vm11, %v7057_v5, %v7066_v36 }
0x1968   :  { %v7081_v39 = vrot.slane %v7068_v25, %v14365_v50 }
0x196a   :  { %v7075_v26 = vpop.permute.xlu1 %7074  ;;  %v7082_v55 = vmul.f32 %v7081_v39, %v16635_v59  ;;  %v7083_v15 = vmul.f32 %v7081_v39, %v16631_v40  ;;  %v7309_v40 = vand.u32 4294901760, %v7308_v30  ;;  %v7315_v59 = vsub.f32 %v16773_v4, %v16783_v1 }
0x196b   :  { %v7077_v18 = vsel %vm674_vm11, %v16655_v47, %v7075_v26 }
0x196c   :  { %v7087_v5 = vrot.slane %v7077_v18, %v14365_v50  ;;  %13531 = vmatprep.subr.mxu1 %v7309_v40  ;;  %v7316_v63 = vand.u32 4294901760, %v7315_v59 }
0x196d   :  { %13532 = vmatpush3.msra.mxu1 %v7309_v40 }
0x196e   :  { %v7088_v47 = vadd.f32 %v7087_v5, %v7082_v55  ;;  %v7089_v54 = vadd.f32 %v7087_v5, %v7083_v15  ;;  %13533 = vmatprep.subr.mxu1 %v7316_v63 }
0x196f   :  { %13534 = vmatpush3.msra.mxu1 %v7316_v63 }
0x1970   :  { %v7090_v3 = vmax.f32 %v7088_v47, 0.0  ;;  %v7091_v9 = vmax.f32 %v7089_v54, 0.0  ;;  %13557 = vmatprep.subr.mxu1 %v16666_v24 }
0x1972   :  { %v16789_v43 = vadd.f32 %v7090_v3, %v16029_v60  ;;  %v16792_v56 = vadd.f32 %v7091_v9, %v16032_v35 }
0x1974   :  { %7131 = vrot.lane.b32.xlu1 %v16792_v56, %s14226_s14  ;;  %7129 = vrot.lane.b32.xlu0 %v16789_v43, %s14226_s14  ;;  %v7109_v37 = vrot.slane %v16789_v43, 7  ;;  %v7110_v52 = vrot.slane %v16792_v56, 7  ;;  %v7121_v10 = vrot.slane %v16789_v43, 1  ;;  %v7122_v60 = vrot.slane %v16792_v56, 1 }
0x1976   :  { %v7111_v35 = vsel %vm69_vm0, %v7109_v37, %v7110_v52  ;;  %v7123_v57 = vsel %vm78_vm1, %v7121_v10, %v7122_v60  ;;  %v7126_v13 = vsel %vm78_vm1, %v7122_v60, 0.0 }
0x1977   :  { %v7127_v53 = vmul.f32 %v14301_v20, %v7123_v57  ;;  %v7128_v42 = vmul.f32 %v14320_v29, %v7126_v13 }
0x1978   :  { %7112 = vrot.lane.b32.xlu0 %v7109_v37, %s14225_s9  ;;  %7114 = vrot.lane.b32.xlu1 %v7111_v35, %s14225_s9 }
0x197c   :  { %7137 = vrot.lane.b32.xlu0 %v7127_v53, %s14227_s29  ;;  %7139 = vrot.lane.b32.xlu1 %v7128_v42, %s14227_s29 }
0x19e6   :  { %v7132_v36 = vpop.permute.xlu1 %7131  ;;  %v7130_v6 = vpop.permute.xlu0 %7129 }
0x19ea   :  { %v7113_v22 = vpop.permute.xlu0 %7112  ;;  %v7115_v25 = vpop.permute.xlu1 %7114 }
0x19eb   :  { %v7118_v48 = vsel %vm69_vm0, 0.0, %v7113_v22  ;;  %v7120_v39 = vmul.f32 %v14318_v28, %v7115_v25 }
0x19ec   :  { %v7119_v34 = vmul.f32 %v14299_v19, %v7118_v48 }
0x19ed   :  { %v7144_v45 = vsel %vm674_vm11, %v7120_v39, %v7132_v36 }
0x19ee   :  { %v7143_v26 = vsel %vm674_vm11, %v7119_v34, %v7130_v6  ;;  %v7138_v14 = vpop.permute.xlu0 %7137  ;;  %v7140_v17 = vpop.permute.xlu1 %7139 }
0x19ef   :  { %v7145_v18 = vsel %vm747_vm12, %v7143_v26, %v7138_v14  ;;  %v7146_v55 = vsel %vm747_vm12, %v7144_v45, %v7140_v17 }
0x19f0   :  { %v7148_v15 = vsel %vm750_vm13, %v7145_v18, 0  ;;  %v7151_v5 = vsel %vm750_vm13, %v7146_v55, 0 }
0x19f1   :  { %v7226_v32 = vand.u32 4294901760, %v7148_v15  ;;  %v16821_v30 = vand.u32 4294901760, %v7151_v5 }
0x19f3   :  { %v7227_v47 = vsub.f32 %v7148_v15, %v7226_v32  ;;  %v7237_v54 = vsub.f32 %v7151_v5, %v16821_v30  ;;  %13535 = vmatprep.mubr.f32.mxu1 %v7226_v32 }
0x19f4   :  { %13536 = vmatmul.mubr.f32.vlgmr.msra.gmra.mxu1 %v16821_v30 }
0x19f5   :  { %v7238_v40 = vand.u32 4294901760, %v7237_v54  ;;  %13558 = vmatpush3.msra.mxu1 %v16666_v24  ;;  %v7228_v59 = vand.u32 4294901760, %v7227_v47 }
0x19f6   :  { %13559 = vmatprep.subr.mxu1 %v16668_v49 }
0x19f7   :  { %13560 = vmatpush3.msra.mxu1 %v16668_v49  ;;  %13573 = vmatprep.mubr.f32.mxu1 %v7228_v59  ;;  %v7229_v3 = vsub.f32 %v7227_v47, %v7228_v59  ;;  %v7239_v9 = vsub.f32 %v7237_v54, %v7238_v40 }
0x19f8   :  { %13561 = vmatprep.subr.mxu1 %v16693_v58 }
0x19f9   :  { %13562 = vmatpush3.msra.mxu1 %v16693_v58  ;;  %v7230_v63 = vand.u32 4294901760, %v7229_v3  ;;  %v7240_v37 = vand.u32 4294901760, %v7239_v9  ;;  %v11457_v9 = vld [vmem:[%s18187_s6 + $0x9] sm:$0x1] }
0x19fa   :  { %13563 = vmatprep.subr.mxu1 %v16701_v51 }
0x19fb   :  { %13564 = vmatpush3.msra.mxu1 %v16701_v51  ;;  %13516 = vmatprep.mubr.f32.mxu0 %v7230_v63 }
0x19fc   :  { %13565 = vmatprep.subr.mxu1 %v16714_v62  ;;  %13517 = vmatmul.mubr.f32.vlgmr.msra.gmra.mxu0 %v7240_v37 }
0x19fd   :  { %13539 = vmatpush3.msra.mxu0 %v16671_v8  ;;  %13566 = vmatpush3.msra.mxu1 %v16714_v62 }
0x19fe   :  { %13540 = vmatprep.subr.mxu0 %v16674_v21  ;;  %13554 = vmatprep.mubr.f32.mxu0 %v7227_v47 }
0x19ff   :  { %13567 = vmatprep.subr.mxu1 %v16729_v44  ;;  %13541 = vmatpush3.msra.mxu0 %v16674_v21 }
0x1a00   :  { %13568 = vmatpush3.msra.mxu1 %v16729_v44  ;;  %13542 = vmatprep.subr.mxu0 %v16699_v12 }
0x1a01   :  { %13569 = vmatprep.subr.mxu1 %v16746_v33  ;;  %13543 = vmatpush3.msra.mxu0 %v16699_v12 }
0x1a02   :  { %13570 = vmatpush3.msra.mxu1 %v16746_v33  ;;  %13544 = vmatprep.subr.mxu0 %v16712_v41 }
0x1a03   :  { %13571 = vmatprep.subr.mxu1 %v16761_v61  ;;  %13545 = vmatpush3.msra.mxu0 %v16712_v41 }
0x1a04   :  { %13572 = vmatpush3.msra.mxu1 %v16761_v61  ;;  %13546 = vmatprep.subr.mxu0 %v16727_v7 }
0x1a05   :  { %13574 = vmatmul.mubr.f32.vlgmr.msra.gmra.mxu1 %v7238_v40  ;;  %13595 = vmatprep.subr.mxu1 %v16666_v24  ;;  %v11456_v40 = vld [vmem:[%s18186_s5 + $0x9] sm:$0x1] }
0x1a06   :  { %13547 = vmatpush3.msra.mxu0 %v16727_v7  ;;  %13596 = vmatpush3.msra.mxu1 %v16666_v24 }
0x1a07   :  { %13611 = vmatprep.mubr.f32.mxu1 %v7226_v32  ;;  %13548 = vmatprep.subr.mxu0 %v16742_v31 }
0x1a08   :  { %13597 = vmatprep.subr.mxu1 %v16668_v49  ;;  %13549 = vmatpush3.msra.mxu0 %v16742_v31 }
0x1a09   :  { %13598 = vmatpush3.msra.mxu1 %v16668_v49  ;;  %13550 = vmatprep.subr.mxu0 %v16759_v11 }
0x1a0a   :  { %13599 = vmatprep.subr.mxu1 %v16693_v58  ;;  %13551 = vmatpush3.msra.mxu0 %v16759_v11 }
0x1a0b   :  { %13600 = vmatpush3.msra.mxu1 %v16693_v58  ;;  %13552 = vmatprep.subr.mxu0 %v16773_v4 }
0x1a0c   :  { %13601 = vmatprep.subr.mxu1 %v16701_v51  ;;  %13553 = vmatpush3.msra.mxu0 %v16773_v4 }
0x1a0d   :  { %13602 = vmatpush3.msra.mxu1 %v16701_v51  ;;  %13555 = vmatmul.mubr.f32.vlgmr.msra.gmra.mxu0 %v7237_v54 }
0x1a0e   :  { %13576 = vmatprep.subr.mxu0 %v16679_v38  ;;  %13603 = vmatprep.subr.mxu1 %v16714_v62 }
0x1a0f   :  { %13577 = vmatpush3.msra.mxu0 %v16679_v38  ;;  %13592 = vmatprep.mubr.f32.mxu0 %v7226_v32 }
0x1a10   :  { %13604 = vmatpush3.msra.mxu1 %v16714_v62  ;;  %13578 = vmatprep.subr.mxu0 %v16682_v2 }
0x1a11   :  { %13605 = vmatprep.subr.mxu1 %v16729_v44  ;;  %13579 = vmatpush3.msra.mxu0 %v16682_v2 }
0x1a12   :  { %13606 = vmatpush3.msra.mxu1 %v16729_v44  ;;  %13580 = vmatprep.subr.mxu0 %v16709_v46 }
0x1a13   :  { %13607 = vmatprep.subr.mxu1 %v16746_v33  ;;  %13581 = vmatpush3.msra.mxu0 %v16709_v46 }
0x1a14   :  { %13608 = vmatpush3.msra.mxu1 %v16746_v33  ;;  %13582 = vmatprep.subr.mxu0 %v16724_v23 }
0x1a15   :  { %13609 = vmatprep.subr.mxu1 %v16761_v61  ;;  %13583 = vmatpush3.msra.mxu0 %v16724_v23 }
0x1a16   :  { %13610 = vmatpush3.msra.mxu1 %v16761_v61  ;;  %13584 = vmatprep.subr.mxu0 %v16739_v27 }
0x1a17   :  { %13612 = vmatmul.mubr.f32.vlgmr.msra.gmra.mxu1 %v16821_v30  ;;  %13585 = vmatpush3.msra.mxu0 %v16739_v27 }
0x1a18   :  { %13586 = vmatprep.subr.mxu0 %v16756_v0 }
0x1a19   :  { %13587 = vmatpush3.msra.mxu0 %v16756_v0 }
0x1a1a   :  { %13588 = vmatprep.subr.mxu0 %v16770_v16 }
0x1a1b   :  { %13589 = vmatpush3.msra.mxu0 %v16770_v16 }
0x1a1c   :  { %13590 = vmatprep.subr.mxu0 %v16783_v1 }
0x1a1d   :  { %13591 = vmatpush3.msra.mxu0 %v16783_v1 }
0x1a1e   :  { %13593 = vmatmul.mubr.f32.vlgmr.msra.gmra.mxu0 %v16821_v30 }
0x1ab4   :  { %v13537_v49 = vpop.f32.mrf.mxu1 }
0x1ab6   :  { %v7353_v38 = vpop.f32.mrf.mxu1 }
0x1abc   :  { %v13518_v24 = vpop.f32.mrf.mxu0 }
0x1abd   :  { %v7360_v2 = vadd.f32 %v13537_v49, %v13518_v24 }
0x1abe   :  { %v7232_v8 = vpop.f32.mrf.mxu0 }
0x1abf   :  { %v7354_v51 = vadd.f32 %v7353_v38, %v7232_v8  ;;  %v11465_v8 = vld [vmem:[%s18185_s4 + $0x2b8] sm:$0xff] }
0x1ac0   :  { %v16928_v38 = vand.u32 4294901760, %v11465_v8 }
0x1ac2   :  { %13614 = vmatprep.subr.mxu0 %v16928_v38 }
0x1ac3   :  { %13615 = vmatpush3.msra.mxu0 %v16928_v38 }
0x1ac5   :  { %v13575_v58 = vpop.f32.mrf.mxu1 }
0x1ac7   :  { %v7535_v62 = vpop.f32.mrf.mxu1 }
0x1acd   :  { %v13556_v21 = vpop.f32.mrf.mxu0 }
0x1ace   :  { %v7455_v46 = vadd.f32 %v13556_v21, %v7360_v2  ;;  %v11464_v21 = vld [vmem:[%s18185_s4 + $0x2b0] sm:$0xff] }
0x1acf   :  { %v7447_v12 = vpop.f32.mrf.mxu0  ;;  %v16930_v2 = vand.u32 4294901760, %v11464_v21 }
0x1ad0   :  { %v7448_v41 = vadd.f32 %v7447_v12, %v7354_v51  ;;  %v7544_v23 = vadd.f32 %v13575_v58, %v7455_v46  ;;  %v16933_v58 = vsub.f32 %v11465_v8, %v16928_v38 }
0x1ad1   :  { %v16936_v12 = vsub.f32 %v11464_v21, %v16930_v2  ;;  %13616 = vmatprep.subr.mxu0 %v16930_v2 }
0x1ad2   :  { %v7536_v31 = vadd.f32 %v7535_v62, %v7448_v41  ;;  %v16941_v51 = vand.u32 4294901760, %v16933_v58  ;;  %13617 = vmatpush3.msra.mxu0 %v16930_v2 }
0x1ad3   :  { %v16944_v46 = vand.u32 4294901760, %v16936_v12 }
0x1ad4   :  { %v7976_v41 = vsub.f32 %v16933_v58, %v16941_v51 }
0x1ad5   :  { %v7983_v62 = vsub.f32 %v16936_v12, %v16944_v46 }
0x1ad7   :  { %v13613_v7 = vpop.f32.mrf.mxu1 }
0x1ad9   :  { %v7723_v61 = vpop.f32.mrf.mxu1 }
0x1ade   :  { %v13594_v44 = vpop.f32.mrf.mxu0 }
0x1adf   :  { %v7645_v27 = vadd.f32 %v13594_v44, %v7544_v23  ;;  %v7977_v23 = vand.u32 4294901760, %v7976_v41  ;;  %v11463_v44 = vld [vmem:[%s18185_s4 + $0x2a8] sm:$0xff] }
0x1ae0   :  { %v7638_v33 = vpop.f32.mrf.mxu0 }
0x1ae1   :  { %v16889_v0 = vadd.f32 %v13613_v7, %v7645_v27  ;;  %v7639_v11 = vadd.f32 %v7638_v33, %v7536_v31  ;;  %v7984_v7 = vand.u32 4294901760, %v7983_v62  ;;  %13633 = vmatprep.subr.mxu1 %v7977_v23  ;;  %v16955_v27 = vand.u32 4294901760, %v11463_v44  ;;  %v11462_v31 = vld [vmem:[%s18185_s4 + $0x2a0] sm:$0xff] }
0x1ae2   :  { %13634 = vmatpush3.msra.mxu1 %v7977_v23 }
0x1ae3   :  { %v7743_v16 = vmul.f32 %v16889_v0, %v16889_v0  ;;  %v16893_v4 = vadd.f32 %v7723_v61, %v7639_v11  ;;  %v7734_v1 = vsel %vm626_vm10, %v16889_v0, 0.0  ;;  %13635 = vmatprep.subr.mxu1 %v7984_v7  ;;  %v16961_v33 = vsub.f32 %v11463_v44, %v16955_v27  ;;  %13618 = vmatprep.subr.mxu0 %v16955_v27  ;;  %v11461_v61 = vld [vmem:[%s18185_s4 + $0x298] sm:$0xff] }
0x1ae4   :  { %13636 = vmatpush3.msra.mxu1 %v7984_v7  ;;  %v16963_v11 = vand.u32 4294901760, %v11462_v31  ;;  %13619 = vmatpush3.msra.mxu0 %v16955_v27 }
0x1ae5   :  { %v7733_v52 = vsel %vm626_vm10, %v16893_v4, 0.0  ;;  %v7742_v10 = vmul.f32 %v16893_v4, %v16893_v4  ;;  %v7745_v35 = vsel %vm626_vm10, %v7743_v16, 0.0  ;;  %v16971_v16 = vand.u32 4294901760, %v16961_v33 }
0x1ae6   :  { %v7735_v60 = vadd.f32 %v7734_v1, %v7733_v52  ;;  %v16974_v1 = vsub.f32 %v11462_v31, %v16963_v11  ;;  %v16976_v52 = vand.u32 4294901760, %v11461_v61  ;;  %13620 = vmatprep.subr.mxu0 %v16963_v11 }
0x1ae7   :  { %v7744_v57 = vsel %vm626_vm10, %v7742_v10, 0.0  ;;  %v11460_v10 = vld [vmem:[%s18185_s4 + $0x290] sm:$0xff]  ;;  %13621 = vmatpush3.msra.mxu0 %v16963_v11 }
0x1ae8   :  { %v7736_v13 = vrot.slane %v7735_v60, 4  ;;  %v7746_v53 = vadd.f32 %v7745_v35, %v7744_v57  ;;  %v16986_v35 = vand.u32 4294901760, %v16974_v1  ;;  %v16989_v57 = vsub.f32 %v11461_v61, %v16976_v52  ;;  %13622 = vmatprep.subr.mxu0 %v16976_v52 }
0x1ae9   :  { %13623 = vmatpush3.msra.mxu0 %v16976_v52 }
0x1aea   :  { %v7737_v42 = vadd.f32 %v7736_v13, %v7735_v60  ;;  %v7747_v36 = vrot.slane %v7746_v53, 4  ;;  %v7990_v60 = vsub.f32 %v16961_v33, %v16971_v16  ;;  %v16991_v13 = vand.u32 4294901760, %v11460_v10 }
0x1aec   :  { %v7738_v6 = vrot.slane %v7737_v42, 2  ;;  %v7748_v22 = vadd.f32 %v7747_v36, %v7746_v53  ;;  %v11459_v53 = vld [vmem:[%s18185_s4 + $0x288] sm:$0xff]  ;;  %v7997_v36 = vsub.f32 %v16974_v1, %v16986_v35  ;;  %13624 = vmatprep.subr.mxu0 %v16991_v13 }
0x1aed   :  { %13625 = vmatpush3.msra.mxu0 %v16991_v13 }
0x1aee   :  { %v7739_v25 = vadd.f32 %v7738_v6, %v7737_v42  ;;  %v7749_v48 = vrot.slane %v7748_v22, 2  ;;  %v7991_v42 = vand.u32 4294901760, %v7990_v60  ;;  %v17001_v6 = vand.u32 4294901760, %v16989_v57 }
0x1af0   :  { %v7740_v39 = vrot.slane %v7739_v25, 1  ;;  %v7750_v34 = vadd.f32 %v7749_v48, %v7748_v22  ;;  %v17004_v22 = vsub.f32 %v11460_v10, %v16991_v13  ;;  %v11458_v48 = vld [vmem:[%s18185_s4 + $0x280] sm:$0xff]  ;;  %13637 = vmatprep.subr.mxu1 %v7991_v42 }
0x1af1   :  { %13638 = vmatpush3.msra.mxu1 %v7991_v42 }
0x1af2   :  { %v7741_v45 = vadd.f32 %v7740_v39, %v7739_v25  ;;  %v7751_v26 = vrot.slane %v7750_v34, 1  ;;  %v17007_v25 = vand.u32 4294901760, %v11459_v53 }
0x1af4   :  { %7754 = vrot.lane.b32.xlu0 %v7741_v45, %s14225_s9  ;;  %v7752_v14 = vadd.f32 %v7751_v26, %v7750_v34  ;;  %v7998_v34 = vand.u32 4294901760, %v7997_v36  ;;  %v17016_v26 = vand.u32 4294901760, %v17004_v22  ;;  %13626 = vmatprep.subr.mxu0 %v17007_v25 }
0x1af5   :  { %13627 = vmatpush3.msra.mxu0 %v17007_v25 }
0x1af6   :  { %7760 = vrot.lane.b32.xlu1 %v7752_v14, %s14225_s9  ;;  %13639 = vmatprep.subr.mxu1 %v7998_v34 }
0x1af7   :  { %13640 = vmatpush3.msra.mxu1 %v7998_v34 }
0x1b66   :  { %v7755_v17 = vpop.permute.xlu0 %7754 }
0x1b67   :  { %v7757_v18 = vadd.f32 %v7755_v17, %v7741_v45  ;;  %v8004_v45 = vsub.f32 %v16989_v57, %v17001_v6 }
0x1b68   :  { %v7761_v55 = vpop.permute.xlu1 %7760 }
0x1b69   :  { %v7758_v15 = vmul.f32 0.03125, %v7757_v18  ;;  %v7763_v5 = vadd.f32 %v7761_v55, %v7752_v14  ;;  %v17018_v14 = vand.u32 4294901760, %v11458_v48  ;;  %v17023_v18 = vsub.f32 %v11459_v53, %v17007_v25 }
0x1b6b   :  { %v7765_v32 = vmul.f32 %v7758_v15, %v7758_v15  ;;  %v7764_v30 = vmul.f32 0.03125, %v7763_v5  ;;  %v8011_v5 = vsub.f32 %v17004_v22, %v17016_v26  ;;  %13628 = vmatprep.subr.mxu0 %v17018_v14 }
0x1b6c   :  { %13629 = vmatpush3.msra.mxu0 %v17018_v14 }
0x1b6d   :  { %v7766_v47 = vsub.f32 %v7764_v30, %v7765_v32  ;;  %v17030_v32 = vsub.f32 %v11458_v48, %v17018_v14  ;;  %v17034_v30 = vand.u32 4294901760, %v17023_v18  ;;  %13652 = vmatprep.subr.mxu0 %v16933_v58 }
0x1b6f   :  { %v7767_v54 = vadd.f32 1e-05, %v7766_v47 }
0x1b71   :  { %14210 = vrsqrt.f32 %v7767_v54  ;;  %v8012_v54 = vand.u32 4294901760, %v8011_v5 }
0x1b7e   :  { %v14211_v59 = vpop.eup %14210 }
0x1b7f   :  { %v16908_v3 = vmul.f32 %v14211_v59, %v11456_v40  ;;  %v17038_v40 = vand.u32 4294901760, %v17030_v32 }
0x1b81   :  { %v7776_v63 = vrot.slane %v16908_v3, %v14365_v50  ;;  %v7770_v37 = vmul.f32 %v16908_v3, %v7758_v15  ;;  %v8005_v15 = vand.u32 4294901760, %v8004_v45 }
0x1b83   :  { %7777 = vrot.lane.b32.xlu0 %v7776_v63, %s14226_s14  ;;  %v16917_v24 = vsub.f32 %v11457_v9, %v7770_v37  ;;  %13641 = vmatprep.subr.mxu1 %v8005_v15 }
0x1b84   :  { %13642 = vmatpush3.msra.mxu1 %v8005_v15 }
0x1b85   :  { %v7785_v49 = vrot.slane %v16917_v24, %v14365_v50  ;;  %13643 = vmatprep.subr.mxu1 %v8012_v54 }
0x1b86   :  { %13644 = vmatpush3.msra.mxu1 %v8012_v54 }
0x1b87   :  { %7786 = vrot.lane.b32.xlu1 %v7785_v49, %s14226_s14  ;;  %v8025_v49 = vsub.f32 %v17030_v32, %v17038_v40 }
0x1b89   :  { %v8026_v41 = vand.u32 4294901760, %v8025_v49 }
0x1bf5   :  { %v7778_v39 = vpop.permute.xlu0 %7777 }
0x1bf6   :  { %v7780_v17 = vsel %vm674_vm11, %v16908_v3, %v7778_v39  ;;  %v8018_v3 = vsub.f32 %v17023_v18, %v17034_v30 }
0x1bf7   :  { %v7793_v55 = vrot.slane %v7780_v17, %v14365_v50 }
0x1bf8   :  { %v8019_v8 = vand.u32 4294901760, %v8018_v3 }
0x1bf9   :  { %v7787_v47 = vpop.permute.xlu1 %7786  ;;  %v7794_v9 = vmul.f32 %v7793_v55, %v16893_v4  ;;  %v7795_v63 = vmul.f32 %v7793_v55, %v16889_v0 }
0x1bfa   :  { %v7789_v59 = vsel %vm674_vm11, %v16917_v24, %v7787_v47  ;;  %13645 = vmatprep.subr.mxu1 %v8019_v8 }
0x1bfb   :  { %v7799_v37 = vrot.slane %v7789_v59, %v14365_v50  ;;  %13646 = vmatpush3.msra.mxu1 %v8019_v8 }
0x1bfc   :  { %13647 = vmatprep.subr.mxu1 %v8026_v41 }
0x1bfd   :  { %v7800_v21 = vadd.f32 %v7799_v37, %v7794_v9  ;;  %v7801_v24 = vadd.f32 %v7799_v37, %v7795_v63  ;;  %13648 = vmatpush3.msra.mxu1 %v8026_v41 }
0x1bfe   :  { %13671 = vmatprep.subr.mxu1 %v16928_v38 }
0x1bff   :  { %v7802_v62 = vmax.f32 %v7800_v21, 0.0  ;;  %v7803_v23 = vmax.f32 %v7801_v24, 0.0 }
0x1c01   :  { %v7831_v7 = vrot.slane %v7802_v62, 1  ;;  %v7832_v4 = vrot.slane %v7803_v23, 1  ;;  %7841 = vrot.lane.b32.xlu1 %v7803_v23, %s14226_s14  ;;  %7839 = vrot.lane.b32.xlu0 %v7802_v62, %s14226_s14  ;;  %v7819_v0 = vrot.slane %v7802_v62, 7  ;;  %v7820_v44 = vrot.slane %v7803_v23, 7 }
0x1c03   :  { %v7821_v31 = vsel %vm69_vm0, %v7819_v0, %v7820_v44  ;;  %v7833_v61 = vsel %vm78_vm1, %v7831_v7, %v7832_v4  ;;  %v7836_v10 = vsel %vm78_vm1, %v7832_v4, 0.0 }
0x1c04   :  { %v7837_v60 = vmul.f32 %v14301_v20, %v7833_v61  ;;  %v7838_v53 = vmul.f32 %v14320_v29, %v7836_v10 }
0x1c05   :  { %7822 = vrot.lane.b32.xlu0 %v7819_v0, %s14225_s9  ;;  %7824 = vrot.lane.b32.xlu1 %v7821_v31, %s14225_s9 }
0x1c09   :  { %7847 = vrot.lane.b32.xlu0 %v7837_v60, %s14227_s29  ;;  %7849 = vrot.lane.b32.xlu1 %v7838_v53, %s14227_s29 }
0x1c73   :  { %v7842_v42 = vpop.permute.xlu1 %7841  ;;  %v7840_v36 = vpop.permute.xlu0 %7839 }
0x1c77   :  { %v7823_v48 = vpop.permute.xlu0 %7822  ;;  %v7825_v39 = vpop.permute.xlu1 %7824 }
0x1c78   :  { %v7828_v34 = vsel %vm69_vm0, 0.0, %v7823_v48  ;;  %v7830_v45 = vmul.f32 %v14318_v28, %v7825_v39 }
0x1c79   :  { %v7829_v17 = vmul.f32 %v14299_v19, %v7828_v34 }
0x1c7a   :  { %v7854_v55 = vsel %vm674_vm11, %v7830_v45, %v7842_v42 }
0x1c7b   :  { %v7853_v15 = vsel %vm674_vm11, %v7829_v17, %v7840_v36  ;;  %v7848_v5 = vpop.permute.xlu0 %7847  ;;  %v7850_v47 = vpop.permute.xlu1 %7849 }
0x1c7c   :  { %v7855_v54 = vsel %vm747_vm12, %v7853_v15, %v7848_v5  ;;  %v7856_v59 = vsel %vm747_vm12, %v7854_v55, %v7850_v47 }
0x1c7d   :  { %v7858_v3 = vsel %vm750_vm13, %v7855_v54, 0  ;;  %v7861_v9 = vsel %vm750_vm13, %v7856_v59, 0 }
0x1c7e   :  { %v7936_v63 = vand.u32 4294901760, %v7858_v3  ;;  %v17072_v37 = vand.u32 4294901760, %v7861_v9 }
0x1c80   :  { %v7937_v49 = vsub.f32 %v7858_v3, %v7936_v63  ;;  %v7947_v8 = vsub.f32 %v7861_v9, %v17072_v37  ;;  %13649 = vmatprep.mubr.f32.mxu1 %v7936_v63 }
0x1c81   :  { %13650 = vmatmul.mubr.f32.vlgmr.msra.gmra.mxu1 %v17072_v37 }
0x1c82   :  { %v7948_v21 = vand.u32 4294901760, %v7947_v8  ;;  %13672 = vmatpush3.msra.mxu1 %v16928_v38  ;;  %v7938_v24 = vand.u32 4294901760, %v7937_v49 }
0x1c83   :  { %13673 = vmatprep.subr.mxu1 %v16930_v2 }
0x1c84   :  { %13674 = vmatpush3.msra.mxu1 %v16930_v2  ;;  %13687 = vmatprep.mubr.f32.mxu1 %v7938_v24  ;;  %v7939_v41 = vsub.f32 %v7937_v49, %v7938_v24  ;;  %v7949_v62 = vsub.f32 %v7947_v8, %v7948_v21 }
0x1c85   :  { %13675 = vmatprep.subr.mxu1 %v16955_v27 }
0x1c86   :  { %13676 = vmatpush3.msra.mxu1 %v16955_v27  ;;  %v7940_v23 = vand.u32 4294901760, %v7939_v41  ;;  %v7950_v7 = vand.u32 4294901760, %v7949_v62  ;;  %v11467_v62 = vld [vmem:[%s18187_s6 + $0xa] sm:$0x1] }
0x1c87   :  { %13677 = vmatprep.subr.mxu1 %v16963_v11 }
0x1c88   :  { %13678 = vmatpush3.msra.mxu1 %v16963_v11  ;;  %13630 = vmatprep.mubr.f32.mxu0 %v7940_v23 }
0x1c89   :  { %13679 = vmatprep.subr.mxu1 %v16976_v52  ;;  %13631 = vmatmul.mubr.f32.vlgmr.msra.gmra.mxu0 %v7950_v7 }
0x1c8a   :  { %13653 = vmatpush3.msra.mxu0 %v16933_v58  ;;  %13680 = vmatpush3.msra.mxu1 %v16976_v52 }
0x1c8b   :  { %13654 = vmatprep.subr.mxu0 %v16936_v12  ;;  %13668 = vmatprep.mubr.f32.mxu0 %v7937_v49 }
0x1c8c   :  { %13681 = vmatprep.subr.mxu1 %v16991_v13  ;;  %13655 = vmatpush3.msra.mxu0 %v16936_v12 }
0x1c8d   :  { %13682 = vmatpush3.msra.mxu1 %v16991_v13  ;;  %13656 = vmatprep.subr.mxu0 %v16961_v33 }
0x1c8e   :  { %13683 = vmatprep.subr.mxu1 %v17007_v25  ;;  %13657 = vmatpush3.msra.mxu0 %v16961_v33 }
0x1c8f   :  { %13684 = vmatpush3.msra.mxu1 %v17007_v25  ;;  %13658 = vmatprep.subr.mxu0 %v16974_v1 }
0x1c90   :  { %13685 = vmatprep.subr.mxu1 %v17018_v14  ;;  %13659 = vmatpush3.msra.mxu0 %v16974_v1 }
0x1c91   :  { %13686 = vmatpush3.msra.mxu1 %v17018_v14  ;;  %13660 = vmatprep.subr.mxu0 %v16989_v57 }
0x1c92   :  { %13688 = vmatmul.mubr.f32.vlgmr.msra.gmra.mxu1 %v7948_v21  ;;  %13709 = vmatprep.subr.mxu1 %v16928_v38  ;;  %v11466_v21 = vld [vmem:[%s18186_s5 + $0xa] sm:$0x1] }
0x1c93   :  { %13661 = vmatpush3.msra.mxu0 %v16989_v57  ;;  %13710 = vmatpush3.msra.mxu1 %v16928_v38 }
0x1c94   :  { %13725 = vmatprep.mubr.f32.mxu1 %v7936_v63  ;;  %13662 = vmatprep.subr.mxu0 %v17004_v22 }
0x1c95   :  { %13711 = vmatprep.subr.mxu1 %v16930_v2  ;;  %13663 = vmatpush3.msra.mxu0 %v17004_v22 }
0x1c96   :  { %13712 = vmatpush3.msra.mxu1 %v16930_v2  ;;  %13664 = vmatprep.subr.mxu0 %v17023_v18 }
0x1c97   :  { %13713 = vmatprep.subr.mxu1 %v16955_v27  ;;  %13665 = vmatpush3.msra.mxu0 %v17023_v18 }
0x1c98   :  { %13714 = vmatpush3.msra.mxu1 %v16955_v27  ;;  %13666 = vmatprep.subr.mxu0 %v17030_v32 }
0x1c99   :  { %13715 = vmatprep.subr.mxu1 %v16963_v11  ;;  %13667 = vmatpush3.msra.mxu0 %v17030_v32 }
0x1c9a   :  { %13716 = vmatpush3.msra.mxu1 %v16963_v11  ;;  %13669 = vmatmul.mubr.f32.vlgmr.msra.gmra.mxu0 %v7947_v8 }
0x1c9b   :  { %13690 = vmatprep.subr.mxu0 %v16941_v51  ;;  %13717 = vmatprep.subr.mxu1 %v16976_v52 }
0x1c9c   :  { %13691 = vmatpush3.msra.mxu0 %v16941_v51  ;;  %13706 = vmatprep.mubr.f32.mxu0 %v7936_v63 }
0x1c9d   :  { %13718 = vmatpush3.msra.mxu1 %v16976_v52  ;;  %13692 = vmatprep.subr.mxu0 %v16944_v46 }
0x1c9e   :  { %13719 = vmatprep.subr.mxu1 %v16991_v13  ;;  %13693 = vmatpush3.msra.mxu0 %v16944_v46 }
0x1c9f   :  { %13720 = vmatpush3.msra.mxu1 %v16991_v13  ;;  %13694 = vmatprep.subr.mxu0 %v16971_v16 }
0x1ca0   :  { %13721 = vmatprep.subr.mxu1 %v17007_v25  ;;  %13695 = vmatpush3.msra.mxu0 %v16971_v16 }
0x1ca1   :  { %13722 = vmatpush3.msra.mxu1 %v17007_v25  ;;  %13696 = vmatprep.subr.mxu0 %v16986_v35 }
0x1ca2   :  { %13723 = vmatprep.subr.mxu1 %v17018_v14  ;;  %13697 = vmatpush3.msra.mxu0 %v16986_v35 }
0x1ca3   :  { %13724 = vmatpush3.msra.mxu1 %v17018_v14  ;;  %13698 = vmatprep.subr.mxu0 %v17001_v6 }
0x1ca4   :  { %13726 = vmatmul.mubr.f32.vlgmr.msra.gmra.mxu1 %v17072_v37  ;;  %13699 = vmatpush3.msra.mxu0 %v17001_v6 }
0x1ca5   :  { %13700 = vmatprep.subr.mxu0 %v17016_v26 }
0x1ca6   :  { %13701 = vmatpush3.msra.mxu0 %v17016_v26 }
0x1ca7   :  { %13702 = vmatprep.subr.mxu0 %v17034_v30 }
0x1ca8   :  { %13703 = vmatpush3.msra.mxu0 %v17034_v30 }
0x1ca9   :  { %13704 = vmatprep.subr.mxu0 %v17038_v40 }
0x1caa   :  { %13705 = vmatpush3.msra.mxu0 %v17038_v40 }
0x1cab   :  { %13707 = vmatmul.mubr.f32.vlgmr.msra.gmra.mxu0 %v17072_v37 }
0x1d41   :  { %v13651_v2 = vpop.f32.mrf.mxu1 }
0x1d43   :  { %v8063_v51 = vpop.f32.mrf.mxu1 }
0x1d49   :  { %v13632_v38 = vpop.f32.mrf.mxu0 }
0x1d4a   :  { %v8070_v46 = vadd.f32 %v13651_v2, %v13632_v38 }
0x1d4b   :  { %v7942_v58 = vpop.f32.mrf.mxu0 }
0x1d4c   :  { %v8064_v11 = vadd.f32 %v8063_v51, %v7942_v58  ;;  %v11475_v58 = vld [vmem:[%s18185_s4 + $0x2f8] sm:$0xff] }
0x1d4d   :  { %v17179_v51 = vand.u32 4294901760, %v11475_v58 }
0x1d4f   :  { %13728 = vmatprep.subr.mxu0 %v17179_v51 }
0x1d50   :  { %13729 = vmatpush3.msra.mxu0 %v17179_v51 }
0x1d52   :  { %v13689_v27 = vpop.f32.mrf.mxu1 }
0x1d54   :  { %v8245_v52 = vpop.f32.mrf.mxu1 }
0x1d5a   :  { %v13670_v12 = vpop.f32.mrf.mxu0 }
0x1d5b   :  { %v8165_v16 = vadd.f32 %v13670_v12, %v8070_v46  ;;  %v11474_v12 = vld [vmem:[%s18185_s4 + $0x2f0] sm:$0xff] }
0x1d5c   :  { %v8157_v33 = vpop.f32.mrf.mxu0  ;;  %v17181_v46 = vand.u32 4294901760, %v11474_v12 }
0x1d5d   :  { %v8158_v1 = vadd.f32 %v8157_v33, %v8064_v11  ;;  %v8254_v35 = vadd.f32 %v13689_v27, %v8165_v16  ;;  %v17184_v27 = vsub.f32 %v11475_v58, %v17179_v51 }
0x1d5e   :  { %v17187_v33 = vsub.f32 %v11474_v12, %v17181_v46  ;;  %13730 = vmatprep.subr.mxu0 %v17181_v46 }
0x1d5f   :  { %v8246_v22 = vadd.f32 %v8245_v52, %v8158_v1  ;;  %v17192_v11 = vand.u32 4294901760, %v17184_v27  ;;  %13731 = vmatpush3.msra.mxu0 %v17181_v46 }
0x1d60   :  { %v17195_v16 = vand.u32 4294901760, %v17187_v33 }
0x1d61   :  { %v8686_v1 = vsub.f32 %v17184_v27, %v17192_v11 }
0x1d62   :  { %v8693_v52 = vsub.f32 %v17187_v33, %v17195_v16 }
0x1d64   :  { %v13727_v57 = vpop.f32.mrf.mxu1 }
0x1d66   :  { %v8433_v18 = vpop.f32.mrf.mxu1 }
0x1d6b   :  { %v13708_v13 = vpop.f32.mrf.mxu0 }
0x1d6c   :  { %v8355_v6 = vadd.f32 %v13708_v13, %v8254_v35  ;;  %v8687_v35 = vand.u32 4294901760, %v8686_v1  ;;  %v11473_v13 = vld [vmem:[%s18185_s4 + $0x2e8] sm:$0xff] }
0x1d6d   :  { %v8348_v25 = vpop.f32.mrf.mxu0 }
0x1d6e   :  { %v17140_v26 = vadd.f32 %v13727_v57, %v8355_v6  ;;  %v8349_v14 = vadd.f32 %v8348_v25, %v8246_v22  ;;  %v8694_v57 = vand.u32 4294901760, %v8693_v52  ;;  %13747 = vmatprep.subr.mxu1 %v8687_v35  ;;  %v17206_v6 = vand.u32 4294901760, %v11473_v13  ;;  %v11472_v22 = vld [vmem:[%s18185_s4 + $0x2e0] sm:$0xff] }
0x1d6f   :  { %13748 = vmatpush3.msra.mxu1 %v8687_v35 }
0x1d70   :  { %v8453_v32 = vmul.f32 %v17140_v26, %v17140_v26  ;;  %v17144_v30 = vadd.f32 %v8433_v18, %v8349_v14  ;;  %v8444_v40 = vsel %vm626_vm10, %v17140_v26, 0.0  ;;  %13749 = vmatprep.subr.mxu1 %v8694_v57  ;;  %v17212_v25 = vsub.f32 %v11473_v13, %v17206_v6  ;;  %13732 = vmatprep.subr.mxu0 %v17206_v6  ;;  %v11471_v18 = vld [vmem:[%s18185_s4 + $0x2d8] sm:$0xff] }
0x1d71   :  { %13750 = vmatpush3.msra.mxu1 %v8694_v57  ;;  %v17214_v14 = vand.u32 4294901760, %v11472_v22  ;;  %13733 = vmatpush3.msra.mxu0 %v17206_v6 }
0x1d72   :  { %v8443_v4 = vsel %vm626_vm10, %v17144_v30, 0.0  ;;  %v8452_v0 = vmul.f32 %v17144_v30, %v17144_v30  ;;  %v8455_v31 = vsel %vm626_vm10, %v8453_v32, 0.0  ;;  %v17222_v32 = vand.u32 4294901760, %v17212_v25 }
0x1d73   :  { %v8445_v44 = vadd.f32 %v8444_v40, %v8443_v4  ;;  %v17225_v40 = vsub.f32 %v11472_v22, %v17214_v14  ;;  %v17227_v4 = vand.u32 4294901760, %v11471_v18  ;;  %13734 = vmatprep.subr.mxu0 %v17214_v14 }
0x1d74   :  { %v8454_v61 = vsel %vm626_vm10, %v8452_v0, 0.0  ;;  %v11470_v0 = vld [vmem:[%s18185_s4 + $0x2d0] sm:$0xff]  ;;  %13735 = vmatpush3.msra.mxu0 %v17214_v14 }
0x1d75   :  { %v8446_v10 = vrot.slane %v8445_v44, 4  ;;  %v8456_v60 = vadd.f32 %v8455_v31, %v8454_v61  ;;  %v17237_v31 = vand.u32 4294901760, %v17225_v40  ;;  %v17240_v61 = vsub.f32 %v11471_v18, %v17227_v4  ;;  %13736 = vmatprep.subr.mxu0 %v17227_v4 }
0x1d76   :  { %13737 = vmatpush3.msra.mxu0 %v17227_v4 }
0x1d77   :  { %v8447_v53 = vadd.f32 %v8446_v10, %v8445_v44  ;;  %v8457_v42 = vrot.slane %v8456_v60, 4  ;;  %v8700_v44 = vsub.f32 %v17212_v25, %v17222_v32  ;;  %v17242_v10 = vand.u32 4294901760, %v11470_v0 }
0x1d79   :  { %v8448_v36 = vrot.slane %v8447_v53, 2  ;;  %v8458_v48 = vadd.f32 %v8457_v42, %v8456_v60  ;;  %v11469_v60 = vld [vmem:[%s18185_s4 + $0x2c8] sm:$0xff]  ;;  %v8707_v42 = vsub.f32 %v17225_v40, %v17237_v31  ;;  %13738 = vmatprep.subr.mxu0 %v17242_v10 }
0x1d7a   :  { %13739 = vmatpush3.msra.mxu0 %v17242_v10 }
0x1d7b   :  { %v8449_v39 = vadd.f32 %v8448_v36, %v8447_v53  ;;  %v8459_v34 = vrot.slane %v8458_v48, 2  ;;  %v8701_v53 = vand.u32 4294901760, %v8700_v44  ;;  %v17252_v36 = vand.u32 4294901760, %v17240_v61 }
0x1d7d   :  { %v8450_v45 = vrot.slane %v8449_v39, 1  ;;  %v8460_v17 = vadd.f32 %v8459_v34, %v8458_v48  ;;  %v17255_v48 = vsub.f32 %v11470_v0, %v17242_v10  ;;  %v11468_v34 = vld [vmem:[%s18185_s4 + $0x2c0] sm:$0xff]  ;;  %13751 = vmatprep.subr.mxu1 %v8701_v53 }
0x1d7e   :  { %13752 = vmatpush3.msra.mxu1 %v8701_v53 }
0x1d7f   :  { %v8451_v55 = vadd.f32 %v8450_v45, %v8449_v39  ;;  %v8461_v15 = vrot.slane %v8460_v17, 1  ;;  %v17258_v39 = vand.u32 4294901760, %v11469_v60 }
0x1d81   :  { %8464 = vrot.lane.b32.xlu0 %v8451_v55, %s14225_s9  ;;  %v8462_v5 = vadd.f32 %v8461_v15, %v8460_v17  ;;  %v8708_v17 = vand.u32 4294901760, %v8707_v42  ;;  %v17267_v15 = vand.u32 4294901760, %v17255_v48  ;;  %13740 = vmatprep.subr.mxu0 %v17258_v39 }
0x1d82   :  { %13741 = vmatpush3.msra.mxu0 %v17258_v39 }
0x1d83   :  { %8470 = vrot.lane.b32.xlu1 %v8462_v5, %s14225_s9  ;;  %13753 = vmatprep.subr.mxu1 %v8708_v17 }
0x1d84   :  { %13754 = vmatpush3.msra.mxu1 %v8708_v17 }
0x1df3   :  { %v8465_v47 = vpop.permute.xlu0 %8464 }
0x1df4   :  { %v8467_v54 = vadd.f32 %v8465_v47, %v8451_v55  ;;  %v8714_v55 = vsub.f32 %v17240_v61, %v17252_v36 }
0x1df5   :  { %v8471_v59 = vpop.permute.xlu1 %8470 }
0x1df6   :  { %v8468_v3 = vmul.f32 0.03125, %v8467_v54  ;;  %v8473_v9 = vadd.f32 %v8471_v59, %v8462_v5  ;;  %v17269_v5 = vand.u32 4294901760, %v11468_v34  ;;  %v17274_v54 = vsub.f32 %v11469_v60, %v17258_v39 }
0x1df8   :  { %v8475_v63 = vmul.f32 %v8468_v3, %v8468_v3  ;;  %v8474_v37 = vmul.f32 0.03125, %v8473_v9  ;;  %v8721_v9 = vsub.f32 %v17255_v48, %v17267_v15  ;;  %13742 = vmatprep.subr.mxu0 %v17269_v5 }
0x1df9   :  { %13743 = vmatpush3.msra.mxu0 %v17269_v5 }
0x1dfa   :  { %v8476_v49 = vsub.f32 %v8474_v37, %v8475_v63  ;;  %v17281_v63 = vsub.f32 %v11468_v34, %v17269_v5  ;;  %v17285_v37 = vand.u32 4294901760, %v17274_v54  ;;  %13766 = vmatprep.subr.mxu0 %v17184_v27 }
0x1dfc   :  { %v8477_v8 = vadd.f32 1e-05, %v8476_v49 }
0x1dfe   :  { %14212 = vrsqrt.f32 %v8477_v8  ;;  %v8722_v8 = vand.u32 4294901760, %v8721_v9 }
0x1e0b   :  { %v14213_v24 = vpop.eup %14212 }
0x1e0c   :  { %v17159_v41 = vmul.f32 %v14213_v24, %v11466_v21  ;;  %v17289_v21 = vand.u32 4294901760, %v17281_v63 }
0x1e0e   :  { %v8486_v23 = vrot.slane %v17159_v41, %v14365_v50  ;;  %v8480_v7 = vmul.f32 %v17159_v41, %v8468_v3  ;;  %v8715_v3 = vand.u32 4294901760, %v8714_v55 }
0x1e10   :  { %8487 = vrot.lane.b32.xlu0 %v8486_v23, %s14226_s14  ;;  %v17168_v38 = vsub.f32 %v11467_v62, %v8480_v7  ;;  %13755 = vmatprep.subr.mxu1 %v8715_v3 }
0x1e11   :  { %13756 = vmatpush3.msra.mxu1 %v8715_v3 }
0x1e12   :  { %v8495_v2 = vrot.slane %v17168_v38, %v14365_v50  ;;  %13757 = vmatprep.subr.mxu1 %v8722_v8 }
0x1e13   :  { %13758 = vmatpush3.msra.mxu1 %v8722_v8 }
0x1e14   :  { %8496 = vrot.lane.b32.xlu1 %v8495_v2, %s14226_s14  ;;  %v8735_v2 = vsub.f32 %v17281_v63, %v17289_v21 }
0x1e16   :  { %v8736_v1 = vand.u32 4294901760, %v8735_v2 }
0x1e82   :  { %v8488_v45 = vpop.permute.xlu0 %8487 }
0x1e83   :  { %v8490_v47 = vsel %vm674_vm11, %v17159_v41, %v8488_v45  ;;  %v8728_v41 = vsub.f32 %v17274_v54, %v17285_v37 }
0x1e84   :  { %v8503_v59 = vrot.slane %v8490_v47, %v14365_v50 }
0x1e85   :  { %v8729_v58 = vand.u32 4294901760, %v8728_v41 }
0x1e86   :  { %v8497_v49 = vpop.permute.xlu1 %8496  ;;  %v8504_v62 = vmul.f32 %v8503_v59, %v17144_v30  ;;  %v8505_v23 = vmul.f32 %v8503_v59, %v17140_v26 }
0x1e87   :  { %v8499_v24 = vsel %vm674_vm11, %v17168_v38, %v8497_v49  ;;  %13759 = vmatprep.subr.mxu1 %v8729_v58 }
0x1e88   :  { %v8509_v7 = vrot.slane %v8499_v24, %v14365_v50  ;;  %13760 = vmatpush3.msra.mxu1 %v8729_v58 }
0x1e89   :  { %13761 = vmatprep.subr.mxu1 %v8736_v1 }
0x1e8a   :  { %v8510_v12 = vadd.f32 %v8509_v7, %v8504_v62  ;;  %v8511_v38 = vadd.f32 %v8509_v7, %v8505_v23  ;;  %13762 = vmatpush3.msra.mxu1 %v8736_v1 }
0x1e8b   :  { %13785 = vmatprep.subr.mxu1 %v17179_v51 }
0x1e8c   :  { %v8512_v52 = vmax.f32 %v8510_v12, 0.0  ;;  %v8513_v35 = vmax.f32 %v8511_v38, 0.0 }
0x1e8e   :  { %v8541_v57 = vrot.slane %v8512_v52, 1  ;;  %v8542_v30 = vrot.slane %v8513_v35, 1  ;;  %8551 = vrot.lane.b32.xlu1 %v8513_v35, %s14226_s14  ;;  %8549 = vrot.lane.b32.xlu0 %v8512_v52, %s14226_s14  ;;  %v8529_v26 = vrot.slane %v8512_v52, 7  ;;  %v8530_v13 = vrot.slane %v8513_v35, 7 }
0x1e90   :  { %v8531_v22 = vsel %vm69_vm0, %v8529_v26, %v8530_v13  ;;  %v8543_v18 = vsel %vm78_vm1, %v8541_v57, %v8542_v30  ;;  %v8546_v0 = vsel %vm78_vm1, %v8542_v30, 0.0 }
0x1e91   :  { %v8547_v44 = vmul.f32 %v14301_v20, %v8543_v18  ;;  %v8548_v60 = vmul.f32 %v14320_v29, %v8546_v0 }
0x1e92   :  { %8532 = vrot.lane.b32.xlu0 %v8529_v26, %s14225_s9  ;;  %8534 = vrot.lane.b32.xlu1 %v8531_v22, %s14225_s9 }
0x1e96   :  { %8557 = vrot.lane.b32.xlu0 %v8547_v44, %s14227_s29  ;;  %8559 = vrot.lane.b32.xlu1 %v8548_v60, %s14227_s29 }
0x1f00   :  { %v8552_v53 = vpop.permute.xlu1 %8551  ;;  %v8550_v42 = vpop.permute.xlu0 %8549 }
0x1f04   :  { %v8533_v34 = vpop.permute.xlu0 %8532  ;;  %v8535_v45 = vpop.permute.xlu1 %8534 }
0x1f05   :  { %v8538_v17 = vsel %vm69_vm0, 0.0, %v8533_v34  ;;  %v8540_v55 = vmul.f32 %v14318_v28, %v8535_v45 }
0x1f06   :  { %v8539_v47 = vmul.f32 %v14299_v19, %v8538_v17 }
0x1f07   :  { %v8564_v59 = vsel %vm674_vm11, %v8540_v55, %v8552_v53 }
0x1f08   :  { %v8563_v3 = vsel %vm674_vm11, %v8539_v47, %v8550_v42  ;;  %v8558_v9 = vpop.permute.xlu0 %8557  ;;  %v8560_v49 = vpop.permute.xlu1 %8559 }
0x1f09   :  { %v8565_v8 = vsel %vm747_vm12, %v8563_v3, %v8558_v9  ;;  %v8566_v24 = vsel %vm747_vm12, %v8564_v59, %v8560_v49 }
0x1f0a   :  { %v8568_v41 = vsel %vm750_vm13, %v8565_v8, 0  ;;  %v8571_v62 = vsel %vm750_vm13, %v8566_v24, 0 }
0x1f0b   :  { %v8646_v23 = vand.u32 4294901760, %v8568_v41  ;;  %v17323_v7 = vand.u32 4294901760, %v8571_v62 }
0x1f0d   :  { %v8647_v2 = vsub.f32 %v8568_v41, %v8646_v23  ;;  %v8657_v58 = vsub.f32 %v8571_v62, %v17323_v7  ;;  %13763 = vmatprep.mubr.f32.mxu1 %v8646_v23 }
0x1f0e   :  { %13764 = vmatmul.mubr.f32.vlgmr.msra.gmra.mxu1 %v17323_v7 }
0x1f0f   :  { %v8658_v12 = vand.u32 4294901760, %v8657_v58  ;;  %13786 = vmatpush3.msra.mxu1 %v17179_v51  ;;  %v8648_v38 = vand.u32 4294901760, %v8647_v2 }
0x1f10   :  { %13787 = vmatprep.subr.mxu1 %v17181_v46 }
0x1f11   :  { %13788 = vmatpush3.msra.mxu1 %v17181_v46  ;;  %13801 = vmatprep.mubr.f32.mxu1 %v8648_v38  ;;  %v8649_v1 = vsub.f32 %v8647_v2, %v8648_v38  ;;  %v8659_v52 = vsub.f32 %v8657_v58, %v8658_v12 }
0x1f12   :  { %13789 = vmatprep.subr.mxu1 %v17206_v6 }
0x1f13   :  { %13790 = vmatpush3.msra.mxu1 %v17206_v6  ;;  %v8650_v35 = vand.u32 4294901760, %v8649_v1  ;;  %v8660_v57 = vand.u32 4294901760, %v8659_v52  ;;  %v11477_v52 = vld [vmem:[%s18187_s6 + $0xb] sm:$0x1] }
0x1f14   :  { %13791 = vmatprep.subr.mxu1 %v17214_v14 }
0x1f15   :  { %13792 = vmatpush3.msra.mxu1 %v17214_v14  ;;  %13744 = vmatprep.mubr.f32.mxu0 %v8650_v35 }
0x1f16   :  { %13793 = vmatprep.subr.mxu1 %v17227_v4  ;;  %13745 = vmatmul.mubr.f32.vlgmr.msra.gmra.mxu0 %v8660_v57 }
0x1f17   :  { %13767 = vmatpush3.msra.mxu0 %v17184_v27  ;;  %13794 = vmatpush3.msra.mxu1 %v17227_v4 }
0x1f18   :  { %13768 = vmatprep.subr.mxu0 %v17187_v33  ;;  %13782 = vmatprep.mubr.f32.mxu0 %v8647_v2 }
0x1f19   :  { %13795 = vmatprep.subr.mxu1 %v17242_v10  ;;  %13769 = vmatpush3.msra.mxu0 %v17187_v33 }
0x1f1a   :  { %13796 = vmatpush3.msra.mxu1 %v17242_v10  ;;  %13770 = vmatprep.subr.mxu0 %v17212_v25 }
0x1f1b   :  { %13797 = vmatprep.subr.mxu1 %v17258_v39  ;;  %13771 = vmatpush3.msra.mxu0 %v17212_v25 }
0x1f1c   :  { %13798 = vmatpush3.msra.mxu1 %v17258_v39  ;;  %13772 = vmatprep.subr.mxu0 %v17225_v40 }
0x1f1d   :  { %13799 = vmatprep.subr.mxu1 %v17269_v5  ;;  %13773 = vmatpush3.msra.mxu0 %v17225_v40 }
0x1f1e   :  { %13800 = vmatpush3.msra.mxu1 %v17269_v5  ;;  %13774 = vmatprep.subr.mxu0 %v17240_v61 }
0x1f1f   :  { %13802 = vmatmul.mubr.f32.vlgmr.msra.gmra.mxu1 %v8658_v12  ;;  %13823 = vmatprep.subr.mxu1 %v17179_v51  ;;  %v11476_v12 = vld [vmem:[%s18186_s5 + $0xb] sm:$0x1] }
0x1f20   :  { %13775 = vmatpush3.msra.mxu0 %v17240_v61  ;;  %13824 = vmatpush3.msra.mxu1 %v17179_v51 }
0x1f21   :  { %13839 = vmatprep.mubr.f32.mxu1 %v8646_v23  ;;  %13776 = vmatprep.subr.mxu0 %v17255_v48 }
0x1f22   :  { %13825 = vmatprep.subr.mxu1 %v17181_v46  ;;  %13777 = vmatpush3.msra.mxu0 %v17255_v48 }
0x1f23   :  { %13826 = vmatpush3.msra.mxu1 %v17181_v46  ;;  %13778 = vmatprep.subr.mxu0 %v17274_v54 }
0x1f24   :  { %13827 = vmatprep.subr.mxu1 %v17206_v6  ;;  %13779 = vmatpush3.msra.mxu0 %v17274_v54 }
0x1f25   :  { %13828 = vmatpush3.msra.mxu1 %v17206_v6  ;;  %13780 = vmatprep.subr.mxu0 %v17281_v63 }
0x1f26   :  { %13829 = vmatprep.subr.mxu1 %v17214_v14  ;;  %13781 = vmatpush3.msra.mxu0 %v17281_v63 }
0x1f27   :  { %13830 = vmatpush3.msra.mxu1 %v17214_v14  ;;  %13783 = vmatmul.mubr.f32.vlgmr.msra.gmra.mxu0 %v8657_v58 }
0x1f28   :  { %13804 = vmatprep.subr.mxu0 %v17192_v11  ;;  %13831 = vmatprep.subr.mxu1 %v17227_v4 }
0x1f29   :  { %13805 = vmatpush3.msra.mxu0 %v17192_v11  ;;  %13820 = vmatprep.mubr.f32.mxu0 %v8646_v23 }
0x1f2a   :  { %13832 = vmatpush3.msra.mxu1 %v17227_v4  ;;  %13806 = vmatprep.subr.mxu0 %v17195_v16 }
0x1f2b   :  { %13833 = vmatprep.subr.mxu1 %v17242_v10  ;;  %13807 = vmatpush3.msra.mxu0 %v17195_v16 }
0x1f2c   :  { %13834 = vmatpush3.msra.mxu1 %v17242_v10  ;;  %13808 = vmatprep.subr.mxu0 %v17222_v32 }
0x1f2d   :  { %13835 = vmatprep.subr.mxu1 %v17258_v39  ;;  %13809 = vmatpush3.msra.mxu0 %v17222_v32 }
0x1f2e   :  { %13836 = vmatpush3.msra.mxu1 %v17258_v39  ;;  %13810 = vmatprep.subr.mxu0 %v17237_v31 }
0x1f2f   :  { %13837 = vmatprep.subr.mxu1 %v17269_v5  ;;  %13811 = vmatpush3.msra.mxu0 %v17237_v31 }
0x1f30   :  { %13838 = vmatpush3.msra.mxu1 %v17269_v5  ;;  %13812 = vmatprep.subr.mxu0 %v17252_v36 }
0x1f31   :  { %13840 = vmatmul.mubr.f32.vlgmr.msra.gmra.mxu1 %v17323_v7  ;;  %13813 = vmatpush3.msra.mxu0 %v17252_v36 }
0x1f32   :  { %13814 = vmatprep.subr.mxu0 %v17267_v15 }
0x1f33   :  { %13815 = vmatpush3.msra.mxu0 %v17267_v15 }
0x1f34   :  { %13816 = vmatprep.subr.mxu0 %v17285_v37 }
0x1f35   :  { %13817 = vmatpush3.msra.mxu0 %v17285_v37 }
0x1f36   :  { %13818 = vmatprep.subr.mxu0 %v17289_v21 }
0x1f37   :  { %13819 = vmatpush3.msra.mxu0 %v17289_v21 }
0x1f38   :  { %13821 = vmatmul.mubr.f32.vlgmr.msra.gmra.mxu0 %v17323_v7 }
0x1fce   :  { %v13765_v46 = vpop.f32.mrf.mxu1 }
0x1fd0   :  { %v8773_v11 = vpop.f32.mrf.mxu1 }
0x1fd6   :  { %v13746_v51 = vpop.f32.mrf.mxu0 }
0x1fd7   :  { %v8780_v16 = vadd.f32 %v13765_v46, %v13746_v51 }
0x1fd8   :  { %v8652_v27 = vpop.f32.mrf.mxu0 }
0x1fd9   :  { %v8774_v14 = vadd.f32 %v8773_v11, %v8652_v27  ;;  %v11485_v27 = vld [vmem:[%s18185_s4 + $0x338] sm:$0xff] }
0x1fda   :  { %v17426_v11 = vand.u32 4294901760, %v11485_v27 }
0x1fdc   :  { %13842 = vmatprep.subr.mxu0 %v17426_v11 }
0x1fdd   :  { %13843 = vmatpush3.msra.mxu0 %v17426_v11 }
0x1fdf   :  { %v13803_v6 = vpop.f32.mrf.mxu1 }
0x1fe1   :  { %v8955_v4 = vpop.f32.mrf.mxu1 }
0x1fe7   :  { %v13784_v33 = vpop.f32.mrf.mxu0 }
0x1fe8   :  { %v8875_v32 = vadd.f32 %v13784_v33, %v8780_v16  ;;  %v11484_v33 = vld [vmem:[%s18185_s4 + $0x330] sm:$0xff] }
0x1fe9   :  { %v8867_v25 = vpop.f32.mrf.mxu0  ;;  %v17428_v16 = vand.u32 4294901760, %v11484_v33 }
0x1fea   :  { %v8868_v40 = vadd.f32 %v8867_v25, %v8774_v14  ;;  %v8964_v31 = vadd.f32 %v13803_v6, %v8875_v32  ;;  %v17431_v6 = vsub.f32 %v11485_v27, %v17426_v11 }
0x1feb   :  { %v17434_v25 = vsub.f32 %v11484_v33, %v17428_v16  ;;  %13844 = vmatprep.subr.mxu0 %v17428_v16 }
0x1fec   :  { %v8956_v48 = vadd.f32 %v8955_v4, %v8868_v40  ;;  %v17439_v14 = vand.u32 4294901760, %v17431_v6  ;;  %13845 = vmatpush3.msra.mxu0 %v17428_v16 }
0x1fed   :  { %v17442_v32 = vand.u32 4294901760, %v17434_v25 }
0x1fee   :  { %v9398_v40 = vsub.f32 %v17431_v6, %v17439_v14 }
0x1fef   :  { %v9405_v4 = vsub.f32 %v17434_v25, %v17442_v32 }
0x1ff1   :  { %v13841_v61 = vpop.f32.mrf.mxu1 }
0x1ff3   :  { %v9143_v54 = vpop.f32.mrf.mxu1 }
0x1ff8   :  { %v13822_v10 = vpop.f32.mrf.mxu0 }
0x1ff9   :  { %v9065_v36 = vadd.f32 %v13822_v10, %v8964_v31  ;;  %v9399_v31 = vand.u32 4294901760, %v9398_v40  ;;  %v11483_v10 = vld [vmem:[%s18185_s4 + $0x328] sm:$0xff] }
0x1ffa   :  { %v9058_v39 = vpop.f32.mrf.mxu0 }
0x1ffb   :  { %v17391_v15 = vadd.f32 %v13841_v61, %v9065_v36  ;;  %v9059_v5 = vadd.f32 %v9058_v39, %v8956_v48  ;;  %v9406_v61 = vand.u32 4294901760, %v9405_v4  ;;  %13861 = vmatprep.subr.mxu1 %v9399_v31  ;;  %v17453_v36 = vand.u32 4294901760, %v11483_v10  ;;  %v11482_v48 = vld [vmem:[%s18185_s4 + $0x320] sm:$0xff] }
0x1ffc   :  { %13862 = vmatpush3.msra.mxu1 %v9399_v31 }
0x1ffd   :  { %v9163_v63 = vmul.f32 %v17391_v15, %v17391_v15  ;;  %v17395_v37 = vadd.f32 %v9143_v54, %v9059_v5  ;;  %v9154_v21 = vsel %vm626_vm10, %v17391_v15, 0.0  ;;  %13863 = vmatprep.subr.mxu1 %v9406_v61  ;;  %v17459_v39 = vsub.f32 %v11483_v10, %v17453_v36  ;;  %13846 = vmatprep.subr.mxu0 %v17453_v36  ;;  %v11481_v54 = vld [vmem:[%s18185_s4 + $0x318] sm:$0xff] }
0x1ffe   :  { %13864 = vmatpush3.msra.mxu1 %v9406_v61  ;;  %v17461_v5 = vand.u32 4294901760, %v11482_v48  ;;  %13847 = vmatpush3.msra.mxu0 %v17453_v36 }
0x1fff   :  { %v9153_v30 = vsel %vm626_vm10, %v17395_v37, 0.0  ;;  %v9162_v26 = vmul.f32 %v17395_v37, %v17395_v37  ;;  %v9165_v22 = vsel %vm626_vm10, %v9163_v63, 0.0  ;;  %v17469_v63 = vand.u32 4294901760, %v17459_v39 }
0x2000   :  { %v9155_v13 = vadd.f32 %v9154_v21, %v9153_v30  ;;  %v17472_v21 = vsub.f32 %v11482_v48, %v17461_v5  ;;  %v17474_v30 = vand.u32 4294901760, %v11481_v54  ;;  %13848 = vmatprep.subr.mxu0 %v17461_v5 }
0x2001   :  { %v9164_v18 = vsel %vm626_vm10, %v9162_v26, 0.0  ;;  %v11480_v26 = vld [vmem:[%s18185_s4 + $0x310] sm:$0xff]  ;;  %13849 = vmatpush3.msra.mxu0 %v17461_v5 }
0x2002   :  { %v9156_v0 = vrot.slane %v9155_v13, 4  ;;  %v9166_v44 = vadd.f32 %v9165_v22, %v9164_v18  ;;  %v17484_v22 = vand.u32 4294901760, %v17472_v21  ;;  %v17487_v18 = vsub.f32 %v11481_v54, %v17474_v30  ;;  %13850 = vmatprep.subr.mxu0 %v17474_v30 }
0x2003   :  { %13851 = vmatpush3.msra.mxu0 %v17474_v30 }
0x2004   :  { %v9157_v60 = vadd.f32 %v9156_v0, %v9155_v13  ;;  %v9167_v53 = vrot.slane %v9166_v44, 4  ;;  %v9412_v13 = vsub.f32 %v17459_v39, %v17469_v63  ;;  %v17489_v0 = vand.u32 4294901760, %v11480_v26 }
0x2006   :  { %v9158_v42 = vrot.slane %v9157_v60, 2  ;;  %v9168_v34 = vadd.f32 %v9167_v53, %v9166_v44  ;;  %v11479_v44 = vld [vmem:[%s18185_s4 + $0x308] sm:$0xff]  ;;  %v9413_v53 = vand.u32 4294901760, %v9412_v13  ;;  %13852 = vmatprep.subr.mxu0 %v17489_v0 }
0x2007   :  { %13853 = vmatpush3.msra.mxu0 %v17489_v0 }
0x2008   :  { %v9159_v45 = vadd.f32 %v9158_v42, %v9157_v60  ;;  %v9169_v17 = vrot.slane %v9168_v34, 2  ;;  %v9419_v42 = vsub.f32 %v17472_v21, %v17484_v22  ;;  %13865 = vmatprep.subr.mxu1 %v9413_v53 }
0x2009   :  { %13866 = vmatpush3.msra.mxu1 %v9413_v53 }
0x200a   :  { %v9160_v55 = vrot.slane %v9159_v45, 1  ;;  %v9170_v47 = vadd.f32 %v9169_v17, %v9168_v34  ;;  %v17499_v34 = vand.u32 4294901760, %v17487_v18 }
0x200c   :  { %v9161_v59 = vadd.f32 %v9160_v55, %v9159_v45  ;;  %v9171_v3 = vrot.slane %v9170_v47, 1  ;;  %v17502_v45 = vsub.f32 %v11480_v26, %v17489_v0  ;;  %v17506_v55 = vand.u32 4294901760, %v11479_v44 }
0x200e   :  { %9174 = vrot.lane.b32.xlu0 %v9161_v59, %s14225_s9  ;;  %v9172_v9 = vadd.f32 %v9171_v3, %v9170_v47  ;;  %v11478_v47 = vld [vmem:[%s18185_s4 + $0x300] sm:$0xff]  ;;  %v9420_v3 = vand.u32 4294901760, %v9419_v42  ;;  %13854 = vmatprep.subr.mxu0 %v17506_v55 }
0x200f   :  { %13855 = vmatpush3.msra.mxu0 %v17506_v55 }
0x2010   :  { %9180 = vrot.lane.b32.xlu1 %v9172_v9, %s14225_s9  ;;  %13867 = vmatprep.subr.mxu1 %v9420_v3 }
0x2011   :  { %13868 = vmatpush3.msra.mxu1 %v9420_v3 }
0x2080   :  { %v9175_v49 = vpop.permute.xlu0 %9174 }
0x2081   :  { %v9177_v8 = vadd.f32 %v9175_v49, %v9161_v59  ;;  %v17516_v49 = vand.u32 4294901760, %v17502_v45 }
0x2082   :  { %v9181_v24 = vpop.permute.xlu1 %9180 }
0x2083   :  { %v9178_v41 = vmul.f32 0.03125, %v9177_v8  ;;  %v9183_v62 = vadd.f32 %v9181_v24, %v9172_v9  ;;  %v9426_v9 = vsub.f32 %v17487_v18, %v17499_v34  ;;  %v17519_v8 = vsub.f32 %v11479_v44, %v17506_v55 }
0x2084   :  { %v17521_v24 = vand.u32 4294901760, %v11478_v47 }
0x2085   :  { %v9185_v23 = vmul.f32 %v9178_v41, %v9178_v41  ;;  %v9184_v7 = vmul.f32 0.03125, %v9183_v62  ;;  %v9427_v62 = vand.u32 4294901760, %v9426_v9 }
0x2086   :  { %13856 = vmatprep.subr.mxu0 %v17521_v24 }
0x2087   :  { %v9186_v2 = vsub.f32 %v9184_v7, %v9185_v23  ;;  %v9433_v23 = vsub.f32 %v17502_v45, %v17516_v49  ;;  %13869 = vmatprep.subr.mxu1 %v9427_v62  ;;  %13857 = vmatpush3.msra.mxu0 %v17521_v24 }
0x2088   :  { %13870 = vmatpush3.msra.mxu1 %v9427_v62  ;;  %13880 = vmatprep.subr.mxu0 %v17431_v6 }
0x2089   :  { %v9187_v58 = vadd.f32 1e-05, %v9186_v2  ;;  %v17530_v2 = vand.u32 4294901760, %v17519_v8 }
0x208b   :  { %14214 = vrsqrt.f32 %v9187_v58  ;;  %v17533_v58 = vsub.f32 %v11478_v47, %v17521_v24 }
0x2098   :  { %v14215_v38 = vpop.eup %14214 }
0x2099   :  { %v9189_v1 = vmul.f32 %v14215_v38, %v11476_v12 }
0x209b   :  { %v9196_v35 = vrot.slane %v9189_v1, %v14365_v50  ;;  %v9190_v57 = vmul.f32 %v9189_v1, %v9178_v41 }
0x209d   :  { %9197 = vrot.lane.b32.xlu0 %v9196_v35, %s14226_s14  ;;  %v17415_v51 = vsub.f32 %v11477_v52, %v9190_v57  ;;  %v9434_v52 = vand.u32 4294901760, %v9433_v23  ;;  %v9440_v35 = vsub.f32 %v17519_v8, %v17530_v2  ;;  %v17543_v57 = vand.u32 4294901760, %v17533_v58 }
0x209f   :  { %v9205_v46 = vrot.slane %v17415_v51, %v14365_v50  ;;  %13871 = vmatprep.subr.mxu1 %v9434_v52 }
0x20a0   :  { %13872 = vmatpush3.msra.mxu1 %v9434_v52 }
0x20a1   :  { %9206 = vrot.lane.b32.xlu1 %v9205_v46, %s14226_s14 }
0x210f   :  { %v9198_v60 = vpop.permute.xlu0 %9197 }
0x2110   :  { %v9200_v17 = vsel %vm674_vm11, %v9189_v1, %v9198_v60 }
0x2111   :  { %v9213_v59 = vrot.slane %v9200_v17, %v14365_v50 }
0x2113   :  { %v9207_v41 = vpop.permute.xlu1 %9206  ;;  %v9214_v12 = vmul.f32 %v9213_v59, %v17395_v37  ;;  %v9215_v38 = vmul.f32 %v9213_v59, %v17391_v15  ;;  %v9441_v15 = vand.u32 4294901760, %v9440_v35  ;;  %v9447_v37 = vsub.f32 %v17533_v58, %v17543_v57 }
0x2114   :  { %v9209_v7 = vsel %vm674_vm11, %v17415_v51, %v9207_v41 }
0x2115   :  { %v9219_v1 = vrot.slane %v9209_v7, %v14365_v50  ;;  %13873 = vmatprep.subr.mxu1 %v9441_v15  ;;  %v9448_v40 = vand.u32 4294901760, %v9447_v37 }
0x2116   :  { %13874 = vmatpush3.msra.mxu1 %v9441_v15 }
0x2117   :  { %v9220_v51 = vadd.f32 %v9219_v1, %v9214_v12  ;;  %v9221_v46 = vadd.f32 %v9219_v1, %v9215_v38  ;;  %13875 = vmatprep.subr.mxu1 %v9448_v40 }
0x2118   :  { %13876 = vmatpush3.msra.mxu1 %v9448_v40 }
0x2119   :  { %v9222_v27 = vmax.f32 %v9220_v51, 0.0  ;;  %v9223_v33 = vmax.f32 %v9221_v46, 0.0  ;;  %13899 = vmatprep.subr.mxu1 %v17426_v11 }
0x211b   :  { %v17549_v4 = vadd.f32 %v9222_v27, %v16789_v43  ;;  %v17552_v31 = vadd.f32 %v9223_v33, %v16792_v56 }
0x211d   :  { %9263 = vrot.lane.b32.xlu1 %v17552_v31, %s14226_s14  ;;  %9261 = vrot.lane.b32.xlu0 %v17549_v4, %s14226_s14  ;;  %v9241_v61 = vrot.slane %v17549_v4, 7  ;;  %v9242_v10 = vrot.slane %v17552_v31, 7  ;;  %v9253_v48 = vrot.slane %v17549_v4, 1  ;;  %v9254_v43 = vrot.slane %v17552_v31, 1 }
0x211f   :  { %v9243_v56 = vsel %vm69_vm0, %v9241_v61, %v9242_v10  ;;  %v9255_v54 = vsel %vm78_vm1, %v9253_v48, %v9254_v43  ;;  %v9258_v26 = vsel %vm78_vm1, %v9254_v43, 0.0 }
0x2120   :  { %v9259_v13 = vmul.f32 %v14301_v20, %v9255_v54  ;;  %v9260_v44 = vmul.f32 %v14320_v29, %v9258_v26 }
0x2121   :  { %9244 = vrot.lane.b32.xlu0 %v9241_v61, %s14225_s9  ;;  %9246 = vrot.lane.b32.xlu1 %v9243_v56, %s14225_s9 }
0x2125   :  { %9269 = vrot.lane.b32.xlu0 %v9259_v13, %s14227_s29  ;;  %9271 = vrot.lane.b32.xlu1 %v9260_v44, %s14227_s29 }
0x218f   :  { %v9264_v60 = vpop.permute.xlu1 %9263  ;;  %v9262_v53 = vpop.permute.xlu0 %9261 }
0x2193   :  { %v9245_v42 = vpop.permute.xlu0 %9244  ;;  %v9247_v17 = vpop.permute.xlu1 %9246 }
0x2194   :  { %v9250_v47 = vsel %vm69_vm0, 0.0, %v9245_v42  ;;  %v9252_v59 = vmul.f32 %v14318_v28, %v9247_v17 }
0x2195   :  { %v9251_v3 = vmul.f32 %v14299_v19, %v9250_v47 }
0x2196   :  { %v9276_v9 = vsel %vm674_vm11, %v9252_v59, %v9264_v60 }
0x2197   :  { %v9275_v41 = vsel %vm674_vm11, %v9251_v3, %v9262_v53  ;;  %v9270_v62 = vpop.permute.xlu0 %9269  ;;  %v9272_v23 = vpop.permute.xlu1 %9271 }
0x2198   :  { %v9277_v7 = vsel %vm747_vm12, %v9275_v41, %v9270_v62  ;;  %v9278_v12 = vsel %vm747_vm12, %v9276_v9, %v9272_v23 }
0x2199   :  { %v9280_v38 = vsel %vm750_vm13, %v9277_v7, 0  ;;  %v9283_v1 = vsel %vm750_vm13, %v9278_v12, 0 }
0x219a   :  { %v9358_v52 = vand.u32 4294901760, %v9280_v38  ;;  %v17581_v35 = vand.u32 4294901760, %v9283_v1 }
0x219c   :  { %v9359_v51 = vsub.f32 %v9280_v38, %v9358_v52  ;;  %v9369_v46 = vsub.f32 %v9283_v1, %v17581_v35  ;;  %13877 = vmatprep.mubr.f32.mxu1 %v9358_v52 }
0x219d   :  { %13878 = vmatmul.mubr.f32.vlgmr.msra.gmra.mxu1 %v17581_v35 }
0x219e   :  { %v9370_v15 = vand.u32 4294901760, %v9369_v46  ;;  %13900 = vmatpush3.msra.mxu1 %v17426_v11  ;;  %v9360_v37 = vand.u32 4294901760, %v9359_v51 }
0x219f   :  { %13901 = vmatprep.subr.mxu1 %v17428_v16 }
0x21a0   :  { %13902 = vmatpush3.msra.mxu1 %v17428_v16  ;;  %13915 = vmatprep.mubr.f32.mxu1 %v9360_v37  ;;  %v9361_v27 = vsub.f32 %v9359_v51, %v9360_v37  ;;  %v9371_v33 = vsub.f32 %v9369_v46, %v9370_v15 }
0x21a1   :  { %13903 = vmatprep.subr.mxu1 %v17453_v36 }
0x21a2   :  { %13904 = vmatpush3.msra.mxu1 %v17453_v36  ;;  %v9362_v40 = vand.u32 4294901760, %v9361_v27  ;;  %v9372_v61 = vand.u32 4294901760, %v9371_v33  ;;  %v11487_v33 = vld [vmem:[%s18187_s6 + $0xc] sm:$0x1] }
0x21a3   :  { %13905 = vmatprep.subr.mxu1 %v17461_v5 }
0x21a4   :  { %13906 = vmatpush3.msra.mxu1 %v17461_v5  ;;  %13858 = vmatprep.mubr.f32.mxu0 %v9362_v40 }
0x21a5   :  { %13907 = vmatprep.subr.mxu1 %v17474_v30  ;;  %13859 = vmatmul.mubr.f32.vlgmr.msra.gmra.mxu0 %v9372_v61 }
0x21a6   :  { %13881 = vmatpush3.msra.mxu0 %v17431_v6  ;;  %13908 = vmatpush3.msra.mxu1 %v17474_v30 }
0x21a7   :  { %13882 = vmatprep.subr.mxu0 %v17434_v25  ;;  %13896 = vmatprep.mubr.f32.mxu0 %v9359_v51 }
0x21a8   :  { %13909 = vmatprep.subr.mxu1 %v17489_v0  ;;  %13883 = vmatpush3.msra.mxu0 %v17434_v25 }
0x21a9   :  { %13910 = vmatpush3.msra.mxu1 %v17489_v0  ;;  %13884 = vmatprep.subr.mxu0 %v17459_v39 }
0x21aa   :  { %13911 = vmatprep.subr.mxu1 %v17506_v55  ;;  %13885 = vmatpush3.msra.mxu0 %v17459_v39 }
0x21ab   :  { %13912 = vmatpush3.msra.mxu1 %v17506_v55  ;;  %13886 = vmatprep.subr.mxu0 %v17472_v21 }
0x21ac   :  { %13913 = vmatprep.subr.mxu1 %v17521_v24  ;;  %13887 = vmatpush3.msra.mxu0 %v17472_v21 }
0x21ad   :  { %13914 = vmatpush3.msra.mxu1 %v17521_v24  ;;  %13888 = vmatprep.subr.mxu0 %v17487_v18 }
0x21ae   :  { %13916 = vmatmul.mubr.f32.vlgmr.msra.gmra.mxu1 %v9370_v15  ;;  %13937 = vmatprep.subr.mxu1 %v17426_v11  ;;  %v11486_v15 = vld [vmem:[%s18186_s5 + $0xc] sm:$0x1] }
0x21af   :  { %13889 = vmatpush3.msra.mxu0 %v17487_v18  ;;  %13938 = vmatpush3.msra.mxu1 %v17426_v11 }
0x21b0   :  { %13953 = vmatprep.mubr.f32.mxu1 %v9358_v52  ;;  %13890 = vmatprep.subr.mxu0 %v17502_v45 }
0x21b1   :  { %13939 = vmatprep.subr.mxu1 %v17428_v16  ;;  %13891 = vmatpush3.msra.mxu0 %v17502_v45 }
0x21b2   :  { %13940 = vmatpush3.msra.mxu1 %v17428_v16  ;;  %13892 = vmatprep.subr.mxu0 %v17519_v8 }
0x21b3   :  { %13941 = vmatprep.subr.mxu1 %v17453_v36  ;;  %13893 = vmatpush3.msra.mxu0 %v17519_v8 }
0x21b4   :  { %13942 = vmatpush3.msra.mxu1 %v17453_v36  ;;  %13894 = vmatprep.subr.mxu0 %v17533_v58 }
0x21b5   :  { %13943 = vmatprep.subr.mxu1 %v17461_v5  ;;  %13895 = vmatpush3.msra.mxu0 %v17533_v58 }
0x21b6   :  { %13944 = vmatpush3.msra.mxu1 %v17461_v5  ;;  %13897 = vmatmul.mubr.f32.vlgmr.msra.gmra.mxu0 %v9369_v46 }
0x21b7   :  { %13918 = vmatprep.subr.mxu0 %v17439_v14  ;;  %13945 = vmatprep.subr.mxu1 %v17474_v30 }
0x21b8   :  { %13919 = vmatpush3.msra.mxu0 %v17439_v14  ;;  %13934 = vmatprep.mubr.f32.mxu0 %v9358_v52 }
0x21b9   :  { %13946 = vmatpush3.msra.mxu1 %v17474_v30  ;;  %13920 = vmatprep.subr.mxu0 %v17442_v32 }
0x21ba   :  { %13947 = vmatprep.subr.mxu1 %v17489_v0  ;;  %13921 = vmatpush3.msra.mxu0 %v17442_v32 }
0x21bb   :  { %13948 = vmatpush3.msra.mxu1 %v17489_v0  ;;  %13922 = vmatprep.subr.mxu0 %v17469_v63 }
0x21bc   :  { %13949 = vmatprep.subr.mxu1 %v17506_v55  ;;  %13923 = vmatpush3.msra.mxu0 %v17469_v63 }
0x21bd   :  { %13950 = vmatpush3.msra.mxu1 %v17506_v55  ;;  %13924 = vmatprep.subr.mxu0 %v17484_v22 }
0x21be   :  { %13951 = vmatprep.subr.mxu1 %v17521_v24  ;;  %13925 = vmatpush3.msra.mxu0 %v17484_v22 }
0x21bf   :  { %13952 = vmatpush3.msra.mxu1 %v17521_v24  ;;  %13926 = vmatprep.subr.mxu0 %v17499_v34 }
0x21c0   :  { %13954 = vmatmul.mubr.f32.vlgmr.msra.gmra.mxu1 %v17581_v35  ;;  %13927 = vmatpush3.msra.mxu0 %v17499_v34 }
0x21c1   :  { %13928 = vmatprep.subr.mxu0 %v17516_v49 }
0x21c2   :  { %13929 = vmatpush3.msra.mxu0 %v17516_v49 }
0x21c3   :  { %13930 = vmatprep.subr.mxu0 %v17530_v2 }
0x21c4   :  { %13931 = vmatpush3.msra.mxu0 %v17530_v2 }
0x21c5   :  { %13932 = vmatprep.subr.mxu0 %v17543_v57 }
0x21c6   :  { %13933 = vmatpush3.msra.mxu0 %v17543_v57 }
0x21c7   :  { %13935 = vmatmul.mubr.f32.vlgmr.msra.gmra.mxu0 %v17581_v35 }
0x225d   :  { %v13879_v16 = vpop.f32.mrf.mxu1 }
0x225f   :  { %v9485_v14 = vpop.f32.mrf.mxu1 }
0x2265   :  { %v13860_v11 = vpop.f32.mrf.mxu0 }
0x2266   :  { %v9492_v32 = vadd.f32 %v13879_v16, %v13860_v11 }
0x2267   :  { %v9364_v6 = vpop.f32.mrf.mxu0 }
0x2268   :  { %v9486_v5 = vadd.f32 %v9485_v14, %v9364_v6  ;;  %v11495_v6 = vld [vmem:[%s18185_s4 + $0x378] sm:$0xff] }
0x2269   :  { %v17688_v14 = vand.u32 4294901760, %v11495_v6 }
0x226b   :  { %13956 = vmatprep.subr.mxu0 %v17688_v14 }
0x226c   :  { %13957 = vmatpush3.msra.mxu0 %v17688_v14 }
0x226e   :  { %v13917_v36 = vpop.f32.mrf.mxu1 }
0x2270   :  { %v9667_v30 = vpop.f32.mrf.mxu1 }
0x2276   :  { %v13898_v25 = vpop.f32.mrf.mxu0 }
0x2277   :  { %v9587_v63 = vadd.f32 %v13898_v25, %v9492_v32  ;;  %v11494_v25 = vld [vmem:[%s18185_s4 + $0x370] sm:$0xff] }
0x2278   :  { %v9579_v39 = vpop.f32.mrf.mxu0  ;;  %v17690_v32 = vand.u32 4294901760, %v11494_v25 }
0x2279   :  { %v9580_v21 = vadd.f32 %v9579_v39, %v9486_v5  ;;  %v9676_v22 = vadd.f32 %v13917_v36, %v9587_v63  ;;  %v17693_v36 = vsub.f32 %v11495_v6, %v17688_v14 }
0x227a   :  { %v17696_v39 = vsub.f32 %v11494_v25, %v17690_v32  ;;  %13958 = vmatprep.subr.mxu0 %v17690_v32 }
0x227b   :  { %v9668_v45 = vadd.f32 %v9667_v30, %v9580_v21  ;;  %v17701_v5 = vand.u32 4294901760, %v17693_v36  ;;  %13959 = vmatpush3.msra.mxu0 %v17690_v32 }
0x227c   :  { %v17704_v63 = vand.u32 4294901760, %v17696_v39 }
0x227d   :  { %v10108_v21 = vsub.f32 %v17693_v36, %v17701_v5 }
0x227e   :  { %v10115_v30 = vsub.f32 %v17696_v39, %v17704_v63 }
0x2280   :  { %v13955_v18 = vpop.f32.mrf.mxu1 }
0x2282   :  { %v9855_v24 = vpop.f32.mrf.mxu1 }
0x2287   :  { %v13936_v0 = vpop.f32.mrf.mxu0 }
0x2288   :  { %v9777_v34 = vadd.f32 %v13936_v0, %v9676_v22  ;;  %v10109_v22 = vand.u32 4294901760, %v10108_v21  ;;  %v11493_v0 = vld [vmem:[%s18185_s4 + $0x368] sm:$0xff] }
0x2289   :  { %v9770_v55 = vpop.f32.mrf.mxu0 }
0x228a   :  { %v17649_v49 = vadd.f32 %v13955_v18, %v9777_v34  ;;  %v9771_v8 = vadd.f32 %v9770_v55, %v9668_v45  ;;  %v10116_v18 = vand.u32 4294901760, %v10115_v30  ;;  %13975 = vmatprep.subr.mxu1 %v10109_v22  ;;  %v17715_v34 = vand.u32 4294901760, %v11493_v0  ;;  %v11492_v45 = vld [vmem:[%s18185_s4 + $0x360] sm:$0xff] }
0x228b   :  { %13976 = vmatpush3.msra.mxu1 %v10109_v22 }
0x228c   :  { %v9875_v2 = vmul.f32 %v17649_v49, %v17649_v49  ;;  %v17653_v58 = vadd.f32 %v9855_v24, %v9771_v8  ;;  %v9866_v57 = vsel %vm626_vm10, %v17649_v49, 0.0  ;;  %13977 = vmatprep.subr.mxu1 %v10116_v18  ;;  %v17721_v55 = vsub.f32 %v11493_v0, %v17715_v34  ;;  %13960 = vmatprep.subr.mxu0 %v17715_v34  ;;  %v11491_v24 = vld [vmem:[%s18185_s4 + $0x358] sm:$0xff] }
0x228d   :  { %13978 = vmatpush3.msra.mxu1 %v10116_v18  ;;  %v17723_v8 = vand.u32 4294901760, %v11492_v45  ;;  %13961 = vmatpush3.msra.mxu0 %v17715_v34 }
0x228e   :  { %v9865_v10 = vsel %vm626_vm10, %v17653_v58, 0.0  ;;  %v9874_v48 = vmul.f32 %v17653_v58, %v17653_v58  ;;  %v9877_v56 = vsel %vm626_vm10, %v9875_v2, 0.0  ;;  %v17731_v2 = vand.u32 4294901760, %v17721_v55 }
0x228f   :  { %v9867_v43 = vadd.f32 %v9866_v57, %v9865_v10  ;;  %v17734_v57 = vsub.f32 %v11492_v45, %v17723_v8  ;;  %v17736_v10 = vand.u32 4294901760, %v11491_v24  ;;  %13962 = vmatprep.subr.mxu0 %v17723_v8 }
0x2290   :  { %v9876_v54 = vsel %vm626_vm10, %v9874_v48, 0.0  ;;  %v11490_v48 = vld [vmem:[%s18185_s4 + $0x350] sm:$0xff]  ;;  %13963 = vmatpush3.msra.mxu0 %v17723_v8 }
0x2291   :  { %v9868_v26 = vrot.slane %v9867_v43, 4  ;;  %v9878_v13 = vadd.f32 %v9877_v56, %v9876_v54  ;;  %v17746_v56 = vand.u32 4294901760, %v17734_v57  ;;  %v17749_v54 = vsub.f32 %v11491_v24, %v17736_v10  ;;  %13964 = vmatprep.subr.mxu0 %v17736_v10 }
0x2292   :  { %13965 = vmatpush3.msra.mxu0 %v17736_v10 }
0x2293   :  { %v9869_v44 = vadd.f32 %v9868_v26, %v9867_v43  ;;  %v9879_v60 = vrot.slane %v9878_v13, 4  ;;  %v10122_v43 = vsub.f32 %v17721_v55, %v17731_v2  ;;  %v17751_v26 = vand.u32 4294901760, %v11490_v48 }
0x2295   :  { %v9870_v53 = vrot.slane %v9869_v44, 2  ;;  %v9880_v42 = vadd.f32 %v9879_v60, %v9878_v13  ;;  %v11489_v13 = vld [vmem:[%s18185_s4 + $0x348] sm:$0xff]  ;;  %v10129_v60 = vsub.f32 %v17734_v57, %v17746_v56  ;;  %13966 = vmatprep.subr.mxu0 %v17751_v26 }
0x2296   :  { %13967 = vmatpush3.msra.mxu0 %v17751_v26 }
0x2297   :  { %v9871_v17 = vadd.f32 %v9870_v53, %v9869_v44  ;;  %v9881_v47 = vrot.slane %v9880_v42, 2  ;;  %v10123_v44 = vand.u32 4294901760, %v10122_v43  ;;  %v17761_v53 = vand.u32 4294901760, %v17749_v54 }
0x2299   :  { %v9872_v59 = vrot.slane %v9871_v17, 1  ;;  %v9882_v3 = vadd.f32 %v9881_v47, %v9880_v42  ;;  %v17764_v42 = vsub.f32 %v11490_v48, %v17751_v26  ;;  %v11488_v47 = vld [vmem:[%s18185_s4 + $0x340] sm:$0xff]  ;;  %13979 = vmatprep.subr.mxu1 %v10123_v44 }
0x229a   :  { %13980 = vmatpush3.msra.mxu1 %v10123_v44 }
0x229b   :  { %v9873_v9 = vadd.f32 %v9872_v59, %v9871_v17  ;;  %v9883_v41 = vrot.slane %v9882_v3, 1  ;;  %v17767_v17 = vand.u32 4294901760, %v11489_v13 }
0x229d   :  { %9886 = vrot.lane.b32.xlu0 %v9873_v9, %s14225_s9  ;;  %v9884_v62 = vadd.f32 %v9883_v41, %v9882_v3  ;;  %v10130_v3 = vand.u32 4294901760, %v10129_v60  ;;  %v17776_v41 = vand.u32 4294901760, %v17764_v42  ;;  %13968 = vmatprep.subr.mxu0 %v17767_v17 }
0x229e   :  { %13969 = vmatpush3.msra.mxu0 %v17767_v17 }
0x229f   :  { %9892 = vrot.lane.b32.xlu1 %v9884_v62, %s14225_s9  ;;  %13981 = vmatprep.subr.mxu1 %v10130_v3 }
0x22a0   :  { %13982 = vmatpush3.msra.mxu1 %v10130_v3 }
0x230f   :  { %v9887_v23 = vpop.permute.xlu0 %9886 }
0x2310   :  { %v9889_v7 = vadd.f32 %v9887_v23, %v9873_v9  ;;  %v10136_v9 = vsub.f32 %v17749_v54, %v17761_v53 }
0x2311   :  { %v9893_v12 = vpop.permute.xlu1 %9892 }
0x2312   :  { %v9890_v38 = vmul.f32 0.03125, %v9889_v7  ;;  %v9895_v1 = vadd.f32 %v9893_v12, %v9884_v62  ;;  %v17778_v62 = vand.u32 4294901760, %v11488_v47  ;;  %v17783_v7 = vsub.f32 %v11489_v13, %v17767_v17 }
0x2314   :  { %v9897_v52 = vmul.f32 %v9890_v38, %v9890_v38  ;;  %v9896_v35 = vmul.f32 0.03125, %v9895_v1  ;;  %v10143_v1 = vsub.f32 %v17764_v42, %v17776_v41  ;;  %13970 = vmatprep.subr.mxu0 %v17778_v62 }
0x2315   :  { %13971 = vmatpush3.msra.mxu0 %v17778_v62 }
0x2316   :  { %v9898_v51 = vsub.f32 %v9896_v35, %v9897_v52  ;;  %v17790_v52 = vsub.f32 %v11488_v47, %v17778_v62  ;;  %v17794_v35 = vand.u32 4294901760, %v17783_v7  ;;  %13994 = vmatprep.subr.mxu0 %v17693_v36 }
0x2318   :  { %v9899_v46 = vadd.f32 1e-05, %v9898_v51 }
0x231a   :  { %14216 = vrsqrt.f32 %v9899_v46  ;;  %v10144_v46 = vand.u32 4294901760, %v10143_v1 }
0x2327   :  { %v14217_v37 = vpop.eup %14216 }
0x2328   :  { %v17668_v27 = vmul.f32 %v14217_v37, %v11486_v15  ;;  %v17798_v15 = vand.u32 4294901760, %v17790_v52 }
0x232a   :  { %v9908_v40 = vrot.slane %v17668_v27, %v14365_v50  ;;  %v9902_v61 = vmul.f32 %v17668_v27, %v9890_v38  ;;  %v10137_v38 = vand.u32 4294901760, %v10136_v9 }
0x232c   :  { %9909 = vrot.lane.b32.xlu0 %v9908_v40, %s14226_s14  ;;  %v17677_v11 = vsub.f32 %v11487_v33, %v9902_v61  ;;  %13983 = vmatprep.subr.mxu1 %v10137_v38 }
0x232d   :  { %13984 = vmatpush3.msra.mxu1 %v10137_v38 }
0x232e   :  { %v9917_v16 = vrot.slane %v17677_v11, %v14365_v50  ;;  %13985 = vmatprep.subr.mxu1 %v10144_v46 }
0x232f   :  { %13986 = vmatpush3.msra.mxu1 %v10144_v46 }
0x2330   :  { %9918 = vrot.lane.b32.xlu1 %v9917_v16, %s14226_s14  ;;  %v10157_v16 = vsub.f32 %v17790_v52, %v17798_v15 }
0x2332   :  { %v10158_v21 = vand.u32 4294901760, %v10157_v16 }
0x239e   :  { %v9910_v59 = vpop.permute.xlu0 %9909 }
0x239f   :  { %v9912_v23 = vsel %vm674_vm11, %v17668_v27, %v9910_v59  ;;  %v10150_v27 = vsub.f32 %v17783_v7, %v17794_v35 }
0x23a0   :  { %v9925_v12 = vrot.slane %v9912_v23, %v14365_v50 }
0x23a1   :  { %v10151_v6 = vand.u32 4294901760, %v10150_v27 }
0x23a2   :  { %v9919_v51 = vpop.permute.xlu1 %9918  ;;  %v9926_v33 = vmul.f32 %v9925_v12, %v17653_v58  ;;  %v9927_v40 = vmul.f32 %v9925_v12, %v17649_v49 }
0x23a3   :  { %v9921_v37 = vsel %vm674_vm11, %v17677_v11, %v9919_v51  ;;  %13987 = vmatprep.subr.mxu1 %v10151_v6 }
0x23a4   :  { %v9931_v61 = vrot.slane %v9921_v37, %v14365_v50  ;;  %13988 = vmatpush3.msra.mxu1 %v10151_v6 }
0x23a5   :  { %13989 = vmatprep.subr.mxu1 %v10158_v21 }
0x23a6   :  { %v9932_v25 = vadd.f32 %v9931_v61, %v9926_v33  ;;  %v9933_v11 = vadd.f32 %v9931_v61, %v9927_v40  ;;  %13990 = vmatpush3.msra.mxu1 %v10158_v21 }
0x23a7   :  { %14013 = vmatprep.subr.mxu1 %v17688_v14 }
0x23a8   :  { %v9934_v30 = vmax.f32 %v9932_v25, 0.0  ;;  %v9935_v22 = vmax.f32 %v9933_v11, 0.0 }
0x23aa   :  { %v9963_v18 = vrot.slane %v9934_v30, 1  ;;  %v9964_v58 = vrot.slane %v9935_v22, 1  ;;  %9973 = vrot.lane.b32.xlu1 %v9935_v22, %s14226_s14  ;;  %9971 = vrot.lane.b32.xlu0 %v9934_v30, %s14226_s14  ;;  %v9951_v49 = vrot.slane %v9934_v30, 7  ;;  %v9952_v0 = vrot.slane %v9935_v22, 7 }
0x23ac   :  { %v9953_v45 = vsel %vm69_vm0, %v9951_v49, %v9952_v0  ;;  %v9965_v24 = vsel %vm78_vm1, %v9963_v18, %v9964_v58  ;;  %v9968_v48 = vsel %vm78_vm1, %v9964_v58, 0.0 }
0x23ad   :  { %v9969_v43 = vmul.f32 %v14301_v20, %v9965_v24  ;;  %v9970_v13 = vmul.f32 %v14320_v29, %v9968_v48 }
0x23ae   :  { %9954 = vrot.lane.b32.xlu0 %v9951_v49, %s14225_s9  ;;  %9956 = vrot.lane.b32.xlu1 %v9953_v45, %s14225_s9 }
0x23b2   :  { %9979 = vrot.lane.b32.xlu0 %v9969_v43, %s14227_s29  ;;  %9981 = vrot.lane.b32.xlu1 %v9970_v13, %s14227_s29 }
0x241c   :  { %v9974_v44 = vpop.permute.xlu1 %9973  ;;  %v9972_v60 = vpop.permute.xlu0 %9971 }
0x2420   :  { %v9955_v47 = vpop.permute.xlu0 %9954  ;;  %v9957_v59 = vpop.permute.xlu1 %9956 }
0x2421   :  { %v9960_v3 = vsel %vm69_vm0, 0.0, %v9955_v47  ;;  %v9962_v9 = vmul.f32 %v14318_v28, %v9957_v59 }
0x2422   :  { %v9961_v23 = vmul.f32 %v14299_v19, %v9960_v3 }
0x2423   :  { %v9986_v12 = vsel %vm674_vm11, %v9962_v9, %v9974_v44 }
0x2424   :  { %v9985_v38 = vsel %vm674_vm11, %v9961_v23, %v9972_v60  ;;  %v9980_v1 = vpop.permute.xlu0 %9979  ;;  %v9982_v51 = vpop.permute.xlu1 %9981 }
0x2425   :  { %v9987_v46 = vsel %vm747_vm12, %v9985_v38, %v9980_v1  ;;  %v9988_v37 = vsel %vm747_vm12, %v9986_v12, %v9982_v51 }
0x2426   :  { %v9990_v27 = vsel %vm750_vm13, %v9987_v46, 0  ;;  %v9993_v33 = vsel %vm750_vm13, %v9988_v37, 0 }
0x2427   :  { %v10068_v40 = vand.u32 4294901760, %v9990_v27  ;;  %v17832_v61 = vand.u32 4294901760, %v9993_v33 }
0x2429   :  { %v10069_v16 = vsub.f32 %v9990_v27, %v10068_v40  ;;  %v10079_v6 = vsub.f32 %v9993_v33, %v17832_v61  ;;  %13991 = vmatprep.mubr.f32.mxu1 %v10068_v40 }
0x242a   :  { %13992 = vmatmul.mubr.f32.vlgmr.msra.gmra.mxu1 %v17832_v61 }
0x242b   :  { %v10080_v25 = vand.u32 4294901760, %v10079_v6  ;;  %14014 = vmatpush3.msra.mxu1 %v17688_v14  ;;  %v10070_v11 = vand.u32 4294901760, %v10069_v16 }
0x242c   :  { %14015 = vmatprep.subr.mxu1 %v17690_v32 }
0x242d   :  { %14016 = vmatpush3.msra.mxu1 %v17690_v32  ;;  %14029 = vmatprep.mubr.f32.mxu1 %v10070_v11  ;;  %v10071_v21 = vsub.f32 %v10069_v16, %v10070_v11  ;;  %v10081_v30 = vsub.f32 %v10079_v6, %v10080_v25 }
0x242e   :  { %14017 = vmatprep.subr.mxu1 %v17715_v34 }
0x242f   :  { %14018 = vmatpush3.msra.mxu1 %v17715_v34  ;;  %v10072_v22 = vand.u32 4294901760, %v10071_v21  ;;  %v10082_v18 = vand.u32 4294901760, %v10081_v30  ;;  %v11497_v30 = vld [vmem:[%s18187_s6 + $0xd] sm:$0x1] }
0x2430   :  { %14019 = vmatprep.subr.mxu1 %v17723_v8 }
0x2431   :  { %14020 = vmatpush3.msra.mxu1 %v17723_v8  ;;  %13972 = vmatprep.mubr.f32.mxu0 %v10072_v22 }
0x2432   :  { %14021 = vmatprep.subr.mxu1 %v17736_v10  ;;  %13973 = vmatmul.mubr.f32.vlgmr.msra.gmra.mxu0 %v10082_v18 }
0x2433   :  { %13995 = vmatpush3.msra.mxu0 %v17693_v36  ;;  %14022 = vmatpush3.msra.mxu1 %v17736_v10 }
0x2434   :  { %13996 = vmatprep.subr.mxu0 %v17696_v39  ;;  %14010 = vmatprep.mubr.f32.mxu0 %v10069_v16 }
0x2435   :  { %14023 = vmatprep.subr.mxu1 %v17751_v26  ;;  %13997 = vmatpush3.msra.mxu0 %v17696_v39 }
0x2436   :  { %14024 = vmatpush3.msra.mxu1 %v17751_v26  ;;  %13998 = vmatprep.subr.mxu0 %v17721_v55 }
0x2437   :  { %14025 = vmatprep.subr.mxu1 %v17767_v17  ;;  %13999 = vmatpush3.msra.mxu0 %v17721_v55 }
0x2438   :  { %14026 = vmatpush3.msra.mxu1 %v17767_v17  ;;  %14000 = vmatprep.subr.mxu0 %v17734_v57 }
0x2439   :  { %14027 = vmatprep.subr.mxu1 %v17778_v62  ;;  %14001 = vmatpush3.msra.mxu0 %v17734_v57 }
0x243a   :  { %14028 = vmatpush3.msra.mxu1 %v17778_v62  ;;  %14002 = vmatprep.subr.mxu0 %v17749_v54 }
0x243b   :  { %14030 = vmatmul.mubr.f32.vlgmr.msra.gmra.mxu1 %v10080_v25  ;;  %14051 = vmatprep.subr.mxu1 %v17688_v14  ;;  %v11496_v25 = vld [vmem:[%s18186_s5 + $0xd] sm:$0x1] }
0x243c   :  { %14003 = vmatpush3.msra.mxu0 %v17749_v54  ;;  %14052 = vmatpush3.msra.mxu1 %v17688_v14 }
0x243d   :  { %14067 = vmatprep.mubr.f32.mxu1 %v10068_v40  ;;  %14004 = vmatprep.subr.mxu0 %v17764_v42 }
0x243e   :  { %14053 = vmatprep.subr.mxu1 %v17690_v32  ;;  %14005 = vmatpush3.msra.mxu0 %v17764_v42 }
0x243f   :  { %14054 = vmatpush3.msra.mxu1 %v17690_v32  ;;  %14006 = vmatprep.subr.mxu0 %v17783_v7 }
0x2440   :  { %14055 = vmatprep.subr.mxu1 %v17715_v34  ;;  %14007 = vmatpush3.msra.mxu0 %v17783_v7 }
0x2441   :  { %14056 = vmatpush3.msra.mxu1 %v17715_v34  ;;  %14008 = vmatprep.subr.mxu0 %v17790_v52 }
0x2442   :  { %14057 = vmatprep.subr.mxu1 %v17723_v8  ;;  %14009 = vmatpush3.msra.mxu0 %v17790_v52 }
0x2443   :  { %14058 = vmatpush3.msra.mxu1 %v17723_v8  ;;  %14011 = vmatmul.mubr.f32.vlgmr.msra.gmra.mxu0 %v10079_v6 }
0x2444   :  { %14032 = vmatprep.subr.mxu0 %v17701_v5  ;;  %14059 = vmatprep.subr.mxu1 %v17736_v10 }
0x2445   :  { %14033 = vmatpush3.msra.mxu0 %v17701_v5  ;;  %14048 = vmatprep.mubr.f32.mxu0 %v10068_v40 }
0x2446   :  { %14060 = vmatpush3.msra.mxu1 %v17736_v10  ;;  %14034 = vmatprep.subr.mxu0 %v17704_v63 }
0x2447   :  { %14061 = vmatprep.subr.mxu1 %v17751_v26  ;;  %14035 = vmatpush3.msra.mxu0 %v17704_v63 }
0x2448   :  { %14062 = vmatpush3.msra.mxu1 %v17751_v26  ;;  %14036 = vmatprep.subr.mxu0 %v17731_v2 }
0x2449   :  { %14063 = vmatprep.subr.mxu1 %v17767_v17  ;;  %14037 = vmatpush3.msra.mxu0 %v17731_v2 }
0x244a   :  { %14064 = vmatpush3.msra.mxu1 %v17767_v17  ;;  %14038 = vmatprep.subr.mxu0 %v17746_v56 }
0x244b   :  { %14065 = vmatprep.subr.mxu1 %v17778_v62  ;;  %14039 = vmatpush3.msra.mxu0 %v17746_v56 }
0x244c   :  { %14066 = vmatpush3.msra.mxu1 %v17778_v62  ;;  %14040 = vmatprep.subr.mxu0 %v17761_v53 }
0x244d   :  { %14068 = vmatmul.mubr.f32.vlgmr.msra.gmra.mxu1 %v17832_v61  ;;  %14041 = vmatpush3.msra.mxu0 %v17761_v53 }
0x244e   :  { %14042 = vmatprep.subr.mxu0 %v17776_v41 }
0x244f   :  { %14043 = vmatpush3.msra.mxu0 %v17776_v41 }
0x2450   :  { %14044 = vmatprep.subr.mxu0 %v17794_v35 }
0x2451   :  { %14045 = vmatpush3.msra.mxu0 %v17794_v35 }
0x2452   :  { %14046 = vmatprep.subr.mxu0 %v17798_v15 }
0x2453   :  { %14047 = vmatpush3.msra.mxu0 %v17798_v15 }
0x2454   :  { %14049 = vmatmul.mubr.f32.vlgmr.msra.gmra.mxu0 %v17832_v61 }
0x24ea   :  { %v13993_v32 = vpop.f32.mrf.mxu1 }
0x24ec   :  { %v10195_v5 = vpop.f32.mrf.mxu1 }
0x24f2   :  { %v13974_v14 = vpop.f32.mrf.mxu0 }
0x24f3   :  { %v10202_v63 = vadd.f32 %v13993_v32, %v13974_v14 }
0x24f4   :  { %v10074_v36 = vpop.f32.mrf.mxu0 }
0x24f5   :  { %v10196_v8 = vadd.f32 %v10195_v5, %v10074_v36  ;;  %v11505_v36 = vld [vmem:[%s18185_s4 + $0x3b8] sm:$0xff] }
0x24f6   :  { %v17939_v5 = vand.u32 4294901760, %v11505_v36 }
0x24f8   :  { %14070 = vmatprep.subr.mxu0 %v17939_v5 }
0x24f9   :  { %14071 = vmatpush3.msra.mxu0 %v17939_v5 }
0x24fb   :  { %v14031_v34 = vpop.f32.mrf.mxu1 }
0x24fd   :  { %v10377_v10 = vpop.f32.mrf.mxu1 }
0x2503   :  { %v14012_v39 = vpop.f32.mrf.mxu0 }
0x2504   :  { %v10297_v2 = vadd.f32 %v14012_v39, %v10202_v63  ;;  %v11504_v39 = vld [vmem:[%s18185_s4 + $0x3b0] sm:$0xff] }
0x2505   :  { %v10289_v55 = vpop.f32.mrf.mxu0  ;;  %v17941_v63 = vand.u32 4294901760, %v11504_v39 }
0x2506   :  { %v10290_v57 = vadd.f32 %v10289_v55, %v10196_v8  ;;  %v10386_v56 = vadd.f32 %v14031_v34, %v10297_v2  ;;  %v17944_v34 = vsub.f32 %v11505_v36, %v17939_v5 }
0x2507   :  { %v17947_v55 = vsub.f32 %v11504_v39, %v17941_v63  ;;  %14072 = vmatprep.subr.mxu0 %v17941_v63 }
0x2508   :  { %v10378_v42 = vadd.f32 %v10377_v10, %v10290_v57  ;;  %v17952_v8 = vand.u32 4294901760, %v17944_v34  ;;  %14073 = vmatpush3.msra.mxu0 %v17941_v63 }
0x2509   :  { %v17955_v2 = vand.u32 4294901760, %v17947_v55 }
0x250a   :  { %v10818_v57 = vsub.f32 %v17944_v34, %v17952_v8 }
0x250b   :  { %v10825_v10 = vsub.f32 %v17947_v55, %v17955_v2 }
0x250d   :  { %v14069_v54 = vpop.f32.mrf.mxu1 }
0x250f   :  { %v10565_v7 = vpop.f32.mrf.mxu1 }
0x2514   :  { %v14050_v26 = vpop.f32.mrf.mxu0 }
0x2515   :  { %v10487_v53 = vadd.f32 %v14050_v26, %v10386_v56  ;;  %v10819_v56 = vand.u32 4294901760, %v10818_v57  ;;  %v11503_v26 = vld [vmem:[%s18185_s4 + $0x3a8] sm:$0xff] }
0x2516   :  { %v10480_v17 = vpop.f32.mrf.mxu0 }
0x2517   :  { %v17900_v41 = vadd.f32 %v14069_v54, %v10487_v53  ;;  %v10481_v62 = vadd.f32 %v10480_v17, %v10378_v42  ;;  %v10826_v54 = vand.u32 4294901760, %v10825_v10  ;;  %14089 = vmatprep.subr.mxu1 %v10819_v56  ;;  %v17966_v53 = vand.u32 4294901760, %v11503_v26  ;;  %v11502_v42 = vld [vmem:[%s18185_s4 + $0x3a0] sm:$0xff] }
0x2518   :  { %14090 = vmatpush3.msra.mxu1 %v10819_v56 }
0x2519   :  { %v10585_v52 = vmul.f32 %v17900_v41, %v17900_v41  ;;  %v17904_v35 = vadd.f32 %v10565_v7, %v10481_v62  ;;  %v10576_v15 = vsel %vm626_vm10, %v17900_v41, 0.0  ;;  %14091 = vmatprep.subr.mxu1 %v10826_v54  ;;  %v17972_v17 = vsub.f32 %v11503_v26, %v17966_v53  ;;  %14074 = vmatprep.subr.mxu0 %v17966_v53  ;;  %v11501_v7 = vld [vmem:[%s18185_s4 + $0x398] sm:$0xff] }
0x251a   :  { %14092 = vmatpush3.msra.mxu1 %v10826_v54  ;;  %v17974_v62 = vand.u32 4294901760, %v11502_v42  ;;  %14075 = vmatpush3.msra.mxu0 %v17966_v53 }
0x251b   :  { %v10575_v58 = vsel %vm626_vm10, %v17904_v35, 0.0  ;;  %v10584_v49 = vmul.f32 %v17904_v35, %v17904_v35  ;;  %v10587_v45 = vsel %vm626_vm10, %v10585_v52, 0.0  ;;  %v17982_v52 = vand.u32 4294901760, %v17972_v17 }
0x251c   :  { %v10577_v0 = vadd.f32 %v10576_v15, %v10575_v58  ;;  %v17985_v15 = vsub.f32 %v11502_v42, %v17974_v62  ;;  %v17987_v58 = vand.u32 4294901760, %v11501_v7  ;;  %14076 = vmatprep.subr.mxu0 %v17974_v62 }
0x251d   :  { %v10586_v24 = vsel %vm626_vm10, %v10584_v49, 0.0  ;;  %v11500_v49 = vld [vmem:[%s18185_s4 + $0x390] sm:$0xff]  ;;  %14077 = vmatpush3.msra.mxu0 %v17974_v62 }
0x251e   :  { %v10578_v48 = vrot.slane %v10577_v0, 4  ;;  %v10588_v43 = vadd.f32 %v10587_v45, %v10586_v24  ;;  %v17997_v45 = vand.u32 4294901760, %v17985_v15  ;;  %v18000_v24 = vsub.f32 %v11501_v7, %v17987_v58  ;;  %14078 = vmatprep.subr.mxu0 %v17987_v58 }
0x251f   :  { %14079 = vmatpush3.msra.mxu0 %v17987_v58 }
0x2520   :  { %v10579_v13 = vadd.f32 %v10578_v48, %v10577_v0  ;;  %v10589_v44 = vrot.slane %v10588_v43, 4  ;;  %v10832_v0 = vsub.f32 %v17972_v17, %v17982_v52  ;;  %v18002_v48 = vand.u32 4294901760, %v11500_v49 }
0x2522   :  { %v10580_v60 = vrot.slane %v10579_v13, 2  ;;  %v10590_v47 = vadd.f32 %v10589_v44, %v10588_v43  ;;  %v11499_v43 = vld [vmem:[%s18185_s4 + $0x388] sm:$0xff]  ;;  %v10839_v44 = vsub.f32 %v17985_v15, %v17997_v45  ;;  %14080 = vmatprep.subr.mxu0 %v18002_v48 }
0x2523   :  { %14081 = vmatpush3.msra.mxu0 %v18002_v48 }
0x2524   :  { %v10581_v59 = vadd.f32 %v10580_v60, %v10579_v13  ;;  %v10591_v3 = vrot.slane %v10590_v47, 2  ;;  %v10833_v13 = vand.u32 4294901760, %v10832_v0  ;;  %v18012_v60 = vand.u32 4294901760, %v18000_v24 }
0x2526   :  { %v10582_v9 = vrot.slane %v10581_v59, 1  ;;  %v10592_v23 = vadd.f32 %v10591_v3, %v10590_v47  ;;  %v18015_v47 = vsub.f32 %v11500_v49, %v18002_v48  ;;  %v11498_v3 = vld [vmem:[%s18185_s4 + $0x380] sm:$0xff]  ;;  %14093 = vmatprep.subr.mxu1 %v10833_v13 }
0x2527   :  { %14094 = vmatpush3.msra.mxu1 %v10833_v13 }
0x2528   :  { %v10583_v12 = vadd.f32 %v10582_v9, %v10581_v59  ;;  %v10593_v38 = vrot.slane %v10592_v23, 1  ;;  %v18018_v59 = vand.u32 4294901760, %v11499_v43 }
0x252a   :  { %10596 = vrot.lane.b32.xlu0 %v10583_v12, %s14225_s9  ;;  %v10594_v1 = vadd.f32 %v10593_v38, %v10592_v23  ;;  %v10840_v23 = vand.u32 4294901760, %v10839_v44  ;;  %v18027_v38 = vand.u32 4294901760, %v18015_v47  ;;  %14082 = vmatprep.subr.mxu0 %v18018_v59 }
0x252b   :  { %14083 = vmatpush3.msra.mxu0 %v18018_v59 }
0x252c   :  { %10602 = vrot.lane.b32.xlu1 %v10594_v1, %s14225_s9  ;;  %14095 = vmatprep.subr.mxu1 %v10840_v23 }
0x252d   :  { %14096 = vmatpush3.msra.mxu1 %v10840_v23 }
0x259c   :  { %v10597_v51 = vpop.permute.xlu0 %10596 }
0x259d   :  { %v10599_v46 = vadd.f32 %v10597_v51, %v10583_v12  ;;  %v10846_v12 = vsub.f32 %v18000_v24, %v18012_v60 }
0x259e   :  { %v10603_v37 = vpop.permute.xlu1 %10602 }
0x259f   :  { %v10600_v27 = vmul.f32 0.03125, %v10599_v46  ;;  %v10605_v33 = vadd.f32 %v10603_v37, %v10594_v1  ;;  %v18029_v1 = vand.u32 4294901760, %v11498_v3  ;;  %v18034_v46 = vsub.f32 %v11499_v43, %v18018_v59 }
0x25a1   :  { %v10607_v40 = vmul.f32 %v10600_v27, %v10600_v27  ;;  %v10606_v61 = vmul.f32 0.03125, %v10605_v33  ;;  %v10853_v33 = vsub.f32 %v18015_v47, %v18027_v38  ;;  %14084 = vmatprep.subr.mxu0 %v18029_v1 }
0x25a2   :  { %14085 = vmatpush3.msra.mxu0 %v18029_v1 }
0x25a3   :  { %v10608_v16 = vsub.f32 %v10606_v61, %v10607_v40  ;;  %v18041_v40 = vsub.f32 %v11498_v3, %v18029_v1  ;;  %v18045_v61 = vand.u32 4294901760, %v18034_v46  ;;  %14108 = vmatprep.subr.mxu0 %v17944_v34 }
0x25a5   :  { %v10609_v6 = vadd.f32 1e-05, %v10608_v16 }
0x25a7   :  { %14218 = vrsqrt.f32 %v10609_v6  ;;  %v10854_v6 = vand.u32 4294901760, %v10853_v33 }
0x25b4   :  { %v14219_v11 = vpop.eup %14218 }
0x25b5   :  { %v17919_v21 = vmul.f32 %v14219_v11, %v11496_v25  ;;  %v18049_v25 = vand.u32 4294901760, %v18041_v40 }
0x25b7   :  { %v10618_v22 = vrot.slane %v17919_v21, %v14365_v50  ;;  %v10612_v18 = vmul.f32 %v17919_v21, %v10600_v27  ;;  %v10847_v27 = vand.u32 4294901760, %v10846_v12 }
0x25b9   :  { %10619 = vrot.lane.b32.xlu0 %v10618_v22, %s14226_s14  ;;  %v17928_v14 = vsub.f32 %v11497_v30, %v10612_v18  ;;  %14097 = vmatprep.subr.mxu1 %v10847_v27 }
0x25ba   :  { %14098 = vmatpush3.msra.mxu1 %v10847_v27 }
0x25bb   :  { %v10627_v32 = vrot.slane %v17928_v14, %v14365_v50  ;;  %14099 = vmatprep.subr.mxu1 %v10854_v6 }
0x25bc   :  { %14100 = vmatpush3.msra.mxu1 %v10854_v6 }
0x25bd   :  { %10628 = vrot.lane.b32.xlu1 %v10627_v32, %s14226_s14  ;;  %v10867_v32 = vsub.f32 %v18041_v40, %v18049_v25 }
0x25bf   :  { %v10868_v57 = vand.u32 4294901760, %v10867_v32 }
0x262b   :  { %v10620_v9 = vpop.permute.xlu0 %10619 }
0x262c   :  { %v10622_v51 = vsel %vm674_vm11, %v17919_v21, %v10620_v9  ;;  %v10860_v21 = vsub.f32 %v18034_v46, %v18045_v61 }
0x262d   :  { %v10635_v37 = vrot.slane %v10622_v51, %v14365_v50 }
0x262e   :  { %v10861_v36 = vand.u32 4294901760, %v10860_v21 }
0x262f   :  { %v10629_v16 = vpop.permute.xlu1 %10628  ;;  %v10636_v30 = vmul.f32 %v10635_v37, %v17904_v35  ;;  %v10637_v22 = vmul.f32 %v10635_v37, %v17900_v41 }
0x2630   :  { %v10631_v11 = vsel %vm674_vm11, %v17928_v14, %v10629_v16  ;;  %14101 = vmatprep.subr.mxu1 %v10861_v36 }
0x2631   :  { %v10641_v18 = vrot.slane %v10631_v11, %v14365_v50  ;;  %14102 = vmatpush3.msra.mxu1 %v10861_v36 }
0x2632   :  { %14103 = vmatprep.subr.mxu1 %v10868_v57 }
0x2633   :  { %v10642_v39 = vadd.f32 %v10641_v18, %v10636_v30  ;;  %v10643_v14 = vadd.f32 %v10641_v18, %v10637_v22  ;;  %14104 = vmatpush3.msra.mxu1 %v10868_v57 }
0x2634   :  { %14127 = vmatprep.subr.mxu1 %v17939_v5 }
0x2635   :  { %v10644_v10 = vmax.f32 %v10642_v39, 0.0  ;;  %v10645_v56 = vmax.f32 %v10643_v14, 0.0 }
0x2637   :  { %v10673_v54 = vrot.slane %v10644_v10, 1  ;;  %v10674_v35 = vrot.slane %v10645_v56, 1  ;;  %10683 = vrot.lane.b32.xlu1 %v10645_v56, %s14226_s14  ;;  %10681 = vrot.lane.b32.xlu0 %v10644_v10, %s14226_s14  ;;  %v10661_v41 = vrot.slane %v10644_v10, 7  ;;  %v10662_v26 = vrot.slane %v10645_v56, 7 }
0x2639   :  { %v10663_v42 = vsel %vm69_vm0, %v10661_v41, %v10662_v26  ;;  %v10675_v7 = vsel %vm78_vm1, %v10673_v54, %v10674_v35  ;;  %v10678_v49 = vsel %vm78_vm1, %v10674_v35, 0.0 }
0x263a   :  { %v10679_v0 = vmul.f32 %v14301_v20, %v10675_v7  ;;  %v10680_v43 = vmul.f32 %v14320_v29, %v10678_v49 }
0x263b   :  { %10664 = vrot.lane.b32.xlu0 %v10661_v41, %s14225_s9  ;;  %10666 = vrot.lane.b32.xlu1 %v10663_v42, %s14225_s9 }
0x263f   :  { %10689 = vrot.lane.b32.xlu0 %v10679_v0, %s14227_s29  ;;  %10691 = vrot.lane.b32.xlu1 %v10680_v43, %s14227_s29 }
0x26a9   :  { %v10684_v13 = vpop.permute.xlu1 %10683  ;;  %v10682_v44 = vpop.permute.xlu0 %10681 }
0x26ad   :  { %v10665_v3 = vpop.permute.xlu0 %10664  ;;  %v10667_v9 = vpop.permute.xlu1 %10666 }
0x26ae   :  { %v10670_v23 = vsel %vm69_vm0, 0.0, %v10665_v3  ;;  %v10672_v12 = vmul.f32 %v14318_v28, %v10667_v9 }
0x26af   :  { %v10671_v51 = vmul.f32 %v14299_v19, %v10670_v23 }
0x26b0   :  { %v10696_v37 = vsel %vm674_vm11, %v10672_v12, %v10684_v13 }
0x26b1   :  { %v10695_v20 = vsel %vm674_vm11, %v10671_v51, %v10682_v44  ;;  %v10690_v27 = vpop.permute.xlu0 %10689  ;;  %v10692_v29 = vpop.permute.xlu1 %10691 }
0x26b2   :  { %v10697_v33 = vsel %vm747_vm12, %v10695_v20, %v10690_v27  ;;  %v10698_v16 = vsel %vm747_vm12, %v10696_v37, %v10692_v29 }
0x26b3   :  { %v10700_v6 = vsel %vm750_vm13, %v10697_v33, 0  ;;  %v10703_v11 = vsel %vm750_vm13, %v10698_v16, 0 }
0x26b4   :  { %v10778_v21 = vand.u32 4294901760, %v10700_v6  ;;  %v18083_v30 = vand.u32 4294901760, %v10703_v11 }
0x26b6   :  { %v10779_v28 = vsub.f32 %v10700_v6, %v10778_v21  ;;  %v10789_v19 = vsub.f32 %v10703_v11, %v18083_v30  ;;  %14105 = vmatprep.mubr.f32.mxu1 %v10778_v21 }
0x26b7   :  { %14106 = vmatmul.mubr.f32.vlgmr.msra.gmra.mxu1 %v18083_v30 }
0x26b8   :  { %v10790_v22 = vand.u32 4294901760, %v10789_v19  ;;  %14128 = vmatpush3.msra.mxu1 %v17939_v5  ;;  %v10780_v18 = vand.u32 4294901760, %v10779_v28 }
0x26b9   :  { %14129 = vmatprep.subr.mxu1 %v17941_v63 }
0x26ba   :  { %14130 = vmatpush3.msra.mxu1 %v17941_v63  ;;  %14143 = vmatprep.mubr.f32.mxu1 %v10780_v18  ;;  %v10781_v32 = vsub.f32 %v10779_v28, %v10780_v18  ;;  %v10791_v36 = vsub.f32 %v10789_v19, %v10790_v22 }
0x26bb   :  { %14131 = vmatprep.subr.mxu1 %v17966_v53 }
0x26bc   :  { %14132 = vmatpush3.msra.mxu1 %v17966_v53  ;;  %v10782_v39 = vand.u32 4294901760, %v10781_v32  ;;  %v10792_v14 = vand.u32 4294901760, %v10791_v36 }
0x26bd   :  { %14133 = vmatprep.subr.mxu1 %v17974_v62 }
0x26be   :  { %14134 = vmatpush3.msra.mxu1 %v17974_v62  ;;  %14086 = vmatprep.mubr.f32.mxu0 %v10782_v39 }
0x26bf   :  { %14135 = vmatprep.subr.mxu1 %v17987_v58  ;;  %14087 = vmatmul.mubr.f32.vlgmr.msra.gmra.mxu0 %v10792_v14 }
0x26c0   :  { %14109 = vmatpush3.msra.mxu0 %v17944_v34  ;;  %14136 = vmatpush3.msra.mxu1 %v17987_v58 }
0x26c1   :  { %14110 = vmatprep.subr.mxu0 %v17947_v55  ;;  %14124 = vmatprep.mubr.f32.mxu0 %v10779_v28 }
0x26c2   :  { %14137 = vmatprep.subr.mxu1 %v18002_v48  ;;  %14111 = vmatpush3.msra.mxu0 %v17947_v55 }
0x26c3   :  { %14138 = vmatpush3.msra.mxu1 %v18002_v48  ;;  %14112 = vmatprep.subr.mxu0 %v17972_v17 }
0x26c4   :  { %14139 = vmatprep.subr.mxu1 %v18018_v59  ;;  %14113 = vmatpush3.msra.mxu0 %v17972_v17 }
0x26c5   :  { %14140 = vmatpush3.msra.mxu1 %v18018_v59  ;;  %14114 = vmatprep.subr.mxu0 %v17985_v15 }
0x26c6   :  { %14141 = vmatprep.subr.mxu1 %v18029_v1  ;;  %14115 = vmatpush3.msra.mxu0 %v17985_v15 }
0x26c7   :  { %14142 = vmatpush3.msra.mxu1 %v18029_v1  ;;  %14116 = vmatprep.subr.mxu0 %v18000_v24 }
0x26c8   :  { %14144 = vmatmul.mubr.f32.vlgmr.msra.gmra.mxu1 %v10790_v22  ;;  %14165 = vmatprep.subr.mxu1 %v17939_v5 }
0x26c9   :  { %14117 = vmatpush3.msra.mxu0 %v18000_v24  ;;  %14166 = vmatpush3.msra.mxu1 %v17939_v5 }
0x26ca   :  { %14181 = vmatprep.mubr.f32.mxu1 %v10778_v21  ;;  %14118 = vmatprep.subr.mxu0 %v18015_v47 }
0x26cb   :  { %14167 = vmatprep.subr.mxu1 %v17941_v63  ;;  %14119 = vmatpush3.msra.mxu0 %v18015_v47 }
0x26cc   :  { %14168 = vmatpush3.msra.mxu1 %v17941_v63  ;;  %14120 = vmatprep.subr.mxu0 %v18034_v46 }
0x26cd   :  { %14169 = vmatprep.subr.mxu1 %v17966_v53  ;;  %14121 = vmatpush3.msra.mxu0 %v18034_v46 }
0x26ce   :  { %14170 = vmatpush3.msra.mxu1 %v17966_v53  ;;  %14122 = vmatprep.subr.mxu0 %v18041_v40 }
0x26cf   :  { %14171 = vmatprep.subr.mxu1 %v17974_v62  ;;  %14123 = vmatpush3.msra.mxu0 %v18041_v40 }
0x26d0   :  { %14172 = vmatpush3.msra.mxu1 %v17974_v62  ;;  %14125 = vmatmul.mubr.f32.vlgmr.msra.gmra.mxu0 %v10789_v19  ;;  %v11507_v19 = vld [vmem:[%s18187_s6 + $0xe] sm:$0x1] }
0x26d1   :  { %14146 = vmatprep.subr.mxu0 %v17952_v8  ;;  %14173 = vmatprep.subr.mxu1 %v17987_v58 }
0x26d2   :  { %14147 = vmatpush3.msra.mxu0 %v17952_v8  ;;  %14162 = vmatprep.mubr.f32.mxu0 %v10778_v21  ;;  %v11506_v21 = vld [vmem:[%s18186_s5 + $0xe] sm:$0x1] }
0x26d3   :  { %14174 = vmatpush3.msra.mxu1 %v17987_v58  ;;  %14148 = vmatprep.subr.mxu0 %v17955_v2 }
0x26d4   :  { %14175 = vmatprep.subr.mxu1 %v18002_v48  ;;  %14149 = vmatpush3.msra.mxu0 %v17955_v2 }
0x26d5   :  { %14176 = vmatpush3.msra.mxu1 %v18002_v48  ;;  %14150 = vmatprep.subr.mxu0 %v17982_v52 }
0x26d6   :  { %14177 = vmatprep.subr.mxu1 %v18018_v59  ;;  %14151 = vmatpush3.msra.mxu0 %v17982_v52 }
0x26d7   :  { %14178 = vmatpush3.msra.mxu1 %v18018_v59  ;;  %14152 = vmatprep.subr.mxu0 %v17997_v45 }
0x26d8   :  { %14179 = vmatprep.subr.mxu1 %v18029_v1  ;;  %14153 = vmatpush3.msra.mxu0 %v17997_v45 }
0x26d9   :  { %14180 = vmatpush3.msra.mxu1 %v18029_v1  ;;  %14154 = vmatprep.subr.mxu0 %v18012_v60 }
0x26da   :  { %14182 = vmatmul.mubr.f32.vlgmr.msra.gmra.mxu1 %v18083_v30  ;;  %14155 = vmatpush3.msra.mxu0 %v18012_v60 }
0x26db   :  { %14156 = vmatprep.subr.mxu0 %v18027_v38 }
0x26dc   :  { %14157 = vmatpush3.msra.mxu0 %v18027_v38 }
0x26dd   :  { %14158 = vmatprep.subr.mxu0 %v18045_v61 }
0x26de   :  { %14159 = vmatpush3.msra.mxu0 %v18045_v61 }
0x26df   :  { %14160 = vmatprep.subr.mxu0 %v18049_v25 }
0x26e0   :  { %14161 = vmatpush3.msra.mxu0 %v18049_v25 }
0x26e1   :  { %14163 = vmatmul.mubr.f32.vlgmr.msra.gmra.mxu0 %v18083_v30 }
0x2777   :  { %v14107_v63 = vpop.f32.mrf.mxu1 }
0x2779   :  { %v10905_v8 = vpop.f32.mrf.mxu1 }
0x277f   :  { %v14088_v5 = vpop.f32.mrf.mxu0 }
0x2780   :  { %v10912_v2 = vadd.f32 %v14107_v63, %v14088_v5 }
0x2781   :  { %v10784_v34 = vpop.f32.mrf.mxu0 }
0x2782   :  { %v10906_v62 = vadd.f32 %v10905_v8, %v10784_v34 }
0x2788   :  { %v14145_v53 = vpop.f32.mrf.mxu1 }
0x278a   :  { %v11087_v58 = vpop.f32.mrf.mxu1 }
0x2790   :  { %v14126_v55 = vpop.f32.mrf.mxu0 }
0x2791   :  { %v11007_v52 = vadd.f32 %v14126_v55, %v10912_v2 }
0x2792   :  { %v10999_v17 = vpop.f32.mrf.mxu0 }
0x2793   :  { %v11000_v15 = vadd.f32 %v10999_v17, %v10906_v62  ;;  %v11096_v45 = vadd.f32 %v14145_v53, %v11007_v52 }
0x2795   :  { %v11088_v47 = vadd.f32 %v11087_v58, %v11000_v15 }
0x279a   :  { %v14183_v24 = vpop.f32.mrf.mxu1 }
0x279c   :  { %v11275_v46 = vpop.f32.mrf.mxu1 }
0x27a1   :  { %v14164_v48 = vpop.f32.mrf.mxu0 }
0x27a2   :  { %v11197_v60 = vadd.f32 %v14164_v48, %v11096_v45 }
0x27a3   :  { %v11190_v59 = vpop.f32.mrf.mxu0 }
0x27a4   :  { %v11282_v38 = vadd.f32 %v14183_v24, %v11197_v60  ;;  %v11191_v1 = vadd.f32 %v11190_v59, %v11088_v47 }
0x27a6   :  { %v11295_v40 = vmul.f32 %v11282_v38, %v11282_v38  ;;  %v11276_v61 = vadd.f32 %v11275_v46, %v11191_v1  ;;  %v11286_v25 = vsel %vm626_vm10, %v11282_v38, 0.0 }
0x27a8   :  { %v11285_v57 = vsel %vm626_vm10, %v11276_v61, 0.0  ;;  %v11294_v10 = vmul.f32 %v11276_v61, %v11276_v61  ;;  %v11297_v54 = vsel %vm626_vm10, %v11295_v40, 0.0 }
0x27a9   :  { %v11287_v56 = vadd.f32 %v11286_v25, %v11285_v57 }
0x27aa   :  { %v11296_v35 = vsel %vm626_vm10, %v11294_v10, 0.0 }
0x27ab   :  { %v11288_v41 = vrot.slane %v11287_v56, 4  ;;  %v11298_v26 = vadd.f32 %v11297_v54, %v11296_v35 }
0x27ad   :  { %v11289_v42 = vadd.f32 %v11288_v41, %v11287_v56  ;;  %v11299_v7 = vrot.slane %v11298_v26, 4 }
0x27af   :  { %v11290_v49 = vrot.slane %v11289_v42, 2  ;;  %v11300_v0 = vadd.f32 %v11299_v7, %v11298_v26 }
0x27b1   :  { %v11291_v43 = vadd.f32 %v11290_v49, %v11289_v42  ;;  %v11301_v13 = vrot.slane %v11300_v0, 2 }
0x27b3   :  { %v11292_v44 = vrot.slane %v11291_v43, 1  ;;  %v11302_v3 = vadd.f32 %v11301_v13, %v11300_v0 }
0x27b5   :  { %v11293_v9 = vadd.f32 %v11292_v44, %v11291_v43  ;;  %v11303_v23 = vrot.slane %v11302_v3, 1 }
0x27b7   :  { %11306 = vrot.lane.b32.xlu0 %v11293_v9, %s14225_s9  ;;  %v11304_v12 = vadd.f32 %v11303_v23, %v11302_v3 }
0x27b9   :  { %11312 = vrot.lane.b32.xlu1 %v11304_v12, %s14225_s9 }
0x2829   :  { %v11307_v51 = vpop.permute.xlu0 %11306 }
0x282a   :  { %v11309_v37 = vadd.f32 %v11307_v51, %v11293_v9 }
0x282b   :  { %v11313_v20 = vpop.permute.xlu1 %11312 }
0x282c   :  { %v11310_v27 = vmul.f32 0.03125, %v11309_v37  ;;  %v11315_v29 = vadd.f32 %v11313_v20, %v11304_v12 }
0x282e   :  { %v11317_v33 = vmul.f32 %v11310_v27, %v11310_v27  ;;  %v11316_v16 = vmul.f32 0.03125, %v11315_v29 }
0x2830   :  { %v11318_v6 = vsub.f32 %v11316_v16, %v11317_v33 }
0x2832   :  { %v11319_v11 = vadd.f32 1e-05, %v11318_v6 }
0x2834   :  { %14220 = vrsqrt.f32 %v11319_v11 }
0x2841   :  { %v14221_v30 = vpop.eup %14220 }
0x2842   :  { %v11321_v28 = vmul.f32 %v14221_v30, %v11506_v21 }
0x2844   :  { %v11328_v22 = vrot.slane %v11321_v28, %v14365_v50  ;;  %v11322_v18 = vmul.f32 %v11321_v28, %v11310_v27 }
0x2846   :  { %11329 = vrot.lane.b32.xlu0 %v11328_v22, %s14226_s14  ;;  %v11323_v32 = vsub.f32 %v11507_v19, %v11322_v18 }
0x2848   :  { %v11337_v36 = vrot.slane %v11323_v32, %v14365_v50 }
0x284a   :  { %11338 = vrot.lane.b32.xlu1 %v11337_v36, %s14226_s14 }
0x28b8   :  { %v11330_v39 = vpop.permute.xlu0 %11329 }
0x28b9   :  { %v11332_v14 = vsel %vm674_vm11, %v11321_v28, %v11330_v39 }
0x28ba   :  { %v11345_v5 = vrot.slane %v11332_v14, %v14365_v50 }
0x28bc   :  { %v11339_v63 = vpop.permute.xlu1 %11338  ;;  %v11346_v55 = vmul.f32 %v11345_v5, %v11276_v61  ;;  %v11347_v8 = vmul.f32 %v11345_v5, %v11282_v38 }
0x28bd   :  { %v11341_v34 = vsel %vm674_vm11, %v11323_v32, %v11339_v63 }
0x28be   :  { %v11351_v2 = vrot.slane %v11341_v34, %v14365_v50 }
0x28c0   :  { %v11352_v53 = vadd.f32 %v11351_v2, %v11346_v55  ;;  %v11353_v17 = vadd.f32 %v11351_v2, %v11347_v8 }
0x28c2   :  { %v11354_v62 = vmax.f32 %v11352_v53, 0.0  ;;  %v11355_v52 = vmax.f32 %v11353_v17, 0.0 }
0x28c4   :  { %v11356_v15 = vadd.f32 %v11354_v62, %v17549_v4  ;;  %v11357_v58 = vadd.f32 %v11355_v52, %v17552_v31 }
0x28c6   :  { %11358 = vst.msk [vmem:[%s18188_s7] sm:$0xff] %vm626_vm10, %v11356_v15  ;;  %11359 = vst.msk [vmem:[%s18188_s7 + $0x8] sm:$0xff] %vm626_vm10, %v11357_v58 }

</bundles_post_ra>
